<compile_context>
chip_gen: v7x
topology: tpu7x:2x2x1
jax: 0.10.0
libtpu: 0.0.40
codegen_flags: <defaults>
</compile_context>

<pallas_src>
import jax
import jax.numpy as jnp
from jax import lax
from jax.experimental import pallas as pl
from jax.experimental.pallas import tpu as pltpu


@jax.jit
def fused_deconv_forward(x, w0, b0, w2):
    """x: (N, Cin, H, W) NCHW f32;  w0: (Cin, C0, 3, 3), b0: (C0,), w2: (C0, C2, 2, 4)."""
    N, CIN, H, W = x.shape
    _, C0, KH0, KW0 = w0.shape          # 3, 3
    _, C2, KH2, KW2 = w2.shape          # 2, 4
    SW = 2                              # conv2 column stride
    H1, W1 = H + KH0 - 1, W + KW0 - 1   # 18, 18  (conv0 output)
    HO = H1 + KH2 - 1                   # 19
    WO = (W1 - 1) * SW + KW2            # 38
    WH = WO // SW                       # 19  even/odd half width
    KWH = KW2 // SW                     # 2   sub-kernel width per parity

    # ---- one-off weight re-layouts (tiny, folded into the jit) -------------
    # conv0 gather kernel:  w0f[ci, kh', kw', co] = w0[ci, co, 2-kh', 2-kw']
    w0f = jnp.transpose(jnp.flip(w0, axis=(2, 3)), (0, 2, 3, 1)).reshape(-1).astype(jnp.float32)
    # conv2 even / odd column sub-kernels (kh flipped, kw split by parity):
    #   w2e[ci, kh', m', co] = w2[ci, co, 1-kh', 2-2m']
    #   w2o[ci, kh', m', co] = w2[ci, co, 1-kh', 3-2m']
    w2f = jnp.flip(w2, axis=2)
    w2e = jnp.stack([w2f[..., 2], w2f[..., 0]], axis=-1)
    w2o = jnp.stack([w2f[..., 3], w2f[..., 1]], axis=-1)
    w2e = jnp.transpose(w2e, (0, 2, 3, 1)).reshape(-1).astype(jnp.float32)
    w2o = jnp.transpose(w2o, (0, 2, 3, 1)).reshape(-1).astype(jnp.float32)
    b0f = b0.astype(jnp.float32)

    def kernel(x_ref, w0_ref, b0_ref, w2e_ref, w2o_ref, o_ref, xpad_ref, v1pad_ref):
        # ------- stage 0: zero-padded activations in VMEM scratch -----------
        xpad_ref[...] = jnp.zeros_like(xpad_ref)
        v1pad_ref[...] = jnp.zeros_like(v1pad_ref)
        for ci in range(CIN):
            xpad_ref[ci, KH0 - 1:KH0 - 1 + H, KW0 - 1:KW0 - 1 + W] = x_ref[0, ci]

        # ------- conv0: ConvTranspose2d(CIN->C0, 3x3, bias) -----------------
        # full correlation with the flipped kernel; accumulators start at bias.
        acc0 = [jnp.full((H1, W1), b0_ref[co], jnp.float32) for co in range(C0)]
        for ci in range(CIN):
            for kh in range(KH0):
                for kw in range(KW0):
                    win = xpad_ref[ci, kh:kh + H1, kw:kw + W1]        # (18,18)
                    base = ((ci * KH0 + kh) * KW0 + kw) * C0
                    for co in range(C0):
                        acc0[co] = acc0[co] + win * w0_ref[base + co]
        for co in range(C0):
            v1pad_ref[co, KH2 - 1:KH2 - 1 + H1, KWH - 1:KWH - 1 + W1] = acc0[co]

        # ------- conv2: ConvTranspose2d(C0->C2, (2,4), stride (1,2)) --------
        # even / odd output columns are two stride-1 transposed convs with
        # (2,2) sub-kernels; interleave via constant 0/1 scatter matmuls so the
        # store is one dense (19,38) slab per output channel.
        rows = lax.broadcasted_iota(jnp.int32, (WH, WO), 0)
        cols = lax.broadcasted_iota(jnp.int32, (WH, WO), 1)
        sc_even = (cols == SW * rows).astype(jnp.float32)             # (19,38)
        sc_odd = (cols == SW * rows + 1).astype(jnp.float32)

        acce = [jnp.zeros((HO, WH), jnp.float32) for _ in range(C2)]
        acco = [jnp.zeros((HO, WH), jnp.float32) for _ in range(C2)]
        for ci in range(C0):
            for kh in range(KH2):
                for m in range(KWH):
                    win = v1pad_ref[ci, kh:kh + HO, m:m + WH]         # (19,19)
                    base = ((ci * KH2 + kh) * KWH + m) * C2
                    for co in range(C2):
                        acce[co] = acce[co] + win * w2e_ref[base + co]
                        acco[co] = acco[co] + win * w2o_ref[base + co]
        for co in range(C2):
            o_ref[0, co, :, :] = (
                jnp.dot(acce[co], sc_even, preferred_element_type=jnp.float32)
                + jnp.dot(acco[co], sc_odd, preferred_element_type=jnp.float32)
            ).astype(o_ref.dtype)

    smem = pl.BlockSpec(memory_space=pltpu.MemorySpace.SMEM)
    return pl.pallas_call(
        kernel,
        out_shape=jax.ShapeDtypeStruct((N, C2, HO, WO), jnp.float32),
        grid=(N,),
        in_specs=[
            pl.BlockSpec((1, CIN, H, W), lambda n: (n, 0, 0, 0)),     # x (VMEM)
            smem, smem, smem, smem,                                   # w0f, b0, w2e, w2o
        ],
        out_specs=pl.BlockSpec((1, C2, HO, WO), lambda n: (n, 0, 0, 0)),
        scratch_shapes=[
            pltpu.VMEM((CIN, H + 2 * (KH0 - 1), W + 2 * (KW0 - 1)), jnp.float32),   # xpad
            pltpu.VMEM((C0, H1 + 2 * (KH2 - 1), W1 + 2 * (KWH - 1)), jnp.float32),  # v1pad
        ],
        compiler_params=pltpu.CompilerParams(dimension_semantics=("parallel",)),
    )(x, w0f, b0f, w2e, w2o)


def conv_transpose2d_ref(x_nchw, w_pt, bias, stride=(1, 1)):
    """Pure-XLA ConvTranspose2d reference (padding=0, output_padding=0, groups=1)."""
    Cin, Cout, KH, KW = w_pt.shape
    sh, sw = stride
    x = jnp.transpose(x_nchw, (0, 2, 3, 1))
    w_eff = jnp.transpose(jnp.flip(w_pt, axis=(2, 3)), (2, 3, 0, 1))   # HWIO
    out = lax.conv_general_dilated(
        x, w_eff, window_strides=(1, 1),
        padding=[(KH - 1, KH - 1), (KW - 1, KW - 1)],
        lhs_dilation=(sh, sw),
        dimension_numbers=("NHWC", "HWIO", "NHWC"))
    if bias is not None:
        out = out + bias.reshape(1, 1, 1, -1)
    return jnp.transpose(out, (0, 3, 1, 2))


class PallasModel:
    # TODO(synk): the original PyTorch module's channel wiring is inconsistent and
    # cannot execute as written (conv2d declared 2->2 but fed 4 channels; conv2d_1
    # in=5 / conv2d_2 in=4 both consume conv2d's output).  Channel counts are
    # minimally adapted (conv2d: 4->4, conv2d_1 in: 4); kernel sizes, strides and
    # bias flags are preserved exactly.
    def __init__(self, key):
        k = jax.random.split(key, 4)

        def u(kk, shape, fan_in):
            bound = 1.0 / jnp.sqrt(float(fan_in))
            return jax.random.uniform(kk, shape, jnp.float32, -bound, bound)

        self.w0 = u(k[0], (4, 4, 3, 3), 4 * 3 * 3)     # conv2d   (bias=True)
        self.b0 = u(k[1], (4,), 4 * 3 * 3)
        self.w1 = u(k[2], (4, 2, 5, 3), 4 * 5 * 3)     # conv2d_1 (dead branch, unused)
        self.w2 = u(k[3], (4, 5, 2, 4), 4 * 2 * 4)     # conv2d_2 (stride (1,2), no bias)

    def forward(self, x1):
        # v3 = conv2d_1(v1.detach()) never reaches the returned value -> dropped;
        # .detach() is a no-op for this inference forward.
        return fused_deconv_forward(x1, self.w0, self.b0, self.w2)

    def forward_ref(self, x1):
        v1 = conv_transpose2d_ref(x1, self.w0, self.b0, (1, 1))
        v4 = conv_transpose2d_ref(v1, self.w2, None, (1, 2))
        return v4


if __name__ == "__main__":
    key = jax.random.PRNGKey(0)
    kx, kp = jax.random.split(key)
    x1 = jax.random.normal(kx, (2, 4, 16, 16), jnp.float32)

    model = PallasModel(kp)

    out = jax.block_until_ready(model.forward(x1))       # fused Pallas path
    ref = jax.block_until_ready(model.forward_ref(x1))   # XLA reference path

    assert out.shape == (2, 5, 19, 38), out.shape
    assert jnp.allclose(out, ref, rtol=1e-4, atol=1e-4), "mismatch vs reference"
    print("KERNEL_OK")
</pallas_src>

<mosaic_0001>
module attributes {stable_mosaic.version = 11 : i64} {
  func.func @kernel(%arg0: i32, %arg1: memref<1x4x16x16xf32, #tpu.memory_space<vmem>>, %arg2: memref<144xf32, #tpu.memory_space<smem>>, %arg3: memref<4xf32, #tpu.memory_space<smem>>, %arg4: memref<80xf32, #tpu.memory_space<smem>>, %arg5: memref<80xf32, #tpu.memory_space<smem>>, %arg6: memref<1x5x19x38xf32, #tpu.memory_space<vmem>>, %arg7: memref<4x20x20xf32, #tpu.memory_space<vmem>>, %arg8: memref<4x20x20xf32, #tpu.memory_space<vmem>>) attributes {dimension_semantics = [#tpu.dimension_semantics<parallel>], iteration_bounds = array<i64: 2>, scalar_prefetch = 0 : i64, scratch_operands = 2 : i64, tpu.core_type = #tpu.core_type<tc>, window_params = [{transform_indices = @transform_0, window_bounds = array<i64: 1, 4, 16, 16>}, {transform_indices = @transform_1, window_bounds = array<i64: 144>}, {transform_indices = @transform_2, window_bounds = array<i64: 4>}, {transform_indices = @transform_3, window_bounds = array<i64: 80>}, {transform_indices = @transform_4, window_bounds = array<i64: 80>}, {transform_indices = @transform_5, window_bounds = array<i64: 1, 5, 19, 38>}]} {
    %cst = arith.constant 0.000000e+00 : f32
    %0 = vector.broadcast %cst : f32 to vector<4x20x20xf32>
    %c0 = arith.constant 0 : index
    %c0_0 = arith.constant 0 : index
    %c0_1 = arith.constant 0 : index
    %1 = vector.load %arg7[%c0, %c0_0, %c0_1] : memref<4x20x20xf32, #tpu.memory_space<vmem>>, vector<4x20x20xf32>
    tpu.vector_store %arg7[%c0, %c0_0, %c0_1], %0 {strides = array<i32>} : memref<4x20x20xf32, #tpu.memory_space<vmem>>, vector<4x20x20xf32>,
    %cst_2 = arith.constant 0.000000e+00 : f32
    %2 = vector.broadcast %cst_2 : f32 to vector<4x20x20xf32>
    %c0_3 = arith.constant 0 : index
    %c0_4 = arith.constant 0 : index
    %c0_5 = arith.constant 0 : index
    %3 = vector.load %arg8[%c0_3, %c0_4, %c0_5] : memref<4x20x20xf32, #tpu.memory_space<vmem>>, vector<4x20x20xf32>
    tpu.vector_store %arg8[%c0_3, %c0_4, %c0_5], %2 {strides = array<i32>} : memref<4x20x20xf32, #tpu.memory_space<vmem>>, vector<4x20x20xf32>,
    %c0_6 = arith.constant 0 : index
    %c0_7 = arith.constant 0 : index
    %c0_8 = arith.constant 0 : index
    %c0_9 = arith.constant 0 : index
    %4 = vector.load %arg1[%c0_6, %c0_7, %c0_8, %c0_9] : memref<1x4x16x16xf32, #tpu.memory_space<vmem>>, vector<1x1x16x16xf32>
    %5 = vector.shape_cast %4 : vector<1x1x16x16xf32> to vector<16x16xf32>
    %c0_10 = arith.constant 0 : index
    %c2 = arith.constant 2 : index
    %c2_11 = arith.constant 2 : index
    %6 = vector.load %arg7[%c0_10, %c2, %c2_11] : memref<4x20x20xf32, #tpu.memory_space<vmem>>, vector<1x16x16xf32>
    %7 = vector.shape_cast %6 : vector<1x16x16xf32> to vector<16x16xf32>
    %8 = vector.shape_cast %5 : vector<16x16xf32> to vector<1x16x16xf32>
    tpu.vector_store %arg7[%c0_10, %c2, %c2_11], %8 {strides = array<i32>} : memref<4x20x20xf32, #tpu.memory_space<vmem>>, vector<1x16x16xf32>,
    %c0_12 = arith.constant 0 : index
    %c1 = arith.constant 1 : index
    %c0_13 = arith.constant 0 : index
    %c0_14 = arith.constant 0 : index
    %9 = vector.load %arg1[%c0_12, %c1, %c0_13, %c0_14] : memref<1x4x16x16xf32, #tpu.memory_space<vmem>>, vector<1x1x16x16xf32>
    %10 = vector.shape_cast %9 : vector<1x1x16x16xf32> to vector<16x16xf32>
    %c1_15 = arith.constant 1 : index
    %c2_16 = arith.constant 2 : index
    %c2_17 = arith.constant 2 : index
    %11 = vector.load %arg7[%c1_15, %c2_16, %c2_17] : memref<4x20x20xf32, #tpu.memory_space<vmem>>, vector<1x16x16xf32>
    %12 = vector.shape_cast %11 : vector<1x16x16xf32> to vector<16x16xf32>
    %13 = vector.shape_cast %10 : vector<16x16xf32> to vector<1x16x16xf32>
    tpu.vector_store %arg7[%c1_15, %c2_16, %c2_17], %13 {strides = array<i32>} : memref<4x20x20xf32, #tpu.memory_space<vmem>>, vector<1x16x16xf32>,
    %c0_18 = arith.constant 0 : index
    %c2_19 = arith.constant 2 : index
    %c0_20 = arith.constant 0 : index
    %c0_21 = arith.constant 0 : index
    %14 = vector.load %arg1[%c0_18, %c2_19, %c0_20, %c0_21] : memref<1x4x16x16xf32, #tpu.memory_space<vmem>>, vector<1x1x16x16xf32>
    %15 = vector.shape_cast %14 : vector<1x1x16x16xf32> to vector<16x16xf32>
    %c2_22 = arith.constant 2 : index
    %c2_23 = arith.constant 2 : index
    %c2_24 = arith.constant 2 : index
    %16 = vector.load %arg7[%c2_22, %c2_23, %c2_24] : memref<4x20x20xf32, #tpu.memory_space<vmem>>, vector<1x16x16xf32>
    %17 = vector.shape_cast %16 : vector<1x16x16xf32> to vector<16x16xf32>
    %18 = vector.shape_cast %15 : vector<16x16xf32> to vector<1x16x16xf32>
    tpu.vector_store %arg7[%c2_22, %c2_23, %c2_24], %18 {strides = array<i32>} : memref<4x20x20xf32, #tpu.memory_space<vmem>>, vector<1x16x16xf32>,
    %c0_25 = arith.constant 0 : index
    %c3 = arith.constant 3 : index
    %c0_26 = arith.constant 0 : index
    %c0_27 = arith.constant 0 : index
    %19 = vector.load %arg1[%c0_25, %c3, %c0_26, %c0_27] : memref<1x4x16x16xf32, #tpu.memory_space<vmem>>, vector<1x1x16x16xf32>
    %20 = vector.shape_cast %19 : vector<1x1x16x16xf32> to vector<16x16xf32>
    %c3_28 = arith.constant 3 : index
    %c2_29 = arith.constant 2 : index
    %c2_30 = arith.constant 2 : index
    %21 = vector.load %arg7[%c3_28, %c2_29, %c2_30] : memref<4x20x20xf32, #tpu.memory_space<vmem>>, vector<1x16x16xf32>
    %22 = vector.shape_cast %21 : vector<1x16x16xf32> to vector<16x16xf32>
    %23 = vector.shape_cast %20 : vector<16x16xf32> to vector<1x16x16xf32>
    tpu.vector_store %arg7[%c3_28, %c2_29, %c2_30], %23 {strides = array<i32>} : memref<4x20x20xf32, #tpu.memory_space<vmem>>, vector<1x16x16xf32>,
    %c0_31 = arith.constant 0 : index
    %24 = memref.load %arg3[%c0_31] : memref<4xf32, #tpu.memory_space<smem>>
    %25 = vector.broadcast %24 : f32 to vector<18x18xf32>
    %c1_32 = arith.constant 1 : index
    %26 = memref.load %arg3[%c1_32] : memref<4xf32, #tpu.memory_space<smem>>
    %27 = vector.broadcast %26 : f32 to vector<18x18xf32>
    %c2_33 = arith.constant 2 : index
    %28 = memref.load %arg3[%c2_33] : memref<4xf32, #tpu.memory_space<smem>>
    %29 = vector.broadcast %28 : f32 to vector<18x18xf32>
    %c3_34 = arith.constant 3 : index
    %30 = memref.load %arg3[%c3_34] : memref<4xf32, #tpu.memory_space<smem>>
    %31 = vector.broadcast %30 : f32 to vector<18x18xf32>
    %c0_35 = arith.constant 0 : index
    %c0_36 = arith.constant 0 : index
    %c0_37 = arith.constant 0 : index
    %32 = vector.load %arg7[%c0_35, %c0_36, %c0_37] : memref<4x20x20xf32, #tpu.memory_space<vmem>>, vector<1x18x18xf32>
    %33 = vector.shape_cast %32 : vector<1x18x18xf32> to vector<18x18xf32>
    %c0_38 = arith.constant 0 : index
    %34 = memref.load %arg2[%c0_38] : memref<144xf32, #tpu.memory_space<smem>>
    %35 = vector.broadcast %34 : f32 to vector<18x18xf32>
    %36 = arith.mulf %33, %35 : vector<18x18xf32>
    %37 = arith.addf %25, %36 : vector<18x18xf32>
    %c1_39 = arith.constant 1 : index
    %38 = memref.load %arg2[%c1_39] : memref<144xf32, #tpu.memory_space<smem>>
    %39 = vector.broadcast %38 : f32 to vector<18x18xf32>
    %40 = arith.mulf %33, %39 : vector<18x18xf32>
    %41 = arith.addf %27, %40 : vector<18x18xf32>
    %c2_40 = arith.constant 2 : index
    %42 = memref.load %arg2[%c2_40] : memref<144xf32, #tpu.memory_space<smem>>
    %43 = vector.broadcast %42 : f32 to vector<18x18xf32>
    %44 = arith.mulf %33, %43 : vector<18x18xf32>
    %45 = arith.addf %29, %44 : vector<18x18xf32>
    %c3_41 = arith.constant 3 : index
    %46 = memref.load %arg2[%c3_41] : memref<144xf32, #tpu.memory_space<smem>>
    %47 = vector.broadcast %46 : f32 to vector<18x18xf32>
    %48 = arith.mulf %33, %47 : vector<18x18xf32>
    %49 = arith.addf %31, %48 : vector<18x18xf32>
    %c0_42 = arith.constant 0 : index
    %c0_43 = arith.constant 0 : index
    %c1_44 = arith.constant 1 : index
    %50 = vector.load %arg7[%c0_42, %c0_43, %c1_44] : memref<4x20x20xf32, #tpu.memory_space<vmem>>, vector<1x18x18xf32>
    %51 = vector.shape_cast %50 : vector<1x18x18xf32> to vector<18x18xf32>
    %c4 = arith.constant 4 : index
    %52 = memref.load %arg2[%c4] : memref<144xf32, #tpu.memory_space<smem>>
    %53 = vector.broadcast %52 : f32 to vector<18x18xf32>
    %54 = arith.mulf %51, %53 : vector<18x18xf32>
    %55 = arith.addf %37, %54 : vector<18x18xf32>
    %c5 = arith.constant 5 : index
    %56 = memref.load %arg2[%c5] : memref<144xf32, #tpu.memory_space<smem>>
    %57 = vector.broadcast %56 : f32 to vector<18x18xf32>
    %58 = arith.mulf %51, %57 : vector<18x18xf32>
    %59 = arith.addf %41, %58 : vector<18x18xf32>
    %c6 = arith.constant 6 : index
    %60 = memref.load %arg2[%c6] : memref<144xf32, #tpu.memory_space<smem>>
    %61 = vector.broadcast %60 : f32 to vector<18x18xf32>
    %62 = arith.mulf %51, %61 : vector<18x18xf32>
    %63 = arith.addf %45, %62 : vector<18x18xf32>
    %c7 = arith.constant 7 : index
    %64 = memref.load %arg2[%c7] : memref<144xf32, #tpu.memory_space<smem>>
    %65 = vector.broadcast %64 : f32 to vector<18x18xf32>
    %66 = arith.mulf %51, %65 : vector<18x18xf32>
    %67 = arith.addf %49, %66 : vector<18x18xf32>
    %c0_45 = arith.constant 0 : index
    %c0_46 = arith.constant 0 : index
    %c2_47 = arith.constant 2 : index
    %68 = vector.load %arg7[%c0_45, %c0_46, %c2_47] : memref<4x20x20xf32, #tpu.memory_space<vmem>>, vector<1x18x18xf32>
    %69 = vector.shape_cast %68 : vector<1x18x18xf32> to vector<18x18xf32>
    %c8 = arith.constant 8 : index
    %70 = memref.load %arg2[%c8] : memref<144xf32, #tpu.memory_space<smem>>
    %71 = vector.broadcast %70 : f32 to vector<18x18xf32>
    %72 = arith.mulf %69, %71 : vector<18x18xf32>
    %73 = arith.addf %55, %72 : vector<18x18xf32>
    %c9 = arith.constant 9 : index
    %74 = memref.load %arg2[%c9] : memref<144xf32, #tpu.memory_space<smem>>
    %75 = vector.broadcast %74 : f32 to vector<18x18xf32>
    %76 = arith.mulf %69, %75 : vector<18x18xf32>
    %77 = arith.addf %59, %76 : vector<18x18xf32>
    %c10 = arith.constant 10 : index
    %78 = memref.load %arg2[%c10] : memref<144xf32, #tpu.memory_space<smem>>
    %79 = vector.broadcast %78 : f32 to vector<18x18xf32>
    %80 = arith.mulf %69, %79 : vector<18x18xf32>
    %81 = arith.addf %63, %80 : vector<18x18xf32>
    %c11 = arith.constant 11 : index
    %82 = memref.load %arg2[%c11] : memref<144xf32, #tpu.memory_space<smem>>
    %83 = vector.broadcast %82 : f32 to vector<18x18xf32>
    %84 = arith.mulf %69, %83 : vector<18x18xf32>
    %85 = arith.addf %67, %84 : vector<18x18xf32>
    %c0_48 = arith.constant 0 : index
    %c1_49 = arith.constant 1 : index
    %c0_50 = arith.constant 0 : index
    %86 = vector.load %arg7[%c0_48, %c1_49, %c0_50] : memref<4x20x20xf32, #tpu.memory_space<vmem>>, vector<1x18x18xf32>
    %87 = vector.shape_cast %86 : vector<1x18x18xf32> to vector<18x18xf32>
    %c12 = arith.constant 12 : index
    %88 = memref.load %arg2[%c12] : memref<144xf32, #tpu.memory_space<smem>>
    %89 = vector.broadcast %88 : f32 to vector<18x18xf32>
    %90 = arith.mulf %87, %89 : vector<18x18xf32>
    %91 = arith.addf %73, %90 : vector<18x18xf32>
    %c13 = arith.constant 13 : index
    %92 = memref.load %arg2[%c13] : memref<144xf32, #tpu.memory_space<smem>>
    %93 = vector.broadcast %92 : f32 to vector<18x18xf32>
    %94 = arith.mulf %87, %93 : vector<18x18xf32>
    %95 = arith.addf %77, %94 : vector<18x18xf32>
    %c14 = arith.constant 14 : index
    %96 = memref.load %arg2[%c14] : memref<144xf32, #tpu.memory_space<smem>>
    %97 = vector.broadcast %96 : f32 to vector<18x18xf32>
    %98 = arith.mulf %87, %97 : vector<18x18xf32>
    %99 = arith.addf %81, %98 : vector<18x18xf32>
    %c15 = arith.constant 15 : index
    %100 = memref.load %arg2[%c15] : memref<144xf32, #tpu.memory_space<smem>>
    %101 = vector.broadcast %100 : f32 to vector<18x18xf32>
    %102 = arith.mulf %87, %101 : vector<18x18xf32>
    %103 = arith.addf %85, %102 : vector<18x18xf32>
    %c0_51 = arith.constant 0 : index
    %c1_52 = arith.constant 1 : index
    %c1_53 = arith.constant 1 : index
    %104 = vector.load %arg7[%c0_51, %c1_52, %c1_53] : memref<4x20x20xf32, #tpu.memory_space<vmem>>, vector<1x18x18xf32>
    %105 = vector.shape_cast %104 : vector<1x18x18xf32> to vector<18x18xf32>
    %c16 = arith.constant 16 : index
    %106 = memref.load %arg2[%c16] : memref<144xf32, #tpu.memory_space<smem>>
    %107 = vector.broadcast %106 : f32 to vector<18x18xf32>
    %108 = arith.mulf %105, %107 : vector<18x18xf32>
    %109 = arith.addf %91, %108 : vector<18x18xf32>
    %c17 = arith.constant 17 : index
    %110 = memref.load %arg2[%c17] : memref<144xf32, #tpu.memory_space<smem>>
    %111 = vector.broadcast %110 : f32 to vector<18x18xf32>
    %112 = arith.mulf %105, %111 : vector<18x18xf32>
    %113 = arith.addf %95, %112 : vector<18x18xf32>
    %c18 = arith.constant 18 : index
    %114 = memref.load %arg2[%c18] : memref<144xf32, #tpu.memory_space<smem>>
    %115 = vector.broadcast %114 : f32 to vector<18x18xf32>
    %116 = arith.mulf %105, %115 : vector<18x18xf32>
    %117 = arith.addf %99, %116 : vector<18x18xf32>
    %c19 = arith.constant 19 : index
    %118 = memref.load %arg2[%c19] : memref<144xf32, #tpu.memory_space<smem>>
    %119 = vector.broadcast %118 : f32 to vector<18x18xf32>
    %120 = arith.mulf %105, %119 : vector<18x18xf32>
    %121 = arith.addf %103, %120 : vector<18x18xf32>
    %c0_54 = arith.constant 0 : index
    %c1_55 = arith.constant 1 : index
    %c2_56 = arith.constant 2 : index
    %122 = vector.load %arg7[%c0_54, %c1_55, %c2_56] : memref<4x20x20xf32, #tpu.memory_space<vmem>>, vector<1x18x18xf32>
    %123 = vector.shape_cast %122 : vector<1x18x18xf32> to vector<18x18xf32>
    %c20 = arith.constant 20 : index
    %124 = memref.load %arg2[%c20] : memref<144xf32, #tpu.memory_space<smem>>
    %125 = vector.broadcast %124 : f32 to vector<18x18xf32>
    %126 = arith.mulf %123, %125 : vector<18x18xf32>
    %127 = arith.addf %109, %126 : vector<18x18xf32>
    %c21 = arith.constant 21 : index
    %128 = memref.load %arg2[%c21] : memref<144xf32, #tpu.memory_space<smem>>
    %129 = vector.broadcast %128 : f32 to vector<18x18xf32>
    %130 = arith.mulf %123, %129 : vector<18x18xf32>
    %131 = arith.addf %113, %130 : vector<18x18xf32>
    %c22 = arith.constant 22 : index
    %132 = memref.load %arg2[%c22] : memref<144xf32, #tpu.memory_space<smem>>
    %133 = vector.broadcast %132 : f32 to vector<18x18xf32>
    %134 = arith.mulf %123, %133 : vector<18x18xf32>
    %135 = arith.addf %117, %134 : vector<18x18xf32>
    %c23 = arith.constant 23 : index
    %136 = memref.load %arg2[%c23] : memref<144xf32, #tpu.memory_space<smem>>
    %137 = vector.broadcast %136 : f32 to vector<18x18xf32>
    %138 = arith.mulf %123, %137 : vector<18x18xf32>
    %139 = arith.addf %121, %138 : vector<18x18xf32>
    %c0_57 = arith.constant 0 : index
    %c2_58 = arith.constant 2 : index
    %c0_59 = arith.constant 0 : index
    %140 = vector.load %arg7[%c0_57, %c2_58, %c0_59] : memref<4x20x20xf32, #tpu.memory_space<vmem>>, vector<1x18x18xf32>
    %141 = vector.shape_cast %140 : vector<1x18x18xf32> to vector<18x18xf32>
    %c24 = arith.constant 24 : index
    %142 = memref.load %arg2[%c24] : memref<144xf32, #tpu.memory_space<smem>>
    %143 = vector.broadcast %142 : f32 to vector<18x18xf32>
    %144 = arith.mulf %141, %143 : vector<18x18xf32>
    %145 = arith.addf %127, %144 : vector<18x18xf32>
    %c25 = arith.constant 25 : index
    %146 = memref.load %arg2[%c25] : memref<144xf32, #tpu.memory_space<smem>>
    %147 = vector.broadcast %146 : f32 to vector<18x18xf32>
    %148 = arith.mulf %141, %147 : vector<18x18xf32>
    %149 = arith.addf %131, %148 : vector<18x18xf32>
    %c26 = arith.constant 26 : index
    %150 = memref.load %arg2[%c26] : memref<144xf32, #tpu.memory_space<smem>>
    %151 = vector.broadcast %150 : f32 to vector<18x18xf32>
    %152 = arith.mulf %141, %151 : vector<18x18xf32>
    %153 = arith.addf %135, %152 : vector<18x18xf32>
    %c27 = arith.constant 27 : index
    %154 = memref.load %arg2[%c27] : memref<144xf32, #tpu.memory_space<smem>>
    %155 = vector.broadcast %154 : f32 to vector<18x18xf32>
    %156 = arith.mulf %141, %155 : vector<18x18xf32>
    %157 = arith.addf %139, %156 : vector<18x18xf32>
    %c0_60 = arith.constant 0 : index
    %c2_61 = arith.constant 2 : index
    %c1_62 = arith.constant 1 : index
    %158 = vector.load %arg7[%c0_60, %c2_61, %c1_62] : memref<4x20x20xf32, #tpu.memory_space<vmem>>, vector<1x18x18xf32>
    %159 = vector.shape_cast %158 : vector<1x18x18xf32> to vector<18x18xf32>
    %c28 = arith.constant 28 : index
    %160 = memref.load %arg2[%c28] : memref<144xf32, #tpu.memory_space<smem>>
    %161 = vector.broadcast %160 : f32 to vector<18x18xf32>
    %162 = arith.mulf %159, %161 : vector<18x18xf32>
    %163 = arith.addf %145, %162 : vector<18x18xf32>
    %c29 = arith.constant 29 : index
    %164 = memref.load %arg2[%c29] : memref<144xf32, #tpu.memory_space<smem>>
    %165 = vector.broadcast %164 : f32 to vector<18x18xf32>
    %166 = arith.mulf %159, %165 : vector<18x18xf32>
    %167 = arith.addf %149, %166 : vector<18x18xf32>
    %c30 = arith.constant 30 : index
    %168 = memref.load %arg2[%c30] : memref<144xf32, #tpu.memory_space<smem>>
    %169 = vector.broadcast %168 : f32 to vector<18x18xf32>
    %170 = arith.mulf %159, %169 : vector<18x18xf32>
    %171 = arith.addf %153, %170 : vector<18x18xf32>
    %c31 = arith.constant 31 : index
    %172 = memref.load %arg2[%c31] : memref<144xf32, #tpu.memory_space<smem>>
    %173 = vector.broadcast %172 : f32 to vector<18x18xf32>
    %174 = arith.mulf %159, %173 : vector<18x18xf32>
    %175 = arith.addf %157, %174 : vector<18x18xf32>
    %c0_63 = arith.constant 0 : index
    %c2_64 = arith.constant 2 : index
    %c2_65 = arith.constant 2 : index
    %176 = vector.load %arg7[%c0_63, %c2_64, %c2_65] : memref<4x20x20xf32, #tpu.memory_space<vmem>>, vector<1x18x18xf32>
    %177 = vector.shape_cast %176 : vector<1x18x18xf32> to vector<18x18xf32>
    %c32 = arith.constant 32 : index
    %178 = memref.load %arg2[%c32] : memref<144xf32, #tpu.memory_space<smem>>
    %179 = vector.broadcast %178 : f32 to vector<18x18xf32>
    %180 = arith.mulf %177, %179 : vector<18x18xf32>
    %181 = arith.addf %163, %180 : vector<18x18xf32>
    %c33 = arith.constant 33 : index
    %182 = memref.load %arg2[%c33] : memref<144xf32, #tpu.memory_space<smem>>
    %183 = vector.broadcast %182 : f32 to vector<18x18xf32>
    %184 = arith.mulf %177, %183 : vector<18x18xf32>
    %185 = arith.addf %167, %184 : vector<18x18xf32>
    %c34 = arith.constant 34 : index
    %186 = memref.load %arg2[%c34] : memref<144xf32, #tpu.memory_space<smem>>
    %187 = vector.broadcast %186 : f32 to vector<18x18xf32>
    %188 = arith.mulf %177, %187 : vector<18x18xf32>
    %189 = arith.addf %171, %188 : vector<18x18xf32>
    %c35 = arith.constant 35 : index
    %190 = memref.load %arg2[%c35] : memref<144xf32, #tpu.memory_space<smem>>
    %191 = vector.broadcast %190 : f32 to vector<18x18xf32>
    %192 = arith.mulf %177, %191 : vector<18x18xf32>
    %193 = arith.addf %175, %192 : vector<18x18xf32>
    %c1_66 = arith.constant 1 : index
    %c0_67 = arith.constant 0 : index
    %c0_68 = arith.constant 0 : index
    %194 = vector.load %arg7[%c1_66, %c0_67, %c0_68] : memref<4x20x20xf32, #tpu.memory_space<vmem>>, vector<1x18x18xf32>
    %195 = vector.shape_cast %194 : vector<1x18x18xf32> to vector<18x18xf32>
    %c36 = arith.constant 36 : index
    %196 = memref.load %arg2[%c36] : memref<144xf32, #tpu.memory_space<smem>>
    %197 = vector.broadcast %196 : f32 to vector<18x18xf32>
    %198 = arith.mulf %195, %197 : vector<18x18xf32>
    %199 = arith.addf %181, %198 : vector<18x18xf32>
    %c37 = arith.constant 37 : index
    %200 = memref.load %arg2[%c37] : memref<144xf32, #tpu.memory_space<smem>>
    %201 = vector.broadcast %200 : f32 to vector<18x18xf32>
    %202 = arith.mulf %195, %201 : vector<18x18xf32>
    %203 = arith.addf %185, %202 : vector<18x18xf32>
    %c38 = arith.constant 38 : index
    %204 = memref.load %arg2[%c38] : memref<144xf32, #tpu.memory_space<smem>>
    %205 = vector.broadcast %204 : f32 to vector<18x18xf32>
    %206 = arith.mulf %195, %205 : vector<18x18xf32>
    %207 = arith.addf %189, %206 : vector<18x18xf32>
    %c39 = arith.constant 39 : index
    %208 = memref.load %arg2[%c39] : memref<144xf32, #tpu.memory_space<smem>>
    %209 = vector.broadcast %208 : f32 to vector<18x18xf32>
    %210 = arith.mulf %195, %209 : vector<18x18xf32>
    %211 = arith.addf %193, %210 : vector<18x18xf32>
    %c1_69 = arith.constant 1 : index
    %c0_70 = arith.constant 0 : index
    %c1_71 = arith.constant 1 : index
    %212 = vector.load %arg7[%c1_69, %c0_70, %c1_71] : memref<4x20x20xf32, #tpu.memory_space<vmem>>, vector<1x18x18xf32>
    %213 = vector.shape_cast %212 : vector<1x18x18xf32> to vector<18x18xf32>
    %c40 = arith.constant 40 : index
    %214 = memref.load %arg2[%c40] : memref<144xf32, #tpu.memory_space<smem>>
    %215 = vector.broadcast %214 : f32 to vector<18x18xf32>
    %216 = arith.mulf %213, %215 : vector<18x18xf32>
    %217 = arith.addf %199, %216 : vector<18x18xf32>
    %c41 = arith.constant 41 : index
    %218 = memref.load %arg2[%c41] : memref<144xf32, #tpu.memory_space<smem>>
    %219 = vector.broadcast %218 : f32 to vector<18x18xf32>
    %220 = arith.mulf %213, %219 : vector<18x18xf32>
    %221 = arith.addf %203, %220 : vector<18x18xf32>
    %c42 = arith.constant 42 : index
    %222 = memref.load %arg2[%c42] : memref<144xf32, #tpu.memory_space<smem>>
    %223 = vector.broadcast %222 : f32 to vector<18x18xf32>
    %224 = arith.mulf %213, %223 : vector<18x18xf32>
    %225 = arith.addf %207, %224 : vector<18x18xf32>
    %c43 = arith.constant 43 : index
    %226 = memref.load %arg2[%c43] : memref<144xf32, #tpu.memory_space<smem>>
    %227 = vector.broadcast %226 : f32 to vector<18x18xf32>
    %228 = arith.mulf %213, %227 : vector<18x18xf32>
    %229 = arith.addf %211, %228 : vector<18x18xf32>
    %c1_72 = arith.constant 1 : index
    %c0_73 = arith.constant 0 : index
    %c2_74 = arith.constant 2 : index
    %230 = vector.load %arg7[%c1_72, %c0_73, %c2_74] : memref<4x20x20xf32, #tpu.memory_space<vmem>>, vector<1x18x18xf32>
    %231 = vector.shape_cast %230 : vector<1x18x18xf32> to vector<18x18xf32>
    %c44 = arith.constant 44 : index
    %232 = memref.load %arg2[%c44] : memref<144xf32, #tpu.memory_space<smem>>
    %233 = vector.broadcast %232 : f32 to vector<18x18xf32>
    %234 = arith.mulf %231, %233 : vector<18x18xf32>
    %235 = arith.addf %217, %234 : vector<18x18xf32>
    %c45 = arith.constant 45 : index
    %236 = memref.load %arg2[%c45] : memref<144xf32, #tpu.memory_space<smem>>
    %237 = vector.broadcast %236 : f32 to vector<18x18xf32>
    %238 = arith.mulf %231, %237 : vector<18x18xf32>
    %239 = arith.addf %221, %238 : vector<18x18xf32>
    %c46 = arith.constant 46 : index
    %240 = memref.load %arg2[%c46] : memref<144xf32, #tpu.memory_space<smem>>
    %241 = vector.broadcast %240 : f32 to vector<18x18xf32>
    %242 = arith.mulf %231, %241 : vector<18x18xf32>
    %243 = arith.addf %225, %242 : vector<18x18xf32>
    %c47 = arith.constant 47 : index
    %244 = memref.load %arg2[%c47] : memref<144xf32, #tpu.memory_space<smem>>
    %245 = vector.broadcast %244 : f32 to vector<18x18xf32>
    %246 = arith.mulf %231, %245 : vector<18x18xf32>
    %247 = arith.addf %229, %246 : vector<18x18xf32>
    %c1_75 = arith.constant 1 : index
    %c1_76 = arith.constant 1 : index
    %c0_77 = arith.constant 0 : index
    %248 = vector.load %arg7[%c1_75, %c1_76, %c0_77] : memref<4x20x20xf32, #tpu.memory_space<vmem>>, vector<1x18x18xf32>
    %249 = vector.shape_cast %248 : vector<1x18x18xf32> to vector<18x18xf32>
    %c48 = arith.constant 48 : index
    %250 = memref.load %arg2[%c48] : memref<144xf32, #tpu.memory_space<smem>>
    %251 = vector.broadcast %250 : f32 to vector<18x18xf32>
    %252 = arith.mulf %249, %251 : vector<18x18xf32>
    %253 = arith.addf %235, %252 : vector<18x18xf32>
    %c49 = arith.constant 49 : index
    %254 = memref.load %arg2[%c49] : memref<144xf32, #tpu.memory_space<smem>>
    %255 = vector.broadcast %254 : f32 to vector<18x18xf32>
    %256 = arith.mulf %249, %255 : vector<18x18xf32>
    %257 = arith.addf %239, %256 : vector<18x18xf32>
    %c50 = arith.constant 50 : index
    %258 = memref.load %arg2[%c50] : memref<144xf32, #tpu.memory_space<smem>>
    %259 = vector.broadcast %258 : f32 to vector<18x18xf32>
    %260 = arith.mulf %249, %259 : vector<18x18xf32>
    %261 = arith.addf %243, %260 : vector<18x18xf32>
    %c51 = arith.constant 51 : index
    %262 = memref.load %arg2[%c51] : memref<144xf32, #tpu.memory_space<smem>>
    %263 = vector.broadcast %262 : f32 to vector<18x18xf32>
    %264 = arith.mulf %249, %263 : vector<18x18xf32>
    %265 = arith.addf %247, %264 : vector<18x18xf32>
    %c1_78 = arith.constant 1 : index
    %c1_79 = arith.constant 1 : index
    %c1_80 = arith.constant 1 : index
    %266 = vector.load %arg7[%c1_78, %c1_79, %c1_80] : memref<4x20x20xf32, #tpu.memory_space<vmem>>, vector<1x18x18xf32>
    %267 = vector.shape_cast %266 : vector<1x18x18xf32> to vector<18x18xf32>
    %c52 = arith.constant 52 : index
    %268 = memref.load %arg2[%c52] : memref<144xf32, #tpu.memory_space<smem>>
    %269 = vector.broadcast %268 : f32 to vector<18x18xf32>
    %270 = arith.mulf %267, %269 : vector<18x18xf32>
    %271 = arith.addf %253, %270 : vector<18x18xf32>
    %c53 = arith.constant 53 : index
    %272 = memref.load %arg2[%c53] : memref<144xf32, #tpu.memory_space<smem>>
    %273 = vector.broadcast %272 : f32 to vector<18x18xf32>
    %274 = arith.mulf %267, %273 : vector<18x18xf32>
    %275 = arith.addf %257, %274 : vector<18x18xf32>
    %c54 = arith.constant 54 : index
    %276 = memref.load %arg2[%c54] : memref<144xf32, #tpu.memory_space<smem>>
    %277 = vector.broadcast %276 : f32 to vector<18x18xf32>
    %278 = arith.mulf %267, %277 : vector<18x18xf32>
    %279 = arith.addf %261, %278 : vector<18x18xf32>
    %c55 = arith.constant 55 : index
    %280 = memref.load %arg2[%c55] : memref<144xf32, #tpu.memory_space<smem>>
    %281 = vector.broadcast %280 : f32 to vector<18x18xf32>
    %282 = arith.mulf %267, %281 : vector<18x18xf32>
    %283 = arith.addf %265, %282 : vector<18x18xf32>
    %c1_81 = arith.constant 1 : index
    %c1_82 = arith.constant 1 : index
    %c2_83 = arith.constant 2 : index
    %284 = vector.load %arg7[%c1_81, %c1_82, %c2_83] : memref<4x20x20xf32, #tpu.memory_space<vmem>>, vector<1x18x18xf32>
    %285 = vector.shape_cast %284 : vector<1x18x18xf32> to vector<18x18xf32>
    %c56 = arith.constant 56 : index
    %286 = memref.load %arg2[%c56] : memref<144xf32, #tpu.memory_space<smem>>
    %287 = vector.broadcast %286 : f32 to vector<18x18xf32>
    %288 = arith.mulf %285, %287 : vector<18x18xf32>
    %289 = arith.addf %271, %288 : vector<18x18xf32>
    %c57 = arith.constant 57 : index
    %290 = memref.load %arg2[%c57] : memref<144xf32, #tpu.memory_space<smem>>
    %291 = vector.broadcast %290 : f32 to vector<18x18xf32>
    %292 = arith.mulf %285, %291 : vector<18x18xf32>
    %293 = arith.addf %275, %292 : vector<18x18xf32>
    %c58 = arith.constant 58 : index
    %294 = memref.load %arg2[%c58] : memref<144xf32, #tpu.memory_space<smem>>
    %295 = vector.broadcast %294 : f32 to vector<18x18xf32>
    %296 = arith.mulf %285, %295 : vector<18x18xf32>
    %297 = arith.addf %279, %296 : vector<18x18xf32>
    %c59 = arith.constant 59 : index
    %298 = memref.load %arg2[%c59] : memref<144xf32, #tpu.memory_space<smem>>
    %299 = vector.broadcast %298 : f32 to vector<18x18xf32>
    %300 = arith.mulf %285, %299 : vector<18x18xf32>
    %301 = arith.addf %283, %300 : vector<18x18xf32>
    %c1_84 = arith.constant 1 : index
    %c2_85 = arith.constant 2 : index
    %c0_86 = arith.constant 0 : index
    %302 = vector.load %arg7[%c1_84, %c2_85, %c0_86] : memref<4x20x20xf32, #tpu.memory_space<vmem>>, vector<1x18x18xf32>
    %303 = vector.shape_cast %302 : vector<1x18x18xf32> to vector<18x18xf32>
    %c60 = arith.constant 60 : index
    %304 = memref.load %arg2[%c60] : memref<144xf32, #tpu.memory_space<smem>>
    %305 = vector.broadcast %304 : f32 to vector<18x18xf32>
    %306 = arith.mulf %303, %305 : vector<18x18xf32>
    %307 = arith.addf %289, %306 : vector<18x18xf32>
    %c61 = arith.constant 61 : index
    %308 = memref.load %arg2[%c61] : memref<144xf32, #tpu.memory_space<smem>>
    %309 = vector.broadcast %308 : f32 to vector<18x18xf32>
    %310 = arith.mulf %303, %309 : vector<18x18xf32>
    %311 = arith.addf %293, %310 : vector<18x18xf32>
    %c62 = arith.constant 62 : index
    %312 = memref.load %arg2[%c62] : memref<144xf32, #tpu.memory_space<smem>>
    %313 = vector.broadcast %312 : f32 to vector<18x18xf32>
    %314 = arith.mulf %303, %313 : vector<18x18xf32>
    %315 = arith.addf %297, %314 : vector<18x18xf32>
    %c63 = arith.constant 63 : index
    %316 = memref.load %arg2[%c63] : memref<144xf32, #tpu.memory_space<smem>>
    %317 = vector.broadcast %316 : f32 to vector<18x18xf32>
    %318 = arith.mulf %303, %317 : vector<18x18xf32>
    %319 = arith.addf %301, %318 : vector<18x18xf32>
    %c1_87 = arith.constant 1 : index
    %c2_88 = arith.constant 2 : index
    %c1_89 = arith.constant 1 : index
    %320 = vector.load %arg7[%c1_87, %c2_88, %c1_89] : memref<4x20x20xf32, #tpu.memory_space<vmem>>, vector<1x18x18xf32>
    %321 = vector.shape_cast %320 : vector<1x18x18xf32> to vector<18x18xf32>
    %c64 = arith.constant 64 : index
    %322 = memref.load %arg2[%c64] : memref<144xf32, #tpu.memory_space<smem>>
    %323 = vector.broadcast %322 : f32 to vector<18x18xf32>
    %324 = arith.mulf %321, %323 : vector<18x18xf32>
    %325 = arith.addf %307, %324 : vector<18x18xf32>
    %c65 = arith.constant 65 : index
    %326 = memref.load %arg2[%c65] : memref<144xf32, #tpu.memory_space<smem>>
    %327 = vector.broadcast %326 : f32 to vector<18x18xf32>
    %328 = arith.mulf %321, %327 : vector<18x18xf32>
    %329 = arith.addf %311, %328 : vector<18x18xf32>
    %c66 = arith.constant 66 : index
    %330 = memref.load %arg2[%c66] : memref<144xf32, #tpu.memory_space<smem>>
    %331 = vector.broadcast %330 : f32 to vector<18x18xf32>
    %332 = arith.mulf %321, %331 : vector<18x18xf32>
    %333 = arith.addf %315, %332 : vector<18x18xf32>
    %c67 = arith.constant 67 : index
    %334 = memref.load %arg2[%c67] : memref<144xf32, #tpu.memory_space<smem>>
    %335 = vector.broadcast %334 : f32 to vector<18x18xf32>
    %336 = arith.mulf %321, %335 : vector<18x18xf32>
    %337 = arith.addf %319, %336 : vector<18x18xf32>
    %c1_90 = arith.constant 1 : index
    %c2_91 = arith.constant 2 : index
    %c2_92 = arith.constant 2 : index
    %338 = vector.load %arg7[%c1_90, %c2_91, %c2_92] : memref<4x20x20xf32, #tpu.memory_space<vmem>>, vector<1x18x18xf32>
    %339 = vector.shape_cast %338 : vector<1x18x18xf32> to vector<18x18xf32>
    %c68 = arith.constant 68 : index
    %340 = memref.load %arg2[%c68] : memref<144xf32, #tpu.memory_space<smem>>
    %341 = vector.broadcast %340 : f32 to vector<18x18xf32>
    %342 = arith.mulf %339, %341 : vector<18x18xf32>
    %343 = arith.addf %325, %342 : vector<18x18xf32>
    %c69 = arith.constant 69 : index
    %344 = memref.load %arg2[%c69] : memref<144xf32, #tpu.memory_space<smem>>
    %345 = vector.broadcast %344 : f32 to vector<18x18xf32>
    %346 = arith.mulf %339, %345 : vector<18x18xf32>
    %347 = arith.addf %329, %346 : vector<18x18xf32>
    %c70 = arith.constant 70 : index
    %348 = memref.load %arg2[%c70] : memref<144xf32, #tpu.memory_space<smem>>
    %349 = vector.broadcast %348 : f32 to vector<18x18xf32>
    %350 = arith.mulf %339, %349 : vector<18x18xf32>
    %351 = arith.addf %333, %350 : vector<18x18xf32>
    %c71 = arith.constant 71 : index
    %352 = memref.load %arg2[%c71] : memref<144xf32, #tpu.memory_space<smem>>
    %353 = vector.broadcast %352 : f32 to vector<18x18xf32>
    %354 = arith.mulf %339, %353 : vector<18x18xf32>
    %355 = arith.addf %337, %354 : vector<18x18xf32>
    %c2_93 = arith.constant 2 : index
    %c0_94 = arith.constant 0 : index
    %c0_95 = arith.constant 0 : index
    %356 = vector.load %arg7[%c2_93, %c0_94, %c0_95] : memref<4x20x20xf32, #tpu.memory_space<vmem>>, vector<1x18x18xf32>
    %357 = vector.shape_cast %356 : vector<1x18x18xf32> to vector<18x18xf32>
    %c72 = arith.constant 72 : index
    %358 = memref.load %arg2[%c72] : memref<144xf32, #tpu.memory_space<smem>>
    %359 = vector.broadcast %358 : f32 to vector<18x18xf32>
    %360 = arith.mulf %357, %359 : vector<18x18xf32>
    %361 = arith.addf %343, %360 : vector<18x18xf32>
    %c73 = arith.constant 73 : index
    %362 = memref.load %arg2[%c73] : memref<144xf32, #tpu.memory_space<smem>>
    %363 = vector.broadcast %362 : f32 to vector<18x18xf32>
    %364 = arith.mulf %357, %363 : vector<18x18xf32>
    %365 = arith.addf %347, %364 : vector<18x18xf32>
    %c74 = arith.constant 74 : index
    %366 = memref.load %arg2[%c74] : memref<144xf32, #tpu.memory_space<smem>>
    %367 = vector.broadcast %366 : f32 to vector<18x18xf32>
    %368 = arith.mulf %357, %367 : vector<18x18xf32>
    %369 = arith.addf %351, %368 : vector<18x18xf32>
    %c75 = arith.constant 75 : index
    %370 = memref.load %arg2[%c75] : memref<144xf32, #tpu.memory_space<smem>>
    %371 = vector.broadcast %370 : f32 to vector<18x18xf32>
    %372 = arith.mulf %357, %371 : vector<18x18xf32>
    %373 = arith.addf %355, %372 : vector<18x18xf32>
    %c2_96 = arith.constant 2 : index
    %c0_97 = arith.constant 0 : index
    %c1_98 = arith.constant 1 : index
    %374 = vector.load %arg7[%c2_96, %c0_97, %c1_98] : memref<4x20x20xf32, #tpu.memory_space<vmem>>, vector<1x18x18xf32>
    %375 = vector.shape_cast %374 : vector<1x18x18xf32> to vector<18x18xf32>
    %c76 = arith.constant 76 : index
    %376 = memref.load %arg2[%c76] : memref<144xf32, #tpu.memory_space<smem>>
    %377 = vector.broadcast %376 : f32 to vector<18x18xf32>
    %378 = arith.mulf %375, %377 : vector<18x18xf32>
    %379 = arith.addf %361, %378 : vector<18x18xf32>
    %c77 = arith.constant 77 : index
    %380 = memref.load %arg2[%c77] : memref<144xf32, #tpu.memory_space<smem>>
    %381 = vector.broadcast %380 : f32 to vector<18x18xf32>
    %382 = arith.mulf %375, %381 : vector<18x18xf32>
    %383 = arith.addf %365, %382 : vector<18x18xf32>
    %c78 = arith.constant 78 : index
    %384 = memref.load %arg2[%c78] : memref<144xf32, #tpu.memory_space<smem>>
    %385 = vector.broadcast %384 : f32 to vector<18x18xf32>
    %386 = arith.mulf %375, %385 : vector<18x18xf32>
    %387 = arith.addf %369, %386 : vector<18x18xf32>
    %c79 = arith.constant 79 : index
    %388 = memref.load %arg2[%c79] : memref<144xf32, #tpu.memory_space<smem>>
    %389 = vector.broadcast %388 : f32 to vector<18x18xf32>
    %390 = arith.mulf %375, %389 : vector<18x18xf32>
    %391 = arith.addf %373, %390 : vector<18x18xf32>
    %c2_99 = arith.constant 2 : index
    %c0_100 = arith.constant 0 : index
    %c2_101 = arith.constant 2 : index
    %392 = vector.load %arg7[%c2_99, %c0_100, %c2_101] : memref<4x20x20xf32, #tpu.memory_space<vmem>>, vector<1x18x18xf32>
    %393 = vector.shape_cast %392 : vector<1x18x18xf32> to vector<18x18xf32>
    %c80 = arith.constant 80 : index
    %394 = memref.load %arg2[%c80] : memref<144xf32, #tpu.memory_space<smem>>
    %395 = vector.broadcast %394 : f32 to vector<18x18xf32>
    %396 = arith.mulf %393, %395 : vector<18x18xf32>
    %397 = arith.addf %379, %396 : vector<18x18xf32>
    %c81 = arith.constant 81 : index
    %398 = memref.load %arg2[%c81] : memref<144xf32, #tpu.memory_space<smem>>
    %399 = vector.broadcast %398 : f32 to vector<18x18xf32>
    %400 = arith.mulf %393, %399 : vector<18x18xf32>
    %401 = arith.addf %383, %400 : vector<18x18xf32>
    %c82 = arith.constant 82 : index
    %402 = memref.load %arg2[%c82] : memref<144xf32, #tpu.memory_space<smem>>
    %403 = vector.broadcast %402 : f32 to vector<18x18xf32>
    %404 = arith.mulf %393, %403 : vector<18x18xf32>
    %405 = arith.addf %387, %404 : vector<18x18xf32>
    %c83 = arith.constant 83 : index
    %406 = memref.load %arg2[%c83] : memref<144xf32, #tpu.memory_space<smem>>
    %407 = vector.broadcast %406 : f32 to vector<18x18xf32>
    %408 = arith.mulf %393, %407 : vector<18x18xf32>
    %409 = arith.addf %391, %408 : vector<18x18xf32>
    %c2_102 = arith.constant 2 : index
    %c1_103 = arith.constant 1 : index
    %c0_104 = arith.constant 0 : index
    %410 = vector.load %arg7[%c2_102, %c1_103, %c0_104] : memref<4x20x20xf32, #tpu.memory_space<vmem>>, vector<1x18x18xf32>
    %411 = vector.shape_cast %410 : vector<1x18x18xf32> to vector<18x18xf32>
    %c84 = arith.constant 84 : index
    %412 = memref.load %arg2[%c84] : memref<144xf32, #tpu.memory_space<smem>>
    %413 = vector.broadcast %412 : f32 to vector<18x18xf32>
    %414 = arith.mulf %411, %413 : vector<18x18xf32>
    %415 = arith.addf %397, %414 : vector<18x18xf32>
    %c85 = arith.constant 85 : index
    %416 = memref.load %arg2[%c85] : memref<144xf32, #tpu.memory_space<smem>>
    %417 = vector.broadcast %416 : f32 to vector<18x18xf32>
    %418 = arith.mulf %411, %417 : vector<18x18xf32>
    %419 = arith.addf %401, %418 : vector<18x18xf32>
    %c86 = arith.constant 86 : index
    %420 = memref.load %arg2[%c86] : memref<144xf32, #tpu.memory_space<smem>>
    %421 = vector.broadcast %420 : f32 to vector<18x18xf32>
    %422 = arith.mulf %411, %421 : vector<18x18xf32>
    %423 = arith.addf %405, %422 : vector<18x18xf32>
    %c87 = arith.constant 87 : index
    %424 = memref.load %arg2[%c87] : memref<144xf32, #tpu.memory_space<smem>>
    %425 = vector.broadcast %424 : f32 to vector<18x18xf32>
    %426 = arith.mulf %411, %425 : vector<18x18xf32>
    %427 = arith.addf %409, %426 : vector<18x18xf32>
    %c2_105 = arith.constant 2 : index
    %c1_106 = arith.constant 1 : index
    %c1_107 = arith.constant 1 : index
    %428 = vector.load %arg7[%c2_105, %c1_106, %c1_107] : memref<4x20x20xf32, #tpu.memory_space<vmem>>, vector<1x18x18xf32>
    %429 = vector.shape_cast %428 : vector<1x18x18xf32> to vector<18x18xf32>
    %c88 = arith.constant 88 : index
    %430 = memref.load %arg2[%c88] : memref<144xf32, #tpu.memory_space<smem>>
    %431 = vector.broadcast %430 : f32 to vector<18x18xf32>
    %432 = arith.mulf %429, %431 : vector<18x18xf32>
    %433 = arith.addf %415, %432 : vector<18x18xf32>
    %c89 = arith.constant 89 : index
    %434 = memref.load %arg2[%c89] : memref<144xf32, #tpu.memory_space<smem>>
    %435 = vector.broadcast %434 : f32 to vector<18x18xf32>
    %436 = arith.mulf %429, %435 : vector<18x18xf32>
    %437 = arith.addf %419, %436 : vector<18x18xf32>
    %c90 = arith.constant 90 : index
    %438 = memref.load %arg2[%c90] : memref<144xf32, #tpu.memory_space<smem>>
    %439 = vector.broadcast %438 : f32 to vector<18x18xf32>
    %440 = arith.mulf %429, %439 : vector<18x18xf32>
    %441 = arith.addf %423, %440 : vector<18x18xf32>
    %c91 = arith.constant 91 : index
    %442 = memref.load %arg2[%c91] : memref<144xf32, #tpu.memory_space<smem>>
    %443 = vector.broadcast %442 : f32 to vector<18x18xf32>
    %444 = arith.mulf %429, %443 : vector<18x18xf32>
    %445 = arith.addf %427, %444 : vector<18x18xf32>
    %c2_108 = arith.constant 2 : index
    %c1_109 = arith.constant 1 : index
    %c2_110 = arith.constant 2 : index
    %446 = vector.load %arg7[%c2_108, %c1_109, %c2_110] : memref<4x20x20xf32, #tpu.memory_space<vmem>>, vector<1x18x18xf32>
    %447 = vector.shape_cast %446 : vector<1x18x18xf32> to vector<18x18xf32>
    %c92 = arith.constant 92 : index
    %448 = memref.load %arg2[%c92] : memref<144xf32, #tpu.memory_space<smem>>
    %449 = vector.broadcast %448 : f32 to vector<18x18xf32>
    %450 = arith.mulf %447, %449 : vector<18x18xf32>
    %451 = arith.addf %433, %450 : vector<18x18xf32>
    %c93 = arith.constant 93 : index
    %452 = memref.load %arg2[%c93] : memref<144xf32, #tpu.memory_space<smem>>
    %453 = vector.broadcast %452 : f32 to vector<18x18xf32>
    %454 = arith.mulf %447, %453 : vector<18x18xf32>
    %455 = arith.addf %437, %454 : vector<18x18xf32>
    %c94 = arith.constant 94 : index
    %456 = memref.load %arg2[%c94] : memref<144xf32, #tpu.memory_space<smem>>
    %457 = vector.broadcast %456 : f32 to vector<18x18xf32>
    %458 = arith.mulf %447, %457 : vector<18x18xf32>
    %459 = arith.addf %441, %458 : vector<18x18xf32>
    %c95 = arith.constant 95 : index
    %460 = memref.load %arg2[%c95] : memref<144xf32, #tpu.memory_space<smem>>
    %461 = vector.broadcast %460 : f32 to vector<18x18xf32>
    %462 = arith.mulf %447, %461 : vector<18x18xf32>
    %463 = arith.addf %445, %462 : vector<18x18xf32>
    %c2_111 = arith.constant 2 : index
    %c2_112 = arith.constant 2 : index
    %c0_113 = arith.constant 0 : index
    %464 = vector.load %arg7[%c2_111, %c2_112, %c0_113] : memref<4x20x20xf32, #tpu.memory_space<vmem>>, vector<1x18x18xf32>
    %465 = vector.shape_cast %464 : vector<1x18x18xf32> to vector<18x18xf32>
    %c96 = arith.constant 96 : index
    %466 = memref.load %arg2[%c96] : memref<144xf32, #tpu.memory_space<smem>>
    %467 = vector.broadcast %466 : f32 to vector<18x18xf32>
    %468 = arith.mulf %465, %467 : vector<18x18xf32>
    %469 = arith.addf %451, %468 : vector<18x18xf32>
    %c97 = arith.constant 97 : index
    %470 = memref.load %arg2[%c97] : memref<144xf32, #tpu.memory_space<smem>>
    %471 = vector.broadcast %470 : f32 to vector<18x18xf32>
    %472 = arith.mulf %465, %471 : vector<18x18xf32>
    %473 = arith.addf %455, %472 : vector<18x18xf32>
    %c98 = arith.constant 98 : index
    %474 = memref.load %arg2[%c98] : memref<144xf32, #tpu.memory_space<smem>>
    %475 = vector.broadcast %474 : f32 to vector<18x18xf32>
    %476 = arith.mulf %465, %475 : vector<18x18xf32>
    %477 = arith.addf %459, %476 : vector<18x18xf32>
    %c99 = arith.constant 99 : index
    %478 = memref.load %arg2[%c99] : memref<144xf32, #tpu.memory_space<smem>>
    %479 = vector.broadcast %478 : f32 to vector<18x18xf32>
    %480 = arith.mulf %465, %479 : vector<18x18xf32>
    %481 = arith.addf %463, %480 : vector<18x18xf32>
    %c2_114 = arith.constant 2 : index
    %c2_115 = arith.constant 2 : index
    %c1_116 = arith.constant 1 : index
    %482 = vector.load %arg7[%c2_114, %c2_115, %c1_116] : memref<4x20x20xf32, #tpu.memory_space<vmem>>, vector<1x18x18xf32>
    %483 = vector.shape_cast %482 : vector<1x18x18xf32> to vector<18x18xf32>
    %c100 = arith.constant 100 : index
    %484 = memref.load %arg2[%c100] : memref<144xf32, #tpu.memory_space<smem>>
    %485 = vector.broadcast %484 : f32 to vector<18x18xf32>
    %486 = arith.mulf %483, %485 : vector<18x18xf32>
    %487 = arith.addf %469, %486 : vector<18x18xf32>
    %c101 = arith.constant 101 : index
    %488 = memref.load %arg2[%c101] : memref<144xf32, #tpu.memory_space<smem>>
    %489 = vector.broadcast %488 : f32 to vector<18x18xf32>
    %490 = arith.mulf %483, %489 : vector<18x18xf32>
    %491 = arith.addf %473, %490 : vector<18x18xf32>
    %c102 = arith.constant 102 : index
    %492 = memref.load %arg2[%c102] : memref<144xf32, #tpu.memory_space<smem>>
    %493 = vector.broadcast %492 : f32 to vector<18x18xf32>
    %494 = arith.mulf %483, %493 : vector<18x18xf32>
    %495 = arith.addf %477, %494 : vector<18x18xf32>
    %c103 = arith.constant 103 : index
    %496 = memref.load %arg2[%c103] : memref<144xf32, #tpu.memory_space<smem>>
    %497 = vector.broadcast %496 : f32 to vector<18x18xf32>
    %498 = arith.mulf %483, %497 : vector<18x18xf32>
    %499 = arith.addf %481, %498 : vector<18x18xf32>
    %c2_117 = arith.constant 2 : index
    %c2_118 = arith.constant 2 : index
    %c2_119 = arith.constant 2 : index
    %500 = vector.load %arg7[%c2_117, %c2_118, %c2_119] : memref<4x20x20xf32, #tpu.memory_space<vmem>>, vector<1x18x18xf32>
    %501 = vector.shape_cast %500 : vector<1x18x18xf32> to vector<18x18xf32>
    %c104 = arith.constant 104 : index
    %502 = memref.load %arg2[%c104] : memref<144xf32, #tpu.memory_space<smem>>
    %503 = vector.broadcast %502 : f32 to vector<18x18xf32>
    %504 = arith.mulf %501, %503 : vector<18x18xf32>
    %505 = arith.addf %487, %504 : vector<18x18xf32>
    %c105 = arith.constant 105 : index
    %506 = memref.load %arg2[%c105] : memref<144xf32, #tpu.memory_space<smem>>
    %507 = vector.broadcast %506 : f32 to vector<18x18xf32>
    %508 = arith.mulf %501, %507 : vector<18x18xf32>
    %509 = arith.addf %491, %508 : vector<18x18xf32>
    %c106 = arith.constant 106 : index
    %510 = memref.load %arg2[%c106] : memref<144xf32, #tpu.memory_space<smem>>
    %511 = vector.broadcast %510 : f32 to vector<18x18xf32>
    %512 = arith.mulf %501, %511 : vector<18x18xf32>
    %513 = arith.addf %495, %512 : vector<18x18xf32>
    %c107 = arith.constant 107 : index
    %514 = memref.load %arg2[%c107] : memref<144xf32, #tpu.memory_space<smem>>
    %515 = vector.broadcast %514 : f32 to vector<18x18xf32>
    %516 = arith.mulf %501, %515 : vector<18x18xf32>
    %517 = arith.addf %499, %516 : vector<18x18xf32>
    %c3_120 = arith.constant 3 : index
    %c0_121 = arith.constant 0 : index
    %c0_122 = arith.constant 0 : index
    %518 = vector.load %arg7[%c3_120, %c0_121, %c0_122] : memref<4x20x20xf32, #tpu.memory_space<vmem>>, vector<1x18x18xf32>
    %519 = vector.shape_cast %518 : vector<1x18x18xf32> to vector<18x18xf32>
    %c108 = arith.constant 108 : index
    %520 = memref.load %arg2[%c108] : memref<144xf32, #tpu.memory_space<smem>>
    %521 = vector.broadcast %520 : f32 to vector<18x18xf32>
    %522 = arith.mulf %519, %521 : vector<18x18xf32>
    %523 = arith.addf %505, %522 : vector<18x18xf32>
    %c109 = arith.constant 109 : index
    %524 = memref.load %arg2[%c109] : memref<144xf32, #tpu.memory_space<smem>>
    %525 = vector.broadcast %524 : f32 to vector<18x18xf32>
    %526 = arith.mulf %519, %525 : vector<18x18xf32>
    %527 = arith.addf %509, %526 : vector<18x18xf32>
    %c110 = arith.constant 110 : index
    %528 = memref.load %arg2[%c110] : memref<144xf32, #tpu.memory_space<smem>>
    %529 = vector.broadcast %528 : f32 to vector<18x18xf32>
    %530 = arith.mulf %519, %529 : vector<18x18xf32>
    %531 = arith.addf %513, %530 : vector<18x18xf32>
    %c111 = arith.constant 111 : index
    %532 = memref.load %arg2[%c111] : memref<144xf32, #tpu.memory_space<smem>>
    %533 = vector.broadcast %532 : f32 to vector<18x18xf32>
    %534 = arith.mulf %519, %533 : vector<18x18xf32>
    %535 = arith.addf %517, %534 : vector<18x18xf32>
    %c3_123 = arith.constant 3 : index
    %c0_124 = arith.constant 0 : index
    %c1_125 = arith.constant 1 : index
    %536 = vector.load %arg7[%c3_123, %c0_124, %c1_125] : memref<4x20x20xf32, #tpu.memory_space<vmem>>, vector<1x18x18xf32>
    %537 = vector.shape_cast %536 : vector<1x18x18xf32> to vector<18x18xf32>
    %c112 = arith.constant 112 : index
    %538 = memref.load %arg2[%c112] : memref<144xf32, #tpu.memory_space<smem>>
    %539 = vector.broadcast %538 : f32 to vector<18x18xf32>
    %540 = arith.mulf %537, %539 : vector<18x18xf32>
    %541 = arith.addf %523, %540 : vector<18x18xf32>
    %c113 = arith.constant 113 : index
    %542 = memref.load %arg2[%c113] : memref<144xf32, #tpu.memory_space<smem>>
    %543 = vector.broadcast %542 : f32 to vector<18x18xf32>
    %544 = arith.mulf %537, %543 : vector<18x18xf32>
    %545 = arith.addf %527, %544 : vector<18x18xf32>
    %c114 = arith.constant 114 : index
    %546 = memref.load %arg2[%c114] : memref<144xf32, #tpu.memory_space<smem>>
    %547 = vector.broadcast %546 : f32 to vector<18x18xf32>
    %548 = arith.mulf %537, %547 : vector<18x18xf32>
    %549 = arith.addf %531, %548 : vector<18x18xf32>
    %c115 = arith.constant 115 : index
    %550 = memref.load %arg2[%c115] : memref<144xf32, #tpu.memory_space<smem>>
    %551 = vector.broadcast %550 : f32 to vector<18x18xf32>
    %552 = arith.mulf %537, %551 : vector<18x18xf32>
    %553 = arith.addf %535, %552 : vector<18x18xf32>
    %c3_126 = arith.constant 3 : index
    %c0_127 = arith.constant 0 : index
    %c2_128 = arith.constant 2 : index
    %554 = vector.load %arg7[%c3_126, %c0_127, %c2_128] : memref<4x20x20xf32, #tpu.memory_space<vmem>>, vector<1x18x18xf32>
    %555 = vector.shape_cast %554 : vector<1x18x18xf32> to vector<18x18xf32>
    %c116 = arith.constant 116 : index
    %556 = memref.load %arg2[%c116] : memref<144xf32, #tpu.memory_space<smem>>
    %557 = vector.broadcast %556 : f32 to vector<18x18xf32>
    %558 = arith.mulf %555, %557 : vector<18x18xf32>
    %559 = arith.addf %541, %558 : vector<18x18xf32>
    %c117 = arith.constant 117 : index
    %560 = memref.load %arg2[%c117] : memref<144xf32, #tpu.memory_space<smem>>
    %561 = vector.broadcast %560 : f32 to vector<18x18xf32>
    %562 = arith.mulf %555, %561 : vector<18x18xf32>
    %563 = arith.addf %545, %562 : vector<18x18xf32>
    %c118 = arith.constant 118 : index
    %564 = memref.load %arg2[%c118] : memref<144xf32, #tpu.memory_space<smem>>
    %565 = vector.broadcast %564 : f32 to vector<18x18xf32>
    %566 = arith.mulf %555, %565 : vector<18x18xf32>
    %567 = arith.addf %549, %566 : vector<18x18xf32>
    %c119 = arith.constant 119 : index
    %568 = memref.load %arg2[%c119] : memref<144xf32, #tpu.memory_space<smem>>
    %569 = vector.broadcast %568 : f32 to vector<18x18xf32>
    %570 = arith.mulf %555, %569 : vector<18x18xf32>
    %571 = arith.addf %553, %570 : vector<18x18xf32>
    %c3_129 = arith.constant 3 : index
    %c1_130 = arith.constant 1 : index
    %c0_131 = arith.constant 0 : index
    %572 = vector.load %arg7[%c3_129, %c1_130, %c0_131] : memref<4x20x20xf32, #tpu.memory_space<vmem>>, vector<1x18x18xf32>
    %573 = vector.shape_cast %572 : vector<1x18x18xf32> to vector<18x18xf32>
    %c120 = arith.constant 120 : index
    %574 = memref.load %arg2[%c120] : memref<144xf32, #tpu.memory_space<smem>>
    %575 = vector.broadcast %574 : f32 to vector<18x18xf32>
    %576 = arith.mulf %573, %575 : vector<18x18xf32>
    %577 = arith.addf %559, %576 : vector<18x18xf32>
    %c121 = arith.constant 121 : index
    %578 = memref.load %arg2[%c121] : memref<144xf32, #tpu.memory_space<smem>>
    %579 = vector.broadcast %578 : f32 to vector<18x18xf32>
    %580 = arith.mulf %573, %579 : vector<18x18xf32>
    %581 = arith.addf %563, %580 : vector<18x18xf32>
    %c122 = arith.constant 122 : index
    %582 = memref.load %arg2[%c122] : memref<144xf32, #tpu.memory_space<smem>>
    %583 = vector.broadcast %582 : f32 to vector<18x18xf32>
    %584 = arith.mulf %573, %583 : vector<18x18xf32>
    %585 = arith.addf %567, %584 : vector<18x18xf32>
    %c123 = arith.constant 123 : index
    %586 = memref.load %arg2[%c123] : memref<144xf32, #tpu.memory_space<smem>>
    %587 = vector.broadcast %586 : f32 to vector<18x18xf32>
    %588 = arith.mulf %573, %587 : vector<18x18xf32>
    %589 = arith.addf %571, %588 : vector<18x18xf32>
    %c3_132 = arith.constant 3 : index
    %c1_133 = arith.constant 1 : index
    %c1_134 = arith.constant 1 : index
    %590 = vector.load %arg7[%c3_132, %c1_133, %c1_134] : memref<4x20x20xf32, #tpu.memory_space<vmem>>, vector<1x18x18xf32>
    %591 = vector.shape_cast %590 : vector<1x18x18xf32> to vector<18x18xf32>
    %c124 = arith.constant 124 : index
    %592 = memref.load %arg2[%c124] : memref<144xf32, #tpu.memory_space<smem>>
    %593 = vector.broadcast %592 : f32 to vector<18x18xf32>
    %594 = arith.mulf %591, %593 : vector<18x18xf32>
    %595 = arith.addf %577, %594 : vector<18x18xf32>
    %c125 = arith.constant 125 : index
    %596 = memref.load %arg2[%c125] : memref<144xf32, #tpu.memory_space<smem>>
    %597 = vector.broadcast %596 : f32 to vector<18x18xf32>
    %598 = arith.mulf %591, %597 : vector<18x18xf32>
    %599 = arith.addf %581, %598 : vector<18x18xf32>
    %c126 = arith.constant 126 : index
    %600 = memref.load %arg2[%c126] : memref<144xf32, #tpu.memory_space<smem>>
    %601 = vector.broadcast %600 : f32 to vector<18x18xf32>
    %602 = arith.mulf %591, %601 : vector<18x18xf32>
    %603 = arith.addf %585, %602 : vector<18x18xf32>
    %c127 = arith.constant 127 : index
    %604 = memref.load %arg2[%c127] : memref<144xf32, #tpu.memory_space<smem>>
    %605 = vector.broadcast %604 : f32 to vector<18x18xf32>
    %606 = arith.mulf %591, %605 : vector<18x18xf32>
    %607 = arith.addf %589, %606 : vector<18x18xf32>
    %c3_135 = arith.constant 3 : index
    %c1_136 = arith.constant 1 : index
    %c2_137 = arith.constant 2 : index
    %608 = vector.load %arg7[%c3_135, %c1_136, %c2_137] : memref<4x20x20xf32, #tpu.memory_space<vmem>>, vector<1x18x18xf32>
    %609 = vector.shape_cast %608 : vector<1x18x18xf32> to vector<18x18xf32>
    %c128 = arith.constant 128 : index
    %610 = memref.load %arg2[%c128] : memref<144xf32, #tpu.memory_space<smem>>
    %611 = vector.broadcast %610 : f32 to vector<18x18xf32>
    %612 = arith.mulf %609, %611 : vector<18x18xf32>
    %613 = arith.addf %595, %612 : vector<18x18xf32>
    %c129 = arith.constant 129 : index
    %614 = memref.load %arg2[%c129] : memref<144xf32, #tpu.memory_space<smem>>
    %615 = vector.broadcast %614 : f32 to vector<18x18xf32>
    %616 = arith.mulf %609, %615 : vector<18x18xf32>
    %617 = arith.addf %599, %616 : vector<18x18xf32>
    %c130 = arith.constant 130 : index
    %618 = memref.load %arg2[%c130] : memref<144xf32, #tpu.memory_space<smem>>
    %619 = vector.broadcast %618 : f32 to vector<18x18xf32>
    %620 = arith.mulf %609, %619 : vector<18x18xf32>
    %621 = arith.addf %603, %620 : vector<18x18xf32>
    %c131 = arith.constant 131 : index
    %622 = memref.load %arg2[%c131] : memref<144xf32, #tpu.memory_space<smem>>
    %623 = vector.broadcast %622 : f32 to vector<18x18xf32>
    %624 = arith.mulf %609, %623 : vector<18x18xf32>
    %625 = arith.addf %607, %624 : vector<18x18xf32>
    %c3_138 = arith.constant 3 : index
    %c2_139 = arith.constant 2 : index
    %c0_140 = arith.constant 0 : index
    %626 = vector.load %arg7[%c3_138, %c2_139, %c0_140] : memref<4x20x20xf32, #tpu.memory_space<vmem>>, vector<1x18x18xf32>
    %627 = vector.shape_cast %626 : vector<1x18x18xf32> to vector<18x18xf32>
    %c132 = arith.constant 132 : index
    %628 = memref.load %arg2[%c132] : memref<144xf32, #tpu.memory_space<smem>>
    %629 = vector.broadcast %628 : f32 to vector<18x18xf32>
    %630 = arith.mulf %627, %629 : vector<18x18xf32>
    %631 = arith.addf %613, %630 : vector<18x18xf32>
    %c133 = arith.constant 133 : index
    %632 = memref.load %arg2[%c133] : memref<144xf32, #tpu.memory_space<smem>>
    %633 = vector.broadcast %632 : f32 to vector<18x18xf32>
    %634 = arith.mulf %627, %633 : vector<18x18xf32>
    %635 = arith.addf %617, %634 : vector<18x18xf32>
    %c134 = arith.constant 134 : index
    %636 = memref.load %arg2[%c134] : memref<144xf32, #tpu.memory_space<smem>>
    %637 = vector.broadcast %636 : f32 to vector<18x18xf32>
    %638 = arith.mulf %627, %637 : vector<18x18xf32>
    %639 = arith.addf %621, %638 : vector<18x18xf32>
    %c135 = arith.constant 135 : index
    %640 = memref.load %arg2[%c135] : memref<144xf32, #tpu.memory_space<smem>>
    %641 = vector.broadcast %640 : f32 to vector<18x18xf32>
    %642 = arith.mulf %627, %641 : vector<18x18xf32>
    %643 = arith.addf %625, %642 : vector<18x18xf32>
    %c3_141 = arith.constant 3 : index
    %c2_142 = arith.constant 2 : index
    %c1_143 = arith.constant 1 : index
    %644 = vector.load %arg7[%c3_141, %c2_142, %c1_143] : memref<4x20x20xf32, #tpu.memory_space<vmem>>, vector<1x18x18xf32>
    %645 = vector.shape_cast %644 : vector<1x18x18xf32> to vector<18x18xf32>
    %c136 = arith.constant 136 : index
    %646 = memref.load %arg2[%c136] : memref<144xf32, #tpu.memory_space<smem>>
    %647 = vector.broadcast %646 : f32 to vector<18x18xf32>
    %648 = arith.mulf %645, %647 : vector<18x18xf32>
    %649 = arith.addf %631, %648 : vector<18x18xf32>
    %c137 = arith.constant 137 : index
    %650 = memref.load %arg2[%c137] : memref<144xf32, #tpu.memory_space<smem>>
    %651 = vector.broadcast %650 : f32 to vector<18x18xf32>
    %652 = arith.mulf %645, %651 : vector<18x18xf32>
    %653 = arith.addf %635, %652 : vector<18x18xf32>
    %c138 = arith.constant 138 : index
    %654 = memref.load %arg2[%c138] : memref<144xf32, #tpu.memory_space<smem>>
    %655 = vector.broadcast %654 : f32 to vector<18x18xf32>
    %656 = arith.mulf %645, %655 : vector<18x18xf32>
    %657 = arith.addf %639, %656 : vector<18x18xf32>
    %c139 = arith.constant 139 : index
    %658 = memref.load %arg2[%c139] : memref<144xf32, #tpu.memory_space<smem>>
    %659 = vector.broadcast %658 : f32 to vector<18x18xf32>
    %660 = arith.mulf %645, %659 : vector<18x18xf32>
    %661 = arith.addf %643, %660 : vector<18x18xf32>
    %c3_144 = arith.constant 3 : index
    %c2_145 = arith.constant 2 : index
    %c2_146 = arith.constant 2 : index
    %662 = vector.load %arg7[%c3_144, %c2_145, %c2_146] : memref<4x20x20xf32, #tpu.memory_space<vmem>>, vector<1x18x18xf32>
    %663 = vector.shape_cast %662 : vector<1x18x18xf32> to vector<18x18xf32>
    %c140 = arith.constant 140 : index
    %664 = memref.load %arg2[%c140] : memref<144xf32, #tpu.memory_space<smem>>
    %665 = vector.broadcast %664 : f32 to vector<18x18xf32>
    %666 = arith.mulf %663, %665 : vector<18x18xf32>
    %667 = arith.addf %649, %666 : vector<18x18xf32>
    %c141 = arith.constant 141 : index
    %668 = memref.load %arg2[%c141] : memref<144xf32, #tpu.memory_space<smem>>
    %669 = vector.broadcast %668 : f32 to vector<18x18xf32>
    %670 = arith.mulf %663, %669 : vector<18x18xf32>
    %671 = arith.addf %653, %670 : vector<18x18xf32>
    %c142 = arith.constant 142 : index
    %672 = memref.load %arg2[%c142] : memref<144xf32, #tpu.memory_space<smem>>
    %673 = vector.broadcast %672 : f32 to vector<18x18xf32>
    %674 = arith.mulf %663, %673 : vector<18x18xf32>
    %675 = arith.addf %657, %674 : vector<18x18xf32>
    %c143 = arith.constant 143 : index
    %676 = memref.load %arg2[%c143] : memref<144xf32, #tpu.memory_space<smem>>
    %677 = vector.broadcast %676 : f32 to vector<18x18xf32>
    %678 = arith.mulf %663, %677 : vector<18x18xf32>
    %679 = arith.addf %661, %678 : vector<18x18xf32>
    %c0_147 = arith.constant 0 : index
    %c1_148 = arith.constant 1 : index
    %c1_149 = arith.constant 1 : index
    %680 = vector.load %arg8[%c0_147, %c1_148, %c1_149] : memref<4x20x20xf32, #tpu.memory_space<vmem>>, vector<1x18x18xf32>
    %681 = vector.shape_cast %680 : vector<1x18x18xf32> to vector<18x18xf32>
    %682 = vector.shape_cast %667 : vector<18x18xf32> to vector<1x18x18xf32>
    tpu.vector_store %arg8[%c0_147, %c1_148, %c1_149], %682 {strides = array<i32>} : memref<4x20x20xf32, #tpu.memory_space<vmem>>, vector<1x18x18xf32>,
    %c1_150 = arith.constant 1 : index
    %c1_151 = arith.constant 1 : index
    %c1_152 = arith.constant 1 : index
    %683 = vector.load %arg8[%c1_150, %c1_151, %c1_152] : memref<4x20x20xf32, #tpu.memory_space<vmem>>, vector<1x18x18xf32>
    %684 = vector.shape_cast %683 : vector<1x18x18xf32> to vector<18x18xf32>
    %685 = vector.shape_cast %671 : vector<18x18xf32> to vector<1x18x18xf32>
    tpu.vector_store %arg8[%c1_150, %c1_151, %c1_152], %685 {strides = array<i32>} : memref<4x20x20xf32, #tpu.memory_space<vmem>>, vector<1x18x18xf32>,
    %c2_153 = arith.constant 2 : index
    %c1_154 = arith.constant 1 : index
    %c1_155 = arith.constant 1 : index
    %686 = vector.load %arg8[%c2_153, %c1_154, %c1_155] : memref<4x20x20xf32, #tpu.memory_space<vmem>>, vector<1x18x18xf32>
    %687 = vector.shape_cast %686 : vector<1x18x18xf32> to vector<18x18xf32>
    %688 = vector.shape_cast %675 : vector<18x18xf32> to vector<1x18x18xf32>
    tpu.vector_store %arg8[%c2_153, %c1_154, %c1_155], %688 {strides = array<i32>} : memref<4x20x20xf32, #tpu.memory_space<vmem>>, vector<1x18x18xf32>,
    %c3_156 = arith.constant 3 : index
    %c1_157 = arith.constant 1 : index
    %c1_158 = arith.constant 1 : index
    %689 = vector.load %arg8[%c3_156, %c1_157, %c1_158] : memref<4x20x20xf32, #tpu.memory_space<vmem>>, vector<1x18x18xf32>
    %690 = vector.shape_cast %689 : vector<1x18x18xf32> to vector<18x18xf32>
    %691 = vector.shape_cast %679 : vector<18x18xf32> to vector<1x18x18xf32>
    tpu.vector_store %arg8[%c3_156, %c1_157, %c1_158], %691 {strides = array<i32>} : memref<4x20x20xf32, #tpu.memory_space<vmem>>, vector<1x18x18xf32>,
    %692 = tpu.iota {dimensions = array<i32: 0>} : vector<19x38xi32>
    %693 = tpu.iota {dimensions = array<i32: 1>} : vector<19x38xi32>
    %c2_i32 = arith.constant 2 : i32
    %694 = vector.broadcast %c2_i32 : i32 to vector<19x38xi32>
    %695 = arith.muli %694, %692 : vector<19x38xi32>
    %696 = arith.cmpi eq, %693, %695 : vector<19x38xi32>
    %697 = arith.extui %696 : vector<19x38xi1> to vector<19x38xi32>
    %698 = arith.sitofp %697 : vector<19x38xi32> to vector<19x38xf32>
    %c2_i32_159 = arith.constant 2 : i32
    %699 = vector.broadcast %c2_i32_159 : i32 to vector<19x38xi32>
    %700 = arith.muli %699, %692 : vector<19x38xi32>
    %c1_i32 = arith.constant 1 : i32
    %701 = vector.broadcast %c1_i32 : i32 to vector<19x38xi32>
    %702 = arith.addi %700, %701 : vector<19x38xi32>
    %703 = arith.cmpi eq, %693, %702 : vector<19x38xi32>
    %704 = arith.extui %703 : vector<19x38xi1> to vector<19x38xi32>
    %705 = arith.sitofp %704 : vector<19x38xi32> to vector<19x38xf32>
    %cst_160 = arith.constant 0.000000e+00 : f32
    %706 = vector.broadcast %cst_160 : f32 to vector<19x19xf32>
    %cst_161 = arith.constant 0.000000e+00 : f32
    %707 = vector.broadcast %cst_161 : f32 to vector<19x19xf32>
    %cst_162 = arith.constant 0.000000e+00 : f32
    %708 = vector.broadcast %cst_162 : f32 to vector<19x19xf32>
    %cst_163 = arith.constant 0.000000e+00 : f32
    %709 = vector.broadcast %cst_163 : f32 to vector<19x19xf32>
    %cst_164 = arith.constant 0.000000e+00 : f32
    %710 = vector.broadcast %cst_164 : f32 to vector<19x19xf32>
    %cst_165 = arith.constant 0.000000e+00 : f32
    %711 = vector.broadcast %cst_165 : f32 to vector<19x19xf32>
    %cst_166 = arith.constant 0.000000e+00 : f32
    %712 = vector.broadcast %cst_166 : f32 to vector<19x19xf32>
    %cst_167 = arith.constant 0.000000e+00 : f32
    %713 = vector.broadcast %cst_167 : f32 to vector<19x19xf32>
    %cst_168 = arith.constant 0.000000e+00 : f32
    %714 = vector.broadcast %cst_168 : f32 to vector<19x19xf32>
    %cst_169 = arith.constant 0.000000e+00 : f32
    %715 = vector.broadcast %cst_169 : f32 to vector<19x19xf32>
    %c0_170 = arith.constant 0 : index
    %c0_171 = arith.constant 0 : index
    %c0_172 = arith.constant 0 : index
    %716 = vector.load %arg8[%c0_170, %c0_171, %c0_172] : memref<4x20x20xf32, #tpu.memory_space<vmem>>, vector<1x19x19xf32>
    %717 = vector.shape_cast %716 : vector<1x19x19xf32> to vector<19x19xf32>
    %c0_173 = arith.constant 0 : index
    %718 = memref.load %arg4[%c0_173] : memref<80xf32, #tpu.memory_space<smem>>
    %719 = vector.broadcast %718 : f32 to vector<19x19xf32>
    %720 = arith.mulf %717, %719 : vector<19x19xf32>
    %721 = arith.addf %706, %720 : vector<19x19xf32>
    %c0_174 = arith.constant 0 : index
    %722 = memref.load %arg5[%c0_174] : memref<80xf32, #tpu.memory_space<smem>>
    %723 = vector.broadcast %722 : f32 to vector<19x19xf32>
    %724 = arith.mulf %717, %723 : vector<19x19xf32>
    %725 = arith.addf %711, %724 : vector<19x19xf32>
    %c1_175 = arith.constant 1 : index
    %726 = memref.load %arg4[%c1_175] : memref<80xf32, #tpu.memory_space<smem>>
    %727 = vector.broadcast %726 : f32 to vector<19x19xf32>
    %728 = arith.mulf %717, %727 : vector<19x19xf32>
    %729 = arith.addf %707, %728 : vector<19x19xf32>
    %c1_176 = arith.constant 1 : index
    %730 = memref.load %arg5[%c1_176] : memref<80xf32, #tpu.memory_space<smem>>
    %731 = vector.broadcast %730 : f32 to vector<19x19xf32>
    %732 = arith.mulf %717, %731 : vector<19x19xf32>
    %733 = arith.addf %712, %732 : vector<19x19xf32>
    %c2_177 = arith.constant 2 : index
    %734 = memref.load %arg4[%c2_177] : memref<80xf32, #tpu.memory_space<smem>>
    %735 = vector.broadcast %734 : f32 to vector<19x19xf32>
    %736 = arith.mulf %717, %735 : vector<19x19xf32>
    %737 = arith.addf %708, %736 : vector<19x19xf32>
    %c2_178 = arith.constant 2 : index
    %738 = memref.load %arg5[%c2_178] : memref<80xf32, #tpu.memory_space<smem>>
    %739 = vector.broadcast %738 : f32 to vector<19x19xf32>
    %740 = arith.mulf %717, %739 : vector<19x19xf32>
    %741 = arith.addf %713, %740 : vector<19x19xf32>
    %c3_179 = arith.constant 3 : index
    %742 = memref.load %arg4[%c3_179] : memref<80xf32, #tpu.memory_space<smem>>
    %743 = vector.broadcast %742 : f32 to vector<19x19xf32>
    %744 = arith.mulf %717, %743 : vector<19x19xf32>
    %745 = arith.addf %709, %744 : vector<19x19xf32>
    %c3_180 = arith.constant 3 : index
    %746 = memref.load %arg5[%c3_180] : memref<80xf32, #tpu.memory_space<smem>>
    %747 = vector.broadcast %746 : f32 to vector<19x19xf32>
    %748 = arith.mulf %717, %747 : vector<19x19xf32>
    %749 = arith.addf %714, %748 : vector<19x19xf32>
    %c4_181 = arith.constant 4 : index
    %750 = memref.load %arg4[%c4_181] : memref<80xf32, #tpu.memory_space<smem>>
    %751 = vector.broadcast %750 : f32 to vector<19x19xf32>
    %752 = arith.mulf %717, %751 : vector<19x19xf32>
    %753 = arith.addf %710, %752 : vector<19x19xf32>
    %c4_182 = arith.constant 4 : index
    %754 = memref.load %arg5[%c4_182] : memref<80xf32, #tpu.memory_space<smem>>
    %755 = vector.broadcast %754 : f32 to vector<19x19xf32>
    %756 = arith.mulf %717, %755 : vector<19x19xf32>
    %757 = arith.addf %715, %756 : vector<19x19xf32>
    %c0_183 = arith.constant 0 : index
    %c0_184 = arith.constant 0 : index
    %c1_185 = arith.constant 1 : index
    %758 = vector.load %arg8[%c0_183, %c0_184, %c1_185] : memref<4x20x20xf32, #tpu.memory_space<vmem>>, vector<1x19x19xf32>
    %759 = vector.shape_cast %758 : vector<1x19x19xf32> to vector<19x19xf32>
    %c5_186 = arith.constant 5 : index
    %760 = memref.load %arg4[%c5_186] : memref<80xf32, #tpu.memory_space<smem>>
    %761 = vector.broadcast %760 : f32 to vector<19x19xf32>
    %762 = arith.mulf %759, %761 : vector<19x19xf32>
    %763 = arith.addf %721, %762 : vector<19x19xf32>
    %c5_187 = arith.constant 5 : index
    %764 = memref.load %arg5[%c5_187] : memref<80xf32, #tpu.memory_space<smem>>
    %765 = vector.broadcast %764 : f32 to vector<19x19xf32>
    %766 = arith.mulf %759, %765 : vector<19x19xf32>
    %767 = arith.addf %725, %766 : vector<19x19xf32>
    %c6_188 = arith.constant 6 : index
    %768 = memref.load %arg4[%c6_188] : memref<80xf32, #tpu.memory_space<smem>>
    %769 = vector.broadcast %768 : f32 to vector<19x19xf32>
    %770 = arith.mulf %759, %769 : vector<19x19xf32>
    %771 = arith.addf %729, %770 : vector<19x19xf32>
    %c6_189 = arith.constant 6 : index
    %772 = memref.load %arg5[%c6_189] : memref<80xf32, #tpu.memory_space<smem>>
    %773 = vector.broadcast %772 : f32 to vector<19x19xf32>
    %774 = arith.mulf %759, %773 : vector<19x19xf32>
    %775 = arith.addf %733, %774 : vector<19x19xf32>
    %c7_190 = arith.constant 7 : index
    %776 = memref.load %arg4[%c7_190] : memref<80xf32, #tpu.memory_space<smem>>
    %777 = vector.broadcast %776 : f32 to vector<19x19xf32>
    %778 = arith.mulf %759, %777 : vector<19x19xf32>
    %779 = arith.addf %737, %778 : vector<19x19xf32>
    %c7_191 = arith.constant 7 : index
    %780 = memref.load %arg5[%c7_191] : memref<80xf32, #tpu.memory_space<smem>>
    %781 = vector.broadcast %780 : f32 to vector<19x19xf32>
    %782 = arith.mulf %759, %781 : vector<19x19xf32>
    %783 = arith.addf %741, %782 : vector<19x19xf32>
    %c8_192 = arith.constant 8 : index
    %784 = memref.load %arg4[%c8_192] : memref<80xf32, #tpu.memory_space<smem>>
    %785 = vector.broadcast %784 : f32 to vector<19x19xf32>
    %786 = arith.mulf %759, %785 : vector<19x19xf32>
    %787 = arith.addf %745, %786 : vector<19x19xf32>
    %c8_193 = arith.constant 8 : index
    %788 = memref.load %arg5[%c8_193] : memref<80xf32, #tpu.memory_space<smem>>
    %789 = vector.broadcast %788 : f32 to vector<19x19xf32>
    %790 = arith.mulf %759, %789 : vector<19x19xf32>
    %791 = arith.addf %749, %790 : vector<19x19xf32>
    %c9_194 = arith.constant 9 : index
    %792 = memref.load %arg4[%c9_194] : memref<80xf32, #tpu.memory_space<smem>>
    %793 = vector.broadcast %792 : f32 to vector<19x19xf32>
    %794 = arith.mulf %759, %793 : vector<19x19xf32>
    %795 = arith.addf %753, %794 : vector<19x19xf32>
    %c9_195 = arith.constant 9 : index
    %796 = memref.load %arg5[%c9_195] : memref<80xf32, #tpu.memory_space<smem>>
    %797 = vector.broadcast %796 : f32 to vector<19x19xf32>
    %798 = arith.mulf %759, %797 : vector<19x19xf32>
    %799 = arith.addf %757, %798 : vector<19x19xf32>
    %c0_196 = arith.constant 0 : index
    %c1_197 = arith.constant 1 : index
    %c0_198 = arith.constant 0 : index
    %800 = vector.load %arg8[%c0_196, %c1_197, %c0_198] : memref<4x20x20xf32, #tpu.memory_space<vmem>>, vector<1x19x19xf32>
    %801 = vector.shape_cast %800 : vector<1x19x19xf32> to vector<19x19xf32>
    %c10_199 = arith.constant 10 : index
    %802 = memref.load %arg4[%c10_199] : memref<80xf32, #tpu.memory_space<smem>>
    %803 = vector.broadcast %802 : f32 to vector<19x19xf32>
    %804 = arith.mulf %801, %803 : vector<19x19xf32>
    %805 = arith.addf %763, %804 : vector<19x19xf32>
    %c10_200 = arith.constant 10 : index
    %806 = memref.load %arg5[%c10_200] : memref<80xf32, #tpu.memory_space<smem>>
    %807 = vector.broadcast %806 : f32 to vector<19x19xf32>
    %808 = arith.mulf %801, %807 : vector<19x19xf32>
    %809 = arith.addf %767, %808 : vector<19x19xf32>
    %c11_201 = arith.constant 11 : index
    %810 = memref.load %arg4[%c11_201] : memref<80xf32, #tpu.memory_space<smem>>
    %811 = vector.broadcast %810 : f32 to vector<19x19xf32>
    %812 = arith.mulf %801, %811 : vector<19x19xf32>
    %813 = arith.addf %771, %812 : vector<19x19xf32>
    %c11_202 = arith.constant 11 : index
    %814 = memref.load %arg5[%c11_202] : memref<80xf32, #tpu.memory_space<smem>>
    %815 = vector.broadcast %814 : f32 to vector<19x19xf32>
    %816 = arith.mulf %801, %815 : vector<19x19xf32>
    %817 = arith.addf %775, %816 : vector<19x19xf32>
    %c12_203 = arith.constant 12 : index
    %818 = memref.load %arg4[%c12_203] : memref<80xf32, #tpu.memory_space<smem>>
    %819 = vector.broadcast %818 : f32 to vector<19x19xf32>
    %820 = arith.mulf %801, %819 : vector<19x19xf32>
    %821 = arith.addf %779, %820 : vector<19x19xf32>
    %c12_204 = arith.constant 12 : index
    %822 = memref.load %arg5[%c12_204] : memref<80xf32, #tpu.memory_space<smem>>
    %823 = vector.broadcast %822 : f32 to vector<19x19xf32>
    %824 = arith.mulf %801, %823 : vector<19x19xf32>
    %825 = arith.addf %783, %824 : vector<19x19xf32>
    %c13_205 = arith.constant 13 : index
    %826 = memref.load %arg4[%c13_205] : memref<80xf32, #tpu.memory_space<smem>>
    %827 = vector.broadcast %826 : f32 to vector<19x19xf32>
    %828 = arith.mulf %801, %827 : vector<19x19xf32>
    %829 = arith.addf %787, %828 : vector<19x19xf32>
    %c13_206 = arith.constant 13 : index
    %830 = memref.load %arg5[%c13_206] : memref<80xf32, #tpu.memory_space<smem>>
    %831 = vector.broadcast %830 : f32 to vector<19x19xf32>
    %832 = arith.mulf %801, %831 : vector<19x19xf32>
    %833 = arith.addf %791, %832 : vector<19x19xf32>
    %c14_207 = arith.constant 14 : index
    %834 = memref.load %arg4[%c14_207] : memref<80xf32, #tpu.memory_space<smem>>
    %835 = vector.broadcast %834 : f32 to vector<19x19xf32>
    %836 = arith.mulf %801, %835 : vector<19x19xf32>
    %837 = arith.addf %795, %836 : vector<19x19xf32>
    %c14_208 = arith.constant 14 : index
    %838 = memref.load %arg5[%c14_208] : memref<80xf32, #tpu.memory_space<smem>>
    %839 = vector.broadcast %838 : f32 to vector<19x19xf32>
    %840 = arith.mulf %801, %839 : vector<19x19xf32>
    %841 = arith.addf %799, %840 : vector<19x19xf32>
    %c0_209 = arith.constant 0 : index
    %c1_210 = arith.constant 1 : index
    %c1_211 = arith.constant 1 : index
    %842 = vector.load %arg8[%c0_209, %c1_210, %c1_211] : memref<4x20x20xf32, #tpu.memory_space<vmem>>, vector<1x19x19xf32>
    %843 = vector.shape_cast %842 : vector<1x19x19xf32> to vector<19x19xf32>
    %c15_212 = arith.constant 15 : index
    %844 = memref.load %arg4[%c15_212] : memref<80xf32, #tpu.memory_space<smem>>
    %845 = vector.broadcast %844 : f32 to vector<19x19xf32>
    %846 = arith.mulf %843, %845 : vector<19x19xf32>
    %847 = arith.addf %805, %846 : vector<19x19xf32>
    %c15_213 = arith.constant 15 : index
    %848 = memref.load %arg5[%c15_213] : memref<80xf32, #tpu.memory_space<smem>>
    %849 = vector.broadcast %848 : f32 to vector<19x19xf32>
    %850 = arith.mulf %843, %849 : vector<19x19xf32>
    %851 = arith.addf %809, %850 : vector<19x19xf32>
    %c16_214 = arith.constant 16 : index
    %852 = memref.load %arg4[%c16_214] : memref<80xf32, #tpu.memory_space<smem>>
    %853 = vector.broadcast %852 : f32 to vector<19x19xf32>
    %854 = arith.mulf %843, %853 : vector<19x19xf32>
    %855 = arith.addf %813, %854 : vector<19x19xf32>
    %c16_215 = arith.constant 16 : index
    %856 = memref.load %arg5[%c16_215] : memref<80xf32, #tpu.memory_space<smem>>
    %857 = vector.broadcast %856 : f32 to vector<19x19xf32>
    %858 = arith.mulf %843, %857 : vector<19x19xf32>
    %859 = arith.addf %817, %858 : vector<19x19xf32>
    %c17_216 = arith.constant 17 : index
    %860 = memref.load %arg4[%c17_216] : memref<80xf32, #tpu.memory_space<smem>>
    %861 = vector.broadcast %860 : f32 to vector<19x19xf32>
    %862 = arith.mulf %843, %861 : vector<19x19xf32>
    %863 = arith.addf %821, %862 : vector<19x19xf32>
    %c17_217 = arith.constant 17 : index
    %864 = memref.load %arg5[%c17_217] : memref<80xf32, #tpu.memory_space<smem>>
    %865 = vector.broadcast %864 : f32 to vector<19x19xf32>
    %866 = arith.mulf %843, %865 : vector<19x19xf32>
    %867 = arith.addf %825, %866 : vector<19x19xf32>
    %c18_218 = arith.constant 18 : index
    %868 = memref.load %arg4[%c18_218] : memref<80xf32, #tpu.memory_space<smem>>
    %869 = vector.broadcast %868 : f32 to vector<19x19xf32>
    %870 = arith.mulf %843, %869 : vector<19x19xf32>
    %871 = arith.addf %829, %870 : vector<19x19xf32>
    %c18_219 = arith.constant 18 : index
    %872 = memref.load %arg5[%c18_219] : memref<80xf32, #tpu.memory_space<smem>>
    %873 = vector.broadcast %872 : f32 to vector<19x19xf32>
    %874 = arith.mulf %843, %873 : vector<19x19xf32>
    %875 = arith.addf %833, %874 : vector<19x19xf32>
    %c19_220 = arith.constant 19 : index
    %876 = memref.load %arg4[%c19_220] : memref<80xf32, #tpu.memory_space<smem>>
    %877 = vector.broadcast %876 : f32 to vector<19x19xf32>
    %878 = arith.mulf %843, %877 : vector<19x19xf32>
    %879 = arith.addf %837, %878 : vector<19x19xf32>
    %c19_221 = arith.constant 19 : index
    %880 = memref.load %arg5[%c19_221] : memref<80xf32, #tpu.memory_space<smem>>
    %881 = vector.broadcast %880 : f32 to vector<19x19xf32>
    %882 = arith.mulf %843, %881 : vector<19x19xf32>
    %883 = arith.addf %841, %882 : vector<19x19xf32>
    %c1_222 = arith.constant 1 : index
    %c0_223 = arith.constant 0 : index
    %c0_224 = arith.constant 0 : index
    %884 = vector.load %arg8[%c1_222, %c0_223, %c0_224] : memref<4x20x20xf32, #tpu.memory_space<vmem>>, vector<1x19x19xf32>
    %885 = vector.shape_cast %884 : vector<1x19x19xf32> to vector<19x19xf32>
    %c20_225 = arith.constant 20 : index
    %886 = memref.load %arg4[%c20_225] : memref<80xf32, #tpu.memory_space<smem>>
    %887 = vector.broadcast %886 : f32 to vector<19x19xf32>
    %888 = arith.mulf %885, %887 : vector<19x19xf32>
    %889 = arith.addf %847, %888 : vector<19x19xf32>
    %c20_226 = arith.constant 20 : index
    %890 = memref.load %arg5[%c20_226] : memref<80xf32, #tpu.memory_space<smem>>
    %891 = vector.broadcast %890 : f32 to vector<19x19xf32>
    %892 = arith.mulf %885, %891 : vector<19x19xf32>
    %893 = arith.addf %851, %892 : vector<19x19xf32>
    %c21_227 = arith.constant 21 : index
    %894 = memref.load %arg4[%c21_227] : memref<80xf32, #tpu.memory_space<smem>>
    %895 = vector.broadcast %894 : f32 to vector<19x19xf32>
    %896 = arith.mulf %885, %895 : vector<19x19xf32>
    %897 = arith.addf %855, %896 : vector<19x19xf32>
    %c21_228 = arith.constant 21 : index
    %898 = memref.load %arg5[%c21_228] : memref<80xf32, #tpu.memory_space<smem>>
    %899 = vector.broadcast %898 : f32 to vector<19x19xf32>
    %900 = arith.mulf %885, %899 : vector<19x19xf32>
    %901 = arith.addf %859, %900 : vector<19x19xf32>
    %c22_229 = arith.constant 22 : index
    %902 = memref.load %arg4[%c22_229] : memref<80xf32, #tpu.memory_space<smem>>
    %903 = vector.broadcast %902 : f32 to vector<19x19xf32>
    %904 = arith.mulf %885, %903 : vector<19x19xf32>
    %905 = arith.addf %863, %904 : vector<19x19xf32>
    %c22_230 = arith.constant 22 : index
    %906 = memref.load %arg5[%c22_230] : memref<80xf32, #tpu.memory_space<smem>>
    %907 = vector.broadcast %906 : f32 to vector<19x19xf32>
    %908 = arith.mulf %885, %907 : vector<19x19xf32>
    %909 = arith.addf %867, %908 : vector<19x19xf32>
    %c23_231 = arith.constant 23 : index
    %910 = memref.load %arg4[%c23_231] : memref<80xf32, #tpu.memory_space<smem>>
    %911 = vector.broadcast %910 : f32 to vector<19x19xf32>
    %912 = arith.mulf %885, %911 : vector<19x19xf32>
    %913 = arith.addf %871, %912 : vector<19x19xf32>
    %c23_232 = arith.constant 23 : index
    %914 = memref.load %arg5[%c23_232] : memref<80xf32, #tpu.memory_space<smem>>
    %915 = vector.broadcast %914 : f32 to vector<19x19xf32>
    %916 = arith.mulf %885, %915 : vector<19x19xf32>
    %917 = arith.addf %875, %916 : vector<19x19xf32>
    %c24_233 = arith.constant 24 : index
    %918 = memref.load %arg4[%c24_233] : memref<80xf32, #tpu.memory_space<smem>>
    %919 = vector.broadcast %918 : f32 to vector<19x19xf32>
    %920 = arith.mulf %885, %919 : vector<19x19xf32>
    %921 = arith.addf %879, %920 : vector<19x19xf32>
    %c24_234 = arith.constant 24 : index
    %922 = memref.load %arg5[%c24_234] : memref<80xf32, #tpu.memory_space<smem>>
    %923 = vector.broadcast %922 : f32 to vector<19x19xf32>
    %924 = arith.mulf %885, %923 : vector<19x19xf32>
    %925 = arith.addf %883, %924 : vector<19x19xf32>
    %c1_235 = arith.constant 1 : index
    %c0_236 = arith.constant 0 : index
    %c1_237 = arith.constant 1 : index
    %926 = vector.load %arg8[%c1_235, %c0_236, %c1_237] : memref<4x20x20xf32, #tpu.memory_space<vmem>>, vector<1x19x19xf32>
    %927 = vector.shape_cast %926 : vector<1x19x19xf32> to vector<19x19xf32>
    %c25_238 = arith.constant 25 : index
    %928 = memref.load %arg4[%c25_238] : memref<80xf32, #tpu.memory_space<smem>>
    %929 = vector.broadcast %928 : f32 to vector<19x19xf32>
    %930 = arith.mulf %927, %929 : vector<19x19xf32>
    %931 = arith.addf %889, %930 : vector<19x19xf32>
    %c25_239 = arith.constant 25 : index
    %932 = memref.load %arg5[%c25_239] : memref<80xf32, #tpu.memory_space<smem>>
    %933 = vector.broadcast %932 : f32 to vector<19x19xf32>
    %934 = arith.mulf %927, %933 : vector<19x19xf32>
    %935 = arith.addf %893, %934 : vector<19x19xf32>
    %c26_240 = arith.constant 26 : index
    %936 = memref.load %arg4[%c26_240] : memref<80xf32, #tpu.memory_space<smem>>
    %937 = vector.broadcast %936 : f32 to vector<19x19xf32>
    %938 = arith.mulf %927, %937 : vector<19x19xf32>
    %939 = arith.addf %897, %938 : vector<19x19xf32>
    %c26_241 = arith.constant 26 : index
    %940 = memref.load %arg5[%c26_241] : memref<80xf32, #tpu.memory_space<smem>>
    %941 = vector.broadcast %940 : f32 to vector<19x19xf32>
    %942 = arith.mulf %927, %941 : vector<19x19xf32>
    %943 = arith.addf %901, %942 : vector<19x19xf32>
    %c27_242 = arith.constant 27 : index
    %944 = memref.load %arg4[%c27_242] : memref<80xf32, #tpu.memory_space<smem>>
    %945 = vector.broadcast %944 : f32 to vector<19x19xf32>
    %946 = arith.mulf %927, %945 : vector<19x19xf32>
    %947 = arith.addf %905, %946 : vector<19x19xf32>
    %c27_243 = arith.constant 27 : index
    %948 = memref.load %arg5[%c27_243] : memref<80xf32, #tpu.memory_space<smem>>
    %949 = vector.broadcast %948 : f32 to vector<19x19xf32>
    %950 = arith.mulf %927, %949 : vector<19x19xf32>
    %951 = arith.addf %909, %950 : vector<19x19xf32>
    %c28_244 = arith.constant 28 : index
    %952 = memref.load %arg4[%c28_244] : memref<80xf32, #tpu.memory_space<smem>>
    %953 = vector.broadcast %952 : f32 to vector<19x19xf32>
    %954 = arith.mulf %927, %953 : vector<19x19xf32>
    %955 = arith.addf %913, %954 : vector<19x19xf32>
    %c28_245 = arith.constant 28 : index
    %956 = memref.load %arg5[%c28_245] : memref<80xf32, #tpu.memory_space<smem>>
    %957 = vector.broadcast %956 : f32 to vector<19x19xf32>
    %958 = arith.mulf %927, %957 : vector<19x19xf32>
    %959 = arith.addf %917, %958 : vector<19x19xf32>
    %c29_246 = arith.constant 29 : index
    %960 = memref.load %arg4[%c29_246] : memref<80xf32, #tpu.memory_space<smem>>
    %961 = vector.broadcast %960 : f32 to vector<19x19xf32>
    %962 = arith.mulf %927, %961 : vector<19x19xf32>
    %963 = arith.addf %921, %962 : vector<19x19xf32>
    %c29_247 = arith.constant 29 : index
    %964 = memref.load %arg5[%c29_247] : memref<80xf32, #tpu.memory_space<smem>>
    %965 = vector.broadcast %964 : f32 to vector<19x19xf32>
    %966 = arith.mulf %927, %965 : vector<19x19xf32>
    %967 = arith.addf %925, %966 : vector<19x19xf32>
    %c1_248 = arith.constant 1 : index
    %c1_249 = arith.constant 1 : index
    %c0_250 = arith.constant 0 : index
    %968 = vector.load %arg8[%c1_248, %c1_249, %c0_250] : memref<4x20x20xf32, #tpu.memory_space<vmem>>, vector<1x19x19xf32>
    %969 = vector.shape_cast %968 : vector<1x19x19xf32> to vector<19x19xf32>
    %c30_251 = arith.constant 30 : index
    %970 = memref.load %arg4[%c30_251] : memref<80xf32, #tpu.memory_space<smem>>
    %971 = vector.broadcast %970 : f32 to vector<19x19xf32>
    %972 = arith.mulf %969, %971 : vector<19x19xf32>
    %973 = arith.addf %931, %972 : vector<19x19xf32>
    %c30_252 = arith.constant 30 : index
    %974 = memref.load %arg5[%c30_252] : memref<80xf32, #tpu.memory_space<smem>>
    %975 = vector.broadcast %974 : f32 to vector<19x19xf32>
    %976 = arith.mulf %969, %975 : vector<19x19xf32>
    %977 = arith.addf %935, %976 : vector<19x19xf32>
    %c31_253 = arith.constant 31 : index
    %978 = memref.load %arg4[%c31_253] : memref<80xf32, #tpu.memory_space<smem>>
    %979 = vector.broadcast %978 : f32 to vector<19x19xf32>
    %980 = arith.mulf %969, %979 : vector<19x19xf32>
    %981 = arith.addf %939, %980 : vector<19x19xf32>
    %c31_254 = arith.constant 31 : index
    %982 = memref.load %arg5[%c31_254] : memref<80xf32, #tpu.memory_space<smem>>
    %983 = vector.broadcast %982 : f32 to vector<19x19xf32>
    %984 = arith.mulf %969, %983 : vector<19x19xf32>
    %985 = arith.addf %943, %984 : vector<19x19xf32>
    %c32_255 = arith.constant 32 : index
    %986 = memref.load %arg4[%c32_255] : memref<80xf32, #tpu.memory_space<smem>>
    %987 = vector.broadcast %986 : f32 to vector<19x19xf32>
    %988 = arith.mulf %969, %987 : vector<19x19xf32>
    %989 = arith.addf %947, %988 : vector<19x19xf32>
    %c32_256 = arith.constant 32 : index
    %990 = memref.load %arg5[%c32_256] : memref<80xf32, #tpu.memory_space<smem>>
    %991 = vector.broadcast %990 : f32 to vector<19x19xf32>
    %992 = arith.mulf %969, %991 : vector<19x19xf32>
    %993 = arith.addf %951, %992 : vector<19x19xf32>
    %c33_257 = arith.constant 33 : index
    %994 = memref.load %arg4[%c33_257] : memref<80xf32, #tpu.memory_space<smem>>
    %995 = vector.broadcast %994 : f32 to vector<19x19xf32>
    %996 = arith.mulf %969, %995 : vector<19x19xf32>
    %997 = arith.addf %955, %996 : vector<19x19xf32>
    %c33_258 = arith.constant 33 : index
    %998 = memref.load %arg5[%c33_258] : memref<80xf32, #tpu.memory_space<smem>>
    %999 = vector.broadcast %998 : f32 to vector<19x19xf32>
    %1000 = arith.mulf %969, %999 : vector<19x19xf32>
    %1001 = arith.addf %959, %1000 : vector<19x19xf32>
    %c34_259 = arith.constant 34 : index
    %1002 = memref.load %arg4[%c34_259] : memref<80xf32, #tpu.memory_space<smem>>
    %1003 = vector.broadcast %1002 : f32 to vector<19x19xf32>
    %1004 = arith.mulf %969, %1003 : vector<19x19xf32>
    %1005 = arith.addf %963, %1004 : vector<19x19xf32>
    %c34_260 = arith.constant 34 : index
    %1006 = memref.load %arg5[%c34_260] : memref<80xf32, #tpu.memory_space<smem>>
    %1007 = vector.broadcast %1006 : f32 to vector<19x19xf32>
    %1008 = arith.mulf %969, %1007 : vector<19x19xf32>
    %1009 = arith.addf %967, %1008 : vector<19x19xf32>
    %c1_261 = arith.constant 1 : index
    %c1_262 = arith.constant 1 : index
    %c1_263 = arith.constant 1 : index
    %1010 = vector.load %arg8[%c1_261, %c1_262, %c1_263] : memref<4x20x20xf32, #tpu.memory_space<vmem>>, vector<1x19x19xf32>
    %1011 = vector.shape_cast %1010 : vector<1x19x19xf32> to vector<19x19xf32>
    %c35_264 = arith.constant 35 : index
    %1012 = memref.load %arg4[%c35_264] : memref<80xf32, #tpu.memory_space<smem>>
    %1013 = vector.broadcast %1012 : f32 to vector<19x19xf32>
    %1014 = arith.mulf %1011, %1013 : vector<19x19xf32>
    %1015 = arith.addf %973, %1014 : vector<19x19xf32>
    %c35_265 = arith.constant 35 : index
    %1016 = memref.load %arg5[%c35_265] : memref<80xf32, #tpu.memory_space<smem>>
    %1017 = vector.broadcast %1016 : f32 to vector<19x19xf32>
    %1018 = arith.mulf %1011, %1017 : vector<19x19xf32>
    %1019 = arith.addf %977, %1018 : vector<19x19xf32>
    %c36_266 = arith.constant 36 : index
    %1020 = memref.load %arg4[%c36_266] : memref<80xf32, #tpu.memory_space<smem>>
    %1021 = vector.broadcast %1020 : f32 to vector<19x19xf32>
    %1022 = arith.mulf %1011, %1021 : vector<19x19xf32>
    %1023 = arith.addf %981, %1022 : vector<19x19xf32>
    %c36_267 = arith.constant 36 : index
    %1024 = memref.load %arg5[%c36_267] : memref<80xf32, #tpu.memory_space<smem>>
    %1025 = vector.broadcast %1024 : f32 to vector<19x19xf32>
    %1026 = arith.mulf %1011, %1025 : vector<19x19xf32>
    %1027 = arith.addf %985, %1026 : vector<19x19xf32>
    %c37_268 = arith.constant 37 : index
    %1028 = memref.load %arg4[%c37_268] : memref<80xf32, #tpu.memory_space<smem>>
    %1029 = vector.broadcast %1028 : f32 to vector<19x19xf32>
    %1030 = arith.mulf %1011, %1029 : vector<19x19xf32>
    %1031 = arith.addf %989, %1030 : vector<19x19xf32>
    %c37_269 = arith.constant 37 : index
    %1032 = memref.load %arg5[%c37_269] : memref<80xf32, #tpu.memory_space<smem>>
    %1033 = vector.broadcast %1032 : f32 to vector<19x19xf32>
    %1034 = arith.mulf %1011, %1033 : vector<19x19xf32>
    %1035 = arith.addf %993, %1034 : vector<19x19xf32>
    %c38_270 = arith.constant 38 : index
    %1036 = memref.load %arg4[%c38_270] : memref<80xf32, #tpu.memory_space<smem>>
    %1037 = vector.broadcast %1036 : f32 to vector<19x19xf32>
    %1038 = arith.mulf %1011, %1037 : vector<19x19xf32>
    %1039 = arith.addf %997, %1038 : vector<19x19xf32>
    %c38_271 = arith.constant 38 : index
    %1040 = memref.load %arg5[%c38_271] : memref<80xf32, #tpu.memory_space<smem>>
    %1041 = vector.broadcast %1040 : f32 to vector<19x19xf32>
    %1042 = arith.mulf %1011, %1041 : vector<19x19xf32>
    %1043 = arith.addf %1001, %1042 : vector<19x19xf32>
    %c39_272 = arith.constant 39 : index
    %1044 = memref.load %arg4[%c39_272] : memref<80xf32, #tpu.memory_space<smem>>
    %1045 = vector.broadcast %1044 : f32 to vector<19x19xf32>
    %1046 = arith.mulf %1011, %1045 : vector<19x19xf32>
    %1047 = arith.addf %1005, %1046 : vector<19x19xf32>
    %c39_273 = arith.constant 39 : index
    %1048 = memref.load %arg5[%c39_273] : memref<80xf32, #tpu.memory_space<smem>>
    %1049 = vector.broadcast %1048 : f32 to vector<19x19xf32>
    %1050 = arith.mulf %1011, %1049 : vector<19x19xf32>
    %1051 = arith.addf %1009, %1050 : vector<19x19xf32>
    %c2_274 = arith.constant 2 : index
    %c0_275 = arith.constant 0 : index
    %c0_276 = arith.constant 0 : index
    %1052 = vector.load %arg8[%c2_274, %c0_275, %c0_276] : memref<4x20x20xf32, #tpu.memory_space<vmem>>, vector<1x19x19xf32>
    %1053 = vector.shape_cast %1052 : vector<1x19x19xf32> to vector<19x19xf32>
    %c40_277 = arith.constant 40 : index
    %1054 = memref.load %arg4[%c40_277] : memref<80xf32, #tpu.memory_space<smem>>
    %1055 = vector.broadcast %1054 : f32 to vector<19x19xf32>
    %1056 = arith.mulf %1053, %1055 : vector<19x19xf32>
    %1057 = arith.addf %1015, %1056 : vector<19x19xf32>
    %c40_278 = arith.constant 40 : index
    %1058 = memref.load %arg5[%c40_278] : memref<80xf32, #tpu.memory_space<smem>>
    %1059 = vector.broadcast %1058 : f32 to vector<19x19xf32>
    %1060 = arith.mulf %1053, %1059 : vector<19x19xf32>
    %1061 = arith.addf %1019, %1060 : vector<19x19xf32>
    %c41_279 = arith.constant 41 : index
    %1062 = memref.load %arg4[%c41_279] : memref<80xf32, #tpu.memory_space<smem>>
    %1063 = vector.broadcast %1062 : f32 to vector<19x19xf32>
    %1064 = arith.mulf %1053, %1063 : vector<19x19xf32>
    %1065 = arith.addf %1023, %1064 : vector<19x19xf32>
    %c41_280 = arith.constant 41 : index
    %1066 = memref.load %arg5[%c41_280] : memref<80xf32, #tpu.memory_space<smem>>
    %1067 = vector.broadcast %1066 : f32 to vector<19x19xf32>
    %1068 = arith.mulf %1053, %1067 : vector<19x19xf32>
    %1069 = arith.addf %1027, %1068 : vector<19x19xf32>
    %c42_281 = arith.constant 42 : index
    %1070 = memref.load %arg4[%c42_281] : memref<80xf32, #tpu.memory_space<smem>>
    %1071 = vector.broadcast %1070 : f32 to vector<19x19xf32>
    %1072 = arith.mulf %1053, %1071 : vector<19x19xf32>
    %1073 = arith.addf %1031, %1072 : vector<19x19xf32>
    %c42_282 = arith.constant 42 : index
    %1074 = memref.load %arg5[%c42_282] : memref<80xf32, #tpu.memory_space<smem>>
    %1075 = vector.broadcast %1074 : f32 to vector<19x19xf32>
    %1076 = arith.mulf %1053, %1075 : vector<19x19xf32>
    %1077 = arith.addf %1035, %1076 : vector<19x19xf32>
    %c43_283 = arith.constant 43 : index
    %1078 = memref.load %arg4[%c43_283] : memref<80xf32, #tpu.memory_space<smem>>
    %1079 = vector.broadcast %1078 : f32 to vector<19x19xf32>
    %1080 = arith.mulf %1053, %1079 : vector<19x19xf32>
    %1081 = arith.addf %1039, %1080 : vector<19x19xf32>
    %c43_284 = arith.constant 43 : index
    %1082 = memref.load %arg5[%c43_284] : memref<80xf32, #tpu.memory_space<smem>>
    %1083 = vector.broadcast %1082 : f32 to vector<19x19xf32>
    %1084 = arith.mulf %1053, %1083 : vector<19x19xf32>
    %1085 = arith.addf %1043, %1084 : vector<19x19xf32>
    %c44_285 = arith.constant 44 : index
    %1086 = memref.load %arg4[%c44_285] : memref<80xf32, #tpu.memory_space<smem>>
    %1087 = vector.broadcast %1086 : f32 to vector<19x19xf32>
    %1088 = arith.mulf %1053, %1087 : vector<19x19xf32>
    %1089 = arith.addf %1047, %1088 : vector<19x19xf32>
    %c44_286 = arith.constant 44 : index
    %1090 = memref.load %arg5[%c44_286] : memref<80xf32, #tpu.memory_space<smem>>
    %1091 = vector.broadcast %1090 : f32 to vector<19x19xf32>
    %1092 = arith.mulf %1053, %1091 : vector<19x19xf32>
    %1093 = arith.addf %1051, %1092 : vector<19x19xf32>
    %c2_287 = arith.constant 2 : index
    %c0_288 = arith.constant 0 : index
    %c1_289 = arith.constant 1 : index
    %1094 = vector.load %arg8[%c2_287, %c0_288, %c1_289] : memref<4x20x20xf32, #tpu.memory_space<vmem>>, vector<1x19x19xf32>
    %1095 = vector.shape_cast %1094 : vector<1x19x19xf32> to vector<19x19xf32>
    %c45_290 = arith.constant 45 : index
    %1096 = memref.load %arg4[%c45_290] : memref<80xf32, #tpu.memory_space<smem>>
    %1097 = vector.broadcast %1096 : f32 to vector<19x19xf32>
    %1098 = arith.mulf %1095, %1097 : vector<19x19xf32>
    %1099 = arith.addf %1057, %1098 : vector<19x19xf32>
    %c45_291 = arith.constant 45 : index
    %1100 = memref.load %arg5[%c45_291] : memref<80xf32, #tpu.memory_space<smem>>
    %1101 = vector.broadcast %1100 : f32 to vector<19x19xf32>
    %1102 = arith.mulf %1095, %1101 : vector<19x19xf32>
    %1103 = arith.addf %1061, %1102 : vector<19x19xf32>
    %c46_292 = arith.constant 46 : index
    %1104 = memref.load %arg4[%c46_292] : memref<80xf32, #tpu.memory_space<smem>>
    %1105 = vector.broadcast %1104 : f32 to vector<19x19xf32>
    %1106 = arith.mulf %1095, %1105 : vector<19x19xf32>
    %1107 = arith.addf %1065, %1106 : vector<19x19xf32>
    %c46_293 = arith.constant 46 : index
    %1108 = memref.load %arg5[%c46_293] : memref<80xf32, #tpu.memory_space<smem>>
    %1109 = vector.broadcast %1108 : f32 to vector<19x19xf32>
    %1110 = arith.mulf %1095, %1109 : vector<19x19xf32>
    %1111 = arith.addf %1069, %1110 : vector<19x19xf32>
    %c47_294 = arith.constant 47 : index
    %1112 = memref.load %arg4[%c47_294] : memref<80xf32, #tpu.memory_space<smem>>
    %1113 = vector.broadcast %1112 : f32 to vector<19x19xf32>
    %1114 = arith.mulf %1095, %1113 : vector<19x19xf32>
    %1115 = arith.addf %1073, %1114 : vector<19x19xf32>
    %c47_295 = arith.constant 47 : index
    %1116 = memref.load %arg5[%c47_295] : memref<80xf32, #tpu.memory_space<smem>>
    %1117 = vector.broadcast %1116 : f32 to vector<19x19xf32>
    %1118 = arith.mulf %1095, %1117 : vector<19x19xf32>
    %1119 = arith.addf %1077, %1118 : vector<19x19xf32>
    %c48_296 = arith.constant 48 : index
    %1120 = memref.load %arg4[%c48_296] : memref<80xf32, #tpu.memory_space<smem>>
    %1121 = vector.broadcast %1120 : f32 to vector<19x19xf32>
    %1122 = arith.mulf %1095, %1121 : vector<19x19xf32>
    %1123 = arith.addf %1081, %1122 : vector<19x19xf32>
    %c48_297 = arith.constant 48 : index
    %1124 = memref.load %arg5[%c48_297] : memref<80xf32, #tpu.memory_space<smem>>
    %1125 = vector.broadcast %1124 : f32 to vector<19x19xf32>
    %1126 = arith.mulf %1095, %1125 : vector<19x19xf32>
    %1127 = arith.addf %1085, %1126 : vector<19x19xf32>
    %c49_298 = arith.constant 49 : index
    %1128 = memref.load %arg4[%c49_298] : memref<80xf32, #tpu.memory_space<smem>>
    %1129 = vector.broadcast %1128 : f32 to vector<19x19xf32>
    %1130 = arith.mulf %1095, %1129 : vector<19x19xf32>
    %1131 = arith.addf %1089, %1130 : vector<19x19xf32>
    %c49_299 = arith.constant 49 : index
    %1132 = memref.load %arg5[%c49_299] : memref<80xf32, #tpu.memory_space<smem>>
    %1133 = vector.broadcast %1132 : f32 to vector<19x19xf32>
    %1134 = arith.mulf %1095, %1133 : vector<19x19xf32>
    %1135 = arith.addf %1093, %1134 : vector<19x19xf32>
    %c2_300 = arith.constant 2 : index
    %c1_301 = arith.constant 1 : index
    %c0_302 = arith.constant 0 : index
    %1136 = vector.load %arg8[%c2_300, %c1_301, %c0_302] : memref<4x20x20xf32, #tpu.memory_space<vmem>>, vector<1x19x19xf32>
    %1137 = vector.shape_cast %1136 : vector<1x19x19xf32> to vector<19x19xf32>
    %c50_303 = arith.constant 50 : index
    %1138 = memref.load %arg4[%c50_303] : memref<80xf32, #tpu.memory_space<smem>>
    %1139 = vector.broadcast %1138 : f32 to vector<19x19xf32>
    %1140 = arith.mulf %1137, %1139 : vector<19x19xf32>
    %1141 = arith.addf %1099, %1140 : vector<19x19xf32>
    %c50_304 = arith.constant 50 : index
    %1142 = memref.load %arg5[%c50_304] : memref<80xf32, #tpu.memory_space<smem>>
    %1143 = vector.broadcast %1142 : f32 to vector<19x19xf32>
    %1144 = arith.mulf %1137, %1143 : vector<19x19xf32>
    %1145 = arith.addf %1103, %1144 : vector<19x19xf32>
    %c51_305 = arith.constant 51 : index
    %1146 = memref.load %arg4[%c51_305] : memref<80xf32, #tpu.memory_space<smem>>
    %1147 = vector.broadcast %1146 : f32 to vector<19x19xf32>
    %1148 = arith.mulf %1137, %1147 : vector<19x19xf32>
    %1149 = arith.addf %1107, %1148 : vector<19x19xf32>
    %c51_306 = arith.constant 51 : index
    %1150 = memref.load %arg5[%c51_306] : memref<80xf32, #tpu.memory_space<smem>>
    %1151 = vector.broadcast %1150 : f32 to vector<19x19xf32>
    %1152 = arith.mulf %1137, %1151 : vector<19x19xf32>
    %1153 = arith.addf %1111, %1152 : vector<19x19xf32>
    %c52_307 = arith.constant 52 : index
    %1154 = memref.load %arg4[%c52_307] : memref<80xf32, #tpu.memory_space<smem>>
    %1155 = vector.broadcast %1154 : f32 to vector<19x19xf32>
    %1156 = arith.mulf %1137, %1155 : vector<19x19xf32>
    %1157 = arith.addf %1115, %1156 : vector<19x19xf32>
    %c52_308 = arith.constant 52 : index
    %1158 = memref.load %arg5[%c52_308] : memref<80xf32, #tpu.memory_space<smem>>
    %1159 = vector.broadcast %1158 : f32 to vector<19x19xf32>
    %1160 = arith.mulf %1137, %1159 : vector<19x19xf32>
    %1161 = arith.addf %1119, %1160 : vector<19x19xf32>
    %c53_309 = arith.constant 53 : index
    %1162 = memref.load %arg4[%c53_309] : memref<80xf32, #tpu.memory_space<smem>>
    %1163 = vector.broadcast %1162 : f32 to vector<19x19xf32>
    %1164 = arith.mulf %1137, %1163 : vector<19x19xf32>
    %1165 = arith.addf %1123, %1164 : vector<19x19xf32>
    %c53_310 = arith.constant 53 : index
    %1166 = memref.load %arg5[%c53_310] : memref<80xf32, #tpu.memory_space<smem>>
    %1167 = vector.broadcast %1166 : f32 to vector<19x19xf32>
    %1168 = arith.mulf %1137, %1167 : vector<19x19xf32>
    %1169 = arith.addf %1127, %1168 : vector<19x19xf32>
    %c54_311 = arith.constant 54 : index
    %1170 = memref.load %arg4[%c54_311] : memref<80xf32, #tpu.memory_space<smem>>
    %1171 = vector.broadcast %1170 : f32 to vector<19x19xf32>
    %1172 = arith.mulf %1137, %1171 : vector<19x19xf32>
    %1173 = arith.addf %1131, %1172 : vector<19x19xf32>
    %c54_312 = arith.constant 54 : index
    %1174 = memref.load %arg5[%c54_312] : memref<80xf32, #tpu.memory_space<smem>>
    %1175 = vector.broadcast %1174 : f32 to vector<19x19xf32>
    %1176 = arith.mulf %1137, %1175 : vector<19x19xf32>
    %1177 = arith.addf %1135, %1176 : vector<19x19xf32>
    %c2_313 = arith.constant 2 : index
    %c1_314 = arith.constant 1 : index
    %c1_315 = arith.constant 1 : index
    %1178 = vector.load %arg8[%c2_313, %c1_314, %c1_315] : memref<4x20x20xf32, #tpu.memory_space<vmem>>, vector<1x19x19xf32>
    %1179 = vector.shape_cast %1178 : vector<1x19x19xf32> to vector<19x19xf32>
    %c55_316 = arith.constant 55 : index
    %1180 = memref.load %arg4[%c55_316] : memref<80xf32, #tpu.memory_space<smem>>
    %1181 = vector.broadcast %1180 : f32 to vector<19x19xf32>
    %1182 = arith.mulf %1179, %1181 : vector<19x19xf32>
    %1183 = arith.addf %1141, %1182 : vector<19x19xf32>
    %c55_317 = arith.constant 55 : index
    %1184 = memref.load %arg5[%c55_317] : memref<80xf32, #tpu.memory_space<smem>>
    %1185 = vector.broadcast %1184 : f32 to vector<19x19xf32>
    %1186 = arith.mulf %1179, %1185 : vector<19x19xf32>
    %1187 = arith.addf %1145, %1186 : vector<19x19xf32>
    %c56_318 = arith.constant 56 : index
    %1188 = memref.load %arg4[%c56_318] : memref<80xf32, #tpu.memory_space<smem>>
    %1189 = vector.broadcast %1188 : f32 to vector<19x19xf32>
    %1190 = arith.mulf %1179, %1189 : vector<19x19xf32>
    %1191 = arith.addf %1149, %1190 : vector<19x19xf32>
    %c56_319 = arith.constant 56 : index
    %1192 = memref.load %arg5[%c56_319] : memref<80xf32, #tpu.memory_space<smem>>
    %1193 = vector.broadcast %1192 : f32 to vector<19x19xf32>
    %1194 = arith.mulf %1179, %1193 : vector<19x19xf32>
    %1195 = arith.addf %1153, %1194 : vector<19x19xf32>
    %c57_320 = arith.constant 57 : index
    %1196 = memref.load %arg4[%c57_320] : memref<80xf32, #tpu.memory_space<smem>>
    %1197 = vector.broadcast %1196 : f32 to vector<19x19xf32>
    %1198 = arith.mulf %1179, %1197 : vector<19x19xf32>
    %1199 = arith.addf %1157, %1198 : vector<19x19xf32>
    %c57_321 = arith.constant 57 : index
    %1200 = memref.load %arg5[%c57_321] : memref<80xf32, #tpu.memory_space<smem>>
    %1201 = vector.broadcast %1200 : f32 to vector<19x19xf32>
    %1202 = arith.mulf %1179, %1201 : vector<19x19xf32>
    %1203 = arith.addf %1161, %1202 : vector<19x19xf32>
    %c58_322 = arith.constant 58 : index
    %1204 = memref.load %arg4[%c58_322] : memref<80xf32, #tpu.memory_space<smem>>
    %1205 = vector.broadcast %1204 : f32 to vector<19x19xf32>
    %1206 = arith.mulf %1179, %1205 : vector<19x19xf32>
    %1207 = arith.addf %1165, %1206 : vector<19x19xf32>
    %c58_323 = arith.constant 58 : index
    %1208 = memref.load %arg5[%c58_323] : memref<80xf32, #tpu.memory_space<smem>>
    %1209 = vector.broadcast %1208 : f32 to vector<19x19xf32>
    %1210 = arith.mulf %1179, %1209 : vector<19x19xf32>
    %1211 = arith.addf %1169, %1210 : vector<19x19xf32>
    %c59_324 = arith.constant 59 : index
    %1212 = memref.load %arg4[%c59_324] : memref<80xf32, #tpu.memory_space<smem>>
    %1213 = vector.broadcast %1212 : f32 to vector<19x19xf32>
    %1214 = arith.mulf %1179, %1213 : vector<19x19xf32>
    %1215 = arith.addf %1173, %1214 : vector<19x19xf32>
    %c59_325 = arith.constant 59 : index
    %1216 = memref.load %arg5[%c59_325] : memref<80xf32, #tpu.memory_space<smem>>
    %1217 = vector.broadcast %1216 : f32 to vector<19x19xf32>
    %1218 = arith.mulf %1179, %1217 : vector<19x19xf32>
    %1219 = arith.addf %1177, %1218 : vector<19x19xf32>
    %c3_326 = arith.constant 3 : index
    %c0_327 = arith.constant 0 : index
    %c0_328 = arith.constant 0 : index
    %1220 = vector.load %arg8[%c3_326, %c0_327, %c0_328] : memref<4x20x20xf32, #tpu.memory_space<vmem>>, vector<1x19x19xf32>
    %1221 = vector.shape_cast %1220 : vector<1x19x19xf32> to vector<19x19xf32>
    %c60_329 = arith.constant 60 : index
    %1222 = memref.load %arg4[%c60_329] : memref<80xf32, #tpu.memory_space<smem>>
    %1223 = vector.broadcast %1222 : f32 to vector<19x19xf32>
    %1224 = arith.mulf %1221, %1223 : vector<19x19xf32>
    %1225 = arith.addf %1183, %1224 : vector<19x19xf32>
    %c60_330 = arith.constant 60 : index
    %1226 = memref.load %arg5[%c60_330] : memref<80xf32, #tpu.memory_space<smem>>
    %1227 = vector.broadcast %1226 : f32 to vector<19x19xf32>
    %1228 = arith.mulf %1221, %1227 : vector<19x19xf32>
    %1229 = arith.addf %1187, %1228 : vector<19x19xf32>
    %c61_331 = arith.constant 61 : index
    %1230 = memref.load %arg4[%c61_331] : memref<80xf32, #tpu.memory_space<smem>>
    %1231 = vector.broadcast %1230 : f32 to vector<19x19xf32>
    %1232 = arith.mulf %1221, %1231 : vector<19x19xf32>
    %1233 = arith.addf %1191, %1232 : vector<19x19xf32>
    %c61_332 = arith.constant 61 : index
    %1234 = memref.load %arg5[%c61_332] : memref<80xf32, #tpu.memory_space<smem>>
    %1235 = vector.broadcast %1234 : f32 to vector<19x19xf32>
    %1236 = arith.mulf %1221, %1235 : vector<19x19xf32>
    %1237 = arith.addf %1195, %1236 : vector<19x19xf32>
    %c62_333 = arith.constant 62 : index
    %1238 = memref.load %arg4[%c62_333] : memref<80xf32, #tpu.memory_space<smem>>
    %1239 = vector.broadcast %1238 : f32 to vector<19x19xf32>
    %1240 = arith.mulf %1221, %1239 : vector<19x19xf32>
    %1241 = arith.addf %1199, %1240 : vector<19x19xf32>
    %c62_334 = arith.constant 62 : index
    %1242 = memref.load %arg5[%c62_334] : memref<80xf32, #tpu.memory_space<smem>>
    %1243 = vector.broadcast %1242 : f32 to vector<19x19xf32>
    %1244 = arith.mulf %1221, %1243 : vector<19x19xf32>
    %1245 = arith.addf %1203, %1244 : vector<19x19xf32>
    %c63_335 = arith.constant 63 : index
    %1246 = memref.load %arg4[%c63_335] : memref<80xf32, #tpu.memory_space<smem>>
    %1247 = vector.broadcast %1246 : f32 to vector<19x19xf32>
    %1248 = arith.mulf %1221, %1247 : vector<19x19xf32>
    %1249 = arith.addf %1207, %1248 : vector<19x19xf32>
    %c63_336 = arith.constant 63 : index
    %1250 = memref.load %arg5[%c63_336] : memref<80xf32, #tpu.memory_space<smem>>
    %1251 = vector.broadcast %1250 : f32 to vector<19x19xf32>
    %1252 = arith.mulf %1221, %1251 : vector<19x19xf32>
    %1253 = arith.addf %1211, %1252 : vector<19x19xf32>
    %c64_337 = arith.constant 64 : index
    %1254 = memref.load %arg4[%c64_337] : memref<80xf32, #tpu.memory_space<smem>>
    %1255 = vector.broadcast %1254 : f32 to vector<19x19xf32>
    %1256 = arith.mulf %1221, %1255 : vector<19x19xf32>
    %1257 = arith.addf %1215, %1256 : vector<19x19xf32>
    %c64_338 = arith.constant 64 : index
    %1258 = memref.load %arg5[%c64_338] : memref<80xf32, #tpu.memory_space<smem>>
    %1259 = vector.broadcast %1258 : f32 to vector<19x19xf32>
    %1260 = arith.mulf %1221, %1259 : vector<19x19xf32>
    %1261 = arith.addf %1219, %1260 : vector<19x19xf32>
    %c3_339 = arith.constant 3 : index
    %c0_340 = arith.constant 0 : index
    %c1_341 = arith.constant 1 : index
    %1262 = vector.load %arg8[%c3_339, %c0_340, %c1_341] : memref<4x20x20xf32, #tpu.memory_space<vmem>>, vector<1x19x19xf32>
    %1263 = vector.shape_cast %1262 : vector<1x19x19xf32> to vector<19x19xf32>
    %c65_342 = arith.constant 65 : index
    %1264 = memref.load %arg4[%c65_342] : memref<80xf32, #tpu.memory_space<smem>>
    %1265 = vector.broadcast %1264 : f32 to vector<19x19xf32>
    %1266 = arith.mulf %1263, %1265 : vector<19x19xf32>
    %1267 = arith.addf %1225, %1266 : vector<19x19xf32>
    %c65_343 = arith.constant 65 : index
    %1268 = memref.load %arg5[%c65_343] : memref<80xf32, #tpu.memory_space<smem>>
    %1269 = vector.broadcast %1268 : f32 to vector<19x19xf32>
    %1270 = arith.mulf %1263, %1269 : vector<19x19xf32>
    %1271 = arith.addf %1229, %1270 : vector<19x19xf32>
    %c66_344 = arith.constant 66 : index
    %1272 = memref.load %arg4[%c66_344] : memref<80xf32, #tpu.memory_space<smem>>
    %1273 = vector.broadcast %1272 : f32 to vector<19x19xf32>
    %1274 = arith.mulf %1263, %1273 : vector<19x19xf32>
    %1275 = arith.addf %1233, %1274 : vector<19x19xf32>
    %c66_345 = arith.constant 66 : index
    %1276 = memref.load %arg5[%c66_345] : memref<80xf32, #tpu.memory_space<smem>>
    %1277 = vector.broadcast %1276 : f32 to vector<19x19xf32>
    %1278 = arith.mulf %1263, %1277 : vector<19x19xf32>
    %1279 = arith.addf %1237, %1278 : vector<19x19xf32>
    %c67_346 = arith.constant 67 : index
    %1280 = memref.load %arg4[%c67_346] : memref<80xf32, #tpu.memory_space<smem>>
    %1281 = vector.broadcast %1280 : f32 to vector<19x19xf32>
    %1282 = arith.mulf %1263, %1281 : vector<19x19xf32>
    %1283 = arith.addf %1241, %1282 : vector<19x19xf32>
    %c67_347 = arith.constant 67 : index
    %1284 = memref.load %arg5[%c67_347] : memref<80xf32, #tpu.memory_space<smem>>
    %1285 = vector.broadcast %1284 : f32 to vector<19x19xf32>
    %1286 = arith.mulf %1263, %1285 : vector<19x19xf32>
    %1287 = arith.addf %1245, %1286 : vector<19x19xf32>
    %c68_348 = arith.constant 68 : index
    %1288 = memref.load %arg4[%c68_348] : memref<80xf32, #tpu.memory_space<smem>>
    %1289 = vector.broadcast %1288 : f32 to vector<19x19xf32>
    %1290 = arith.mulf %1263, %1289 : vector<19x19xf32>
    %1291 = arith.addf %1249, %1290 : vector<19x19xf32>
    %c68_349 = arith.constant 68 : index
    %1292 = memref.load %arg5[%c68_349] : memref<80xf32, #tpu.memory_space<smem>>
    %1293 = vector.broadcast %1292 : f32 to vector<19x19xf32>
    %1294 = arith.mulf %1263, %1293 : vector<19x19xf32>
    %1295 = arith.addf %1253, %1294 : vector<19x19xf32>
    %c69_350 = arith.constant 69 : index
    %1296 = memref.load %arg4[%c69_350] : memref<80xf32, #tpu.memory_space<smem>>
    %1297 = vector.broadcast %1296 : f32 to vector<19x19xf32>
    %1298 = arith.mulf %1263, %1297 : vector<19x19xf32>
    %1299 = arith.addf %1257, %1298 : vector<19x19xf32>
    %c69_351 = arith.constant 69 : index
    %1300 = memref.load %arg5[%c69_351] : memref<80xf32, #tpu.memory_space<smem>>
    %1301 = vector.broadcast %1300 : f32 to vector<19x19xf32>
    %1302 = arith.mulf %1263, %1301 : vector<19x19xf32>
    %1303 = arith.addf %1261, %1302 : vector<19x19xf32>
    %c3_352 = arith.constant 3 : index
    %c1_353 = arith.constant 1 : index
    %c0_354 = arith.constant 0 : index
    %1304 = vector.load %arg8[%c3_352, %c1_353, %c0_354] : memref<4x20x20xf32, #tpu.memory_space<vmem>>, vector<1x19x19xf32>
    %1305 = vector.shape_cast %1304 : vector<1x19x19xf32> to vector<19x19xf32>
    %c70_355 = arith.constant 70 : index
    %1306 = memref.load %arg4[%c70_355] : memref<80xf32, #tpu.memory_space<smem>>
    %1307 = vector.broadcast %1306 : f32 to vector<19x19xf32>
    %1308 = arith.mulf %1305, %1307 : vector<19x19xf32>
    %1309 = arith.addf %1267, %1308 : vector<19x19xf32>
    %c70_356 = arith.constant 70 : index
    %1310 = memref.load %arg5[%c70_356] : memref<80xf32, #tpu.memory_space<smem>>
    %1311 = vector.broadcast %1310 : f32 to vector<19x19xf32>
    %1312 = arith.mulf %1305, %1311 : vector<19x19xf32>
    %1313 = arith.addf %1271, %1312 : vector<19x19xf32>
    %c71_357 = arith.constant 71 : index
    %1314 = memref.load %arg4[%c71_357] : memref<80xf32, #tpu.memory_space<smem>>
    %1315 = vector.broadcast %1314 : f32 to vector<19x19xf32>
    %1316 = arith.mulf %1305, %1315 : vector<19x19xf32>
    %1317 = arith.addf %1275, %1316 : vector<19x19xf32>
    %c71_358 = arith.constant 71 : index
    %1318 = memref.load %arg5[%c71_358] : memref<80xf32, #tpu.memory_space<smem>>
    %1319 = vector.broadcast %1318 : f32 to vector<19x19xf32>
    %1320 = arith.mulf %1305, %1319 : vector<19x19xf32>
    %1321 = arith.addf %1279, %1320 : vector<19x19xf32>
    %c72_359 = arith.constant 72 : index
    %1322 = memref.load %arg4[%c72_359] : memref<80xf32, #tpu.memory_space<smem>>
    %1323 = vector.broadcast %1322 : f32 to vector<19x19xf32>
    %1324 = arith.mulf %1305, %1323 : vector<19x19xf32>
    %1325 = arith.addf %1283, %1324 : vector<19x19xf32>
    %c72_360 = arith.constant 72 : index
    %1326 = memref.load %arg5[%c72_360] : memref<80xf32, #tpu.memory_space<smem>>
    %1327 = vector.broadcast %1326 : f32 to vector<19x19xf32>
    %1328 = arith.mulf %1305, %1327 : vector<19x19xf32>
    %1329 = arith.addf %1287, %1328 : vector<19x19xf32>
    %c73_361 = arith.constant 73 : index
    %1330 = memref.load %arg4[%c73_361] : memref<80xf32, #tpu.memory_space<smem>>
    %1331 = vector.broadcast %1330 : f32 to vector<19x19xf32>
    %1332 = arith.mulf %1305, %1331 : vector<19x19xf32>
    %1333 = arith.addf %1291, %1332 : vector<19x19xf32>
    %c73_362 = arith.constant 73 : index
    %1334 = memref.load %arg5[%c73_362] : memref<80xf32, #tpu.memory_space<smem>>
    %1335 = vector.broadcast %1334 : f32 to vector<19x19xf32>
    %1336 = arith.mulf %1305, %1335 : vector<19x19xf32>
    %1337 = arith.addf %1295, %1336 : vector<19x19xf32>
    %c74_363 = arith.constant 74 : index
    %1338 = memref.load %arg4[%c74_363] : memref<80xf32, #tpu.memory_space<smem>>
    %1339 = vector.broadcast %1338 : f32 to vector<19x19xf32>
    %1340 = arith.mulf %1305, %1339 : vector<19x19xf32>
    %1341 = arith.addf %1299, %1340 : vector<19x19xf32>
    %c74_364 = arith.constant 74 : index
    %1342 = memref.load %arg5[%c74_364] : memref<80xf32, #tpu.memory_space<smem>>
    %1343 = vector.broadcast %1342 : f32 to vector<19x19xf32>
    %1344 = arith.mulf %1305, %1343 : vector<19x19xf32>
    %1345 = arith.addf %1303, %1344 : vector<19x19xf32>
    %c3_365 = arith.constant 3 : index
    %c1_366 = arith.constant 1 : index
    %c1_367 = arith.constant 1 : index
    %1346 = vector.load %arg8[%c3_365, %c1_366, %c1_367] : memref<4x20x20xf32, #tpu.memory_space<vmem>>, vector<1x19x19xf32>
    %1347 = vector.shape_cast %1346 : vector<1x19x19xf32> to vector<19x19xf32>
    %c75_368 = arith.constant 75 : index
    %1348 = memref.load %arg4[%c75_368] : memref<80xf32, #tpu.memory_space<smem>>
    %1349 = vector.broadcast %1348 : f32 to vector<19x19xf32>
    %1350 = arith.mulf %1347, %1349 : vector<19x19xf32>
    %1351 = arith.addf %1309, %1350 : vector<19x19xf32>
    %c75_369 = arith.constant 75 : index
    %1352 = memref.load %arg5[%c75_369] : memref<80xf32, #tpu.memory_space<smem>>
    %1353 = vector.broadcast %1352 : f32 to vector<19x19xf32>
    %1354 = arith.mulf %1347, %1353 : vector<19x19xf32>
    %1355 = arith.addf %1313, %1354 : vector<19x19xf32>
    %c76_370 = arith.constant 76 : index
    %1356 = memref.load %arg4[%c76_370] : memref<80xf32, #tpu.memory_space<smem>>
    %1357 = vector.broadcast %1356 : f32 to vector<19x19xf32>
    %1358 = arith.mulf %1347, %1357 : vector<19x19xf32>
    %1359 = arith.addf %1317, %1358 : vector<19x19xf32>
    %c76_371 = arith.constant 76 : index
    %1360 = memref.load %arg5[%c76_371] : memref<80xf32, #tpu.memory_space<smem>>
    %1361 = vector.broadcast %1360 : f32 to vector<19x19xf32>
    %1362 = arith.mulf %1347, %1361 : vector<19x19xf32>
    %1363 = arith.addf %1321, %1362 : vector<19x19xf32>
    %c77_372 = arith.constant 77 : index
    %1364 = memref.load %arg4[%c77_372] : memref<80xf32, #tpu.memory_space<smem>>
    %1365 = vector.broadcast %1364 : f32 to vector<19x19xf32>
    %1366 = arith.mulf %1347, %1365 : vector<19x19xf32>
    %1367 = arith.addf %1325, %1366 : vector<19x19xf32>
    %c77_373 = arith.constant 77 : index
    %1368 = memref.load %arg5[%c77_373] : memref<80xf32, #tpu.memory_space<smem>>
    %1369 = vector.broadcast %1368 : f32 to vector<19x19xf32>
    %1370 = arith.mulf %1347, %1369 : vector<19x19xf32>
    %1371 = arith.addf %1329, %1370 : vector<19x19xf32>
    %c78_374 = arith.constant 78 : index
    %1372 = memref.load %arg4[%c78_374] : memref<80xf32, #tpu.memory_space<smem>>
    %1373 = vector.broadcast %1372 : f32 to vector<19x19xf32>
    %1374 = arith.mulf %1347, %1373 : vector<19x19xf32>
    %1375 = arith.addf %1333, %1374 : vector<19x19xf32>
    %c78_375 = arith.constant 78 : index
    %1376 = memref.load %arg5[%c78_375] : memref<80xf32, #tpu.memory_space<smem>>
    %1377 = vector.broadcast %1376 : f32 to vector<19x19xf32>
    %1378 = arith.mulf %1347, %1377 : vector<19x19xf32>
    %1379 = arith.addf %1337, %1378 : vector<19x19xf32>
    %c79_376 = arith.constant 79 : index
    %1380 = memref.load %arg4[%c79_376] : memref<80xf32, #tpu.memory_space<smem>>
    %1381 = vector.broadcast %1380 : f32 to vector<19x19xf32>
    %1382 = arith.mulf %1347, %1381 : vector<19x19xf32>
    %1383 = arith.addf %1341, %1382 : vector<19x19xf32>
    %c79_377 = arith.constant 79 : index
    %1384 = memref.load %arg5[%c79_377] : memref<80xf32, #tpu.memory_space<smem>>
    %1385 = vector.broadcast %1384 : f32 to vector<19x19xf32>
    %1386 = arith.mulf %1347, %1385 : vector<19x19xf32>
    %1387 = arith.addf %1345, %1386 : vector<19x19xf32>
    %cst_378 = arith.constant dense<0.000000e+00> : vector<19x38xf32>
    %1388 = tpu.matmul %1351, %698, %cst_378 {dimension_numbers = #tpu.dot_dimension_numbers<[1], [0], [0], [1], [0, 0, 1, 1], [], []>} : vector<19x19xf32>, vector<19x38xf32>, vector<19x38xf32> -> vector<19x38xf32>
    %cst_379 = arith.constant dense<0.000000e+00> : vector<19x38xf32>
    %1389 = tpu.matmul %1355, %705, %cst_379 {dimension_numbers = #tpu.dot_dimension_numbers<[1], [0], [0], [1], [0, 0, 1, 1], [], []>} : vector<19x19xf32>, vector<19x38xf32>, vector<19x38xf32> -> vector<19x38xf32>
    %1390 = arith.addf %1388, %1389 : vector<19x38xf32>
    %c0_380 = arith.constant 0 : index
    %c0_381 = arith.constant 0 : index
    %c0_382 = arith.constant 0 : index
    %c0_383 = arith.constant 0 : index
    %1391 = vector.load %arg6[%c0_380, %c0_381, %c0_382, %c0_383] : memref<1x5x19x38xf32, #tpu.memory_space<vmem>>, vector<1x1x19x38xf32>
    %1392 = vector.shape_cast %1391 : vector<1x1x19x38xf32> to vector<19x38xf32>
    %1393 = vector.shape_cast %1390 : vector<19x38xf32> to vector<1x1x19x38xf32>
    tpu.vector_store %arg6[%c0_380, %c0_381, %c0_382, %c0_383], %1393 {strides = array<i32>} : memref<1x5x19x38xf32, #tpu.memory_space<vmem>>, vector<1x1x19x38xf32>,
    %cst_384 = arith.constant dense<0.000000e+00> : vector<19x38xf32>
    %1394 = tpu.matmul %1359, %698, %cst_384 {dimension_numbers = #tpu.dot_dimension_numbers<[1], [0], [0], [1], [0, 0, 1, 1], [], []>} : vector<19x19xf32>, vector<19x38xf32>, vector<19x38xf32> -> vector<19x38xf32>
    %cst_385 = arith.constant dense<0.000000e+00> : vector<19x38xf32>
    %1395 = tpu.matmul %1363, %705, %cst_385 {dimension_numbers = #tpu.dot_dimension_numbers<[1], [0], [0], [1], [0, 0, 1, 1], [], []>} : vector<19x19xf32>, vector<19x38xf32>, vector<19x38xf32> -> vector<19x38xf32>
    %1396 = arith.addf %1394, %1395 : vector<19x38xf32>
    %c0_386 = arith.constant 0 : index
    %c1_387 = arith.constant 1 : index
    %c0_388 = arith.constant 0 : index
    %c0_389 = arith.constant 0 : index
    %1397 = vector.load %arg6[%c0_386, %c1_387, %c0_388, %c0_389] : memref<1x5x19x38xf32, #tpu.memory_space<vmem>>, vector<1x1x19x38xf32>
    %1398 = vector.shape_cast %1397 : vector<1x1x19x38xf32> to vector<19x38xf32>
    %1399 = vector.shape_cast %1396 : vector<19x38xf32> to vector<1x1x19x38xf32>
    tpu.vector_store %arg6[%c0_386, %c1_387, %c0_388, %c0_389], %1399 {strides = array<i32>} : memref<1x5x19x38xf32, #tpu.memory_space<vmem>>, vector<1x1x19x38xf32>,
    %cst_390 = arith.constant dense<0.000000e+00> : vector<19x38xf32>
    %1400 = tpu.matmul %1367, %698, %cst_390 {dimension_numbers = #tpu.dot_dimension_numbers<[1], [0], [0], [1], [0, 0, 1, 1], [], []>} : vector<19x19xf32>, vector<19x38xf32>, vector<19x38xf32> -> vector<19x38xf32>
    %cst_391 = arith.constant dense<0.000000e+00> : vector<19x38xf32>
    %1401 = tpu.matmul %1371, %705, %cst_391 {dimension_numbers = #tpu.dot_dimension_numbers<[1], [0], [0], [1], [0, 0, 1, 1], [], []>} : vector<19x19xf32>, vector<19x38xf32>, vector<19x38xf32> -> vector<19x38xf32>
    %1402 = arith.addf %1400, %1401 : vector<19x38xf32>
    %c0_392 = arith.constant 0 : index
    %c2_393 = arith.constant 2 : index
    %c0_394 = arith.constant 0 : index
    %c0_395 = arith.constant 0 : index
    %1403 = vector.load %arg6[%c0_392, %c2_393, %c0_394, %c0_395] : memref<1x5x19x38xf32, #tpu.memory_space<vmem>>, vector<1x1x19x38xf32>
    %1404 = vector.shape_cast %1403 : vector<1x1x19x38xf32> to vector<19x38xf32>
    %1405 = vector.shape_cast %1402 : vector<19x38xf32> to vector<1x1x19x38xf32>
    tpu.vector_store %arg6[%c0_392, %c2_393, %c0_394, %c0_395], %1405 {strides = array<i32>} : memref<1x5x19x38xf32, #tpu.memory_space<vmem>>, vector<1x1x19x38xf32>,
    %cst_396 = arith.constant dense<0.000000e+00> : vector<19x38xf32>
    %1406 = tpu.matmul %1375, %698, %cst_396 {dimension_numbers = #tpu.dot_dimension_numbers<[1], [0], [0], [1], [0, 0, 1, 1], [], []>} : vector<19x19xf32>, vector<19x38xf32>, vector<19x38xf32> -> vector<19x38xf32>
    %cst_397 = arith.constant dense<0.000000e+00> : vector<19x38xf32>
    %1407 = tpu.matmul %1379, %705, %cst_397 {dimension_numbers = #tpu.dot_dimension_numbers<[1], [0], [0], [1], [0, 0, 1, 1], [], []>} : vector<19x19xf32>, vector<19x38xf32>, vector<19x38xf32> -> vector<19x38xf32>
    %1408 = arith.addf %1406, %1407 : vector<19x38xf32>
    %c0_398 = arith.constant 0 : index
    %c3_399 = arith.constant 3 : index
    %c0_400 = arith.constant 0 : index
    %c0_401 = arith.constant 0 : index
    %1409 = vector.load %arg6[%c0_398, %c3_399, %c0_400, %c0_401] : memref<1x5x19x38xf32, #tpu.memory_space<vmem>>, vector<1x1x19x38xf32>
    %1410 = vector.shape_cast %1409 : vector<1x1x19x38xf32> to vector<19x38xf32>
    %1411 = vector.shape_cast %1408 : vector<19x38xf32> to vector<1x1x19x38xf32>
    tpu.vector_store %arg6[%c0_398, %c3_399, %c0_400, %c0_401], %1411 {strides = array<i32>} : memref<1x5x19x38xf32, #tpu.memory_space<vmem>>, vector<1x1x19x38xf32>,
    %cst_402 = arith.constant dense<0.000000e+00> : vector<19x38xf32>
    %1412 = tpu.matmul %1383, %698, %cst_402 {dimension_numbers = #tpu.dot_dimension_numbers<[1], [0], [0], [1], [0, 0, 1, 1], [], []>} : vector<19x19xf32>, vector<19x38xf32>, vector<19x38xf32> -> vector<19x38xf32>
    %cst_403 = arith.constant dense<0.000000e+00> : vector<19x38xf32>
    %1413 = tpu.matmul %1387, %705, %cst_403 {dimension_numbers = #tpu.dot_dimension_numbers<[1], [0], [0], [1], [0, 0, 1, 1], [], []>} : vector<19x19xf32>, vector<19x38xf32>, vector<19x38xf32> -> vector<19x38xf32>
    %1414 = arith.addf %1412, %1413 : vector<19x38xf32>
    %c0_404 = arith.constant 0 : index
    %c4_405 = arith.constant 4 : index
    %c0_406 = arith.constant 0 : index
    %c0_407 = arith.constant 0 : index
    %1415 = vector.load %arg6[%c0_404, %c4_405, %c0_406, %c0_407] : memref<1x5x19x38xf32, #tpu.memory_space<vmem>>, vector<1x1x19x38xf32>
    %1416 = vector.shape_cast %1415 : vector<1x1x19x38xf32> to vector<19x38xf32>
    %1417 = vector.shape_cast %1414 : vector<19x38xf32> to vector<1x1x19x38xf32>
    tpu.vector_store %arg6[%c0_404, %c4_405, %c0_406, %c0_407], %1417 {strides = array<i32>} : memref<1x5x19x38xf32, #tpu.memory_space<vmem>>, vector<1x1x19x38xf32>,
    return
  }
  func.func @transform_0(%arg0: i32) -> (i32, i32, i32, i32) {
    %c0_i32 = arith.constant 0 : i32
    %c0_i32_0 = arith.constant 0 : i32
    %c0_i32_1 = arith.constant 0 : i32
    %c0_i32_2 = arith.constant 0 : i32
    return %arg0, %c0_i32, %c0_i32_0, %c0_i32_1 : i32, i32, i32, i32
  }
  func.func @transform_1(%arg0: i32) -> i32 {
    %c0_i32 = arith.constant 0 : i32
    %c0_i32_0 = arith.constant 0 : i32
    return %c0_i32 : i32
  }
  func.func @transform_2(%arg0: i32) -> i32 {
    %c0_i32 = arith.constant 0 : i32
    %c0_i32_0 = arith.constant 0 : i32
    return %c0_i32 : i32
  }
  func.func @transform_3(%arg0: i32) -> i32 {
    %c0_i32 = arith.constant 0 : i32
    %c0_i32_0 = arith.constant 0 : i32
    return %c0_i32 : i32
  }
  func.func @transform_4(%arg0: i32) -> i32 {
    %c0_i32 = arith.constant 0 : i32
    %c0_i32_0 = arith.constant 0 : i32
    return %c0_i32 : i32
  }
  func.func @transform_5(%arg0: i32) -> (i32, i32, i32, i32) {
    %c0_i32 = arith.constant 0 : i32
    %c0_i32_0 = arith.constant 0 : i32
    %c0_i32_1 = arith.constant 0 : i32
    %c0_i32_2 = arith.constant 0 : i32
    return %arg0, %c0_i32, %c0_i32_0, %c0_i32_1 : i32, i32, i32, i32
  }
}

</mosaic_0001>

<bundles_post_ra>
// kernel: reverse.2
= control target key start
LH: loop header
LB: loop body
LE: loop exit
PB: predicated region body
PF: predicated region fallthrough
CT: control target
= control target key end

     0   :  { %s104_s0 = inlined_call_operand.vmem [shape: f32[4,5,2,1], index: 0, kind: input, shape index: {}]   ;;  %s105_s1 = inlined_call_operand.vmem [shape: f32[4,5,2,1], index: 1, kind: output, shape index: {}]  }
   0x1   :  { %v32_v0 = vld [vmem:[%s104_s0 + $0x1] sm:$0x1]  ;;  %v33_v1 = vld [vmem:[%s104_s0 + $0x3] sm:$0x1]  ;;  %v35_v2 = vld [vmem:[%s104_s0 + $0x5] sm:$0x1] }
   0x2   :  { %4 = vst [vmem:[%s105_s1] sm:$0x1] %v32_v0  ;;  %34 = vst [vmem:[%s105_s1 + $0x2] sm:$0x1] %v33_v1  ;;  %v37_v3 = vld [vmem:[%s104_s0 + $0x7] sm:$0x1] }
   0x3   :  { %36 = vst [vmem:[%s105_s1 + $0x4] sm:$0x1] %v35_v2  ;;  %v17_v4 = vld [vmem:[%s104_s0] sm:$0x1]  ;;  %v40_v5 = vld [vmem:[%s104_s0 + $0x2] sm:$0x1] }
   0x4   :  { %38 = vst [vmem:[%s105_s1 + $0x6] sm:$0x1] %v37_v3  ;;  %39 = vst [vmem:[%s105_s1 + $0x1] sm:$0x1] %v17_v4  ;;  %v42_v6 = vld [vmem:[%s104_s0 + $0x4] sm:$0x1] }
   0x5   :  { %41 = vst [vmem:[%s105_s1 + $0x3] sm:$0x1] %v40_v5  ;;  %v44_v7 = vld [vmem:[%s104_s0 + $0x6] sm:$0x1]  ;;  %43 = vst [vmem:[%s105_s1 + $0x5] sm:$0x1] %v42_v6 }
   0x6   :  { %45 = vst [vmem:[%s105_s1 + $0x7] sm:$0x1] %v44_v7 }

// kernel: fused_deconv_forward.1
= control target key start
LH: loop header
LB: loop body
LE: loop exit
PB: predicated region body
PF: predicated region fallthrough
CT: control target
= control target key end

     0   :  { %10 = vsyncpa [#allocation5], 0  ;;  %s11301_s0 = inlined_call_operand.vmem [shape: f32[2,4,16,16], index: 0, kind: input, shape index: {}]   ;;  %s11302_s1 = inlined_call_operand.vmem [shape: f32[144], index: 1, kind: input, shape index: {}]   ;;  %s11303_s2 = inlined_call_operand.vmem [shape: f32[4], index: 2, kind: input, shape index: {}]   ;;  %s11304_s3 = inlined_call_operand.vmem [shape: f32[80], index: 3, kind: input, shape index: {}]   ;;  %s11305_s4 = inlined_call_operand.vmem [shape: f32[80], index: 4, kind: input, shape index: {}]   ;;  %s11306_s5 = inlined_call_operand.vmem [shape: f32[2,5,19,38], index: 5, kind: output, shape index: {}]  }
   0x1   :  { %11 = vsyncpa [#allocation7], 0 }
   0x2   :  { %12 = vsyncpa [#allocation10], 0  ;;  %s6971_s18 = smov 0  }
   0x3 LB: > { %s183_s21 = sshll.u32 %s11303_s2, 4  ;;  %s6980_s22 = sadd.s32 4294967295, %s6927_s18   ;;  %s6927_s18 = sphi %s6971_s18, %s18_s18   ;;  %s184_s21 = int_to_ptr.vmem [resolvable:$true] %s183_s21 }
   0x4   : > { %p6082_p0 = scmp.ge.s32.totalorder %s6927_s18, 1  ;;  %p159_p1 = scmp.lt.s32.totalorder %s6927_s18, 3 }
   0x5   : > { %p6784_p2 = scmp.eq.s32.totalorder %s6980_s22, 0  ;;  %s172_s26 = sshll.u32 %s11302_s1, 4  ;;  %s6992_s26 = int_to_ptr.vmem [resolvable:$true] %s172_s26 }
   0x6   : > { %p6985_p3 = pnand %p6082_p0, %p159_p1  ;;  %s194_s29 = sshll.u32 %s11304_s3, 4  ;;  %s6999_s29 = int_to_ptr.vmem [resolvable:$true] %s194_s29 }
   0x7   : > { %s205_s8 = sshll.u32 %s11305_s4, 4  ;;  %s6849_s9 = scalar_lea.vmem %s184_s21, 16  ;;  %s7010_s8 = int_to_ptr.vmem [resolvable:$true] %s205_s8 }
   0x8   : > { %p6771_p4 = pneg %p6985_p3  ;;  %p6850_p6 = scmp.ne.s32.totalorder %s184_s21, %s6849_s9 }
   0x9   : > { %p6857_p10 = scmp.lt.s32.totalorder %s184_s21, %s184_s21  ;;  %p6858_p11 = scmp.lt.s32.totalorder %s6849_s9, %s6849_s9 }
   0xa   : > { %p7003_p5 = pnand %p6784_p2, %p6771_p4 }
   0xb   : > { %p6859_p12 = por %p6858_p11, %p6857_p10 }
   0xc   : > { %p6851_p7 = pneg %p7003_p5 }
   0xe   : > { %p6852_p8 = pnand %p6851_p7, %p6850_p6 }
  0x10   : > { %p6853_p9 = pneg %p6852_p8 }
  0x12   : > { %p6860_p13 = pnand %p6859_p12, %p6853_p9 }
  0x14   : > { %6863 = shalt.err (!%p6860_p13)
}
  0x15   : > { %s6929_s10 = smov [#allocation6]   ;;  %s6864_s11 = scalar_lea.vmem %s6992_s26, 32 }
  0x16   : > { %6777 = dma.vmem_to_smem (!%p7003_p5), %s184_s21, 16, %s6929_s10, [#allocation7]  }
  0x17   : > { %p6865_p0 = scmp.ne.s32.totalorder %s6992_s26, %s6864_s11  ;;  %p6872_p6 = scmp.lt.s32.totalorder %s6992_s26, %s6992_s26 }
  0x18   : > { %p6873_p8 = scmp.lt.s32.totalorder %s6864_s11, %s6864_s11 }
  0x19   : > { %p6867_p1 = pnand %p6865_p0, %p6851_p7 }
  0x1a   : > { %p6874_p10 = por %p6873_p8, %p6872_p6 }
  0x1b   : > { %p6868_p4 = pneg %p6867_p1 }
  0x1d   : > { %p6875_p9 = pnand %p6874_p10, %p6868_p4 }
  0x1f   : > { %6878 = shalt.err (!%p6875_p9)
}
  0x20   : > { %s6930_s12 = smov [#allocation4]   ;;  %s6879_s13 = scalar_lea.vmem %s6999_s29, 16 }
  0x21   : > { %6774 = dma.vmem_to_smem (!%p7003_p5), %s6992_s26, 32, %s6930_s12, [#allocation5]  }
  0x22   : > { %p6880_p11 = scmp.ne.s32.totalorder %s6999_s29, %s6879_s13  ;;  %p6887_p0 = scmp.lt.s32.totalorder %s6999_s29, %s6999_s29 }
  0x23   : > { %p6888_p1 = scmp.lt.s32.totalorder %s6879_s13, %s6879_s13 }
  0x24   : > { %p6882_p12 = pnand %p6880_p11, %p6851_p7 }
  0x25   : > { %p6889_p4 = por %p6888_p1, %p6887_p0 }
  0x26   : > { %p6883_p13 = pneg %p6882_p12 }
  0x28   : > { %p6890_p6 = pnand %p6889_p4, %p6883_p13 }
  0x2a   : > { %6893 = shalt.err (!%p6890_p6)
}
  0x2b   : > { %s6931_s14 = smov [#allocation8]   ;;  %s6894_s15 = scalar_lea.vmem %s7010_s8, 16 }
  0x2c   : > { %6780 = dma.vmem_to_smem (!%p7003_p5), %s6999_s29, 16, %s6931_s14, [#allocation7]  }
  0x2d   : > { %p6895_p8 = scmp.ne.s32.totalorder %s7010_s8, %s6894_s15  ;;  %p6902_p11 = scmp.lt.s32.totalorder %s7010_s8, %s7010_s8 }
  0x2e   : > { %p6903_p12 = scmp.lt.s32.totalorder %s6894_s15, %s6894_s15 }
  0x2f   : > { %p6897_p10 = pnand %p6895_p8, %p6851_p7 }
  0x30   : > { %p6904_p13 = por %p6903_p12, %p6902_p11 }
  0x31   : > { %p6898_p9 = pneg %p6897_p10 }
  0x33   : > { %p6905_p0 = pnand %p6904_p13, %p6898_p9 }
  0x35   : > { %6908 = shalt.err (!%p6905_p0)
}
  0x36   : > { %s6932_s16 = smov [#allocation9]   ;;  %226 = sbr.rel (%p6985_p3) target bundleno = 1795 (0x703), region = 40 }
  0x37   : > { %6783 = dma.vmem_to_smem (!%p7003_p5), %s7010_s8, 16, %s6932_s16, [#allocation10]  }
  0x3d   : > { %6914 = dma.done.wait (%p6784_p2), [#allocation5], 32  }
  0x3e   : > { %6916 = vsyncadd (%p6784_p2), [#allocation5], 4294967264 }
  0x3f   : > { %6918 = dma.done.wait (%p6784_p2), [#allocation7], 32  }
  0x40   : > { %6920 = vsyncadd (%p6784_p2), [#allocation7], 4294967264 }
  0x41   : > { %6922 = dma.done.wait (%p6784_p2), [#allocation10], 16  }
  0x42   : > { %6924 = vsyncadd (%p6784_p2), [#allocation10], 4294967280 }
  0x43   : > { %244 = sfence }
  0x44   : > { %p267_p3 = scmp.lt.s32.totalorder %s6980_s22, 1  ;;  %vm277_vm0 = vcmask 162816   ;;  %vm280_vm1 = vcmask 158720   ;;  %v11307_v0 = vmov 0.0   ;;  %s6934_s23 = smov 2   ;;  %vm313_vm2 = vcmask 146448  }
  0x45   : > { %278 = vst.msk [vmem:[#allocation2] sm:$0xff] %vm277_vm0, %v11307_v0  ;;  %279 = vst.msk [vmem:[#allocation2 + $0x8] sm:$0xff] %vm277_vm0, %v11307_v0  ;;  %s6132_s24 = sld [smem:[#allocation4 + $0x1c]]  ;;  %s6133_s25 = sld [smem:[#allocation4 + $0x1d]]  ;;  %vm2718_vm3 = vcmask 154632   ;;  %vm2721_vm4 = vcmask 148488  }
  0x46   : > { %282 = vst.msk [vmem:[#allocation2 + $0x18] sm:$0xff] %vm277_vm0, %v11307_v0  ;;  %283 = vst.msk [vmem:[#allocation2 + $0x20] sm:$0xff] %vm277_vm0, %v11307_v0  ;;  %s11607_s22 = smov (!%p267_p3, %s6980_s22), 1  ;;  %s6134_s26 = sld [smem:[#allocation4 + $0x1e]]  ;;  %vm6939_vm6 = vmmov 0   ;;  %vm5075_vm13 = vcmask 1042432  }
  0x47   : > { %285 = vst.msk [vmem:[#allocation2 + $0x30] sm:$0xff] %vm277_vm0, %v11307_v0  ;;  %286 = vst.msk [vmem:[#allocation2 + $0x38] sm:$0xff] %vm277_vm0, %v11307_v0  ;;  %s6486_s17 = sshll.u32 %s11607_s22, 6  ;;  %s6135_s27 = sld [smem:[#allocation4 + $0x1f]]  ;;  %vm5065_vm15 = vcmask 154624  }
  0x48   : > { %288 = vst.msk [vmem:[#allocation2 + $0x48] sm:$0xff] %vm277_vm0, %v11307_v0  ;;  %289 = vst.msk [vmem:[#allocation2 + $0x50] sm:$0xff] %vm277_vm0, %v11307_v0  ;;  %s271_s21 = scalar_lea.vmem %s11301_s0, %s6486_s17  ;;  %s6935_s28 = smov 127  }
  0x49   : > { %291 = vst.msk [vmem:[#allocation3] sm:$0xff] %vm277_vm0, %v11307_v0  ;;  %292 = vst.msk [vmem:[#allocation3 + $0x8] sm:$0xff] %vm277_vm0, %v11307_v0  ;;  %v303_v1 = vld [vmem:[%s271_s21] sm:$0xff]  ;;  %v6096_v2 = vld [vmem:[%s271_s21 + $0x10] sm:$0xff]  ;;  %s6108_s29 = sld [smem:[#allocation4 + $0x4]]  ;;  %s6109_s30 = sld [smem:[#allocation4 + $0x5]] }
  0x4a   : > { %294 = vst.msk [vmem:[#allocation3 + $0x18] sm:$0xff] %vm277_vm0, %v11307_v0  ;;  %295 = vst.msk [vmem:[#allocation3 + $0x20] sm:$0xff] %vm277_vm0, %v11307_v0  ;;  %307 = vrot.lane.b32.xlu0 %v303_v1, %s6934_s23  ;;  %321 = vrot.lane.b32.xlu1 %v6096_v2, %s6934_s23  ;;  %v304_v3 = vld [vmem:[%s271_s21 + $0x8] sm:$0xff]  ;;  %v6097_v4 = vld [vmem:[%s271_s21 + $0x18] sm:$0xff]  ;;  %s6110_s6 = sld [smem:[#allocation4 + $0x6]]  ;;  %s6111_s7 = sld [smem:[#allocation4 + $0x7]] }
  0x4b   : > { %297 = vst.msk [vmem:[#allocation3 + $0x30] sm:$0xff] %vm277_vm0, %v11307_v0  ;;  %298 = vst.msk [vmem:[#allocation3 + $0x38] sm:$0xff] %vm277_vm0, %v11307_v0  ;;  %v6098_v5 = vld [vmem:[%s271_s21 + $0x20] sm:$0xff]  ;;  %v6099_v6 = vld [vmem:[%s271_s21 + $0x28] sm:$0xff]  ;;  %v7123_v10 = vstv %s6132_s24  ;;  %v7125_v11 = vstv %s6133_s25  ;;  %s6112_s8 = sld [smem:[#allocation4 + $0x8]]  ;;  %s6113_s9 = sld [smem:[#allocation4 + $0x9]] }
  0x4c   : > { %300 = vst.msk [vmem:[#allocation3 + $0x48] sm:$0xff] %vm277_vm0, %v11307_v0  ;;  %301 = vst.msk [vmem:[#allocation3 + $0x50] sm:$0xff] %vm277_vm0, %v11307_v0  ;;  %v6100_v7 = vld [vmem:[%s271_s21 + $0x30] sm:$0xff]  ;;  %v6101_v8 = vld [vmem:[%s271_s21 + $0x38] sm:$0xff]  ;;  %v7131_v14 = vstv %s6134_s26  ;;  %s6114_s10 = sld [smem:[#allocation4 + $0xa]]  ;;  %s6936_s11 = smov 126  }
  0x4d   : > { %281 = vst.msk [vmem:[#allocation2 + $0x10] sm:$0xf] %vm280_vm1, %v11307_v0  ;;  %284 = vst.msk [vmem:[#allocation2 + $0x28] sm:$0xf] %vm280_vm1, %v11307_v0  ;;  %v7133_v15 = vstv %s6135_s27  ;;  %s6115_s12 = sld [smem:[#allocation4 + $0xb]]  ;;  %s6120_s13 = sld [smem:[#allocation4 + $0x10]] }
  0x4e   : > { %287 = vst.msk [vmem:[#allocation2 + $0x40] sm:$0xf] %vm280_vm1, %v11307_v0  ;;  %290 = vst.msk [vmem:[#allocation2 + $0x58] sm:$0xf] %vm280_vm1, %v11307_v0  ;;  %309 = vrot.lane.b32.xlu0 %v304_v3, %s6934_s23  ;;  %323 = vrot.lane.b32.xlu1 %v6097_v4, %s6934_s23  ;;  %s6121_s14 = sld [smem:[#allocation4 + $0x11]]  ;;  %s6122_s15 = sld [smem:[#allocation4 + $0x12]] }
  0x4f   : > { %293 = vst.msk [vmem:[#allocation3 + $0x10] sm:$0xf] %vm280_vm1, %v11307_v0  ;;  %296 = vst.msk [vmem:[#allocation3 + $0x28] sm:$0xf] %vm280_vm1, %v11307_v0  ;;  %v402_v22 = vstv %s6108_s29  ;;  %v422_v33 = vstv %s6109_s30  ;;  %s6123_s16 = sld [smem:[#allocation4 + $0x13]]  ;;  %s6124_s17 = sld [smem:[#allocation4 + $0x14]] }
  0x50   : > { %299 = vst.msk [vmem:[#allocation3 + $0x40] sm:$0xf] %vm280_vm1, %v11307_v0  ;;  %302 = vst.msk [vmem:[#allocation3 + $0x58] sm:$0xf] %vm280_vm1, %v11307_v0  ;;  %v442_v36 = vstv %s6110_s6  ;;  %v462_v41 = vstv %s6111_s7  ;;  %s6125_s19 = sld [smem:[#allocation4 + $0x15]]  ;;  %s6126_s20 = sld [smem:[#allocation4 + $0x16]] }
  0x51   : > { %v482_v44 = vstv %s6112_s8  ;;  %v502_v49 = vstv %s6113_s9  ;;  %s6127_s21 = sld [smem:[#allocation4 + $0x17]]  ;;  %s6137_s24 = sld [smem:[#allocation4 + $0x21]]  ;;  %vm5251_vm0 = vcmask 310272   ;;  %vm5254_vm1 = vcmask 305152  }
  0x52   : > { %335 = vrot.lane.b32.xlu0 %v6098_v5, %s6934_s23  ;;  %337 = vrot.lane.b32.xlu1 %v6099_v6, %s6934_s23  ;;  %v522_v52 = vstv %s6114_s10  ;;  %s6138_s25 = sld [smem:[#allocation4 + $0x22]]  ;;  %s6139_s26 = sld [smem:[#allocation4 + $0x23]] }
  0x53   : > { %v542_v57 = vstv %s6115_s12  ;;  %v597_v61 = vstv %s6120_s13  ;;  %s369_s27 = sld [smem:[#allocation4]]  ;;  %s6105_s6 = sld [smem:[#allocation4 + $0x1]] }
  0x54   : > { %v7121_v9 = vld [vmem:[#allocation2 + $0x12] sm:$0x3]  ;;  %v617_v5 = vstv %s6121_s14  ;;  %s6144_s29 = sld [smem:[#allocation4 + $0x28]]  ;;  %s6102_s7 = sld [smem:[#allocation6 + $0x1]] }
  0x55   : > { %v795_v12 = vmul.f32 %v7123_v10, %v7121_v9  ;;  %v815_v13 = vmul.f32 %v7125_v11, %v7121_v9  ;;  %v835_v16 = vmul.f32 %v7131_v14, %v7121_v9  ;;  %v855_v17 = vmul.f32 %v7133_v15, %v7121_v9  ;;  %s358_s30 = sld [smem:[#allocation6]]  ;;  %s7327_s8 = sld [smem:[#allocation4 + $0xc]] }
  0x56   : > { %349 = vrot.lane.b32.xlu0 %v6100_v7, %s6934_s23  ;;  %351 = vrot.lane.b32.xlu1 %v6101_v8, %s6934_s23  ;;  %v637_v8 = vstv %s6122_s15  ;;  %s6136_s23 = sld [smem:[#allocation4 + $0x20]]  ;;  %s7329_s9 = sld [smem:[#allocation6 + $0x2]] }
  0x57   : > { %s7331_s10 = sld [smem:[#allocation4 + $0x2]]  ;;  %s7339_s12 = sld [smem:[#allocation4 + $0x29]] }
  0x58   : > { %s7346_s13 = sld [smem:[#allocation6 + $0x3]]  ;;  %s7349_s14 = sld [smem:[#allocation4 + $0x2a]] }
  0x59   : > { %s7362_s15 = sld [smem:[#allocation4 + $0x3]] }
  0x5a   : > { %803 = vrot.lane.b32.xlu0 %v795_v12, %s6935_s28  ;;  %823 = vrot.lane.b32.xlu1 %v815_v13, %s6935_s28 }
  0x5e   : > { %843 = vrot.lane.b32.xlu0 %v835_v16, %s6935_s28  ;;  %863 = vrot.lane.b32.xlu1 %v855_v17, %s6935_s28 }
  0xbc   : > { %v308_v18 = vpop.permute.xlu0 %307  ;;  %v322_v19 = vpop.permute.xlu1 %321 }
  0xbd   : > { %314 = vst.msk [vmem:[#allocation2 + $0x2] sm:$0xff] %vm313_vm2, %v308_v18  ;;  %328 = vst.msk [vmem:[#allocation2 + $0x1a] sm:$0xff] %vm313_vm2, %v322_v19  ;;  %v657_v18 = vstv %s6123_s16  ;;  %s7367_s16 = sld [smem:[#allocation4 + $0xd]] }
  0xc0   : > { %v310_v20 = vpop.permute.xlu0 %309  ;;  %v324_v21 = vpop.permute.xlu1 %323 }
  0xc1   : > { %315 = vst.msk [vmem:[#allocation2 + $0xa] sm:$0xff] %vm313_vm2, %v310_v20  ;;  %329 = vst.msk [vmem:[#allocation2 + $0x22] sm:$0xff] %vm313_vm2, %v324_v21  ;;  %v677_v21 = vstv %s6124_s17  ;;  %s7389_s17 = sld [smem:[#allocation4 + $0x2b]] }
  0xc4   : > { %v7147_v23 = vld [vmem:[#allocation2] sm:$0xff]  ;;  %v336_v24 = vpop.permute.xlu0 %335  ;;  %v338_v25 = vpop.permute.xlu1 %337 }
  0xc5   : > { %v403_v26 = vmul.f32 %v402_v22, %v7147_v23  ;;  %342 = vst.msk [vmem:[#allocation2 + $0x32] sm:$0xff] %vm313_vm2, %v336_v24  ;;  %343 = vst.msk [vmem:[#allocation2 + $0x3a] sm:$0xff] %vm313_vm2, %v338_v25  ;;  %v423_v35 = vmul.f32 %v422_v33, %v7147_v23  ;;  %v443_v37 = vmul.f32 %v442_v36, %v7147_v23  ;;  %v7201_v60 = vld [vmem:[#allocation2 + $0x1] sm:$0xff] }
  0xc6   : > { %v463_v43 = vmul.f32 %v462_v41, %v7147_v23  ;;  %v483_v45 = vmul.f32 %v482_v44, %v7147_v23  ;;  %v503_v51 = vmul.f32 %v502_v49, %v7147_v23  ;;  %v523_v53 = vmul.f32 %v522_v52, %v7147_v23 }
  0xc7   : > { %409 = vrot.lane.b32.xlu0 %v403_v26, %s6935_s28  ;;  %v543_v59 = vmul.f32 %v542_v57, %v7147_v23  ;;  %v598_v62 = vmul.f32 %v597_v61, %v7201_v60  ;;  %v618_v7 = vmul.f32 %v617_v5, %v7201_v60  ;;  %v638_v12 = vmul.f32 %v637_v8, %v7201_v60 }
  0xc8   : > { %v7153_v27 = vld [vmem:[#allocation2 + $0x8] sm:$0xff]  ;;  %v7155_v28 = vld [vmem:[#allocation2 + $0x10] sm:$0x3]  ;;  %v350_v29 = vpop.permute.xlu0 %349  ;;  %v352_v30 = vpop.permute.xlu1 %351  ;;  %v658_v20 = vmul.f32 %v657_v18, %v7201_v60 }
  0xc9   : > { %v405_v31 = vmul.f32 %v402_v22, %v7155_v28  ;;  %v404_v32 = vmul.f32 %v402_v22, %v7153_v27  ;;  %356 = vst.msk [vmem:[#allocation2 + $0x4a] sm:$0xff] %vm313_vm2, %v350_v29  ;;  %357 = vst.msk [vmem:[#allocation2 + $0x52] sm:$0xff] %vm313_vm2, %v352_v30  ;;  %v424_v34 = vmul.f32 %v422_v33, %v7153_v27  ;;  %v7207_v1 = vld [vmem:[#allocation2 + $0x9] sm:$0xff]  ;;  %v7209_v2 = vld [vmem:[#allocation2 + $0x11] sm:$0x3]  ;;  %v697_v29 = vstv %s6125_s19  ;;  %s7391_s19 = sld [smem:[#allocation4 + $0xe]] }
  0xca   : > { %v425_v38 = vmul.f32 %v422_v33, %v7155_v28  ;;  %v445_v39 = vmul.f32 %v442_v36, %v7155_v28  ;;  %v444_v40 = vmul.f32 %v442_v36, %v7153_v27  ;;  %v464_v42 = vmul.f32 %v462_v41, %v7153_v27 }
  0xcb   : > { %413 = vrot.lane.b32.xlu0 %v405_v31, %s6935_s28  ;;  %411 = vrot.lane.b32.xlu1 %v404_v32, %s6935_s28  ;;  %v465_v46 = vmul.f32 %v462_v41, %v7155_v28  ;;  %v485_v47 = vmul.f32 %v482_v44, %v7155_v28  ;;  %v484_v48 = vmul.f32 %v482_v44, %v7153_v27  ;;  %v717_v32 = vstv %s6126_s20  ;;  %s7406_s20 = sld [smem:[#allocation4 + $0x2c]] }
  0xcc   : > { %v504_v50 = vmul.f32 %v502_v49, %v7153_v27  ;;  %v505_v54 = vmul.f32 %v502_v49, %v7155_v28  ;;  %v525_v55 = vmul.f32 %v522_v52, %v7155_v28  ;;  %v524_v56 = vmul.f32 %v522_v52, %v7153_v27 }
  0xcd   : > { %v544_v58 = vmul.f32 %v542_v57, %v7153_v27  ;;  %v545_v63 = vmul.f32 %v542_v57, %v7155_v28  ;;  %v600_v3 = vmul.f32 %v597_v61, %v7209_v2  ;;  %v599_v4 = vmul.f32 %v597_v61, %v7207_v1 }
  0xce   : > { %v619_v6 = vmul.f32 %v617_v5, %v7207_v1  ;;  %v620_v13 = vmul.f32 %v617_v5, %v7209_v2  ;;  %v640_v16 = vmul.f32 %v637_v8, %v7209_v2  ;;  %v639_v17 = vmul.f32 %v637_v8, %v7207_v1 }
  0xcf   : > { %431 = vrot.lane.b32.xlu0 %v424_v34, %s6935_s28  ;;  %429 = vrot.lane.b32.xlu1 %v423_v35, %s6935_s28  ;;  %v659_v19 = vmul.f32 %v657_v18, %v7207_v1  ;;  %v678_v22 = vmul.f32 %v677_v21, %v7201_v60  ;;  %v660_v24 = vmul.f32 %v657_v18, %v7209_v2  ;;  %v892_v57 = vstv %s6137_s24  ;;  %s6150_s24 = sld [smem:[#allocation4 + $0x2e]] }
  0xd0   : > { %v680_v25 = vmul.f32 %v677_v21, %v7209_v2  ;;  %v679_v26 = vmul.f32 %v677_v21, %v7207_v1  ;;  %v699_v30 = vmul.f32 %v697_v29, %v7207_v1  ;;  %v698_v31 = vmul.f32 %v697_v29, %v7201_v60  ;;  %v7341_v21 = vld [vmem:[#allocation2 + $0x18] sm:$0xff] }
  0xd1   : > { %v718_v33 = vmul.f32 %v717_v32, %v7201_v60  ;;  %v700_v34 = vmul.f32 %v697_v29, %v7209_v2  ;;  %v720_v35 = vmul.f32 %v717_v32, %v7209_v2  ;;  %v719_v36 = vmul.f32 %v717_v32, %v7207_v1 }
  0xd2   : > { %v378_v29 = vstv %s6105_s6  ;;  %s6129_s6 = sld [smem:[#allocation4 + $0x19]] }
  0xd3   : > { %449 = vrot.lane.b32.xlu0 %v443_v37, %s6935_s28  ;;  %433 = vrot.lane.b32.xlu1 %v425_v38, %s6935_s28  ;;  %v737_v37 = vstv %s6127_s21  ;;  %s7427_s21 = sld [smem:[#allocation4 + $0xf]] }
  0xd4   : > { %v739_v38 = vmul.f32 %v737_v37, %v7207_v1 }
  0xd7   : > { %453 = vrot.lane.b32.xlu0 %v445_v39, %s6935_s28  ;;  %451 = vrot.lane.b32.xlu1 %v444_v40, %s6935_s28  ;;  %v738_v39 = vmul.f32 %v737_v37, %v7201_v60  ;;  %v7255_v40 = vld [vmem:[#allocation2 + $0x2] sm:$0xff] }
  0xd8   : > { %v793_v41 = vmul.f32 %v7123_v10, %v7255_v40  ;;  %v893_v61 = vmul.f32 %v892_v57, %v7255_v40 }
  0xdb   : > { %471 = vrot.lane.b32.xlu0 %v464_v42, %s6935_s28  ;;  %469 = vrot.lane.b32.xlu1 %v463_v43, %s6935_s28  ;;  %v740_v42 = vmul.f32 %v737_v37, %v7209_v2  ;;  %v7262_v43 = vld [vmem:[#allocation2 + $0xa] sm:$0xff]  ;;  %v361_v37 = vstv %s6102_s7  ;;  %s6130_s7 = sld [smem:[#allocation4 + $0x1a]] }
  0xdc   : > { %v814_v44 = vmul.f32 %v7125_v11, %v7262_v43  ;;  %v834_v49 = vmul.f32 %v7131_v14, %v7262_v43 }
  0xdf   : > { %489 = vrot.lane.b32.xlu0 %v483_v45, %s6936_s11  ;;  %473 = vrot.lane.b32.xlu1 %v465_v46, %s6935_s28  ;;  %v794_v45 = vmul.f32 %v7123_v10, %v7262_v43  ;;  %v833_v46 = vmul.f32 %v7131_v14, %v7255_v40  ;;  %v854_v10 = vmul.f32 %v7133_v15, %v7262_v43 }
  0xe3   : > { %493 = vrot.lane.b32.xlu0 %v485_v47, %s6936_s11  ;;  %491 = vrot.lane.b32.xlu1 %v484_v48, %s6936_s11  ;;  %v813_v47 = vmul.f32 %v7125_v11, %v7255_v40  ;;  %v7276_v48 = vpop.permute.xlu0 %803 }
  0xe7   : > { %511 = vrot.lane.b32.xlu0 %v504_v50, %s6936_s11  ;;  %509 = vrot.lane.b32.xlu1 %v503_v51, %s6936_s11  ;;  %v7284_v50 = vpop.permute.xlu1 %823  ;;  %v872_v51 = vstv %s6136_s23  ;;  %v7288_v11 = vpop.permute.xlu0 %843  ;;  %s6149_s23 = sld [smem:[#allocation4 + $0x2d]] }
  0xe8   : > { %v873_v52 = vmul.f32 %v872_v51, %v7255_v40 }
  0xeb   : > { %529 = vrot.lane.b32.xlu0 %v523_v53, %s6936_s11  ;;  %513 = vrot.lane.b32.xlu1 %v505_v54, %s6936_s11  ;;  %v853_v53 = vmul.f32 %v7133_v15, %v7255_v40  ;;  %v7295_v14 = vpop.permute.xlu1 %863  ;;  %v875_v54 = vmul.f32 %v872_v51, %v7121_v9 }
  0xef   : > { %533 = vrot.lane.b32.xlu0 %v525_v55, %s6936_s11  ;;  %531 = vrot.lane.b32.xlu1 %v524_v56, %s6936_s11  ;;  %v874_v56 = vmul.f32 %v872_v51, %v7262_v43  ;;  %v1007_v51 = vstv %s7339_s12  ;;  %s6161_s12 = sld [smem:[#allocation4 + $0x39]] }
  0xf3   : > { %551 = vrot.lane.b32.xlu0 %v544_v58, %s6936_s11  ;;  %549 = vrot.lane.b32.xlu1 %v543_v59, %s6936_s11  ;;  %v894_v59 = vmul.f32 %v892_v57, %v7262_v43 }
  0xf7   : > { %604 = vrot.lane.b32.xlu0 %v598_v62, %s6935_s28  ;;  %553 = vrot.lane.b32.xlu1 %v545_v63, %s6936_s11  ;;  %v912_v62 = vstv %s6138_s25  ;;  %v895_v63 = vmul.f32 %v892_v57, %v7121_v9  ;;  %v7384_v57 = vstv %s7346_s13  ;;  %s6151_s25 = sld [smem:[#allocation4 + $0x2f]]  ;;  %s6162_s13 = sld [smem:[#allocation4 + $0x3a]] }
  0xf8   : > { %v913_v5 = vmul.f32 %v912_v62, %v7255_v40 }
  0xfb   : > { %608 = vrot.lane.b32.xlu0 %v600_v3, %s6935_s28  ;;  %606 = vrot.lane.b32.xlu1 %v599_v4, %s6935_s28 }
  0xff   : > { %626 = vrot.lane.b32.xlu0 %v619_v6, %s6935_s28  ;;  %624 = vrot.lane.b32.xlu1 %v618_v7, %s6935_s28  ;;  %v915_v6 = vmul.f32 %v912_v62, %v7121_v9 }
 0x103   : > { %644 = vrot.lane.b32.xlu0 %v638_v12, %s6935_s28  ;;  %628 = vrot.lane.b32.xlu1 %v620_v13, %s6935_s28  ;;  %v914_v12 = vmul.f32 %v912_v62, %v7262_v43  ;;  %v932_v13 = vstv %s6139_s26  ;;  %s6156_s26 = sld [smem:[#allocation4 + $0x34]] }
 0x107   : > { %648 = vrot.lane.b32.xlu0 %v640_v16, %s6935_s28  ;;  %646 = vrot.lane.b32.xlu1 %v639_v17, %s6935_s28  ;;  %v370_v16 = vstv %s369_s27  ;;  %s6128_s27 = sld [smem:[#allocation4 + $0x18]] }
 0x10b   : > { %666 = vrot.lane.b32.xlu0 %v659_v19, %s6935_s28  ;;  %664 = vrot.lane.b32.xlu1 %v658_v20, %s6935_s28  ;;  %v934_v19 = vmul.f32 %v932_v13, %v7262_v43  ;;  %v933_v20 = vmul.f32 %v932_v13, %v7255_v40 }
 0x10f   : > { %684 = vrot.lane.b32.xlu0 %v678_v22, %s6936_s11  ;;  %668 = vrot.lane.b32.xlu1 %v660_v24, %s6935_s28  ;;  %v371_v22 = vmul.f32 %v370_v16, %v7147_v23  ;;  %v987_v24 = vstv %s6144_s29  ;;  %s6157_s29 = sld [smem:[#allocation4 + $0x35]] }
 0x110   : > { %v988_v32 = vmul.f32 %v987_v24, %v7341_v21 }
 0x113   : > { %688 = vrot.lane.b32.xlu0 %v680_v25, %s6936_s11  ;;  %686 = vrot.lane.b32.xlu1 %v679_v26, %s6936_s11  ;;  %v359_v25 = vstv %s358_s30  ;;  %v935_v26 = vmul.f32 %v932_v13, %v7121_v9  ;;  %v373_v9 = vmul.f32 %v370_v16, %v7155_v28  ;;  %s6158_s30 = sld [smem:[#allocation4 + $0x36]] }
 0x117   : > { %706 = vrot.lane.b32.xlu0 %v699_v30, %s6936_s11  ;;  %704 = vrot.lane.b32.xlu1 %v698_v31, %s6936_s11 }
 0x11b   : > { %724 = vrot.lane.b32.xlu0 %v718_v33, %s6936_s11  ;;  %708 = vrot.lane.b32.xlu1 %v700_v34, %s6936_s11  ;;  %v7356_v33 = vld [vmem:[#allocation2 + $0x20] sm:$0xff]  ;;  %v7358_v34 = vld [vmem:[#allocation2 + $0x28] sm:$0x3] }
 0x11f   : > { %728 = vrot.lane.b32.xlu0 %v720_v35, %s6936_s11  ;;  %726 = vrot.lane.b32.xlu1 %v719_v36, %s6936_s11  ;;  %v374_v35 = vadd.f32 %v371_v22, %v359_v25  ;;  %v372_v36 = vmul.f32 %v370_v16, %v7153_v27 }
 0x123   : > { %746 = vrot.lane.b32.xlu0 %v739_v38, %s6936_s11  ;;  %744 = vrot.lane.b32.xlu1 %v738_v39, %s6936_s11  ;;  %v565_v38 = vstv %s7327_s8  ;;  %s6159_s8 = sld [smem:[#allocation4 + $0x37]] }
 0x127   : > { %799 = vrot.lane.b32.xlu0 %v793_v41, %s6935_s28  ;;  %748 = vrot.lane.b32.xlu1 %v740_v42, %s6936_s11  ;;  %v379_v41 = vmul.f32 %v378_v29, %v7147_v23  ;;  %v7372_v42 = vstv %s7329_s9  ;;  %s6160_s9 = sld [smem:[#allocation4 + $0x38]] }
 0x12b   : > { %821 = vrot.lane.b32.xlu0 %v814_v44, %s6935_s28  ;;  %801 = vrot.lane.b32.xlu1 %v794_v45, %s6935_s28  ;;  %v386_v44 = vstv %s7331_s10  ;;  %v380_v45 = vmul.f32 %v378_v29, %v7153_v27  ;;  %s6131_s10 = sld [smem:[#allocation4 + $0x1b]] }
 0x12f   : > { %839 = vrot.lane.b32.xlu0 %v833_v46, %s6935_s28  ;;  %819 = vrot.lane.b32.xlu1 %v813_v47, %s6935_s28 }
 0x133   : > { %861 = vrot.lane.b32.xlu0 %v854_v10, %s6935_s28  ;;  %841 = vrot.lane.b32.xlu1 %v834_v49, %s6935_s28  ;;  %v990_v10 = vmul.f32 %v987_v24, %v7358_v34  ;;  %v989_v49 = vmul.f32 %v987_v24, %v7356_v33 }
 0x137   : > { %879 = vrot.lane.b32.xlu0 %v873_v52, %s6936_s11  ;;  %859 = vrot.lane.b32.xlu1 %v853_v53, %s6935_s28  ;;  %v375_v52 = vadd.f32 %v372_v36, %v359_v25  ;;  %v376_v53 = vadd.f32 %v373_v9, %v359_v25  ;;  %v568_v25 = vmul.f32 %v565_v38, %v7209_v2 }
 0x139   : > { %v7298_v55 = vpop.permute.xlu0 %409 }
 0x13a   : > { %v418_v39 = vadd.f32 %v7298_v55, %v374_v35  ;;  %v566_v55 = vmul.f32 %v565_v38, %v7201_v60 }
 0x13b   : > { %883 = vrot.lane.b32.xlu0 %v875_v54, %s6936_s11  ;;  %881 = vrot.lane.b32.xlu1 %v874_v56, %s6936_s11  ;;  %v381_v56 = vmul.f32 %v378_v29, %v7155_v28  ;;  %v394_v29 = vstv %s7362_s15  ;;  %s6140_s15 = sld [smem:[#allocation4 + $0x24]] }
 0x13d   : > { %v7303_v58 = vpop.permute.xlu1 %411  ;;  %v7305_v15 = vpop.permute.xlu0 %413 }
 0x13e   : > { %v420_v62 = vadd.f32 %v7305_v15, %v376_v53  ;;  %v384_v15 = vadd.f32 %v381_v56, %v361_v37 }
 0x13f   : > { %901 = vrot.lane.b32.xlu0 %v894_v59, %s6936_s11  ;;  %899 = vrot.lane.b32.xlu1 %v893_v61, %s6936_s11  ;;  %v1027_v59 = vstv %s7349_s14  ;;  %v419_v61 = vadd.f32 %v7303_v58, %v375_v52  ;;  %v567_v58 = vmul.f32 %v565_v38, %v7207_v1  ;;  %v389_v38 = vmul.f32 %v386_v44, %v7155_v28  ;;  %s6163_s14 = sld [smem:[#allocation4 + $0x3b]] }
 0x141   : > { %v7312_v3 = vpop.permute.xlu1 %429  ;;  %v7314_v4 = vpop.permute.xlu0 %431 }
 0x143   : > { %919 = vrot.lane.b32.xlu0 %v913_v5, %s6936_s11  ;;  %903 = vrot.lane.b32.xlu1 %v895_v63, %s6936_s11  ;;  %v382_v63 = vadd.f32 %v379_v41, %v361_v37 }
 0x145   : > { %v7320_v7 = vpop.permute.xlu1 %433  ;;  %v7322_v8 = vpop.permute.xlu0 %449  ;;  %v438_v35 = vadd.f32 %v7312_v3, %v382_v63  ;;  %v392_v63 = vadd.f32 %v389_v38, %v7372_v42 }
 0x147   : > { %923 = vrot.lane.b32.xlu0 %v915_v6, %s6936_s11  ;;  %921 = vrot.lane.b32.xlu1 %v914_v12, %s6936_s11  ;;  %v383_v6 = vadd.f32 %v380_v45, %v361_v37  ;;  %v387_v12 = vmul.f32 %v386_v44, %v7147_v23 }
 0x149   : > { %v7333_v17 = vpop.permute.xlu1 %451  ;;  %v7335_v18 = vpop.permute.xlu0 %453  ;;  %v439_v36 = vadd.f32 %v7314_v4, %v383_v6  ;;  %v390_v37 = vadd.f32 %v387_v12, %v7372_v42 }
 0x14b   : > { %941 = vrot.lane.b32.xlu0 %v934_v19, %s6936_s11  ;;  %939 = vrot.lane.b32.xlu1 %v933_v20, %s6936_s11  ;;  %v1009_v19 = vmul.f32 %v1007_v51, %v7356_v33  ;;  %v1008_v20 = vmul.f32 %v1007_v51, %v7341_v21  ;;  %v458_v56 = vadd.f32 %v7322_v8, %v390_v37 }
 0x14d   : > { %v7351_v30 = vpop.permute.xlu1 %469  ;;  %v7353_v31 = vpop.permute.xlu0 %471 }
 0x14f   : > { %994 = vrot.lane.b32.xlu0 %v988_v32, %s6935_s28  ;;  %943 = vrot.lane.b32.xlu1 %v935_v26, %s6936_s11  ;;  %v388_v26 = vmul.f32 %v386_v44, %v7153_v27  ;;  %v573_v32 = vstv %s7367_s16  ;;  %v1047_v44 = vstv %s7389_s17  ;;  %s6168_s16 = sld [smem:[#allocation4 + $0x40]]  ;;  %s7642_s17 = sld [smem:[#allocation4 + $0x25]] }
 0x150   : > { %v574_v4 = vmul.f32 %v573_v32, %v7201_v60  ;;  %v575_v52 = vmul.f32 %v573_v32, %v7207_v1 }
 0x151   : > { %v7376_v46 = vpop.permute.xlu1 %473  ;;  %v490_v47 = vpop.permute.xlu0 %489  ;;  %v391_v53 = vadd.f32 %v388_v26, %v7372_v42  ;;  %v1067_v42 = vstv %s7406_s20  ;;  %s7661_s20 = sld [smem:[#allocation4 + $0x26]] }
 0x152   : > { %v498_v54 = vadd.f32 %v490_v47, %v418_v39  ;;  %v1028_v47 = vmul.f32 %v1027_v59, %v7341_v21 }
 0x153   : > { %998 = vrot.lane.b32.xlu0 %v990_v10, %s6935_s28  ;;  %996 = vrot.lane.b32.xlu1 %v989_v49, %s6935_s28  ;;  %v1010_v10 = vmul.f32 %v1007_v51, %v7358_v34  ;;  %v440_v51 = vadd.f32 %v7320_v7, %v384_v15  ;;  %v576_v7 = vmul.f32 %v573_v32, %v7209_v2 }
 0x154   : > { %v7395_v5 = vadd.f32 %v566_v55, %v498_v54  ;;  %v395_v54 = vmul.f32 %v394_v29, %v7147_v23  ;;  %v581_v55 = vstv %s7391_s19  ;;  %v396_v23 = vmul.f32 %v394_v29, %v7153_v27  ;;  %s7651_s19 = sld [smem:[#allocation4 + $0x41]] }
 0x155   : > { %v492_v13 = vpop.permute.xlu1 %491  ;;  %v494_v16 = vpop.permute.xlu0 %493  ;;  %v582_v8 = vmul.f32 %v581_v55, %v7201_v60  ;;  %v459_v27 = vadd.f32 %v7333_v17, %v391_v53  ;;  %v397_v15 = vmul.f32 %v394_v29, %v7155_v28  ;;  %v583_v17 = vmul.f32 %v581_v55, %v7207_v1 }
 0x156   : > { %v499_v22 = vadd.f32 %v492_v13, %v419_v61  ;;  %v500_v24 = vadd.f32 %v494_v16, %v420_v62  ;;  %v1030_v13 = vmul.f32 %v1027_v59, %v7358_v34  ;;  %v1029_v16 = vmul.f32 %v1027_v59, %v7356_v33 }
 0x157   : > { %1016 = vrot.lane.b32.xlu0 %v1009_v19, %s6935_s28  ;;  %1014 = vrot.lane.b32.xlu1 %v1008_v20, %s6935_s28 }
 0x158   : > { %v7411_v9 = vadd.f32 %v567_v58, %v499_v22  ;;  %v7413_v39 = vadd.f32 %v568_v25, %v500_v24  ;;  %v398_v22 = vadd.f32 %v395_v54, %v7384_v57  ;;  %v460_v24 = vadd.f32 %v7335_v18, %v392_v63 }
 0x159   : > { %v510_v41 = vpop.permute.xlu1 %509  ;;  %v512_v45 = vpop.permute.xlu0 %511  ;;  %v399_v25 = vadd.f32 %v396_v23, %v7384_v57  ;;  %v584_v18 = vmul.f32 %v581_v55, %v7209_v2  ;;  %v1069_v23 = vmul.f32 %v1067_v42, %v7356_v33 }
 0x15a   : > { %v518_v49 = vadd.f32 %v510_v41, %v438_v35  ;;  %v519_v3 = vadd.f32 %v512_v45, %v439_v36  ;;  %v1049_v35 = vmul.f32 %v1047_v44, %v7356_v33  ;;  %v1048_v36 = vmul.f32 %v1047_v44, %v7341_v21 }
 0x15b   : > { %1034 = vrot.lane.b32.xlu0 %v1028_v47, %s6935_s28  ;;  %1018 = vrot.lane.b32.xlu1 %v1010_v10, %s6935_s28  ;;  %v589_v41 = vstv %s7427_s21  ;;  %v478_v28 = vadd.f32 %v7351_v30, %v398_v22  ;;  %v479_v29 = vadd.f32 %v7353_v31, %v399_v25  ;;  %v400_v10 = vadd.f32 %v397_v15, %v7384_v57  ;;  %s7673_s21 = sld [smem:[#allocation4 + $0x42]] }
 0x15c   : > { %v7431_v61 = vadd.f32 %v574_v4, %v518_v49  ;;  %v7433_v62 = vadd.f32 %v575_v52, %v519_v3  ;;  %v1068_v4 = vmul.f32 %v1067_v42, %v7341_v21  ;;  %v1050_v52 = vmul.f32 %v1047_v44, %v7358_v34 }
 0x15d   : > { %v514_v6 = vpop.permute.xlu1 %513  ;;  %v530_v12 = vpop.permute.xlu0 %529  ;;  %v590_v55 = vmul.f32 %v589_v41, %v7201_v60  ;;  %v591_v30 = vmul.f32 %v589_v41, %v7207_v1  ;;  %v480_v31 = vadd.f32 %v7376_v46, %v400_v10  ;;  %v1070_v44 = vmul.f32 %v1067_v42, %v7358_v34  ;;  %v7521_v10 = vld [vmem:[#allocation2 + $0x29] sm:$0x3] }
 0x15e   : > { %v520_v19 = vadd.f32 %v514_v6, %v440_v51  ;;  %v538_v20 = vadd.f32 %v530_v12, %v458_v56  ;;  %v1087_v60 = vstv %s6149_s23  ;;  %v592_v1 = vmul.f32 %v589_v41, %v7209_v2  ;;  %s7701_s23 = sld [smem:[#allocation4 + $0x27]] }
 0x15f   : > { %1038 = vrot.lane.b32.xlu0 %v1030_v13, %s6935_s28  ;;  %1036 = vrot.lane.b32.xlu1 %v1029_v16, %s6935_s28  ;;  %v1089_v16 = vmul.f32 %v1087_v60, %v7356_v33  ;;  %v1090_v22 = vmul.f32 %v1087_v60, %v7358_v34  ;;  %v1127_v15 = vstv %s6151_s25  ;;  %s6172_s25 = sld [smem:[#allocation4 + $0x44]] }
 0x160   : > { %v7447_v58 = vadd.f32 %v576_v7, %v520_v19  ;;  %v7449_v59 = vadd.f32 %v582_v8, %v538_v20  ;;  %v1088_v19 = vmul.f32 %v1087_v60, %v7341_v21  ;;  %v1107_v20 = vstv %s6150_s24  ;;  %s7714_s24 = sld [smem:[#allocation4 + $0x43]] }
 0x161   : > { %v532_v26 = vpop.permute.xlu1 %531  ;;  %v534_v32 = vpop.permute.xlu0 %533  ;;  %v1108_v8 = vmul.f32 %v1107_v20, %v7341_v21  ;;  %v1109_v25 = vmul.f32 %v1107_v20, %v7356_v33  ;;  %v1130_v41 = vmul.f32 %v1127_v15, %v7358_v34 }
 0x162   : > { %v539_v37 = vadd.f32 %v532_v26, %v459_v27  ;;  %v540_v38 = vadd.f32 %v534_v32, %v460_v24  ;;  %v1110_v24 = vmul.f32 %v1107_v20, %v7358_v34 }
 0x163   : > { %1056 = vrot.lane.b32.xlu0 %v1049_v35, %s6935_s28  ;;  %1054 = vrot.lane.b32.xlu1 %v1048_v36, %s6935_s28  ;;  %v1128_v35 = vmul.f32 %v1127_v15, %v7341_v21  ;;  %v1129_v36 = vmul.f32 %v1127_v15, %v7356_v33 }
 0x164   : > { %v7462_v45 = vadd.f32 %v583_v17, %v539_v37  ;;  %v7464_v47 = vadd.f32 %v584_v18, %v540_v38  ;;  %v7509_v37 = vld [vmem:[#allocation2 + $0x19] sm:$0xff]  ;;  %v1182_v38 = vstv %s6156_s26  ;;  %s6173_s26 = sld [smem:[#allocation4 + $0x45]] }
 0x165   : > { %v550_v49 = vpop.permute.xlu1 %549  ;;  %v552_v3 = vpop.permute.xlu0 %551 }
 0x166   : > { %v558_v53 = vadd.f32 %v550_v49, %v478_v28  ;;  %v559_v54 = vadd.f32 %v552_v3, %v479_v29  ;;  %v1183_v28 = vmul.f32 %v1182_v38, %v7509_v37  ;;  %v7519_v29 = vld [vmem:[#allocation2 + $0x21] sm:$0xff]  ;;  %v7525_v49 = vstv %s6128_s27  ;;  %s6174_s27 = sld [smem:[#allocation4 + $0x46]] }
 0x167   : > { %1074 = vrot.lane.b32.xlu0 %v1068_v4, %s6936_s11  ;;  %1058 = vrot.lane.b32.xlu1 %v1050_v52, %s6935_s28 }
 0x168   : > { %v7474_v57 = vadd.f32 %v590_v55, %v558_v53  ;;  %v7476_v51 = vadd.f32 %v591_v30, %v559_v54  ;;  %v1184_v53 = vmul.f32 %v1182_v38, %v7519_v29  ;;  %v1185_v54 = vmul.f32 %v1182_v38, %v7521_v10 }
 0x169   : > { %v554_v56 = vpop.permute.xlu1 %553  ;;  %v605_v63 = vpop.permute.xlu0 %604  ;;  %v1202_v30 = vstv %s6157_s29  ;;  %s6175_s29 = sld [smem:[#allocation4 + $0x47]] }
 0x16a   : > { %v560_v6 = vadd.f32 %v554_v56, %v480_v31  ;;  %v613_v3 = vadd.f32 %v605_v63, %v7395_v5  ;;  %v761_v31 = vmul.f32 %v7525_v49, %v7255_v40 }
 0x16b   : > { %1078 = vrot.lane.b32.xlu0 %v1070_v44, %s6936_s11  ;;  %1076 = vrot.lane.b32.xlu1 %v1069_v23, %s6936_s11  ;;  %v1203_v23 = vmul.f32 %v1202_v30, %v7509_v37 }
 0x16c   : > { %v7483_v12 = vadd.f32 %v592_v1, %v560_v6  ;;  %v1204_v6 = vmul.f32 %v1202_v30, %v7519_v29  ;;  %v1222_v1 = vstv %s6158_s30  ;;  %s6152_s30 = sld [smem:[#allocation4 + $0x30]] }
 0x16d   : > { %v607_v46 = vpop.permute.xlu1 %606  ;;  %v7485_v13 = vpop.permute.xlu0 %608 }
 0x16e   : > { %v614_v56 = vadd.f32 %v607_v46, %v7411_v9  ;;  %v7547_v9 = vstv %s6129_s6  ;;  %s6180_s6 = sld [smem:[#allocation4 + $0x4c]] }
 0x16f   : > { %1096 = vrot.lane.b32.xlu0 %v1089_v16, %s6936_s11  ;;  %1094 = vrot.lane.b32.xlu1 %v1088_v19, %s6936_s11  ;;  %v762_v16 = vmul.f32 %v7525_v49, %v7262_v43  ;;  %v769_v38 = vmul.f32 %v7547_v9, %v7255_v40 }
 0x171   : > { %v625_v2 = vpop.permute.xlu1 %624  ;;  %v627_v7 = vpop.permute.xlu0 %626 }
 0x172   : > { %v633_v46 = vadd.f32 %v625_v2, %v7431_v61  ;;  %v634_v19 = vadd.f32 %v627_v7, %v7433_v62  ;;  %v7561_v61 = vstv %s6130_s7  ;;  %s7796_s7 = sld [smem:[#allocation4 + $0x31]] }
 0x173   : > { %1114 = vrot.lane.b32.xlu0 %v1108_v8, %s6936_s11  ;;  %1098 = vrot.lane.b32.xlu1 %v1090_v22, %s6936_s11 }
 0x175   : > { %v7495_v42 = vpop.permute.xlu1 %628  ;;  %v7497_v27 = vpop.permute.xlu0 %644 }
 0x176   : > { %v653_v62 = vadd.f32 %v7497_v27, %v7449_v59 }
 0x177   : > { %1118 = vrot.lane.b32.xlu0 %v1110_v24, %s6936_s11  ;;  %1116 = vrot.lane.b32.xlu1 %v1109_v25, %s6936_s11  ;;  %v1205_v24 = vmul.f32 %v1202_v30, %v7521_v10  ;;  %v1223_v25 = vmul.f32 %v1222_v1, %v7509_v37 }
 0x179   : > { %v7503_v26 = vpop.permute.xlu1 %646  ;;  %v7505_v32 = vpop.permute.xlu0 %648 }
 0x17a   : > { %v654_v59 = vadd.f32 %v7503_v26, %v7462_v45  ;;  %v7589_v45 = vstv %s6131_s10  ;;  %s7818_s10 = sld [smem:[#allocation4 + $0x4e]] }
 0x17b   : > { %1134 = vrot.lane.b32.xlu1 %v1128_v35, %s6936_s11  ;;  %1136 = vrot.lane.b32.xlu0 %v1129_v36, %s6936_s11  ;;  %v770_v36 = vmul.f32 %v7547_v9, %v7262_v43 }
 0x17d   : > { %v7513_v17 = vpop.permute.xlu1 %664  ;;  %v7515_v18 = vpop.permute.xlu0 %666 }
 0x17e   : > { %v673_v26 = vadd.f32 %v7513_v17, %v7474_v57  ;;  %v785_v57 = vmul.f32 %v7589_v45, %v7255_v40 }
 0x17f   : > { %1138 = vrot.lane.b32.xlu1 %v1130_v41, %s6936_s11  ;;  %1189 = vrot.lane.b32.xlu0 %v1183_v28, %s6935_s28 }
 0x181   : > { %v7528_v4 = vpop.permute.xlu1 %668  ;;  %v685_v52 = vpop.permute.xlu0 %684 }
 0x182   : > { %v693_v55 = vadd.f32 %v685_v52, %v613_v3  ;;  %v1224_v3 = vmul.f32 %v1222_v1, %v7519_v29  ;;  %v1225_v52 = vmul.f32 %v1222_v1, %v7521_v10  ;;  %v674_v1 = vadd.f32 %v7515_v18, %v7476_v51 }
 0x183   : > { %1191 = vrot.lane.b32.xlu1 %v1184_v53, %s6935_s28  ;;  %1193 = vrot.lane.b32.xlu0 %v1185_v54, %s6935_s28  ;;  %v1242_v54 = vstv %s6159_s8  ;;  %s7803_s8 = sld [smem:[#allocation4 + $0x4d]] }
 0x184   : > { %v7537_v5 = vadd.f32 %v761_v31, %v693_v55  ;;  %v777_v55 = vmul.f32 %v7561_v61, %v7255_v40 }
 0x185   : > { %v687_v63 = vpop.permute.xlu1 %686  ;;  %v7539_v44 = vpop.permute.xlu0 %688 }
 0x186   : > { %v694_v60 = vadd.f32 %v687_v63, %v614_v56  ;;  %v1243_v56 = vmul.f32 %v1242_v54, %v7509_v37  ;;  %v1244_v63 = vmul.f32 %v1242_v54, %v7519_v29 }
 0x187   : > { %1209 = vrot.lane.b32.xlu1 %v1203_v23, %s6935_s28  ;;  %1211 = vrot.lane.b32.xlu0 %v1204_v6, %s6935_s28  ;;  %v1262_v6 = vstv %s6160_s9  ;;  %s7811_s9 = sld [smem:[#allocation4 + $0x32]] }
 0x188   : > { %v7551_v20 = vadd.f32 %v762_v16, %v694_v60  ;;  %v778_v60 = vmul.f32 %v7561_v61, %v7262_v43 }
 0x189   : > { %v705_v8 = vpop.permute.xlu1 %704  ;;  %v707_v22 = vpop.permute.xlu0 %706 }
 0x18a   : > { %v713_v15 = vadd.f32 %v705_v8, %v633_v46  ;;  %v714_v35 = vadd.f32 %v707_v22, %v634_v19  ;;  %v1245_v8 = vmul.f32 %v1242_v54, %v7521_v10  ;;  %v1263_v22 = vmul.f32 %v1262_v6, %v7509_v37 }
 0x18b   : > { %1213 = vrot.lane.b32.xlu1 %v1205_v24, %s6935_s28  ;;  %1229 = vrot.lane.b32.xlu0 %v1223_v25, %s6935_s28 }
 0x18c   : > { %v7565_v2 = vadd.f32 %v770_v36, %v714_v35  ;;  %v7567_v7 = vadd.f32 %v769_v38, %v713_v15  ;;  %v786_v15 = vmul.f32 %v7589_v45, %v7262_v43  ;;  %v1264_v36 = vmul.f32 %v1262_v6, %v7519_v29 }
 0x18d   : > { %v7569_v41 = vpop.permute.xlu1 %708  ;;  %v725_v28 = vpop.permute.xlu0 %724  ;;  %v1265_v38 = vmul.f32 %v1262_v6, %v7521_v10 }
 0x18e   : > { %v733_v53 = vadd.f32 %v725_v28, %v653_v62  ;;  %v1282_v62 = vstv %s6161_s12  ;;  %s7843_s12 = sld [smem:[#allocation4 + $0x33]] }
 0x18f   : > { %1231 = vrot.lane.b32.xlu1 %v1224_v3, %s6935_s28  ;;  %1233 = vrot.lane.b32.xlu0 %v1225_v52, %s6935_s28  ;;  %v1283_v28 = vmul.f32 %v1282_v62, %v7509_v37  ;;  %v1284_v3 = vmul.f32 %v1282_v62, %v7519_v29  ;;  %v1302_v52 = vstv %s6162_s13  ;;  %s7856_s13 = sld [smem:[#allocation4 + $0x4f]] }
 0x190   : > { %v7579_v27 = vadd.f32 %v777_v55, %v733_v53  ;;  %v1285_v55 = vmul.f32 %v1282_v62, %v7521_v10 }
 0x191   : > { %v727_v30 = vpop.permute.xlu1 %726  ;;  %v7581_v31 = vpop.permute.xlu0 %728 }
 0x192   : > { %v734_v23 = vadd.f32 %v727_v30, %v654_v59  ;;  %v1303_v59 = vmul.f32 %v1302_v52, %v7509_v37  ;;  %v615_v30 = vadd.f32 %v7485_v13, %v7413_v39  ;;  %v1305_v39 = vmul.f32 %v1302_v52, %v7521_v10 }
 0x193   : > { %1249 = vrot.lane.b32.xlu1 %v1243_v56, %s6935_s28  ;;  %1251 = vrot.lane.b32.xlu0 %v1244_v63, %s6935_s28  ;;  %v7629_v56 = vld [vmem:[#allocation2 + $0x12] sm:$0x3]  ;;  %v1322_v13 = vstv %s6163_s14  ;;  %s6184_s14 = sld [smem:[#allocation4 + $0x50]] }
 0x194   : > { %v7595_v16 = vadd.f32 %v778_v60, %v734_v23  ;;  %v763_v63 = vmul.f32 %v7629_v56, %v7525_v49  ;;  %v695_v23 = vadd.f32 %v7539_v44, %v615_v30  ;;  %v635_v44 = vadd.f32 %v7495_v42, %v7447_v58  ;;  %v7663_v42 = vld [vmem:[#allocation2 + $0x2a] sm:$0x3] }
 0x195   : > { %v745_v46 = vpop.permute.xlu1 %744  ;;  %v747_v19 = vpop.permute.xlu0 %746 }
 0x196   : > { %v753_v24 = vadd.f32 %v745_v46, %v673_v26  ;;  %v754_v25 = vadd.f32 %v747_v19, %v674_v1  ;;  %v1304_v26 = vmul.f32 %v1302_v52, %v7519_v29  ;;  %v955_v1 = vstv %s6140_s15  ;;  %s6185_s15 = sld [smem:[#allocation4 + $0x51]] }
 0x197   : > { %1253 = vrot.lane.b32.xlu1 %v1245_v8, %s6935_s28  ;;  %1269 = vrot.lane.b32.xlu0 %v1263_v22, %s6936_s11  ;;  %v766_v46 = vadd.f32 %v763_v63, %v695_v23  ;;  %v1323_v22 = vmul.f32 %v1322_v13, %v7509_v37  ;;  %v715_v58 = vadd.f32 %v7569_v41, %v635_v44  ;;  %v963_v23 = vstv %s7642_s17  ;;  %s6187_s17 = sld [smem:[#allocation4 + $0x53]] }
 0x198   : > { %v7605_v51 = vadd.f32 %v786_v15, %v754_v25  ;;  %v7607_v17 = vadd.f32 %v785_v57, %v753_v24  ;;  %v1324_v24 = vmul.f32 %v1322_v13, %v7519_v29  ;;  %v7653_v25 = vld [vmem:[#allocation2 + $0x1a] sm:$0xff]  ;;  %v1377_v57 = vstv %s6168_s16  ;;  %s6186_s16 = sld [smem:[#allocation4 + $0x52]] }
 0x199   : > { %v7609_v18 = vpop.permute.xlu1 %748  ;;  %v800_v35 = vpop.permute.xlu0 %799  ;;  %v1378_v52 = vmul.f32 %v1377_v57, %v7653_v25  ;;  %v1380_v63 = vmul.f32 %v1377_v57, %v7663_v42 }
 0x19a   : > { %v808_v49 = vadd.f32 %v800_v35, %v7537_v5  ;;  %v771_v5 = vmul.f32 %v7629_v56, %v7547_v9 }
 0x19b   : > { %1271 = vrot.lane.b32.xlu1 %v1264_v36, %s6936_s11  ;;  %1273 = vrot.lane.b32.xlu0 %v1265_v38, %s6936_s11  ;;  %v956_v36 = vmul.f32 %v955_v1, %v7341_v21  ;;  %v810_v38 = vadd.f32 %v7276_v48, %v766_v46  ;;  %v779_v48 = vmul.f32 %v7629_v56, %v7561_v61 }
 0x19d   : > { %v802_v40 = vpop.permute.xlu1 %801  ;;  %v7615_v43 = vpop.permute.xlu0 %821 }
 0x19e   : > { %v809_v35 = vadd.f32 %v802_v40, %v7551_v20 }
 0x19f   : > { %1289 = vrot.lane.b32.xlu1 %v1283_v28, %s6936_s11  ;;  %1291 = vrot.lane.b32.xlu0 %v1284_v3, %s6936_s11  ;;  %v655_v28 = vadd.f32 %v7505_v32, %v7464_v47  ;;  %v1325_v3 = vmul.f32 %v1322_v13, %v7521_v10  ;;  %v958_v47 = vmul.f32 %v955_v1, %v7358_v34 }
 0x1a0   : > { %v774_v32 = vadd.f32 %v771_v5, %v715_v58 }
 0x1a1   : > { %v820_v53 = vpop.permute.xlu1 %819  ;;  %v7621_v54 = vpop.permute.xlu0 %839  ;;  %v735_v30 = vadd.f32 %v7581_v31, %v655_v28 }
 0x1a2   : > { %v828_v61 = vadd.f32 %v820_v53, %v7567_v7  ;;  %v971_v7 = vstv %s7661_s20  ;;  %v848_v53 = vadd.f32 %v7621_v54, %v7579_v27  ;;  %v966_v27 = vmul.f32 %v963_v23, %v7358_v34  ;;  %s6192_s20 = sld [smem:[#allocation4 + $0x58]] }
 0x1a3   : > { %1293 = vrot.lane.b32.xlu1 %v1285_v55, %s6936_s11  ;;  %1309 = vrot.lane.b32.xlu0 %v1303_v59, %s6936_s11  ;;  %v957_v55 = vmul.f32 %v955_v1, %v7356_v33  ;;  %v7676_v59 = vld [vmem:[#allocation2 + $0x22] sm:$0xff]  ;;  %v972_v54 = vmul.f32 %v971_v7, %v7341_v21 }
 0x1a4   : > { %v1379_v31 = vmul.f32 %v1377_v57, %v7676_v59 }
 0x1a5   : > { %v7634_v6 = vpop.permute.xlu1 %841  ;;  %v7636_v60 = vpop.permute.xlu0 %861 }
 0x1a7   : > { %1311 = vrot.lane.b32.xlu1 %v1304_v26, %s6936_s11  ;;  %1313 = vrot.lane.b32.xlu0 %v1305_v39, %s6936_s11  ;;  %v829_v26 = vadd.f32 %v7615_v43, %v7565_v2  ;;  %v830_v2 = vadd.f32 %v7284_v50, %v774_v32  ;;  %v782_v43 = vadd.f32 %v779_v48, %v735_v30 }
 0x1a8   : > { %v974_v32 = vmul.f32 %v971_v7, %v7358_v34  ;;  %v869_v30 = vadd.f32 %v7636_v60, %v7605_v51 }
 0x1a9   : > { %v7647_v19 = vpop.permute.xlu1 %859  ;;  %v880_v8 = vpop.permute.xlu0 %879 }
 0x1aa   : > { %v888_v15 = vadd.f32 %v880_v8, %v808_v49  ;;  %v1397_v49 = vstv %s7651_s19  ;;  %s6164_s19 = sld [smem:[#allocation4 + $0x3c]] }
 0x1ab   : > { %1329 = vrot.lane.b32.xlu1 %v1323_v22, %s6936_s11  ;;  %1331 = vrot.lane.b32.xlu0 %v1324_v24, %s6936_s11  ;;  %v964_v22 = vmul.f32 %v963_v23, %v7341_v21  ;;  %v965_v24 = vmul.f32 %v963_v23, %v7356_v33  ;;  %v1399_v50 = vmul.f32 %v1397_v49, %v7676_v59 }
 0x1ac   : > { %v7667_v62 = vadd.f32 %v956_v36, %v888_v15  ;;  %v675_v36 = vadd.f32 %v7528_v4, %v7483_v12  ;;  %v1400_v4 = vmul.f32 %v1397_v49, %v7663_v42 }
 0x1ad   : > { %v882_v9 = vpop.permute.xlu1 %881  ;;  %v884_v41 = vpop.permute.xlu0 %883 }
 0x1ae   : > { %v889_v20 = vadd.f32 %v882_v9, %v809_v35  ;;  %v890_v40 = vadd.f32 %v884_v41, %v810_v38  ;;  %v1398_v35 = vmul.f32 %v1397_v49, %v7653_v25  ;;  %v1417_v38 = vstv %s7673_s21  ;;  %s6165_s21 = sld [smem:[#allocation4 + $0x3d]] }
 0x1af   : > { %1333 = vrot.lane.b32.xlu1 %v1325_v3, %s6936_s11  ;;  %1384 = vrot.lane.b32.xlu0 %v1378_v52, %s6935_s28  ;;  %v787_v41 = vmul.f32 %v7629_v56, %v7589_v45  ;;  %v755_v12 = vadd.f32 %v7609_v18, %v675_v36  ;;  %v849_v3 = vadd.f32 %v7634_v6, %v7595_v16  ;;  %v979_v6 = vstv %s7701_s23  ;;  %s6193_s23 = sld [smem:[#allocation4 + $0x59]] }
 0x1b0   : > { %v7689_v39 = vadd.f32 %v957_v55, %v889_v20  ;;  %v7691_v13 = vadd.f32 %v958_v47, %v890_v40  ;;  %v850_v52 = vadd.f32 %v7288_v11, %v782_v43  ;;  %v1418_v18 = vmul.f32 %v1417_v38, %v7653_v25 }
 0x1b1   : > { %v900_v1 = vpop.permute.xlu1 %899  ;;  %v902_v46 = vpop.permute.xlu0 %901  ;;  %v973_v47 = vmul.f32 %v971_v7, %v7356_v33  ;;  %v790_v16 = vadd.f32 %v787_v41, %v755_v12  ;;  %v1420_v11 = vmul.f32 %v1417_v38, %v7663_v42  ;;  %v1497_v12 = vstv %s6174_s27  ;;  %s6195_s27 = sld [smem:[#allocation4 + $0x5b]] }
 0x1b2   : > { %v908_v44 = vadd.f32 %v900_v1, %v828_v61  ;;  %v909_v8 = vadd.f32 %v902_v46, %v829_v26  ;;  %v1419_v46 = vmul.f32 %v1417_v38, %v7676_v59 }
 0x1b3   : > { %1386 = vrot.lane.b32.xlu1 %v1379_v31, %s6935_s28  ;;  %1388 = vrot.lane.b32.xlu0 %v1380_v63, %s6935_s28  ;;  %v868_v63 = vadd.f32 %v7647_v19, %v7607_v17  ;;  %v1437_v31 = vstv %s7714_s24  ;;  %v870_v51 = vadd.f32 %v7295_v14, %v790_v16  ;;  %s6166_s24 = sld [smem:[#allocation4 + $0x3e]] }
 0x1b4   : > { %v7705_v15 = vadd.f32 %v964_v22, %v908_v44  ;;  %v7707_v57 = vadd.f32 %v965_v24, %v909_v8  ;;  %v980_v8 = vmul.f32 %v979_v6, %v7341_v21  ;;  %v981_v22 = vmul.f32 %v979_v6, %v7356_v33 }
 0x1b5   : > { %v904_v5 = vpop.permute.xlu1 %903  ;;  %v920_v58 = vpop.permute.xlu0 %919  ;;  %v1439_v7 = vmul.f32 %v1437_v31, %v7676_v59  ;;  %v1457_v21 = vstv %s6172_s25  ;;  %v982_v33 = vmul.f32 %v979_v6, %v7358_v34  ;;  %v1440_v14 = vmul.f32 %v1437_v31, %v7663_v42  ;;  %s6194_s25 = sld [smem:[#allocation4 + $0x5a]] }
 0x1b6   : > { %v910_v28 = vadd.f32 %v904_v5, %v830_v2  ;;  %v928_v9 = vadd.f32 %v920_v58, %v848_v53  ;;  %v1438_v2 = vmul.f32 %v1437_v31, %v7653_v25  ;;  %v1458_v58 = vmul.f32 %v1457_v21, %v7653_v25 }
 0x1b7   : > { %1404 = vrot.lane.b32.xlu1 %v1398_v35, %s6935_s28  ;;  %1406 = vrot.lane.b32.xlu0 %v1399_v50, %s6935_s28  ;;  %v1460_v35 = vmul.f32 %v1457_v21, %v7663_v42  ;;  %v1459_v38 = vmul.f32 %v1457_v21, %v7676_v59 }
 0x1b8   : > { %v7727_v55 = vadd.f32 %v966_v27, %v910_v28  ;;  %v7729_v48 = vadd.f32 %v972_v54, %v928_v9  ;;  %v1477_v28 = vstv %s6173_s26  ;;  %s6167_s26 = sld [smem:[#allocation4 + $0x3f]] }
 0x1b9   : > { %v922_v20 = vpop.permute.xlu1 %921  ;;  %v924_v45 = vpop.permute.xlu0 %923  ;;  %v1478_v54 = vmul.f32 %v1477_v28, %v7653_v25  ;;  %v1479_v41 = vmul.f32 %v1477_v28, %v7676_v59 }
 0x1ba   : > { %v929_v56 = vadd.f32 %v922_v20, %v849_v3  ;;  %v930_v40 = vadd.f32 %v924_v45, %v850_v52  ;;  %v1498_v20 = vmul.f32 %v1497_v12, %v7653_v25  ;;  %v1500_v45 = vmul.f32 %v1497_v12, %v7663_v42 }
 0x1bb   : > { %1408 = vrot.lane.b32.xlu1 %v1400_v4, %s6935_s28  ;;  %1424 = vrot.lane.b32.xlu0 %v1418_v18, %s6935_s28  ;;  %v1480_v4 = vmul.f32 %v1477_v28, %v7663_v42 }
 0x1bc   : > { %v7742_v23 = vadd.f32 %v973_v47, %v929_v56  ;;  %v7744_v26 = vadd.f32 %v974_v32, %v930_v40  ;;  %v1499_v40 = vmul.f32 %v1497_v12, %v7676_v59  ;;  %v1517_v47 = vstv %s6175_s29  ;;  %s6196_s29 = sld [smem:[#allocation4 + $0x5c]] }
 0x1bd   : > { %v940_v61 = vpop.permute.xlu1 %939  ;;  %v942_v1 = vpop.permute.xlu0 %941  ;;  %v1150_v32 = vstv %s6152_s30  ;;  %s6197_s30 = sld [smem:[#allocation4 + $0x5d]] }
 0x1be   : > { %v948_v49 = vadd.f32 %v940_v61, %v868_v63  ;;  %v949_v44 = vadd.f32 %v942_v1, %v869_v30  ;;  %v1518_v30 = vmul.f32 %v1517_v47, %v7653_v25  ;;  %v1519_v63 = vmul.f32 %v1517_v47, %v7676_v59  ;;  %v7805_v61 = vld [vmem:[#allocation2 + $0x30] sm:$0xff] }
 0x1bf   : > { %1426 = vrot.lane.b32.xlu1 %v1419_v46, %s6935_s28  ;;  %1428 = vrot.lane.b32.xlu0 %v1420_v11, %s6935_s28  ;;  %v1572_v46 = vstv %s6180_s6  ;;  %v1151_v31 = vmul.f32 %v1150_v32, %v7509_v37  ;;  %v1152_v21 = vmul.f32 %v1150_v32, %v7519_v29  ;;  %s6198_s6 = sld [smem:[#allocation4 + $0x5e]] }
 0x1c0   : > { %v7753_v17 = vadd.f32 %v980_v8, %v948_v49  ;;  %v7755_v60 = vadd.f32 %v981_v22, %v949_v44 }
 0x1c1   : > { %v944_v19 = vpop.permute.xlu1 %943  ;;  %v995_v24 = vpop.permute.xlu0 %994 }
 0x1c2   : > { %v950_v43 = vadd.f32 %v944_v19, %v870_v51  ;;  %v1003_v16 = vadd.f32 %v995_v24, %v7667_v62  ;;  %v1520_v62 = vmul.f32 %v1517_v47, %v7663_v42  ;;  %v1573_v19 = vmul.f32 %v1572_v46, %v7805_v61  ;;  %v7820_v24 = vld [vmem:[#allocation2 + $0x38] sm:$0xff] }
 0x1c3   : > { %1444 = vrot.lane.b32.xlu1 %v1438_v2, %s6935_s28  ;;  %1446 = vrot.lane.b32.xlu0 %v1439_v7, %s6935_s28  ;;  %v7822_v2 = vld [vmem:[#allocation2 + $0x40] sm:$0x3] }
 0x1c4   : > { %v7763_v53 = vadd.f32 %v982_v33, %v950_v43  ;;  %v1575_v28 = vmul.f32 %v1572_v46, %v7822_v2 }
 0x1c5   : > { %v997_v36 = vpop.permute.xlu1 %996  ;;  %v999_v5 = vpop.permute.xlu0 %998 }
 0x1c6   : > { %v1004_v49 = vadd.f32 %v997_v36, %v7689_v39  ;;  %v1005_v44 = vadd.f32 %v999_v5, %v7691_v13  ;;  %v1153_v39 = vmul.f32 %v1150_v32, %v7521_v10  ;;  %v1158_v13 = vstv %s7796_s7  ;;  %s6199_s7 = sld [smem:[#allocation4 + $0x5f]] }
 0x1c7   : > { %1448 = vrot.lane.b32.xlu1 %v1440_v14, %s6935_s28  ;;  %1464 = vrot.lane.b32.xlu0 %v1458_v58, %s6936_s11 }
 0x1c9   : > { %v1015_v34 = vpop.permute.xlu1 %1014  ;;  %v1017_v50 = vpop.permute.xlu0 %1016 }
 0x1ca   : > { %v1023_v33 = vadd.f32 %v1015_v34, %v7705_v15  ;;  %v1024_v14 = vadd.f32 %v1017_v50, %v7707_v57  ;;  %v1160_v15 = vmul.f32 %v1158_v13, %v7519_v29  ;;  %v1166_v57 = vstv %s7811_s9  ;;  %s6204_s9 = sld [smem:[#allocation4 + $0x64]] }
 0x1cb   : > { %1466 = vrot.lane.b32.xlu1 %v1459_v38, %s6936_s11  ;;  %1468 = vrot.lane.b32.xlu0 %v1460_v35, %s6936_s11  ;;  %v1574_v38 = vmul.f32 %v1572_v46, %v7820_v24 }
 0x1cd   : > { %v7772_v9 = vpop.permute.xlu1 %1018  ;;  %v7774_v27 = vpop.permute.xlu0 %1034 }
 0x1ce   : > { %v1025_v34 = vadd.f32 %v7772_v9, %v7727_v55  ;;  %v1043_v50 = vadd.f32 %v7774_v27, %v7729_v48  ;;  %v1161_v55 = vmul.f32 %v1158_v13, %v7521_v10  ;;  %v1167_v9 = vmul.f32 %v1166_v57, %v7509_v37 }
 0x1cf   : > { %1484 = vrot.lane.b32.xlu1 %v1478_v54, %s6936_s11  ;;  %1486 = vrot.lane.b32.xlu0 %v1479_v41, %s6936_s11  ;;  %v1592_v54 = vstv %s7803_s8  ;;  %s6176_s8 = sld [smem:[#allocation4 + $0x48]] }
 0x1d0   : > { %v1593_v32 = vmul.f32 %v1592_v54, %v7805_v61 }
 0x1d1   : > { %v7781_v3 = vpop.permute.xlu1 %1036  ;;  %v7783_v52 = vpop.permute.xlu0 %1038 }
 0x1d2   : > { %v1044_v48 = vadd.f32 %v7781_v3, %v7742_v23  ;;  %v1045_v27 = vadd.f32 %v7783_v52, %v7744_v26  ;;  %v1169_v23 = vmul.f32 %v1166_v57, %v7521_v10  ;;  %v1174_v26 = vstv %s7843_s12  ;;  %s8083_s12 = sld [smem:[#allocation4 + $0x65]] }
 0x1d3   : > { %1488 = vrot.lane.b32.xlu1 %v1480_v4, %s6936_s11  ;;  %1504 = vrot.lane.b32.xlu0 %v1498_v20, %s6936_s11  ;;  %v1159_v4 = vmul.f32 %v1158_v13, %v7509_v37 }
 0x1d5   : > { %v7789_v18 = vpop.permute.xlu1 %1054  ;;  %v7791_v56 = vpop.permute.xlu0 %1056 }
 0x1d6   : > { %v1063_v3 = vadd.f32 %v7789_v18, %v7753_v17  ;;  %v1064_v52 = vadd.f32 %v7791_v56, %v7755_v60  ;;  %v1176_v17 = vmul.f32 %v1174_v26, %v7519_v29 }
 0x1d7   : > { %1506 = vrot.lane.b32.xlu1 %v1499_v40, %s6936_s11  ;;  %1508 = vrot.lane.b32.xlu0 %v1500_v45, %s6936_s11 }
 0x1d9   : > { %v7799_v11 = vpop.permute.xlu1 %1058  ;;  %v1075_v6 = vpop.permute.xlu0 %1074 }
 0x1da   : > { %v1083_v1 = vadd.f32 %v1075_v6, %v1003_v16  ;;  %v1594_v16 = vmul.f32 %v1592_v54, %v7820_v24  ;;  %v1612_v6 = vstv %s7818_s10  ;;  %v1065_v60 = vadd.f32 %v7799_v11, %v7763_v53  ;;  %s8071_s10 = sld [smem:[#allocation4 + $0x49]] }
 0x1db   : > { %1524 = vrot.lane.b32.xlu1 %v1518_v30, %s6936_s11  ;;  %1526 = vrot.lane.b32.xlu0 %v1519_v63, %s6936_s11  ;;  %v1614_v13 = vmul.f32 %v1612_v6, %v7820_v24 }
 0x1dc   : > { %v7815_v8 = vadd.f32 %v1151_v31, %v1083_v1 }
 0x1dd   : > { %v1077_v22 = vpop.permute.xlu1 %1076  ;;  %v1079_v51 = vpop.permute.xlu0 %1078 }
 0x1de   : > { %v1084_v7 = vadd.f32 %v1077_v22, %v1004_v49  ;;  %v1085_v43 = vadd.f32 %v1079_v51, %v1005_v44  ;;  %v1595_v49 = vmul.f32 %v1592_v54, %v7822_v2  ;;  %v1613_v44 = vmul.f32 %v1612_v6, %v7805_v61 }
 0x1df   : > { %1528 = vrot.lane.b32.xlu1 %v1520_v62, %s6936_s11  ;;  %1579 = vrot.lane.b32.xlu0 %v1573_v19, %s6935_s28  ;;  %v1168_v19 = vmul.f32 %v1166_v57, %v7519_v29  ;;  %v1177_v29 = vmul.f32 %v1174_v26, %v7521_v10 }
 0x1e0   : > { %v7831_v36 = vadd.f32 %v1152_v21, %v1084_v7  ;;  %v7833_v5 = vadd.f32 %v1153_v39, %v1085_v43 }
 0x1e1   : > { %v1095_v58 = vpop.permute.xlu1 %1094  ;;  %v1097_v35 = vpop.permute.xlu0 %1096 }
 0x1e2   : > { %v1103_v41 = vadd.f32 %v1095_v58, %v1023_v33  ;;  %v1104_v12 = vadd.f32 %v1097_v35, %v1024_v14  ;;  %v1615_v33 = vmul.f32 %v1612_v6, %v7822_v2  ;;  %v1632_v14 = vstv %s7856_s13  ;;  %s8091_s13 = sld [smem:[#allocation4 + $0x4a]] }
 0x1e3   : > { %1581 = vrot.lane.b32.xlu1 %v1574_v38, %s6935_s28  ;;  %1583 = vrot.lane.b32.xlu0 %v1575_v28, %s6935_s28  ;;  %v1175_v38 = vmul.f32 %v1174_v26, %v7509_v37  ;;  %v1635_v57 = vmul.f32 %v1632_v14, %v7822_v2 }
 0x1e4   : > { %v7849_v20 = vadd.f32 %v1159_v4, %v1103_v41  ;;  %v7851_v45 = vadd.f32 %v1160_v15, %v1104_v12  ;;  %v1633_v41 = vmul.f32 %v1632_v14, %v7805_v61  ;;  %v1634_v12 = vmul.f32 %v1632_v14, %v7820_v24 }
 0x1e5   : > { %v1099_v40 = vpop.permute.xlu1 %1098  ;;  %v1115_v47 = vpop.permute.xlu0 %1114  ;;  %v1652_v4 = vstv %s6184_s14  ;;  %s8103_s14 = sld [smem:[#allocation4 + $0x66]] }
 0x1e6   : > { %v1105_v30 = vadd.f32 %v1099_v40, %v1025_v34  ;;  %v1123_v63 = vadd.f32 %v1115_v47, %v1043_v50  ;;  %v1653_v34 = vmul.f32 %v1652_v4, %v7805_v61  ;;  %v1654_v40 = vmul.f32 %v1652_v4, %v7820_v24 }
 0x1e7   : > { %1599 = vrot.lane.b32.xlu1 %v1593_v32, %s6935_s28  ;;  %1601 = vrot.lane.b32.xlu0 %v1594_v16, %s6935_s28  ;;  %v1655_v47 = vmul.f32 %v1652_v4, %v7822_v2  ;;  %v1672_v32 = vstv %s6185_s15  ;;  %s8130_s15 = sld [smem:[#allocation4 + $0x4b]] }
 0x1e8   : > { %v7866_v1 = vadd.f32 %v1161_v55, %v1105_v30  ;;  %v7868_v46 = vadd.f32 %v1167_v9, %v1123_v63  ;;  %v1673_v30 = vmul.f32 %v1672_v32, %v7805_v61  ;;  %v1674_v63 = vmul.f32 %v1672_v32, %v7820_v24 }
 0x1e9   : > { %v1117_v31 = vpop.permute.xlu1 %1116  ;;  %v1119_v62 = vpop.permute.xlu0 %1118  ;;  %v1692_v55 = vstv %s6186_s16  ;;  %s8146_s16 = sld [smem:[#allocation4 + $0x67]] }
 0x1ea   : > { %v1124_v22 = vadd.f32 %v1117_v31, %v1044_v48  ;;  %v1125_v51 = vadd.f32 %v1119_v62, %v1045_v27  ;;  %v1675_v27 = vmul.f32 %v1672_v32, %v7822_v2  ;;  %v1693_v31 = vmul.f32 %v1692_v55, %v7805_v61 }
 0x1eb   : > { %1603 = vrot.lane.b32.xlu1 %v1595_v49, %s6935_s28  ;;  %1619 = vrot.lane.b32.xlu0 %v1613_v44, %s6935_s28  ;;  %v1694_v44 = vmul.f32 %v1692_v55, %v7820_v24 }
 0x1ec   : > { %v7881_v7 = vadd.f32 %v1168_v19, %v1124_v22  ;;  %v7883_v43 = vadd.f32 %v1169_v23, %v1125_v51  ;;  %v1695_v22 = vmul.f32 %v1692_v55, %v7822_v2  ;;  %v1712_v51 = vstv %s6187_s17  ;;  %s6208_s17 = sld [smem:[#allocation4 + $0x68]] }
 0x1ed   : > { %v1135_v21 = vpop.permute.xlu1 %1134  ;;  %v1137_v39 = vpop.permute.xlu0 %1136  ;;  %v7939_v19 = vstv %s6164_s19  ;;  %s6209_s19 = sld [smem:[#allocation4 + $0x69]] }
 0x1ee   : > { %v1143_v58 = vadd.f32 %v1135_v21, %v1063_v3  ;;  %v1144_v35 = vadd.f32 %v1137_v39, %v1064_v52  ;;  %v1713_v52 = vmul.f32 %v1712_v51, %v7805_v61  ;;  %v1714_v21 = vmul.f32 %v1712_v51, %v7820_v24  ;;  %v7946_v39 = vld [vmem:[#allocation2 + $0x31] sm:$0xff] }
 0x1ef   : > { %1621 = vrot.lane.b32.xlu1 %v1614_v13, %s6935_s28  ;;  %1623 = vrot.lane.b32.xlu0 %v1615_v33, %s6935_s28  ;;  %v1767_v33 = vstv %s6192_s20  ;;  %v1346_v14 = vmul.f32 %v7939_v19, %v7653_v25  ;;  %s6210_s20 = sld [smem:[#allocation4 + $0x6a]] }
 0x1f0   : > { %v7894_v18 = vadd.f32 %v1175_v38, %v1143_v58  ;;  %v7896_v56 = vadd.f32 %v1176_v17, %v1144_v35  ;;  %v1715_v17 = vmul.f32 %v1712_v51, %v7822_v2 }
 0x1f1   : > { %v1139_v28 = vpop.permute.xlu1 %1138  ;;  %v1190_v54 = vpop.permute.xlu0 %1189 }
 0x1f2   : > { %v1145_v37 = vadd.f32 %v1139_v28, %v1065_v60  ;;  %v1198_v23 = vadd.f32 %v1190_v54, %v7815_v8  ;;  %v1768_v60 = vmul.f32 %v1767_v33, %v7946_v39  ;;  %v7959_v28 = vld [vmem:[#allocation2 + $0x39] sm:$0xff]  ;;  %v7961_v54 = vld [vmem:[#allocation2 + $0x41] sm:$0x3] }
 0x1f3   : > { %1639 = vrot.lane.b32.xlu1 %v1633_v41, %s6935_s28  ;;  %1641 = vrot.lane.b32.xlu0 %v1634_v12, %s6935_s28  ;;  %v1347_v12 = vmul.f32 %v7939_v19, %v7676_v59 }
 0x1f4   : > { %v7903_v53 = vadd.f32 %v1177_v29, %v1145_v37 }
 0x1f5   : > { %v1192_v11 = vpop.permute.xlu1 %1191  ;;  %v7905_v15 = vpop.permute.xlu0 %1193 }
 0x1f6   : > { %v1199_v8 = vadd.f32 %v1192_v11, %v7831_v36  ;;  %v7967_v36 = vstv %s6165_s21  ;;  %s6211_s21 = sld [smem:[#allocation4 + $0x6b]] }
 0x1f7   : > { %1643 = vrot.lane.b32.xlu1 %v1635_v57, %s6935_s28  ;;  %1659 = vrot.lane.b32.xlu0 %v1653_v34, %s6936_s11  ;;  %v1769_v34 = vmul.f32 %v1767_v33, %v7959_v28  ;;  %v1355_v55 = vmul.f32 %v7967_v36, %v7676_v59 }
 0x1f9   : > { %v1210_v50 = vpop.permute.xlu1 %1209  ;;  %v1212_v10 = vpop.permute.xlu0 %1211 }
 0x1fa   : > { %v1218_v37 = vadd.f32 %v1210_v50, %v7849_v20  ;;  %v1219_v4 = vadd.f32 %v1212_v10, %v7851_v45  ;;  %v7981_v20 = vstv %s6166_s24  ;;  %s6216_s24 = sld [smem:[#allocation4 + $0x70]] }
 0x1fb   : > { %1661 = vrot.lane.b32.xlu1 %v1654_v40, %s6936_s11  ;;  %1663 = vrot.lane.b32.xlu0 %v1655_v47, %s6936_s11  ;;  %v1770_v40 = vmul.f32 %v1767_v33, %v7961_v54  ;;  %v1787_v47 = vstv %s6193_s23  ;;  %s6188_s23 = sld [smem:[#allocation4 + $0x54]] }
 0x1fd   : > { %v7915_v16 = vpop.permute.xlu1 %1213  ;;  %v7917_v6 = vpop.permute.xlu0 %1229 }
 0x1fe   : > { %v1238_v45 = vadd.f32 %v7917_v6, %v7868_v46 }
 0x1ff   : > { %1679 = vrot.lane.b32.xlu1 %v1673_v30, %s6936_s11  ;;  %1681 = vrot.lane.b32.xlu0 %v1674_v63, %s6936_s11  ;;  %v1354_v63 = vmul.f32 %v7967_v36, %v7653_v25 }
 0x201   : > { %v7923_v9 = vpop.permute.xlu1 %1231  ;;  %v7925_v48 = vpop.permute.xlu0 %1233 }
 0x202   : > { %v1239_v46 = vadd.f32 %v7923_v9, %v7881_v7 }
 0x203   : > { %1683 = vrot.lane.b32.xlu1 %v1675_v27, %s6936_s11  ;;  %1699 = vrot.lane.b32.xlu0 %v1693_v31, %s6936_s11 }
 0x205   : > { %v7931_v62 = vpop.permute.xlu1 %1249  ;;  %v7933_v49 = vpop.permute.xlu0 %1251 }
 0x206   : > { %v1258_v7 = vadd.f32 %v7931_v62, %v7894_v18  ;;  %v1259_v9 = vadd.f32 %v7933_v49, %v7896_v56 }
 0x207   : > { %1701 = vrot.lane.b32.xlu1 %v1694_v44, %s6936_s11  ;;  %1703 = vrot.lane.b32.xlu0 %v1695_v22, %s6936_s11  ;;  %v1788_v44 = vmul.f32 %v1787_v47, %v7946_v39  ;;  %v1789_v22 = vmul.f32 %v1787_v47, %v7959_v28 }
 0x209   : > { %v7942_v26 = vpop.permute.xlu1 %1253  ;;  %v1270_v3 = vpop.permute.xlu0 %1269 }
 0x20a   : > { %v1278_v13 = vadd.f32 %v1270_v3, %v1198_v23  ;;  %v1807_v23 = vstv %s6194_s25  ;;  %v1362_v3 = vmul.f32 %v7981_v20, %v7653_v25  ;;  %s8230_s25 = sld [smem:[#allocation4 + $0x55]] }
 0x20b   : > { %1719 = vrot.lane.b32.xlu1 %v1713_v52, %s6936_s11  ;;  %1721 = vrot.lane.b32.xlu0 %v1714_v21, %s6936_s11  ;;  %v1808_v33 = vmul.f32 %v1807_v23, %v7946_v39 }
 0x20c   : > { %v7953_v58 = vadd.f32 %v1346_v14, %v1278_v13  ;;  %v1790_v13 = vmul.f32 %v1787_v47, %v7961_v54 }
 0x20d   : > { %v1272_v35 = vpop.permute.xlu1 %1271  ;;  %v7955_v38 = vpop.permute.xlu0 %1273 }
 0x20e   : > { %v1279_v41 = vadd.f32 %v1272_v35, %v1199_v8  ;;  %v1363_v8 = vmul.f32 %v7981_v20, %v7676_v59  ;;  %v8009_v35 = vstv %s6167_s26  ;;  %s8237_s26 = sld [smem:[#allocation4 + $0x71]] }
 0x20f   : > { %1723 = vrot.lane.b32.xlu1 %v1715_v17, %s6936_s11  ;;  %1774 = vrot.lane.b32.xlu0 %v1768_v60, %s6935_s28  ;;  %v1371_v18 = vmul.f32 %v8009_v35, %v7676_v59 }
 0x210   : > { %v7971_v29 = vadd.f32 %v1347_v12, %v1279_v41  ;;  %v1809_v12 = vmul.f32 %v1807_v23, %v7959_v28 }
 0x211   : > { %v1290_v11 = vpop.permute.xlu1 %1289  ;;  %v1292_v57 = vpop.permute.xlu0 %1291 }
 0x212   : > { %v1298_v32 = vadd.f32 %v1290_v11, %v1218_v37  ;;  %v1299_v30 = vadd.f32 %v1292_v57, %v1219_v4  ;;  %v1810_v37 = vmul.f32 %v1807_v23, %v7961_v54  ;;  %v1827_v4 = vstv %s6195_s27  ;;  %s8245_s27 = sld [smem:[#allocation4 + $0x56]] }
 0x213   : > { %1776 = vrot.lane.b32.xlu1 %v1769_v34, %s6935_s28  ;;  %1778 = vrot.lane.b32.xlu0 %v1770_v40, %s6935_s28  ;;  %v1370_v34 = vmul.f32 %v8009_v35, %v7653_v25  ;;  %v1828_v47 = vmul.f32 %v1827_v4, %v7946_v39 }
 0x214   : > { %v7985_v50 = vadd.f32 %v1354_v63, %v1298_v32  ;;  %v7987_v10 = vadd.f32 %v1355_v55, %v1299_v30  ;;  %v1829_v32 = vmul.f32 %v1827_v4, %v7959_v28  ;;  %v1847_v30 = vstv %s6196_s29  ;;  %s8252_s29 = sld [smem:[#allocation4 + $0x72]] }
 0x215   : > { %v7989_v27 = vpop.permute.xlu1 %1293  ;;  %v1310_v31 = vpop.permute.xlu0 %1309  ;;  %v1830_v63 = vmul.f32 %v1827_v4, %v7961_v54  ;;  %v1848_v55 = vmul.f32 %v1847_v30, %v7946_v39 }
 0x216   : > { %v1318_v51 = vadd.f32 %v1310_v31, %v1238_v45 }
 0x217   : > { %1794 = vrot.lane.b32.xlu1 %v1788_v44, %s6935_s28  ;;  %1796 = vrot.lane.b32.xlu0 %v1789_v22, %s6935_s28  ;;  %v1849_v44 = vmul.f32 %v1847_v30, %v7959_v28  ;;  %v1850_v22 = vmul.f32 %v1847_v30, %v7961_v54 }
 0x218   : > { %v7999_v6 = vadd.f32 %v1362_v3, %v1318_v51  ;;  %v1867_v51 = vstv %s6197_s30  ;;  %s8277_s30 = sld [smem:[#allocation4 + $0x57]] }
 0x219   : > { %v1312_v52 = vpop.permute.xlu1 %1311  ;;  %v8001_v21 = vpop.permute.xlu0 %1313 }
 0x21a   : > { %v1319_v14 = vadd.f32 %v1312_v52, %v1239_v46  ;;  %v1868_v46 = vmul.f32 %v1867_v51, %v7946_v39  ;;  %v1869_v52 = vmul.f32 %v1867_v51, %v7959_v28 }
 0x21b   : > { %1798 = vrot.lane.b32.xlu1 %v1790_v13, %s6935_s28  ;;  %1814 = vrot.lane.b32.xlu0 %v1808_v33, %s6935_s28  ;;  %v1887_v13 = vstv %s6198_s6  ;;  %s8290_s6 = sld [smem:[#allocation4 + $0x73]] }
 0x21c   : > { %v8015_v17 = vadd.f32 %v1363_v8, %v1319_v14  ;;  %v1870_v8 = vmul.f32 %v1867_v51, %v7961_v54 }
 0x21d   : > { %v1330_v60 = vpop.permute.xlu1 %1329  ;;  %v1332_v41 = vpop.permute.xlu0 %1331 }
 0x21e   : > { %v1338_v11 = vadd.f32 %v1330_v60, %v1258_v7  ;;  %v1339_v57 = vadd.f32 %v1332_v41, %v1259_v9  ;;  %v1888_v7 = vmul.f32 %v1887_v13, %v7946_v39  ;;  %v1200_v9 = vadd.f32 %v7905_v15, %v7833_v5 }
 0x21f   : > { %1816 = vrot.lane.b32.xlu1 %v1809_v12, %s6935_s28  ;;  %1818 = vrot.lane.b32.xlu0 %v1810_v37, %s6935_s28  ;;  %v1889_v12 = vmul.f32 %v1887_v13, %v7959_v28  ;;  %v1890_v37 = vmul.f32 %v1887_v13, %v7961_v54  ;;  %v1540_v5 = vstv %s6176_s8  ;;  %s6221_s8 = sld [smem:[#allocation4 + $0x75]] }
 0x220   : > { %v8025_v56 = vadd.f32 %v1370_v34, %v1338_v11  ;;  %v8027_v62 = vadd.f32 %v1371_v18, %v1339_v57  ;;  %v1280_v4 = vadd.f32 %v7955_v38, %v1200_v9  ;;  %v1348_v11 = vmul.f32 %v7939_v19, %v7663_v42  ;;  %v8085_v38 = vld [vmem:[#allocation2 + $0x32] sm:$0xff] }
 0x221   : > { %v8029_v49 = vpop.permute.xlu1 %1333  ;;  %v1385_v40 = vpop.permute.xlu0 %1384  ;;  %v1907_v57 = vstv %s6199_s7  ;;  %v1542_v9 = vmul.f32 %v1540_v5, %v7820_v24  ;;  %s6220_s7 = sld [smem:[#allocation4 + $0x74]] }
 0x222   : > { %v1393_v15 = vadd.f32 %v1385_v40, %v7953_v58  ;;  %v1351_v19 = vadd.f32 %v1348_v11, %v1280_v4  ;;  %v1910_v58 = vmul.f32 %v1907_v57, %v7961_v54  ;;  %v8093_v40 = vld [vmem:[#allocation2 + $0x42] sm:$0x3] }
 0x223   : > { %1834 = vrot.lane.b32.xlu1 %v1828_v47, %s6935_s28  ;;  %1836 = vrot.lane.b32.xlu0 %v1829_v32, %s6935_s28  ;;  %v1908_v47 = vmul.f32 %v1907_v57, %v7946_v39  ;;  %v1909_v32 = vmul.f32 %v1907_v57, %v7959_v28 }
 0x225   : > { %v1387_v25 = vpop.permute.xlu1 %1386  ;;  %v1389_v59 = vpop.permute.xlu0 %1388 }
 0x226   : > { %v1394_v51 = vadd.f32 %v1387_v25, %v7971_v29  ;;  %v1240_v25 = vadd.f32 %v7925_v48, %v7883_v43  ;;  %v1364_v43 = vmul.f32 %v7981_v20, %v7663_v42  ;;  %v1556_v20 = vstv %s8091_s13  ;;  %s6228_s13 = sld [smem:[#allocation4 + $0x7c]] }
 0x227   : > { %1838 = vrot.lane.b32.xlu1 %v1830_v63, %s6935_s28  ;;  %1854 = vrot.lane.b32.xlu0 %v1848_v55, %s6936_s11  ;;  %v1962_v63 = vstv %s6204_s9  ;;  %v1541_v55 = vmul.f32 %v1540_v5, %v7805_v61  ;;  %s6222_s9 = sld [smem:[#allocation4 + $0x76]] }
 0x228   : > { %v1965_v11 = vmul.f32 %v1962_v63, %v8093_v40 }
 0x229   : > { %v8039_v45 = vpop.permute.xlu1 %1404  ;;  %v8041_v31 = vpop.permute.xlu0 %1406 }
 0x22a   : > { %v1414_v57 = vadd.f32 %v8041_v31, %v7987_v10 }
 0x22b   : > { %1856 = vrot.lane.b32.xlu1 %v1849_v44, %s6936_s11  ;;  %1858 = vrot.lane.b32.xlu0 %v1850_v22, %s6936_s11  ;;  %v8095_v44 = vld [vmem:[#allocation2 + $0x3a] sm:$0xff]  ;;  %v1220_v22 = vadd.f32 %v7915_v16, %v7866_v1  ;;  %v1356_v1 = vmul.f32 %v7967_v36, %v7663_v42 }
 0x22d   : > { %v8047_v23 = vpop.permute.xlu1 %1408  ;;  %v8049_v3 = vpop.permute.xlu0 %1424  ;;  %v1300_v4 = vadd.f32 %v7989_v27, %v1220_v22  ;;  %v1413_v27 = vadd.f32 %v8039_v45, %v7985_v50  ;;  %v1320_v50 = vadd.f32 %v8001_v21, %v1240_v25 }
 0x22f   : > { %1874 = vrot.lane.b32.xlu1 %v1868_v46, %s6936_s11  ;;  %1876 = vrot.lane.b32.xlu0 %v1869_v52, %s6936_s11  ;;  %v1395_v46 = vadd.f32 %v1389_v59, %v1351_v19  ;;  %v1964_v59 = vmul.f32 %v1962_v63, %v8095_v44  ;;  %v1359_v10 = vadd.f32 %v1356_v1, %v1300_v4 }
 0x231   : > { %v8055_v33 = vpop.permute.xlu1 %1426  ;;  %v8057_v14 = vpop.permute.xlu0 %1428  ;;  %v1415_v19 = vadd.f32 %v8047_v23, %v1359_v10 }
 0x233   : > { %1878 = vrot.lane.b32.xlu1 %v1870_v8, %s6936_s11  ;;  %1894 = vrot.lane.b32.xlu0 %v1888_v7, %s6936_s11  ;;  %v1963_v7 = vmul.f32 %v1962_v63, %v8085_v38 }
 0x235   : > { %v8065_v60 = vpop.permute.xlu1 %1444  ;;  %v8067_v41 = vpop.permute.xlu0 %1446 }
 0x237   : > { %1896 = vrot.lane.b32.xlu1 %v1889_v12, %s6936_s11  ;;  %1898 = vrot.lane.b32.xlu0 %v1890_v37, %s6936_s11  ;;  %v1543_v12 = vmul.f32 %v1540_v5, %v7822_v2  ;;  %v1548_v37 = vstv %s8071_s10  ;;  %s6223_s10 = sld [smem:[#allocation4 + $0x77]] }
 0x239   : > { %v8079_v34 = vpop.permute.xlu1 %1448  ;;  %v1465_v18 = vpop.permute.xlu0 %1464 }
 0x23a   : > { %v1473_v30 = vadd.f32 %v1465_v18, %v1393_v15  ;;  %v1982_v18 = vstv %s8083_s12  ;;  %s6200_s12 = sld [smem:[#allocation4 + $0x60]] }
 0x23b   : > { %1914 = vrot.lane.b32.xlu1 %v1908_v47, %s6936_s11  ;;  %1916 = vrot.lane.b32.xlu0 %v1909_v32, %s6936_s11  ;;  %v1549_v47 = vmul.f32 %v1548_v37, %v7805_v61  ;;  %v1550_v32 = vmul.f32 %v1548_v37, %v7820_v24  ;;  %v1983_v21 = vmul.f32 %v1982_v18, %v8085_v38 }
 0x23c   : > { %v8100_v52 = vadd.f32 %v1541_v55, %v1473_v30  ;;  %v1433_v30 = vadd.f32 %v8049_v3, %v7999_v6  ;;  %v1557_v6 = vmul.f32 %v1556_v20, %v7805_v61  ;;  %v1260_v3 = vadd.f32 %v7942_v26, %v7903_v53 }
 0x23d   : > { %v1467_v13 = vpop.permute.xlu1 %1466  ;;  %v1469_v8 = vpop.permute.xlu0 %1468  ;;  %v1558_v53 = vmul.f32 %v1556_v20, %v7820_v24  ;;  %v1559_v26 = vmul.f32 %v1556_v20, %v7822_v2 }
 0x23e   : > { %v1474_v16 = vadd.f32 %v1467_v13, %v1394_v51  ;;  %v1475_v29 = vadd.f32 %v1469_v8, %v1395_v46  ;;  %v1984_v51 = vmul.f32 %v1982_v18, %v8095_v44  ;;  %v2002_v46 = vstv %s8103_s14  ;;  %s6201_s14 = sld [smem:[#allocation4 + $0x61]] }
 0x23f   : > { %1918 = vrot.lane.b32.xlu1 %v1910_v58, %s6936_s11  ;;  %1969 = vrot.lane.b32.xlu0 %v1963_v7, %s6935_s28  ;;  %v1551_v13 = vmul.f32 %v1548_v37, %v7822_v2  ;;  %v1367_v8 = vadd.f32 %v1364_v43, %v1320_v50  ;;  %v2003_v25 = vmul.f32 %v2002_v46, %v8085_v38 }
 0x240   : > { %v8121_v36 = vadd.f32 %v1542_v9, %v1474_v16  ;;  %v8123_v5 = vadd.f32 %v1543_v12, %v1475_v29  ;;  %v1985_v9 = vmul.f32 %v1982_v18, %v8093_v40  ;;  %v1434_v12 = vadd.f32 %v8055_v33, %v8015_v17 }
 0x241   : > { %v1485_v48 = vpop.permute.xlu1 %1484  ;;  %v1487_v15 = vpop.permute.xlu0 %1486  ;;  %v1435_v37 = vadd.f32 %v8057_v14, %v1367_v8  ;;  %v1372_v17 = vmul.f32 %v8009_v35, %v7663_v42  ;;  %v1454_v43 = vadd.f32 %v8067_v41, %v8027_v62  ;;  %v2022_v18 = vstv %s8146_s16  ;;  %s6202_s16 = sld [smem:[#allocation4 + $0x62]] }
 0x242   : > { %v1493_v45 = vadd.f32 %v1485_v48, %v1413_v27  ;;  %v1494_v31 = vadd.f32 %v1487_v15, %v1414_v57  ;;  %v2005_v27 = vmul.f32 %v2002_v46, %v8093_v40  ;;  %v1453_v57 = vadd.f32 %v8065_v60, %v8025_v56 }
 0x243   : > { %1971 = vrot.lane.b32.xlu1 %v1964_v59, %s6935_s28  ;;  %1973 = vrot.lane.b32.xlu0 %v1965_v11, %s6935_s28  ;;  %v1564_v59 = vstv %s8130_s15  ;;  %v1340_v11 = vadd.f32 %v8029_v49, %v1260_v3  ;;  %v2004_v15 = vmul.f32 %v2002_v46, %v8095_v44  ;;  %v2023_v20 = vmul.f32 %v2022_v18, %v8085_v38  ;;  %s6229_s15 = sld [smem:[#allocation4 + $0x7d]] }
 0x244   : > { %v8139_v63 = vadd.f32 %v1549_v47, %v1493_v45  ;;  %v8141_v55 = vadd.f32 %v1550_v32, %v1494_v31  ;;  %v1565_v47 = vmul.f32 %v1564_v59, %v7805_v61  ;;  %v1566_v45 = vmul.f32 %v1564_v59, %v7820_v24 }
 0x245   : > { %v1489_v58 = vpop.permute.xlu1 %1488  ;;  %v1505_v22 = vpop.permute.xlu0 %1504  ;;  %v1375_v32 = vadd.f32 %v1372_v17, %v1340_v11  ;;  %v2024_v61 = vmul.f32 %v2022_v18, %v8095_v44  ;;  %v1567_v24 = vmul.f32 %v1564_v59, %v7822_v2  ;;  %v2102_v17 = vstv %s6211_s21  ;;  %s6232_s21 = sld [smem:[#allocation4 + $0x80]] }
 0x246   : > { %v1495_v23 = vadd.f32 %v1489_v58, %v1415_v19  ;;  %v1513_v7 = vadd.f32 %v1505_v22, %v1433_v30  ;;  %v2042_v30 = vstv %s6208_s17  ;;  %s6230_s17 = sld [smem:[#allocation4 + $0x7e]] }
 0x247   : > { %1989 = vrot.lane.b32.xlu1 %v1983_v21, %s6935_s28  ;;  %1991 = vrot.lane.b32.xlu0 %v1984_v51, %s6935_s28  ;;  %v1455_v56 = vadd.f32 %v8079_v34, %v1375_v32  ;;  %v2025_v34 = vmul.f32 %v2022_v18, %v8093_v40  ;;  %v2043_v51 = vmul.f32 %v2042_v30, %v8085_v38  ;;  %v2157_v18 = vstv %s6216_s24  ;;  %s6234_s24 = sld [smem:[#allocation4 + $0x82]] }
 0x248   : > { %v8158_v4 = vadd.f32 %v1551_v13, %v1495_v23  ;;  %v8160_v1 = vadd.f32 %v1557_v6, %v1513_v7  ;;  %v2045_v46 = vmul.f32 %v2042_v30, %v8093_v40  ;;  %v2044_v8 = vmul.f32 %v2042_v30, %v8095_v44 }
 0x249   : > { %v1507_v16 = vpop.permute.xlu1 %1506  ;;  %v1509_v29 = vpop.permute.xlu0 %1508  ;;  %v2062_v23 = vstv %s6209_s19  ;;  %s6203_s19 = sld [smem:[#allocation4 + $0x63]] }
 0x24a   : > { %v1514_v33 = vadd.f32 %v1507_v16, %v1434_v12  ;;  %v1515_v14 = vadd.f32 %v1509_v29, %v1435_v37  ;;  %v2063_v3 = vmul.f32 %v2062_v23, %v8085_v38  ;;  %v2082_v12 = vstv %s6210_s20  ;;  %s6231_s20 = sld [smem:[#allocation4 + $0x7f]] }
 0x24b   : > { %1993 = vrot.lane.b32.xlu1 %v1985_v9, %s6935_s28  ;;  %2009 = vrot.lane.b32.xlu0 %v2003_v25, %s6935_s28  ;;  %v2064_v9 = vmul.f32 %v2062_v23, %v8095_v44  ;;  %v2065_v37 = vmul.f32 %v2062_v23, %v8093_v40  ;;  %v2083_v25 = vmul.f32 %v2082_v12, %v8085_v38 }
 0x24c   : > { %v8176_v48 = vadd.f32 %v1558_v53, %v1514_v33  ;;  %v8178_v49 = vadd.f32 %v1559_v26, %v1515_v14  ;;  %v2085_v53 = vmul.f32 %v2082_v12, %v8093_v40  ;;  %v2084_v11 = vmul.f32 %v2082_v12, %v8095_v44 }
 0x24d   : > { %v1525_v42 = vpop.permute.xlu1 %1524  ;;  %v1527_v35 = vpop.permute.xlu0 %1526  ;;  %v1735_v33 = vstv %s6188_s23  ;;  %s6233_s23 = sld [smem:[#allocation4 + $0x81]] }
 0x24e   : > { %v1533_v50 = vadd.f32 %v1525_v42, %v1453_v57  ;;  %v1534_v10 = vadd.f32 %v1527_v35, %v1454_v43  ;;  %v2103_v43 = vmul.f32 %v2102_v17, %v8085_v38  ;;  %v2104_v42 = vmul.f32 %v2102_v17, %v8095_v44  ;;  %v8239_v35 = vld [vmem:[#allocation2 + $0x48] sm:$0xff] }
 0x24f   : > { %2011 = vrot.lane.b32.xlu1 %v2004_v15, %s6935_s28  ;;  %2013 = vrot.lane.b32.xlu0 %v2005_v27, %s6935_s28  ;;  %v1737_v30 = vmul.f32 %v1735_v33, %v7959_v28 }
 0x250   : > { %v8187_v62 = vadd.f32 %v1565_v47, %v1533_v50  ;;  %v8189_v60 = vadd.f32 %v1566_v45, %v1534_v10  ;;  %v1736_v47 = vmul.f32 %v1735_v33, %v7946_v39 }
 0x251   : > { %v1529_v41 = vpop.permute.xlu1 %1528  ;;  %v1580_v31 = vpop.permute.xlu0 %1579 }
 0x252   : > { %v1535_v19 = vadd.f32 %v1529_v41, %v1455_v56  ;;  %v1588_v14 = vadd.f32 %v1580_v31, %v8100_v52  ;;  %v2105_v52 = vmul.f32 %v2102_v17, %v8093_v40  ;;  %v2158_v41 = vmul.f32 %v2157_v18, %v8239_v35  ;;  %v8254_v31 = vld [vmem:[#allocation2 + $0x50] sm:$0xff] }
 0x253   : > { %2029 = vrot.lane.b32.xlu1 %v2023_v20, %s6935_s28  ;;  %2031 = vrot.lane.b32.xlu0 %v2024_v61, %s6935_s28  ;;  %v8256_v20 = vld [vmem:[#allocation2 + $0x58] sm:$0x3] }
 0x254   : > { %v8197_v58 = vadd.f32 %v1567_v24, %v1535_v19  ;;  %v2160_v23 = vmul.f32 %v2157_v18, %v8256_v20 }
 0x255   : > { %v1582_v22 = vpop.permute.xlu1 %1581  ;;  %v1584_v21 = vpop.permute.xlu0 %1583 }
 0x256   : > { %v1589_v32 = vadd.f32 %v1582_v22, %v8121_v36  ;;  %v1590_v50 = vadd.f32 %v1584_v21, %v8123_v5  ;;  %v1738_v36 = vmul.f32 %v1735_v33, %v7961_v54  ;;  %v1743_v5 = vstv %s8230_s25  ;;  %s6235_s25 = sld [smem:[#allocation4 + $0x83]] }
 0x257   : > { %2033 = vrot.lane.b32.xlu1 %v2025_v34, %s6935_s28  ;;  %2049 = vrot.lane.b32.xlu0 %v2043_v51, %s6936_s11 }
 0x259   : > { %v1600_v2 = vpop.permute.xlu1 %1599  ;;  %v1602_v13 = vpop.permute.xlu0 %1601 }
 0x25a   : > { %v1608_v24 = vadd.f32 %v1600_v2, %v8139_v63  ;;  %v1609_v34 = vadd.f32 %v1602_v13, %v8141_v55  ;;  %v1745_v63 = vmul.f32 %v1743_v5, %v7959_v28  ;;  %v1751_v55 = vstv %s8245_s27  ;;  %s6240_s27 = sld [smem:[#allocation4 + $0x88]] }
 0x25b   : > { %2051 = vrot.lane.b32.xlu1 %v2044_v8, %s6936_s11  ;;  %2053 = vrot.lane.b32.xlu0 %v2045_v46, %s6936_s11  ;;  %v2159_v8 = vmul.f32 %v2157_v18, %v8254_v31 }
 0x25d   : > { %v8206_v7 = vpop.permute.xlu1 %1603  ;;  %v8208_v6 = vpop.permute.xlu0 %1619 }
 0x25e   : > { %v1610_v2 = vadd.f32 %v8206_v7, %v8158_v4  ;;  %v1628_v13 = vadd.f32 %v8208_v6, %v8160_v1  ;;  %v1746_v4 = vmul.f32 %v1743_v5, %v7961_v54  ;;  %v1752_v7 = vmul.f32 %v1751_v55, %v7946_v39 }
 0x25f   : > { %2069 = vrot.lane.b32.xlu1 %v2063_v3, %s6936_s11  ;;  %2071 = vrot.lane.b32.xlu0 %v2064_v9, %s6936_s11  ;;  %v2177_v3 = vstv %s8237_s26  ;;  %s6212_s26 = sld [smem:[#allocation4 + $0x6c]] }
 0x260   : > { %v2178_v33 = vmul.f32 %v2177_v3, %v8239_v35 }
 0x261   : > { %v8215_v16 = vpop.permute.xlu1 %1621  ;;  %v8217_v29 = vpop.permute.xlu0 %1623 }
 0x262   : > { %v1629_v1 = vadd.f32 %v8215_v16, %v8176_v48  ;;  %v1630_v6 = vadd.f32 %v8217_v29, %v8178_v49  ;;  %v1754_v48 = vmul.f32 %v1751_v55, %v7961_v54  ;;  %v1759_v49 = vstv %s8277_s30  ;;  %s8517_s30 = sld [smem:[#allocation4 + $0x89]] }
 0x263   : > { %2073 = vrot.lane.b32.xlu1 %v2065_v37, %s6936_s11  ;;  %2089 = vrot.lane.b32.xlu0 %v2083_v25, %s6936_s11  ;;  %v1744_v37 = vmul.f32 %v1743_v5, %v7946_v39 }
 0x265   : > { %v8223_v26 = vpop.permute.xlu1 %1639  ;;  %v8225_v59 = vpop.permute.xlu0 %1641 }
 0x266   : > { %v1648_v16 = vadd.f32 %v8223_v26, %v8187_v62  ;;  %v1649_v29 = vadd.f32 %v8225_v59, %v8189_v60  ;;  %v1761_v62 = vmul.f32 %v1759_v49, %v7959_v28 }
 0x267   : > { %2091 = vrot.lane.b32.xlu1 %v2084_v11, %s6936_s11  ;;  %2093 = vrot.lane.b32.xlu0 %v2085_v53, %s6936_s11 }
 0x269   : > { %v8233_v27 = vpop.permute.xlu1 %1643  ;;  %v1660_v57 = vpop.permute.xlu0 %1659 }
 0x26a   : > { %v1668_v15 = vadd.f32 %v1660_v57, %v1588_v14  ;;  %v2179_v14 = vmul.f32 %v2177_v3, %v8254_v31  ;;  %v2197_v57 = vstv %s8252_s29  ;;  %v1650_v60 = vadd.f32 %v8233_v27, %v8197_v58  ;;  %s8505_s29 = sld [smem:[#allocation4 + $0x6d]] }
 0x26b   : > { %2109 = vrot.lane.b32.xlu1 %v2103_v43, %s6936_s11  ;;  %2111 = vrot.lane.b32.xlu0 %v2104_v42, %s6936_s11  ;;  %v2199_v5 = vmul.f32 %v2197_v57, %v8254_v31 }
 0x26c   : > { %v8249_v10 = vadd.f32 %v1736_v47, %v1668_v15 }
 0x26d   : > { %v1662_v45 = vpop.permute.xlu1 %1661  ;;  %v1664_v56 = vpop.permute.xlu0 %1663 }
 0x26e   : > { %v1669_v61 = vadd.f32 %v1662_v45, %v1589_v32  ;;  %v1670_v19 = vadd.f32 %v1664_v56, %v1590_v50  ;;  %v2180_v32 = vmul.f32 %v2177_v3, %v8256_v20  ;;  %v2198_v50 = vmul.f32 %v2197_v57, %v8239_v35 }
 0x26f   : > { %2113 = vrot.lane.b32.xlu1 %v2105_v52, %s6936_s11  ;;  %2164 = vrot.lane.b32.xlu0 %v2158_v41, %s6935_s28  ;;  %v1753_v41 = vmul.f32 %v1751_v55, %v7959_v28  ;;  %v1762_v28 = vmul.f32 %v1759_v49, %v7961_v54 }
 0x270   : > { %v8265_v22 = vadd.f32 %v1737_v30, %v1669_v61  ;;  %v8267_v21 = vadd.f32 %v1738_v36, %v1670_v19 }
 0x271   : > { %v1680_v51 = vpop.permute.xlu1 %1679  ;;  %v1682_v46 = vpop.permute.xlu0 %1681 }
 0x272   : > { %v1688_v9 = vadd.f32 %v1680_v51, %v1608_v24  ;;  %v1689_v12 = vadd.f32 %v1682_v46, %v1609_v34  ;;  %v2200_v24 = vmul.f32 %v2197_v57, %v8256_v20  ;;  %v2217_v34 = vstv %s8290_s6  ;;  %s8525_s6 = sld [smem:[#allocation4 + $0x6e]] }
 0x273   : > { %2166 = vrot.lane.b32.xlu1 %v2159_v8, %s6935_s28  ;;  %2168 = vrot.lane.b32.xlu0 %v2160_v23, %s6935_s28  ;;  %v1760_v8 = vmul.f32 %v1759_v49, %v7946_v39  ;;  %v2220_v55 = vmul.f32 %v2217_v34, %v8256_v20 }
 0x274   : > { %v8283_v25 = vadd.f32 %v1744_v37, %v1688_v9  ;;  %v8285_v53 = vadd.f32 %v1745_v63, %v1689_v12  ;;  %v2218_v9 = vmul.f32 %v2217_v34, %v8239_v35  ;;  %v2219_v12 = vmul.f32 %v2217_v34, %v8254_v31 }
 0x275   : > { %v1684_v11 = vpop.permute.xlu1 %1683  ;;  %v1700_v17 = vpop.permute.xlu0 %1699  ;;  %v2237_v37 = vstv %s6220_s7  ;;  %s8537_s7 = sld [smem:[#allocation4 + $0x8a]] }
 0x276   : > { %v1690_v43 = vadd.f32 %v1684_v11, %v1610_v2  ;;  %v1708_v42 = vadd.f32 %v1700_v17, %v1628_v13  ;;  %v2238_v2 = vmul.f32 %v2237_v37, %v8239_v35  ;;  %v2239_v11 = vmul.f32 %v2237_v37, %v8254_v31 }
 0x277   : > { %2184 = vrot.lane.b32.xlu1 %v2178_v33, %s6935_s28  ;;  %2186 = vrot.lane.b32.xlu0 %v2179_v14, %s6935_s28  ;;  %v2240_v17 = vmul.f32 %v2237_v37, %v8256_v20  ;;  %v2257_v33 = vstv %s6221_s8  ;;  %s8564_s8 = sld [smem:[#allocation4 + $0x6f]] }
 0x278   : > { %v8300_v15 = vadd.f32 %v1746_v4, %v1690_v43  ;;  %v8302_v18 = vadd.f32 %v1752_v7, %v1708_v42  ;;  %v2258_v43 = vmul.f32 %v2257_v33, %v8239_v35  ;;  %v2259_v42 = vmul.f32 %v2257_v33, %v8254_v31 }
 0x279   : > { %v1702_v47 = vpop.permute.xlu1 %1701  ;;  %v1704_v52 = vpop.permute.xlu0 %1703  ;;  %v2277_v4 = vstv %s6222_s9  ;;  %s8580_s9 = sld [smem:[#allocation4 + $0x8b]] }
 0x27a   : > { %v1709_v45 = vadd.f32 %v1702_v47, %v1629_v1  ;;  %v1710_v56 = vadd.f32 %v1704_v52, %v1630_v6  ;;  %v2260_v6 = vmul.f32 %v2257_v33, %v8256_v20  ;;  %v2278_v47 = vmul.f32 %v2277_v4, %v8239_v35 }
 0x27b   : > { %2188 = vrot.lane.b32.xlu1 %v2180_v32, %s6935_s28  ;;  %2204 = vrot.lane.b32.xlu0 %v2198_v50, %s6935_s28  ;;  %v2279_v50 = vmul.f32 %v2277_v4, %v8254_v31 }
 0x27c   : > { %v8315_v61 = vadd.f32 %v1753_v41, %v1709_v45  ;;  %v8317_v19 = vadd.f32 %v1754_v48, %v1710_v56  ;;  %v2280_v45 = vmul.f32 %v2277_v4, %v8256_v20  ;;  %v2297_v56 = vstv %s6223_s10  ;;  %s6244_s10 = sld [smem:[#allocation4 + $0x8c]] }
 0x27d   : > { %v1720_v30 = vpop.permute.xlu1 %1719  ;;  %v1722_v36 = vpop.permute.xlu0 %1721  ;;  %v8373_v41 = vstv %s6200_s12  ;;  %s6245_s12 = sld [smem:[#allocation4 + $0x8d]] }
 0x27e   : > { %v1728_v51 = vadd.f32 %v1720_v30, %v1648_v16  ;;  %v1729_v46 = vadd.f32 %v1722_v36, %v1649_v29  ;;  %v2298_v29 = vmul.f32 %v2297_v56, %v8239_v35  ;;  %v2299_v30 = vmul.f32 %v2297_v56, %v8254_v31  ;;  %v8380_v36 = vld [vmem:[#allocation2 + $0x49] sm:$0xff] }
 0x27f   : > { %2206 = vrot.lane.b32.xlu1 %v2199_v5, %s6935_s28  ;;  %2208 = vrot.lane.b32.xlu0 %v2200_v24, %s6935_s28  ;;  %v2352_v24 = vstv %s6228_s13  ;;  %v1931_v34 = vmul.f32 %v8373_v41, %v8085_v38  ;;  %s6246_s13 = sld [smem:[#allocation4 + $0x8e]] }
 0x280   : > { %v8328_v26 = vadd.f32 %v1760_v8, %v1728_v51  ;;  %v8330_v59 = vadd.f32 %v1761_v62, %v1729_v46  ;;  %v2300_v62 = vmul.f32 %v2297_v56, %v8256_v20 }
 0x281   : > { %v1724_v23 = vpop.permute.xlu1 %1723  ;;  %v1775_v3 = vpop.permute.xlu0 %1774 }
 0x282   : > { %v1730_v39 = vadd.f32 %v1724_v23, %v1650_v60  ;;  %v1783_v48 = vadd.f32 %v1775_v3, %v8249_v10  ;;  %v2353_v60 = vmul.f32 %v2352_v24, %v8380_v36  ;;  %v8393_v23 = vld [vmem:[#allocation2 + $0x51] sm:$0xff]  ;;  %v8395_v3 = vld [vmem:[#allocation2 + $0x59] sm:$0x3] }
 0x283   : > { %2224 = vrot.lane.b32.xlu1 %v2218_v9, %s6935_s28  ;;  %2226 = vrot.lane.b32.xlu0 %v2219_v12, %s6935_s28  ;;  %v1932_v12 = vmul.f32 %v8373_v41, %v8095_v44 }
 0x284   : > { %v8337_v58 = vadd.f32 %v1762_v28, %v1730_v39 }
 0x285   : > { %v1777_v27 = vpop.permute.xlu1 %1776  ;;  %v8339_v63 = vpop.permute.xlu0 %1778 }
 0x286   : > { %v1784_v10 = vadd.f32 %v1777_v27, %v8265_v22  ;;  %v8401_v22 = vstv %s6201_s14  ;;  %s6247_s14 = sld [smem:[#allocation4 + $0x8f]] }
 0x287   : > { %2228 = vrot.lane.b32.xlu1 %v2220_v55, %s6935_s28  ;;  %2244 = vrot.lane.b32.xlu0 %v2238_v2, %s6936_s11  ;;  %v2354_v2 = vmul.f32 %v2352_v24, %v8393_v23  ;;  %v1940_v4 = vmul.f32 %v8401_v22, %v8095_v44 }
 0x289   : > { %v1795_v13 = vpop.permute.xlu1 %1794  ;;  %v1797_v54 = vpop.permute.xlu0 %1796 }
 0x28a   : > { %v1803_v39 = vadd.f32 %v1795_v13, %v8283_v25  ;;  %v1804_v37 = vadd.f32 %v1797_v54, %v8285_v53  ;;  %v8415_v25 = vstv %s6202_s16  ;;  %s6225_s16 = sld [smem:[#allocation4 + $0x79]] }
 0x28b   : > { %2246 = vrot.lane.b32.xlu1 %v2239_v11, %s6936_s11  ;;  %2248 = vrot.lane.b32.xlu0 %v2240_v17, %s6936_s11  ;;  %v2355_v11 = vmul.f32 %v2352_v24, %v8395_v3  ;;  %v2372_v17 = vstv %s6229_s15  ;;  %s6224_s15 = sld [smem:[#allocation4 + $0x78]] }
 0x28d   : > { %v8349_v14 = vpop.permute.xlu1 %1798  ;;  %v8351_v57 = vpop.permute.xlu0 %1814 }
 0x28e   : > { %v1823_v53 = vadd.f32 %v8351_v57, %v8302_v18 }
 0x28f   : > { %2264 = vrot.lane.b32.xlu1 %v2258_v43, %s6936_s11  ;;  %2266 = vrot.lane.b32.xlu0 %v2259_v42, %s6936_s11  ;;  %v1939_v42 = vmul.f32 %v8401_v22, %v8085_v38 }
 0x291   : > { %v8357_v7 = vpop.permute.xlu1 %1816  ;;  %v8359_v1 = vpop.permute.xlu0 %1818 }
 0x292   : > { %v1824_v18 = vadd.f32 %v8357_v7, %v8315_v61 }
 0x293   : > { %2268 = vrot.lane.b32.xlu1 %v2260_v6, %s6936_s11  ;;  %2284 = vrot.lane.b32.xlu0 %v2278_v47, %s6936_s11 }
 0x295   : > { %v8365_v52 = vpop.permute.xlu1 %1834  ;;  %v8367_v32 = vpop.permute.xlu0 %1836 }
 0x296   : > { %v1843_v61 = vadd.f32 %v8365_v52, %v8328_v26  ;;  %v1844_v7 = vadd.f32 %v8367_v32, %v8330_v59 }
 0x297   : > { %2286 = vrot.lane.b32.xlu1 %v2279_v50, %s6936_s11  ;;  %2288 = vrot.lane.b32.xlu0 %v2280_v45, %s6936_s11  ;;  %v2373_v50 = vmul.f32 %v2372_v17, %v8380_v36  ;;  %v2374_v45 = vmul.f32 %v2372_v17, %v8393_v23 }
 0x299   : > { %v8376_v49 = vpop.permute.xlu1 %1838  ;;  %v1855_v16 = vpop.permute.xlu0 %1854 }
 0x29a   : > { %v1863_v5 = vadd.f32 %v1855_v16, %v1783_v48  ;;  %v2392_v48 = vstv %s6230_s17  ;;  %v1947_v16 = vmul.f32 %v8415_v25, %v8085_v38  ;;  %s6226_s17 = sld [smem:[#allocation4 + $0x7a]] }
 0x29b   : > { %2304 = vrot.lane.b32.xlu1 %v2298_v29, %s6936_s11  ;;  %2306 = vrot.lane.b32.xlu0 %v2299_v30, %s6936_s11  ;;  %v2393_v24 = vmul.f32 %v2392_v48, %v8380_v36 }
 0x29c   : > { %v8387_v51 = vadd.f32 %v1931_v34, %v1863_v5  ;;  %v2375_v5 = vmul.f32 %v2372_v17, %v8395_v3 }
 0x29d   : > { %v1857_v46 = vpop.permute.xlu1 %1856  ;;  %v8389_v8 = vpop.permute.xlu0 %1858 }
 0x29e   : > { %v1864_v9 = vadd.f32 %v1857_v46, %v1784_v10  ;;  %v1948_v10 = vmul.f32 %v8415_v25, %v8095_v44  ;;  %v8443_v46 = vstv %s6203_s19  ;;  %s6227_s19 = sld [smem:[#allocation4 + $0x7b]] }
 0x29f   : > { %2308 = vrot.lane.b32.xlu1 %v2300_v62, %s6936_s11  ;;  %2359 = vrot.lane.b32.xlu0 %v2353_v60, %s6935_s28  ;;  %v1956_v26 = vmul.f32 %v8443_v46, %v8095_v44 }
 0x2a0   : > { %v8405_v28 = vadd.f32 %v1932_v12, %v1864_v9  ;;  %v2394_v12 = vmul.f32 %v2392_v48, %v8393_v23 }
 0x2a1   : > { %v1875_v27 = vpop.permute.xlu1 %1874  ;;  %v1877_v55 = vpop.permute.xlu0 %1876 }
 0x2a2   : > { %v1883_v33 = vadd.f32 %v1875_v27, %v1803_v39  ;;  %v1884_v43 = vadd.f32 %v1877_v55, %v1804_v37  ;;  %v2395_v39 = vmul.f32 %v2392_v48, %v8395_v3  ;;  %v2412_v37 = vstv %s6231_s20  ;;  %s6237_s20 = sld [smem:[#allocation4 + $0x85]] }
 0x2a3   : > { %2361 = vrot.lane.b32.xlu1 %v2354_v2, %s6935_s28  ;;  %2363 = vrot.lane.b32.xlu0 %v2355_v11, %s6935_s28  ;;  %v1955_v2 = vmul.f32 %v8443_v46, %v8085_v38  ;;  %v2413_v17 = vmul.f32 %v2412_v37, %v8380_v36 }
 0x2a4   : > { %v8419_v13 = vadd.f32 %v1939_v42, %v1883_v33  ;;  %v8421_v54 = vadd.f32 %v1940_v4, %v1884_v43  ;;  %v2414_v33 = vmul.f32 %v2412_v37, %v8393_v23  ;;  %v2432_v43 = vstv %s6232_s21  ;;  %s6238_s21 = sld [smem:[#allocation4 + $0x86]] }
 0x2a5   : > { %v8423_v6 = vpop.permute.xlu1 %1878  ;;  %v1895_v47 = vpop.permute.xlu0 %1894  ;;  %v2415_v42 = vmul.f32 %v2412_v37, %v8395_v3  ;;  %v2433_v4 = vmul.f32 %v2432_v43, %v8380_v36 }
 0x2a6   : > { %v1903_v56 = vadd.f32 %v1895_v47, %v1823_v53 }
 0x2a7   : > { %2379 = vrot.lane.b32.xlu1 %v2373_v50, %s6935_s28  ;;  %2381 = vrot.lane.b32.xlu0 %v2374_v45, %s6935_s28  ;;  %v2434_v50 = vmul.f32 %v2432_v43, %v8393_v23  ;;  %v2435_v45 = vmul.f32 %v2432_v43, %v8395_v3 }
 0x2a8   : > { %v8433_v57 = vadd.f32 %v1947_v16, %v1903_v56  ;;  %v2452_v56 = vstv %s6233_s23  ;;  %s6239_s23 = sld [smem:[#allocation4 + $0x87]] }
 0x2a9   : > { %v1897_v29 = vpop.permute.xlu1 %1896  ;;  %v8435_v30 = vpop.permute.xlu0 %1898 }
 0x2aa   : > { %v1904_v34 = vadd.f32 %v1897_v29, %v1824_v18  ;;  %v2453_v18 = vmul.f32 %v2452_v56, %v8380_v36  ;;  %v2454_v29 = vmul.f32 %v2452_v56, %v8393_v23 }
 0x2ab   : > { %2383 = vrot.lane.b32.xlu1 %v2375_v5, %s6935_s28  ;;  %2399 = vrot.lane.b32.xlu0 %v2393_v24, %s6935_s28  ;;  %v2472_v5 = vstv %s6234_s24  ;;  %s6937_s24 = smov 1  }
 0x2ac   : > { %v8449_v62 = vadd.f32 %v1948_v10, %v1904_v34  ;;  %v2455_v10 = vmul.f32 %v2452_v56, %v8395_v3 }
 0x2ad   : > { %v1915_v60 = vpop.permute.xlu1 %1914  ;;  %v1917_v9 = vpop.permute.xlu0 %1916 }
 0x2ae   : > { %v1923_v27 = vadd.f32 %v1915_v60, %v1843_v61  ;;  %v1924_v55 = vadd.f32 %v1917_v9, %v1844_v7  ;;  %v2473_v61 = vmul.f32 %v2472_v5, %v8380_v36  ;;  %v1785_v7 = vadd.f32 %v8339_v63, %v8267_v21 }
 0x2af   : > { %2401 = vrot.lane.b32.xlu1 %v2394_v12, %s6935_s28  ;;  %2403 = vrot.lane.b32.xlu0 %v2395_v39, %s6935_s28  ;;  %v2474_v12 = vmul.f32 %v2472_v5, %v8393_v23  ;;  %v2475_v39 = vmul.f32 %v2472_v5, %v8395_v3  ;;  %v2125_v21 = vstv %s6212_s26  ;;  %s6263_s26 = sld [smem:[#allocation9 + $0x5]] }
 0x2b0   : > { %v8459_v59 = vadd.f32 %v1955_v2, %v1923_v27  ;;  %v8461_v52 = vadd.f32 %v1956_v26, %v1924_v55  ;;  %v1865_v37 = vadd.f32 %v8389_v8, %v1785_v7  ;;  %v1933_v27 = vmul.f32 %v8373_v41, %v8093_v40  ;;  %v8519_v8 = vld [vmem:[#allocation2 + $0x4a] sm:$0xff] }
 0x2b1   : > { %v8463_v32 = vpop.permute.xlu1 %1918  ;;  %v1970_v11 = vpop.permute.xlu0 %1969  ;;  %v2492_v55 = vstv %s6235_s25  ;;  %v2127_v7 = vmul.f32 %v2125_v21, %v8254_v31  ;;  %s6262_s25 = sld [smem:[#allocation8 + $0x5]] }
 0x2b2   : > { %v1978_v63 = vadd.f32 %v1970_v11, %v8387_v51  ;;  %v1936_v41 = vadd.f32 %v1933_v27, %v1865_v37  ;;  %v2495_v51 = vmul.f32 %v2492_v55, %v8395_v3  ;;  %v8527_v11 = vld [vmem:[#allocation2 + $0x5a] sm:$0x3] }
 0x2b3   : > { %2419 = vrot.lane.b32.xlu1 %v2413_v17, %s6935_s28  ;;  %2421 = vrot.lane.b32.xlu0 %v2414_v33, %s6935_s28  ;;  %v2493_v17 = vmul.f32 %v2492_v55, %v8380_v36  ;;  %v2494_v33 = vmul.f32 %v2492_v55, %v8393_v23 }
 0x2b5   : > { %v1972_v38 = vpop.permute.xlu1 %1971  ;;  %v1974_v44 = vpop.permute.xlu0 %1973 }
 0x2b6   : > { %v1979_v56 = vadd.f32 %v1972_v38, %v8405_v28  ;;  %v1825_v38 = vadd.f32 %v8359_v1, %v8317_v19  ;;  %v1949_v19 = vmul.f32 %v8415_v25, %v8093_v40  ;;  %v2141_v25 = vstv %s8525_s6  ;;  %s6267_s6 = sld [smem:[#allocation9 + $0x7]] }
 0x2b7   : > { %2423 = vrot.lane.b32.xlu1 %v2415_v42, %s6935_s28  ;;  %2439 = vrot.lane.b32.xlu0 %v2433_v4, %s6936_s11  ;;  %v2547_v42 = vstv %s6240_s27  ;;  %v2126_v4 = vmul.f32 %v2125_v21, %v8239_v35  ;;  %s6264_s27 = sld [smem:[#allocation8 + $0x6]] }
 0x2b8   : > { %v2550_v27 = vmul.f32 %v2547_v42, %v8527_v11 }
 0x2b9   : > { %v8473_v53 = vpop.permute.xlu1 %1989  ;;  %v8475_v47 = vpop.permute.xlu0 %1991 }
 0x2ba   : > { %v1999_v55 = vadd.f32 %v8475_v47, %v8421_v54 }
 0x2bb   : > { %2441 = vrot.lane.b32.xlu1 %v2434_v50, %s6936_s11  ;;  %2443 = vrot.lane.b32.xlu0 %v2435_v45, %s6936_s11  ;;  %v8529_v50 = vld [vmem:[#allocation2 + $0x52] sm:$0xff]  ;;  %v1805_v45 = vadd.f32 %v8349_v14, %v8300_v15  ;;  %v1941_v15 = vmul.f32 %v8401_v22, %v8093_v40 }
 0x2bd   : > { %v8481_v48 = vpop.permute.xlu1 %1993  ;;  %v8483_v16 = vpop.permute.xlu0 %2009  ;;  %v1885_v37 = vadd.f32 %v8423_v6, %v1805_v45  ;;  %v1998_v6 = vadd.f32 %v8473_v53, %v8419_v13  ;;  %v1905_v13 = vadd.f32 %v8435_v30, %v1825_v38 }
 0x2bf   : > { %2459 = vrot.lane.b32.xlu1 %v2453_v18, %s6936_s11  ;;  %2461 = vrot.lane.b32.xlu0 %v2454_v29, %s6936_s11  ;;  %v1980_v18 = vadd.f32 %v1974_v44, %v1936_v41  ;;  %v2549_v44 = vmul.f32 %v2547_v42, %v8529_v50  ;;  %v1944_v54 = vadd.f32 %v1941_v15, %v1885_v37 }
 0x2c1   : > { %v8489_v24 = vpop.permute.xlu1 %2011  ;;  %v8491_v34 = vpop.permute.xlu0 %2013  ;;  %v2000_v41 = vadd.f32 %v8481_v48, %v1944_v54 }
 0x2c3   : > { %2463 = vrot.lane.b32.xlu1 %v2455_v10, %s6936_s11  ;;  %2479 = vrot.lane.b32.xlu0 %v2473_v61, %s6936_s11  ;;  %v2548_v61 = vmul.f32 %v2547_v42, %v8519_v8 }
 0x2c5   : > { %v8499_v60 = vpop.permute.xlu1 %2029  ;;  %v8501_v9 = vpop.permute.xlu0 %2031 }
 0x2c7   : > { %2481 = vrot.lane.b32.xlu1 %v2474_v12, %s6936_s11  ;;  %2483 = vrot.lane.b32.xlu0 %v2475_v39, %s6936_s11  ;;  %v2128_v12 = vmul.f32 %v2125_v21, %v8256_v20  ;;  %v2133_v39 = vstv %s8505_s29  ;;  %s6265_s29 = sld [smem:[#allocation9 + $0x6]] }
 0x2c9   : > { %v8513_v2 = vpop.permute.xlu1 %2033  ;;  %v2050_v26 = vpop.permute.xlu0 %2049 }
 0x2ca   : > { %v2058_v43 = vadd.f32 %v2050_v26, %v1978_v63  ;;  %v2567_v26 = vstv %s8517_s30  ;;  %s6266_s30 = sld [smem:[#allocation8 + $0x7]] }
 0x2cb   : > { %2499 = vrot.lane.b32.xlu1 %v2493_v17, %s6936_s11  ;;  %2501 = vrot.lane.b32.xlu0 %v2494_v33, %s6936_s11  ;;  %v2134_v17 = vmul.f32 %v2133_v39, %v8239_v35  ;;  %v2135_v33 = vmul.f32 %v2133_v39, %v8254_v31  ;;  %v2568_v30 = vmul.f32 %v2567_v26, %v8519_v8 }
 0x2cc   : > { %v8534_v29 = vadd.f32 %v2126_v4, %v2058_v43  ;;  %v2018_v43 = vadd.f32 %v8483_v16, %v8433_v57  ;;  %v2142_v57 = vmul.f32 %v2141_v25, %v8239_v35  ;;  %v1845_v16 = vadd.f32 %v8376_v49, %v8337_v58 }
 0x2cd   : > { %v2052_v5 = vpop.permute.xlu1 %2051  ;;  %v2054_v10 = vpop.permute.xlu0 %2053  ;;  %v2143_v58 = vmul.f32 %v2141_v25, %v8254_v31  ;;  %v2144_v49 = vmul.f32 %v2141_v25, %v8256_v20 }
 0x2ce   : > { %v2059_v14 = vadd.f32 %v2052_v5, %v1979_v56  ;;  %v2060_v28 = vadd.f32 %v2054_v10, %v1980_v18  ;;  %v2569_v56 = vmul.f32 %v2567_v26, %v8529_v50  ;;  %v2587_v18 = vstv %s8537_s7  ;;  %s6268_s7 = sld [smem:[#allocation8 + $0x8]] }
 0x2cf   : > { %2503 = vrot.lane.b32.xlu1 %v2495_v51, %s6936_s11  ;;  %2554 = vrot.lane.b32.xlu0 %v2548_v61, %s6935_s28  ;;  %v2136_v5 = vmul.f32 %v2133_v39, %v8256_v20  ;;  %v1952_v10 = vadd.f32 %v1949_v19, %v1905_v13  ;;  %v2588_v38 = vmul.f32 %v2587_v18, %v8519_v8 }
 0x2d0   : > { %v8555_v22 = vadd.f32 %v2127_v7, %v2059_v14  ;;  %v8557_v21 = vadd.f32 %v2128_v12, %v2060_v28  ;;  %v2570_v7 = vmul.f32 %v2567_v26, %v8527_v11  ;;  %v2019_v12 = vadd.f32 %v8489_v24, %v8449_v62 }
 0x2d1   : > { %v2070_v1 = vpop.permute.xlu1 %2069  ;;  %v2072_v63 = vpop.permute.xlu0 %2071  ;;  %v2020_v39 = vadd.f32 %v8491_v34, %v1952_v10  ;;  %v1957_v62 = vmul.f32 %v8443_v46, %v8093_v40  ;;  %v2039_v19 = vadd.f32 %v8501_v9, %v8461_v52  ;;  %v2607_v26 = vstv %s8580_s9  ;;  %s6270_s9 = sld [smem:[#allocation8 + $0x9]] }
 0x2d2   : > { %v2078_v53 = vadd.f32 %v2070_v1, %v1998_v6  ;;  %v2079_v47 = vadd.f32 %v2072_v63, %v1999_v55  ;;  %v2590_v6 = vmul.f32 %v2587_v18, %v8527_v11  ;;  %v2038_v55 = vadd.f32 %v8499_v60, %v8459_v59 }
 0x2d3   : > { %2556 = vrot.lane.b32.xlu1 %v2549_v44, %s6935_s28  ;;  %2558 = vrot.lane.b32.xlu0 %v2550_v27, %s6935_s28  ;;  %v2149_v44 = vstv %s8564_s8  ;;  %v1925_v27 = vadd.f32 %v8463_v32, %v1845_v16  ;;  %v2589_v63 = vmul.f32 %v2587_v18, %v8529_v50  ;;  %v2608_v25 = vmul.f32 %v2607_v26, %v8519_v8  ;;  %s6269_s8 = sld [smem:[#allocation9 + $0x8]] }
 0x2d4   : > { %v8573_v42 = vadd.f32 %v2134_v17, %v2078_v53  ;;  %v8575_v4 = vadd.f32 %v2135_v33, %v2079_v47  ;;  %v2150_v17 = vmul.f32 %v2149_v44, %v8239_v35  ;;  %v2151_v53 = vmul.f32 %v2149_v44, %v8254_v31 }
 0x2d5   : > { %v2074_v51 = vpop.permute.xlu1 %2073  ;;  %v2090_v45 = vpop.permute.xlu0 %2089  ;;  %v1960_v33 = vadd.f32 %v1957_v62, %v1925_v27  ;;  %v2609_v35 = vmul.f32 %v2607_v26, %v8529_v50  ;;  %v2152_v31 = vmul.f32 %v2149_v44, %v8256_v20  ;;  %v2687_v62 = vstv %s6247_s14  ;;  %s6284_s14 = sld [smem:[#allocation8 + $0x10]] }
 0x2d6   : > { %v2080_v48 = vadd.f32 %v2074_v51, %v2000_v41  ;;  %v2098_v61 = vadd.f32 %v2090_v45, %v2018_v43  ;;  %v2627_v43 = vstv %s6244_s10  ;;  %s6271_s10 = sld [smem:[#allocation9 + $0x9]] }
 0x2d7   : > { %2574 = vrot.lane.b32.xlu1 %v2568_v30, %s6935_s28  ;;  %2576 = vrot.lane.b32.xlu0 %v2569_v56, %s6935_s28  ;;  %v2040_v59 = vadd.f32 %v8513_v2, %v1960_v33  ;;  %v2610_v2 = vmul.f32 %v2607_v26, %v8527_v11  ;;  %v2628_v56 = vmul.f32 %v2627_v43, %v8519_v8 }
 0x2d8   : > { %v8592_v37 = vadd.f32 %v2136_v5, %v2080_v48  ;;  %v8594_v15 = vadd.f32 %v2142_v57, %v2098_v61  ;;  %v2630_v18 = vmul.f32 %v2627_v43, %v8527_v11  ;;  %v2629_v10 = vmul.f32 %v2627_v43, %v8529_v50 }
 0x2d9   : > { %v2092_v14 = vpop.permute.xlu1 %2091  ;;  %v2094_v28 = vpop.permute.xlu0 %2093  ;;  %v2647_v48 = vstv %s6245_s12  ;;  %v2690_v26 = vmul.f32 %v2687_v62, %v8527_v11  ;;  %s6282_s12 = sld [smem:[#allocation8 + $0xf]] }
 0x2da   : > { %v2099_v24 = vadd.f32 %v2092_v14, %v2019_v12  ;;  %v2100_v34 = vadd.f32 %v2094_v28, %v2020_v39  ;;  %v2648_v16 = vmul.f32 %v2647_v48, %v8519_v8  ;;  %v2667_v12 = vstv %s6246_s13  ;;  %s6283_s13 = sld [smem:[#allocation9 + $0xf]] }
 0x2db   : > { %2578 = vrot.lane.b32.xlu1 %v2570_v7, %s6935_s28  ;;  %2594 = vrot.lane.b32.xlu0 %v2588_v38, %s6935_s28  ;;  %v2649_v7 = vmul.f32 %v2647_v48, %v8529_v50  ;;  %v2650_v39 = vmul.f32 %v2647_v48, %v8527_v11  ;;  %v2668_v38 = vmul.f32 %v2667_v12, %v8519_v8 }
 0x2dc   : > { %v8610_v1 = vadd.f32 %v2143_v58, %v2099_v24  ;;  %v8612_v32 = vadd.f32 %v2144_v49, %v2100_v34  ;;  %v2670_v58 = vmul.f32 %v2667_v12, %v8527_v11  ;;  %v2669_v27 = vmul.f32 %v2667_v12, %v8529_v50 }
 0x2dd   : > { %v2110_v40 = vpop.permute.xlu1 %2109  ;;  %v2112_v46 = vpop.permute.xlu0 %2111  ;;  %v2320_v24 = vstv %s6224_s15  ;;  %s6285_s15 = sld [smem:[#allocation9 + $0x10]] }
 0x2de   : > { %v2118_v13 = vadd.f32 %v2110_v40, %v2038_v55  ;;  %v2119_v54 = vadd.f32 %v2112_v46, %v2039_v19  ;;  %v2688_v19 = vmul.f32 %v2687_v62, %v8519_v8  ;;  %v2689_v40 = vmul.f32 %v2687_v62, %v8529_v50 }
 0x2df   : > { %2596 = vrot.lane.b32.xlu1 %v2589_v63, %s6935_s28  ;;  %2598 = vrot.lane.b32.xlu0 %v2590_v6, %s6935_s28  ;;  %v2321_v63 = vmul.f32 %v2320_v24, %v8380_v36 }
 0x2e0   : > { %v8621_v52 = vadd.f32 %v2150_v17, %v2118_v13  ;;  %v8623_v60 = vadd.f32 %v2151_v53, %v2119_v54 }
 0x2e1   : > { %v2114_v9 = vpop.permute.xlu1 %2113  ;;  %v2165_v47 = vpop.permute.xlu0 %2164 }
 0x2e2   : > { %v2120_v41 = vadd.f32 %v2114_v9, %v2040_v59  ;;  %v2173_v34 = vadd.f32 %v2165_v47, %v8534_v29  ;;  %v2322_v9 = vmul.f32 %v2320_v24, %v8393_v23  ;;  %v2323_v47 = vmul.f32 %v2320_v24, %v8395_v3 }
 0x2e3   : > { %2614 = vrot.lane.b32.xlu1 %v2608_v25, %s6935_s28  ;;  %2616 = vrot.lane.b32.xlu0 %v2609_v35, %s6935_s28  ;;  %v2328_v25 = vstv %s6225_s16  ;;  %s6286_s16 = sld [smem:[#allocation8 + $0x11]] }
 0x2e4   : > { %v8631_v51 = vadd.f32 %v2152_v31, %v2120_v41  ;;  %v2331_v12 = vmul.f32 %v2328_v25, %v8395_v3 }
 0x2e5   : > { %v2167_v45 = vpop.permute.xlu1 %2166  ;;  %v2169_v30 = vpop.permute.xlu0 %2168 }
 0x2e6   : > { %v2174_v17 = vadd.f32 %v2167_v45, %v8555_v22  ;;  %v2175_v29 = vadd.f32 %v2169_v30, %v8557_v21  ;;  %v2329_v30 = vmul.f32 %v2328_v25, %v8380_v36 }
 0x2e7   : > { %2618 = vrot.lane.b32.xlu1 %v2610_v2, %s6935_s28  ;;  %2634 = vrot.lane.b32.xlu0 %v2628_v56, %s6936_s11  ;;  %v2330_v56 = vmul.f32 %v2328_v25, %v8393_v23 }
 0x2e9   : > { %v2185_v20 = vpop.permute.xlu1 %2184  ;;  %v2187_v5 = vpop.permute.xlu0 %2186 }
 0x2ea   : > { %v2193_v35 = vadd.f32 %v2185_v20, %v8573_v42  ;;  %v2194_v41 = vadd.f32 %v2187_v5, %v8575_v4 }
 0x2eb   : > { %2636 = vrot.lane.b32.xlu1 %v2629_v10, %s6936_s11  ;;  %2638 = vrot.lane.b32.xlu0 %v2630_v18, %s6936_s11  ;;  %v2336_v18 = vstv %s6226_s17  ;;  %s6287_s17 = sld [smem:[#allocation9 + $0x11]] }
 0x2ec   : > { %v2338_v24 = vmul.f32 %v2336_v18, %v8393_v23 }
 0x2ed   : > { %v2189_v61 = vpop.permute.xlu1 %2188  ;;  %v2205_v57 = vpop.permute.xlu0 %2204 }
 0x2ee   : > { %v2195_v10 = vadd.f32 %v2189_v61, %v8592_v37  ;;  %v2213_v42 = vadd.f32 %v2205_v57, %v8594_v15 }
 0x2ef   : > { %2654 = vrot.lane.b32.xlu1 %v2648_v16, %s6936_s11  ;;  %2656 = vrot.lane.b32.xlu0 %v2649_v7, %s6936_s11 }
 0x2f1   : > { %v2207_v14 = vpop.permute.xlu1 %2206  ;;  %v2209_v28 = vpop.permute.xlu0 %2208 }
 0x2f3   : > { %2658 = vrot.lane.b32.xlu1 %v2650_v39, %s6936_s11  ;;  %2674 = vrot.lane.b32.xlu0 %v2668_v38, %s6936_s11  ;;  %v2337_v39 = vmul.f32 %v2336_v18, %v8380_v36  ;;  %v2214_v38 = vadd.f32 %v2207_v14, %v8610_v1 }
 0x2f5   : > { %v8649_v49 = vpop.permute.xlu1 %2224  ;;  %v8651_v44 = vpop.permute.xlu0 %2226 }
 0x2f6   : > { %v2234_v1 = vadd.f32 %v8651_v44, %v8623_v60 }
 0x2f7   : > { %2676 = vrot.lane.b32.xlu1 %v2669_v27, %s6936_s11  ;;  %2678 = vrot.lane.b32.xlu0 %v2670_v58, %s6936_s11  ;;  %v2215_v58 = vadd.f32 %v2209_v28, %v8612_v32 }
 0x2f9   : > { %v8657_v6 = vpop.permute.xlu1 %2228  ;;  %v2245_v55 = vpop.permute.xlu0 %2244 }
 0x2fa   : > { %v2253_v46 = vadd.f32 %v2245_v55, %v2173_v34  ;;  %v2339_v34 = vmul.f32 %v2336_v18, %v8395_v3  ;;  %v2344_v55 = vstv %s6227_s19  ;;  %s6288_s19 = sld [smem:[#allocation8 + $0x12]] }
 0x2fb   : > { %2694 = vrot.lane.b32.xlu1 %v2688_v19, %s6936_s11  ;;  %2696 = vrot.lane.b32.xlu0 %v2689_v40, %s6936_s11  ;;  %v2233_v19 = vadd.f32 %v8649_v49, %v8621_v52  ;;  %v2347_v60 = vmul.f32 %v2344_v55, %v8395_v3 }
 0x2fc   : > { %v8667_v33 = vadd.f32 %v2321_v63, %v2253_v46 }
 0x2fd   : > { %v2247_v13 = vpop.permute.xlu1 %2246  ;;  %v2249_v54 = vpop.permute.xlu0 %2248 }
 0x2fe   : > { %v2254_v53 = vadd.f32 %v2247_v13, %v2174_v17  ;;  %v2255_v59 = vadd.f32 %v2249_v54, %v2175_v29  ;;  %v2346_v17 = vmul.f32 %v2344_v55, %v8393_v23  ;;  %v2235_v29 = vadd.f32 %v8657_v6, %v8631_v51 }
 0x2ff   : > { %2698 = vrot.lane.b32.xlu1 %v2690_v26, %s6936_s11  ;;  %v2345_v26 = vmul.f32 %v2344_v55, %v8380_v36  ;;  %s6236_s11 = sld [smem:[#allocation4 + $0x84]] }
 0x300   : > { %v8674_v22 = vadd.f32 %v2322_v9, %v2254_v53  ;;  %v8676_v21 = vadd.f32 %v2323_v47, %v2255_v59 }
 0x301   : > { %v2265_v43 = vpop.permute.xlu1 %2264  ;;  %v2267_v31 = vpop.permute.xlu0 %2266 }
 0x302   : > { %v2273_v2 = vadd.f32 %v2265_v43, %v2193_v35  ;;  %v2274_v45 = vadd.f32 %v2267_v31, %v2194_v41 }
 0x304   : > { %v8682_v20 = vadd.f32 %v2329_v30, %v2273_v2  ;;  %v8684_v4 = vadd.f32 %v2330_v56, %v2274_v45 }
 0x305   : > { %v2269_v5 = vpop.permute.xlu1 %2268  ;;  %v2285_v48 = vpop.permute.xlu0 %2284  ;;  %v8715_v43 = vstv %s6236_s11  ;;  %s6289_s11 = sld [smem:[#allocation9 + $0x12]] }
 0x306   : > { %v2275_v16 = vadd.f32 %v2269_v5, %v2195_v10  ;;  %v2293_v7 = vadd.f32 %v2285_v48, %v2213_v42  ;;  %v2516_v30 = vmul.f32 %v8715_v43, %v8519_v8  ;;  %v2517_v48 = vmul.f32 %v8715_v43, %v8529_v50 }
 0x308   : > { %v8690_v27 = vadd.f32 %v2331_v12, %v2275_v16  ;;  %v8692_v37 = vadd.f32 %v2337_v39, %v2293_v7  ;;  %v8725_v16 = vstv %s6237_s20  ;;  %s6290_s20 = sld [smem:[#allocation8 + $0x13]] }
 0x309   : > { %v2287_v15 = vpop.permute.xlu1 %2286  ;;  %v2289_v61 = vpop.permute.xlu0 %2288 }
 0x30a   : > { %v2294_v57 = vadd.f32 %v2287_v15, %v2214_v38  ;;  %v2295_v62 = vadd.f32 %v2289_v61, %v2215_v58  ;;  %v2525_v61 = vmul.f32 %v8725_v16, %v8529_v50 }
 0x30c   : > { %v2341_v32 = vadd.f32 %v2338_v24, %v2294_v57  ;;  %v8700_v14 = vadd.f32 %v2339_v34, %v2295_v62  ;;  %v8733_v57 = vstv %s6238_s21  ;;  %s2804_s21 = sld [smem:[#allocation8]] }
 0x30d   : > { %v2305_v28 = vpop.permute.xlu1 %2304  ;;  %v2307_v40 = vpop.permute.xlu0 %2306 }
 0x30e   : > { %v2313_v46 = vadd.f32 %v2305_v28, %v2233_v19  ;;  %v2314_v63 = vadd.f32 %v2307_v40, %v2234_v1  ;;  %v2532_v19 = vmul.f32 %v8733_v57, %v8519_v8 }
 0x310   : > { %v2348_v13 = vadd.f32 %v2345_v26, %v2313_v46  ;;  %v2349_v54 = vadd.f32 %v2346_v17, %v2314_v63  ;;  %v2533_v26 = vmul.f32 %v8733_v57, %v8529_v50  ;;  %v8740_v17 = vstv %s6239_s23  ;;  %s6291_s23 = sld [smem:[#allocation9 + $0x13]] }
 0x311   : > { %v2309_v52 = vpop.permute.xlu1 %2308  ;;  %v2360_v49 = vpop.permute.xlu0 %2359 }
 0x312   : > { %v2315_v53 = vadd.f32 %v2309_v52, %v2235_v29  ;;  %v2368_v3 = vadd.f32 %v2360_v49, %v8667_v33 }
 0x314   : > { %v8707_v44 = vadd.f32 %v2347_v60, %v2315_v53 }
 0x315   : > { %v2362_v59 = vpop.permute.xlu1 %2361  ;;  %v8709_v9 = vpop.permute.xlu0 %2363 }
 0x316   : > { %v2369_v56 = vadd.f32 %v2362_v59, %v8674_v22  ;;  %v2524_v22 = vmul.f32 %v8725_v16, %v8519_v8 }
 0x319   : > { %v2380_v47 = vpop.permute.xlu1 %2379  ;;  %v2382_v25 = vpop.permute.xlu0 %2381 }
 0x31a   : > { %v2388_v33 = vadd.f32 %v2380_v47, %v8682_v20  ;;  %v2389_v7 = vadd.f32 %v2382_v25, %v8684_v4  ;;  %v2540_v47 = vmul.f32 %v8740_v17, %v8519_v8  ;;  %v2370_v8 = vadd.f32 %v8709_v9, %v8676_v21 }
 0x31d   : > { %v8711_v36 = vpop.permute.xlu1 %2383  ;;  %v2400_v23 = vpop.permute.xlu0 %2399 }
 0x31e   : > { %v2408_v62 = vadd.f32 %v2400_v23, %v8692_v37 }
 0x321   : > { %v2402_v35 = vpop.permute.xlu1 %2401  ;;  %v8713_v51 = vpop.permute.xlu0 %2403 }
 0x322   : > { %v2409_v1 = vadd.f32 %v2402_v35, %v2341_v32  ;;  %v2541_v32 = vmul.f32 %v8740_v17, %v8529_v50 }
 0x325   : > { %v2420_v6 = vpop.permute.xlu1 %2419  ;;  %v2422_v41 = vpop.permute.xlu0 %2421 }
 0x326   : > { %v2428_v29 = vadd.f32 %v2420_v6, %v2348_v13  ;;  %v2429_v37 = vadd.f32 %v2422_v41, %v2349_v54 }
 0x329   : > { %v8718_v31 = vpop.permute.xlu1 %2423  ;;  %v2440_v2 = vpop.permute.xlu0 %2439 }
 0x32a   : > { %v2448_v45 = vadd.f32 %v2440_v2, %v2368_v3 }
 0x32c   : > { %v2519_v18 = vadd.f32 %v2516_v30, %v2448_v45 }
 0x32d   : > { %v2442_v10 = vpop.permute.xlu1 %2441  ;;  %v2444_v42 = vpop.permute.xlu0 %2443 }
 0x32e   : > { %v2449_v5 = vadd.f32 %v2442_v10, %v2369_v56  ;;  %v2450_v50 = vadd.f32 %v2444_v42, %v2370_v8  ;;  %v2526_v42 = vmul.f32 %v8725_v16, %v8527_v11 }
 0x330   : > { %v2520_v12 = vadd.f32 %v2517_v48, %v2449_v5  ;;  %v2518_v48 = vmul.f32 %v8715_v43, %v8527_v11 }
 0x331   : > { %v2460_v39 = vpop.permute.xlu1 %2459  ;;  %v2462_v38 = vpop.permute.xlu0 %2461 }
 0x332   : > { %v2468_v58 = vadd.f32 %v2460_v39, %v2388_v33  ;;  %v2469_v15 = vadd.f32 %v2462_v38, %v2389_v7  ;;  %v2521_v38 = vadd.f32 %v2518_v48, %v2450_v50 }
 0x334   : > { %v2527_v24 = vadd.f32 %v2524_v22, %v2468_v58  ;;  %v2528_v20 = vadd.f32 %v2525_v61, %v2469_v15  ;;  %v2390_v15 = vadd.f32 %v8711_v36, %v8690_v27  ;;  %v2534_v27 = vmul.f32 %v8733_v57, %v8527_v11 }
 0x335   : > { %v2464_v34 = vpop.permute.xlu1 %2463  ;;  %v2480_v4 = vpop.permute.xlu0 %2479  ;;  %v2430_v57 = vadd.f32 %v8718_v31, %v8707_v44 }
 0x336   : > { %v2488_v55 = vadd.f32 %v2480_v4, %v2408_v62  ;;  %v2470_v62 = vadd.f32 %v2464_v34, %v2390_v15  ;;  %v2410_v4 = vadd.f32 %v8713_v51, %v8700_v14 }
 0x338   : > { %v2535_v28 = vadd.f32 %v2532_v19, %v2488_v55 }
 0x339   : > { %v2482_v40 = vpop.permute.xlu1 %2481  ;;  %v2484_v46 = vpop.permute.xlu0 %2483 }
 0x33a   : > { %v2489_v63 = vadd.f32 %v2482_v40, %v2409_v1  ;;  %v2490_v34 = vadd.f32 %v2484_v46, %v2410_v4  ;;  %v2529_v1 = vadd.f32 %v2526_v42, %v2470_v62  ;;  %v2945_v4 = vstv %s6265_s29  ;;  %s8923_s29 = sld [smem:[#allocation8 + $0x1]] }
 0x33c   : > { %v2536_v52 = vadd.f32 %v2533_v26, %v2489_v63 }
 0x33d   : > { %v2500_v49 = vpop.permute.xlu1 %2499  ;;  %v2502_v53 = vpop.permute.xlu0 %2501 }
 0x33e   : > { %v2508_v60 = vadd.f32 %v2500_v49, %v2428_v29  ;;  %v2509_v59 = vadd.f32 %v2502_v53, %v2429_v37 }
 0x340   : > { %v8746_v25 = vadd.f32 %v2540_v47, %v2508_v60  ;;  %v8748_v23 = vadd.f32 %v2541_v32, %v2509_v59  ;;  %v2542_v60 = vmul.f32 %v8740_v17, %v8527_v11 }
 0x341   : > { %v2504_v35 = vpop.permute.xlu1 %2503  ;;  %v2555_v3 = vpop.permute.xlu0 %2554 }
 0x342   : > { %v2563_v33 = vadd.f32 %v2555_v3, %v2519_v18  ;;  %v2510_v53 = vadd.f32 %v2504_v35, %v2430_v57 }
 0x345   : > { %v2557_v2 = vpop.permute.xlu1 %2556  ;;  %v2559_v13 = vpop.permute.xlu0 %2558 }
 0x346   : > { %v2564_v22 = vadd.f32 %v2557_v2, %v2520_v12  ;;  %v2565_v61 = vadd.f32 %v2559_v13, %v2521_v38 }
 0x349   : > { %v2575_v54 = vpop.permute.xlu1 %2574  ;;  %v2577_v6 = vpop.permute.xlu0 %2576 }
 0x34a   : > { %v2583_v55 = vadd.f32 %v2575_v54, %v2527_v24  ;;  %v2584_v19 = vadd.f32 %v2577_v6, %v2528_v20  ;;  %v2537_v24 = vadd.f32 %v2534_v27, %v2490_v34  ;;  %v2885_v6 = vstv %s6262_s25  ;;  %s6302_s25 = sld [smem:[#allocation8 + $0x19]] }
 0x34b   : > { %v2965_v27 = vstv %s6266_s30  ;;  %s8925_s30 = sld [smem:[#allocation9 + $0x19]] }
 0x34d   : > { %v2579_v41 = vpop.permute.xlu1 %2578  ;;  %v2595_v45 = vpop.permute.xlu0 %2594 }
 0x34e   : > { %v2585_v63 = vadd.f32 %v2579_v41, %v2529_v1  ;;  %v2603_v26 = vadd.f32 %v2595_v45, %v2535_v28 }
 0x351   : > { %v2597_v30 = vpop.permute.xlu1 %2596  ;;  %v2599_v56 = vpop.permute.xlu0 %2598 }
 0x352   : > { %v2604_v37 = vadd.f32 %v2597_v30, %v2536_v52  ;;  %v2605_v49 = vadd.f32 %v2599_v56, %v2537_v24  ;;  %v2545_v52 = vadd.f32 %v2542_v60, %v2510_v53 }
 0x355   : > { %v2615_v10 = vpop.permute.xlu1 %2614  ;;  %v2617_v5 = vpop.permute.xlu0 %2616 }
 0x356   : > { %v2623_v32 = vadd.f32 %v2615_v10, %v8746_v25  ;;  %v2624_v3 = vadd.f32 %v2617_v5, %v8748_v23 }
 0x359   : > { %v2619_v7 = vpop.permute.xlu1 %2618  ;;  %v2635_v39 = vpop.permute.xlu0 %2634 }
 0x35a   : > { %v2643_v58 = vadd.f32 %v2635_v39, %v2563_v33  ;;  %v2625_v54 = vadd.f32 %v2619_v7, %v2545_v52  ;;  %v2905_v7 = vstv %s6263_s26  ;;  %s2812_s26 = sld [smem:[#allocation9]] }
 0x35c   : > { %2709 = vrot.lane.b32.xlu0 %v2643_v58, %s6937_s24 }
 0x35d   : > { %v2637_v21 = vpop.permute.xlu1 %2636  ;;  %v2639_v9 = vpop.permute.xlu0 %2638 }
 0x35e   : > { %v2644_v43 = vadd.f32 %v2637_v21, %v2564_v22  ;;  %v2645_v18 = vadd.f32 %v2639_v9, %v2565_v61  ;;  %v2925_v22 = vstv %s6264_s27  ;;  %s8918_s27 = sld [smem:[#allocation9 + $0xa]] }
 0x360   : > { %2711 = vrot.lane.b32.xlu1 %v2644_v43, %s6937_s24  ;;  %2713 = vrot.lane.b32.xlu0 %v2645_v18, %s6937_s24 }
 0x361   : > { %v2655_v36 = vpop.permute.xlu1 %2654  ;;  %v2657_v12 = vpop.permute.xlu0 %2656 }
 0x362   : > { %v2663_v40 = vadd.f32 %v2655_v36, %v2583_v55  ;;  %v2664_v16 = vadd.f32 %v2657_v12, %v2584_v19 }
 0x364   : > { %2726 = vrot.lane.b32.xlu1 %v2663_v40, %s6937_s24  ;;  %2728 = vrot.lane.b32.xlu0 %v2664_v16, %s6937_s24  ;;  %v2985_v40 = vstv %s6267_s6  ;;  %s8932_s6 = sld [smem:[#allocation8 + $0xb]] }
 0x365   : > { %v2659_v14 = vpop.permute.xlu1 %2658  ;;  %v2675_v51 = vpop.permute.xlu0 %2674 }
 0x366   : > { %v2665_v20 = vadd.f32 %v2659_v14, %v2585_v63  ;;  %v2683_v29 = vadd.f32 %v2675_v51, %v2603_v26  ;;  %v3005_v26 = vstv %s6268_s7  ;;  %s8940_s7 = sld [smem:[#allocation8 + $0x1a]] }
 0x368   : > { %2730 = vrot.lane.b32.xlu1 %v2665_v20, %s6937_s24  ;;  %2742 = vrot.lane.b32.xlu0 %v2683_v29, %s6937_s24  ;;  %v3025_v29 = vstv %s6269_s8  ;;  %s8961_s8 = sld [smem:[#allocation9 + $0x1]] }
 0x369   : > { %v2677_v46 = vpop.permute.xlu1 %2676  ;;  %v2679_v28 = vpop.permute.xlu0 %2678 }
 0x36a   : > { %v2684_v59 = vadd.f32 %v2677_v46, %v2604_v37  ;;  %v2685_v47 = vadd.f32 %v2679_v28, %v2605_v49  ;;  %v3045_v49 = vstv %s6270_s9  ;;  %s8963_s9 = sld [smem:[#allocation8 + $0x23]] }
 0x36c   : > { %2744 = vrot.lane.b32.xlu1 %v2684_v59, %s6937_s24  ;;  %2746 = vrot.lane.b32.xlu0 %v2685_v47, %s6937_s24  ;;  %v3065_v59 = vstv %s6271_s10  ;;  %s8970_s10 = sld [smem:[#allocation9 + $0xb]] }
 0x36d   : > { %v2695_v44 = vpop.permute.xlu1 %2694  ;;  %v2697_v31 = vpop.permute.xlu0 %2696 }
 0x36e   : > { %v2703_v2 = vadd.f32 %v2695_v44, %v2623_v32  ;;  %v2704_v13 = vadd.f32 %v2697_v31, %v2624_v3  ;;  %v3168_v44 = vstv %s6282_s12  ;;  %s8983_s12 = sld [smem:[#allocation8 + $0x2]] }
 0x370   : > { %2758 = vrot.lane.b32.xlu1 %v2703_v2, %s6937_s24  ;;  %2760 = vrot.lane.b32.xlu0 %v2704_v13, %s6937_s24 }
 0x371   : > { %v2699_v11 = vpop.permute.xlu1 %2698 }
 0x372   : > { %v2705_v17 = vadd.f32 %v2699_v11, %v2625_v54 }
 0x374   : > { %2762 = vrot.lane.b32.xlu1 %v2705_v17, %s6937_s24  ;;  %v3188_v17 = vstv %s6283_s13  ;;  %s6272_s24 = sld [smem:[#allocation8 + $0xa]]  ;;  %s8985_s13 = sld [smem:[#allocation9 + $0x23]] }
 0x3ce   : > { %v2710_v25 = vpop.permute.xlu0 %2709 }
 0x3cf   : > { %2719 = vst.msk [vmem:[#allocation3 + $0x1] sm:$0xff] %vm2718_vm3, %v2710_v25 }
 0x3d2   : > { %v2712_v23 = vpop.permute.xlu1 %2711  ;;  %v2714_v35 = vpop.permute.xlu0 %2713 }
 0x3d3   : > { %2720 = vst.msk [vmem:[#allocation3 + $0x9] sm:$0xff] %vm2718_vm3, %v2712_v23 }
 0x3d4   : > { %2722 = vst.msk [vmem:[#allocation3 + $0x11] sm:$0x3] %vm2721_vm4, %v2714_v35  ;;  %v3208_v35 = vstv %s6284_s14  ;;  %s8991_s14 = sld [smem:[#allocation8 + $0xc]] }
 0x3d6   : > { %v8783_v41 = vld [vmem:[#allocation3] sm:$0xff]  ;;  %v2727_v45 = vpop.permute.xlu1 %2726  ;;  %v2729_v30 = vpop.permute.xlu0 %2728 }
 0x3d7   : > { %2736 = vst.msk [vmem:[#allocation3 + $0x19] sm:$0xff] %vm2718_vm3, %v2727_v45  ;;  %2737 = vst.msk [vmem:[#allocation3 + $0x21] sm:$0xff] %vm2718_vm3, %v2729_v30  ;;  %v2886_v56 = vmul.f32 %v2885_v6, %v8783_v41  ;;  %v2906_v58 = vmul.f32 %v2905_v7, %v8783_v41  ;;  %v2926_v62 = vmul.f32 %v2925_v22, %v8783_v41  ;;  %v8854_v3 = vld [vmem:[#allocation3 + $0x1] sm:$0xff] }
 0x3d8   : > { %v2946_v55 = vmul.f32 %v2945_v4, %v8783_v41  ;;  %v2966_v12 = vmul.f32 %v2965_v27, %v8783_v41  ;;  %v2986_v16 = vmul.f32 %v2985_v40, %v8783_v41  ;;  %v3006_v51 = vmul.f32 %v3005_v26, %v8783_v41 }
 0x3d9   : > { %2892 = vrot.lane.b32.xlu0 %v2886_v56, %s6935_s28  ;;  %v3026_v57 = vmul.f32 %v3025_v29, %v8783_v41  ;;  %v3046_v28 = vmul.f32 %v3045_v49, %v8783_v41  ;;  %v3066_v47 = vmul.f32 %v3065_v59, %v8783_v41  ;;  %v3169_v52 = vmul.f32 %v3168_v44, %v8854_v3 }
 0x3da   : > { %v8789_v8 = vld [vmem:[#allocation3 + $0x8] sm:$0xff]  ;;  %v2731_v5 = vpop.permute.xlu1 %2730  ;;  %v2743_v50 = vpop.permute.xlu0 %2742  ;;  %v3189_v25 = vmul.f32 %v3188_v17, %v8854_v3  ;;  %v3209_v45 = vmul.f32 %v3208_v35, %v8854_v3 }
 0x3db   : > { %v8791_v10 = vld [vmem:[#allocation3 + $0x10] sm:$0x7]  ;;  %2738 = vst.msk [vmem:[#allocation3 + $0x29] sm:$0x3] %vm2721_vm4, %v2731_v5  ;;  %v2887_v48 = vmul.f32 %v2885_v6, %v8789_v8  ;;  %v2907_v15 = vmul.f32 %v2905_v7, %v8789_v8  ;;  %v2927_v43 = vmul.f32 %v2925_v22, %v8789_v8  ;;  %v2947_v19 = vmul.f32 %v2945_v4, %v8789_v8 }
 0x3dc   : > { %2752 = vst.msk [vmem:[#allocation3 + $0x31] sm:$0xff] %vm2718_vm3, %v2743_v50  ;;  %v2888_v33 = vmul.f32 %v2885_v6, %v8791_v10  ;;  %v2908_v9 = vmul.f32 %v2905_v7, %v8791_v10  ;;  %v2928_v18 = vmul.f32 %v2925_v22, %v8791_v10  ;;  %v2948_v36 = vmul.f32 %v2945_v4, %v8791_v10  ;;  %v8860_v2 = vld [vmem:[#allocation3 + $0x9] sm:$0xff]  ;;  %v8862_v13 = vld [vmem:[#allocation3 + $0x11] sm:$0x7] }
 0x3dd   : > { %2894 = vrot.lane.b32.xlu1 %v2887_v48, %s6935_s28  ;;  %v2967_v34 = vmul.f32 %v2965_v27, %v8789_v8  ;;  %v2968_v1 = vmul.f32 %v2965_v27, %v8791_v10  ;;  %v2987_v63 = vmul.f32 %v2985_v40, %v8789_v8  ;;  %v2988_v14 = vmul.f32 %v2985_v40, %v8791_v10 }
 0x3de   : > { %2896 = vrot.lane.b32.xlu0 %v2888_v33, %s6935_s28  ;;  %v2745_v39 = vpop.permute.xlu1 %2744  ;;  %v2747_v38 = vpop.permute.xlu0 %2746  ;;  %v3007_v24 = vmul.f32 %v3005_v26, %v8789_v8  ;;  %v3008_v20 = vmul.f32 %v3005_v26, %v8791_v10  ;;  %v3027_v37 = vmul.f32 %v3025_v29, %v8789_v8  ;;  %v3028_v46 = vmul.f32 %v3025_v29, %v8791_v10 }
 0x3df   : > { %2753 = vst.msk [vmem:[#allocation3 + $0x39] sm:$0xff] %vm2718_vm3, %v2745_v39  ;;  %v3047_v53 = vmul.f32 %v3045_v49, %v8789_v8  ;;  %v3048_v60 = vmul.f32 %v3045_v49, %v8791_v10  ;;  %v3067_v32 = vmul.f32 %v3065_v59, %v8789_v8  ;;  %v3068_v31 = vmul.f32 %v3065_v59, %v8791_v10 }
 0x3e0   : > { %2754 = vst.msk [vmem:[#allocation3 + $0x41] sm:$0x3] %vm2721_vm4, %v2747_v38  ;;  %v3170_v54 = vmul.f32 %v3168_v44, %v8860_v2  ;;  %v3171_v11 = vmul.f32 %v3168_v44, %v8862_v13  ;;  %v3190_v23 = vmul.f32 %v3188_v17, %v8860_v2  ;;  %v3191_v6 = vmul.f32 %v3188_v17, %v8862_v13 }
 0x3e1   : > { %2912 = vrot.lane.b32.xlu1 %v2906_v58, %s6935_s28  ;;  %v3210_v30 = vmul.f32 %v3208_v35, %v8860_v2  ;;  %v3211_v56 = vmul.f32 %v3208_v35, %v8862_v13  ;;  %v3228_v5 = vstv %s6285_s15  ;;  %v3248_v33 = vstv %s6286_s16  ;;  %s9006_s15 = sld [smem:[#allocation8 + $0x2d]]  ;;  %s9014_s16 = sld [smem:[#allocation9 + $0x2]] }
 0x3e2   : > { %2914 = vrot.lane.b32.xlu0 %v2907_v15, %s6935_s28  ;;  %v2759_v61 = vpop.permute.xlu1 %2758  ;;  %v2761_v21 = vpop.permute.xlu0 %2760  ;;  %v3229_v50 = vmul.f32 %v3228_v5, %v8854_v3  ;;  %v3230_v48 = vmul.f32 %v3228_v5, %v8860_v2  ;;  %v3231_v7 = vmul.f32 %v3228_v5, %v8862_v13  ;;  %v3249_v39 = vmul.f32 %v3248_v33, %v8854_v3  ;;  %v8944_v44 = vld [vmem:[#allocation3 + $0x28] sm:$0x7] }
 0x3e3   : > { %2768 = vst.msk [vmem:[#allocation3 + $0x49] sm:$0xff] %vm2718_vm3, %v2759_v61  ;;  %2769 = vst.msk [vmem:[#allocation3 + $0x51] sm:$0xff] %vm2718_vm3, %v2761_v21  ;;  %v3250_v38 = vmul.f32 %v3248_v33, %v8860_v2  ;;  %v3251_v58 = vmul.f32 %v3248_v33, %v8862_v13  ;;  %v3268_v15 = vstv %s6287_s17  ;;  %v3288_v21 = vstv %s6288_s19  ;;  %s9031_s17 = sld [smem:[#allocation9 + $0x2d]]  ;;  %s9033_s19 = sld [smem:[#allocation9 + $0x1a]] }
 0x3e4   : > { %v3269_v22 = vmul.f32 %v3268_v15, %v8854_v3  ;;  %v3270_v61 = vmul.f32 %v3268_v15, %v8860_v2  ;;  %v3348_v40 = vstv %s6291_s23  ;;  %v3451_v29 = vstv %s6302_s25  ;;  %s9068_s23 = sld [smem:[#allocation8 + $0xd]]  ;;  %s9107_s25 = sld [smem:[#allocation8 + $0x37]] }
 0x3e5   : > { %2916 = vrot.lane.b32.xlu1 %v2908_v9, %s6935_s28  ;;  %v3271_v9 = vmul.f32 %v3268_v15, %v8862_v13  ;;  %v3096_v17 = vstv %s8918_s27  ;;  %s9128_s27 = sld [smem:[#allocation8 + $0x4]] }
 0x3e6   : > { %2932 = vrot.lane.b32.xlu0 %v2926_v62, %s6935_s28  ;;  %v2763_v42 = vpop.permute.xlu1 %2762  ;;  %v3289_v62 = vmul.f32 %v3288_v21, %v8854_v3 }
 0x3e7   : > { %2770 = vst.msk [vmem:[#allocation3 + $0x59] sm:$0x3] %vm2721_vm4, %v2763_v42  ;;  %v3290_v42 = vmul.f32 %v3288_v21, %v8860_v2 }
 0x3e9   : > { %2934 = vrot.lane.b32.xlu1 %v2927_v43, %s6935_s28  ;;  %v3291_v43 = vmul.f32 %v3288_v21, %v8862_v13 }
 0x3ea   : > { %2936 = vrot.lane.b32.xlu0 %v2928_v18, %s6935_s28  ;;  %v3308_v18 = vstv %s6289_s11  ;;  %s9042_s11 = sld [smem:[#allocation9 + $0xc]] }
 0x3eb   : > { %v3309_v4 = vmul.f32 %v3308_v18, %v8854_v3  ;;  %v3311_v27 = vmul.f32 %v3308_v18, %v8862_v13 }
 0x3ed   : > { %2952 = vrot.lane.b32.xlu1 %v2946_v55, %s6935_s28  ;;  %v3310_v55 = vmul.f32 %v3308_v18, %v8860_v2  ;;  %v8981_v18 = vstv %s8940_s7  ;;  %s9177_s7 = sld [smem:[#allocation9 + $0x4]] }
 0x3ee   : > { %2954 = vrot.lane.b32.xlu0 %v2947_v19, %s6935_s28  ;;  %v3328_v19 = vstv %s6290_s20  ;;  %s9057_s20 = sld [smem:[#allocation8 + $0x3]] }
 0x3f1   : > { %2956 = vrot.lane.b32.xlu1 %v2948_v36, %s6935_s28  ;;  %v3329_v36 = vmul.f32 %v3328_v19, %v8854_v3 }
 0x3f2   : > { %2972 = vrot.lane.b32.xlu0 %v2966_v12, %s6935_s28  ;;  %v3330_v12 = vmul.f32 %v3328_v19, %v8860_v2 }
 0x3f5   : > { %2974 = vrot.lane.b32.xlu1 %v2967_v34, %s6935_s28  ;;  %v3331_v34 = vmul.f32 %v3328_v19, %v8862_v13  ;;  %v3099_v19 = vmul.f32 %v3096_v17, %v8862_v13 }
 0x3f6   : > { %2976 = vrot.lane.b32.xlu0 %v2968_v1, %s6935_s28  ;;  %v2805_v1 = vstv %s2804_s21  ;;  %s9059_s21 = sld [smem:[#allocation9 + $0x1b]] }
 0x3f7   : > { %v2808_v49 = vmul.f32 %v2805_v1, %v8791_v10 }
 0x3f9   : > { %2992 = vrot.lane.b32.xlu1 %v2986_v16, %s6935_s28  ;;  %v3088_v16 = vstv %s6272_s24  ;;  %s9105_s24 = sld [smem:[#allocation9 + $0x3]] }
 0x3fa   : > { %2994 = vrot.lane.b32.xlu0 %v2987_v63, %s6935_s28  ;;  %v2806_v63 = vmul.f32 %v2805_v1, %v8783_v41 }
 0x3fd   : > { %2996 = vrot.lane.b32.xlu1 %v2988_v14, %s6935_s28  ;;  %v3349_v14 = vmul.f32 %v3348_v40, %v8854_v3 }
 0x3fe   : > { %3012 = vrot.lane.b32.xlu0 %v3006_v51, %s6935_s28  ;;  %v3350_v51 = vmul.f32 %v3348_v40, %v8860_v2 }
 0x401   : > { %3014 = vrot.lane.b32.xlu1 %v3007_v24, %s6935_s28  ;;  %v8927_v24 = vld [vmem:[#allocation3 + $0x18] sm:$0xff] }
 0x402   : > { %3016 = vrot.lane.b32.xlu0 %v3008_v20, %s6935_s28  ;;  %v3452_v59 = vmul.f32 %v3451_v29, %v8927_v24 }
 0x405   : > { %3032 = vrot.lane.b32.xlu1 %v3026_v57, %s6935_s28  ;;  %v3089_v57 = vmul.f32 %v3088_v16, %v8854_v3 }
 0x406   : > { %3034 = vrot.lane.b32.xlu0 %v3027_v37, %s6935_s28  ;;  %v2807_v37 = vmul.f32 %v2805_v1, %v8789_v8 }
 0x409   : > { %3036 = vrot.lane.b32.xlu1 %v3028_v46, %s6935_s28 }
 0x40a   : > { %3052 = vrot.lane.b32.xlu0 %v3046_v28, %s6935_s28 }
 0x40d   : > { %3054 = vrot.lane.b32.xlu1 %v3047_v53, %s6935_s28 }
 0x40e   : > { %3056 = vrot.lane.b32.xlu0 %v3048_v60, %s6935_s28  ;;  %v3351_v60 = vmul.f32 %v3348_v40, %v8862_v13 }
 0x411   : > { %3072 = vrot.lane.b32.xlu1 %v3066_v47, %s6935_s28  ;;  %v2813_v47 = vstv %s2812_s26  ;;  %s9116_s26 = sld [smem:[#allocation9 + $0xd]] }
 0x412   : > { %3074 = vrot.lane.b32.xlu0 %v3067_v32, %s6935_s28  ;;  %v8942_v32 = vld [vmem:[#allocation3 + $0x20] sm:$0xff]  ;;  %v2816_v15 = vmul.f32 %v2813_v47, %v8791_v10 }
 0x413   : > { %v3453_v5 = vmul.f32 %v3451_v29, %v8942_v32 }
 0x415   : > { %3076 = vrot.lane.b32.xlu1 %v3068_v31, %s6935_s28 }
 0x416   : > { %3175 = vrot.lane.b32.xlu0 %v3169_v52, %s6935_s28 }
 0x419   : > { %3177 = vrot.lane.b32.xlu1 %v3170_v54, %s6935_s28  ;;  %v3090_v54 = vmul.f32 %v3088_v16, %v8860_v2 }
 0x41a   : > { %3179 = vrot.lane.b32.xlu0 %v3171_v11, %s6935_s28  ;;  %v3091_v11 = vmul.f32 %v3088_v16, %v8862_v13 }
 0x41d   : > { %3195 = vrot.lane.b32.xlu1 %v3189_v25, %s6935_s28  ;;  %v2814_v25 = vmul.f32 %v2813_v47, %v8783_v41 }
 0x41e   : > { %3197 = vrot.lane.b32.xlu0 %v3190_v23, %s6935_s28  ;;  %v2815_v23 = vmul.f32 %v2813_v47, %v8789_v8 }
 0x421   : > { %3199 = vrot.lane.b32.xlu1 %v3191_v6, %s6935_s28 }
 0x422   : > { %3215 = vrot.lane.b32.xlu0 %v3209_v45, %s6935_s28 }
 0x425   : > { %3217 = vrot.lane.b32.xlu1 %v3210_v30, %s6935_s28 }
 0x426   : > { %3219 = vrot.lane.b32.xlu0 %v3211_v56, %s6935_s28  ;;  %v3454_v56 = vmul.f32 %v3451_v29, %v8944_v44 }
 0x429   : > { %3235 = vrot.lane.b32.xlu1 %v3229_v50, %s6935_s28  ;;  %v2821_v50 = vstv %s8923_s29  ;;  %s9130_s29 = sld [smem:[#allocation9 + $0x37]] }
 0x42a   : > { %3237 = vrot.lane.b32.xlu0 %v3230_v48, %s6935_s28  ;;  %v3471_v48 = vstv %s8925_s30  ;;  %s9138_s30 = sld [smem:[#allocation8 + $0xe]] }
 0x42d   : > { %3239 = vrot.lane.b32.xlu1 %v3231_v7, %s6935_s28 }
 0x42e   : > { %3255 = vrot.lane.b32.xlu0 %v3249_v39, %s6935_s28  ;;  %v3097_v39 = vmul.f32 %v3096_v17, %v8854_v3 }
 0x431   : > { %3257 = vrot.lane.b32.xlu1 %v3250_v38, %s6935_s28  ;;  %v3098_v38 = vmul.f32 %v3096_v17, %v8860_v2  ;;  %v2837_v17 = vstv %s8983_s12  ;;  %s6383_s12 = sld [smem:[#allocation9 + $0x41]] }
 0x432   : > { %3259 = vrot.lane.b32.xlu0 %v3251_v58, %s6935_s28  ;;  %v3104_v58 = vstv %s8932_s6  ;;  %s9154_s6 = sld [smem:[#allocation9 + $0x24]] }
 0x435   : > { %3275 = vrot.lane.b32.xlu1 %v3269_v22, %s6935_s28  ;;  %v2822_v22 = vmul.f32 %v2821_v50, %v8783_v41 }
 0x436   : > { %3277 = vrot.lane.b32.xlu0 %v3270_v61, %s6935_s28 }
 0x439   : > { %3279 = vrot.lane.b32.xlu1 %v3271_v9, %s6935_s28 }
 0x43a   : > { %3295 = vrot.lane.b32.xlu0 %v3289_v62, %s6935_s28 }
 0x43d   : > { %3297 = vrot.lane.b32.xlu1 %v3290_v42, %s6935_s28  ;;  %v3473_v42 = vmul.f32 %v3471_v48, %v8942_v32 }
 0x43e   : > { %3299 = vrot.lane.b32.xlu0 %v3291_v43, %s6935_s28  ;;  %v3472_v43 = vmul.f32 %v3471_v48, %v8927_v24 }
 0x441   : > { %3315 = vrot.lane.b32.xlu1 %v3309_v4, %s6935_s28 }
 0x442   : > { %3317 = vrot.lane.b32.xlu0 %v3310_v55, %s6935_s28 }
 0x445   : > { %3319 = vrot.lane.b32.xlu1 %v3311_v27, %s6935_s28  ;;  %v3105_v27 = vmul.f32 %v3104_v58, %v8854_v3 }
 0x446   : > { %3335 = vrot.lane.b32.xlu0 %v3329_v36, %s6935_s28  ;;  %v2823_v36 = vmul.f32 %v2821_v50, %v8789_v8 }
 0x449   : > { %3337 = vrot.lane.b32.xlu1 %v3330_v12, %s6935_s28  ;;  %v2824_v12 = vmul.f32 %v2821_v50, %v8791_v10  ;;  %v3120_v50 = vstv %s8991_s14  ;;  %s6347_s14 = sld [smem:[#allocation9 + $0x2f]] }
 0x44a   : > { %3339 = vrot.lane.b32.xlu0 %v3331_v34, %s6935_s28 }
 0x44b   : > { %v2893_v26 = vpop.permute.xlu0 %2892 }
 0x44c   : > { %v2901_v20 = vadd.f32 %v2893_v26, %v2806_v63  ;;  %v3492_v63 = vmul.f32 %v8981_v18, %v8927_v24  ;;  %v3474_v26 = vmul.f32 %v3471_v48, %v8944_v44 }
 0x44d   : > { %3355 = vrot.lane.b32.xlu1 %v3349_v14, %s6935_s28  ;;  %v2829_v14 = vstv %s8961_s8  ;;  %s9179_s8 = sld [smem:[#allocation9 + $0x25]] }
 0x44e   : > { %3357 = vrot.lane.b32.xlu0 %v3350_v51, %s6935_s28  ;;  %v8936_v46 = vadd.f32 %v3089_v57, %v2901_v20  ;;  %v9004_v51 = vstv %s8963_s9  ;;  %v9008_v20 = vld [vmem:[#allocation3 + $0x19] sm:$0xff]  ;;  %v2832_v48 = vmul.f32 %v2829_v14, %v8791_v10  ;;  %s9186_s9 = sld [smem:[#allocation9 + $0xe]] }
 0x44f   : > { %v2895_v28 = vpop.permute.xlu1 %2894 }
 0x450   : > { %v2897_v53 = vpop.permute.xlu0 %2896  ;;  %v2902_v31 = vadd.f32 %v2895_v28, %v2807_v37  ;;  %v3106_v37 = vmul.f32 %v3104_v58, %v8860_v2  ;;  %v3112_v28 = vstv %s8970_s10  ;;  %s9221_s10 = sld [smem:[#allocation8 + $0x41]] }
 0x451   : > { %v2903_v52 = vadd.f32 %v2897_v53, %v2808_v49  ;;  %3359 = vrot.lane.b32.xlu1 %v3351_v60, %s6935_s28  ;;  %v3107_v49 = vmul.f32 %v3104_v58, %v8862_v13  ;;  %v2830_v53 = vmul.f32 %v2829_v14, %v8783_v41  ;;  %v2831_v60 = vmul.f32 %v2829_v14, %v8789_v8 }
 0x452   : > { %3458 = vrot.lane.b32.xlu0 %v3452_v59, %s6935_s28  ;;  %v8953_v35 = vadd.f32 %v3090_v54, %v2902_v31  ;;  %v3735_v54 = vmul.f32 %v9004_v51, %v9008_v20 }
 0x453   : > { %v8955_v6 = vadd.f32 %v3091_v11, %v2903_v52  ;;  %v2913_v45 = vpop.permute.xlu1 %2912  ;;  %v3493_v11 = vmul.f32 %v8981_v18, %v8942_v32 }
 0x454   : > { %v2915_v30 = vpop.permute.xlu0 %2914  ;;  %v2921_v33 = vadd.f32 %v2913_v45, %v2814_v25  ;;  %v9029_v25 = vstv %s8985_s13  ;;  %s6345_s13 = sld [smem:[#allocation9 + $0x2e]] }
 0x455   : > { %v2922_v7 = vadd.f32 %v2915_v30, %v2815_v23  ;;  %3460 = vrot.lane.b32.xlu1 %v3453_v5, %s6935_s28  ;;  %v9035_v23 = vld [vmem:[#allocation3 + $0x21] sm:$0xff]  ;;  %v3114_v5 = vmul.f32 %v3112_v28, %v8860_v2 }
 0x456   : > { %3462 = vrot.lane.b32.xlu0 %v3454_v56, %s6935_s28  ;;  %v8974_v61 = vadd.f32 %v3097_v39, %v2921_v33  ;;  %v3113_v56 = vmul.f32 %v3112_v28, %v8854_v3  ;;  %v2838_v33 = vmul.f32 %v2837_v17, %v8783_v41 }
 0x457   : > { %v8976_v21 = vadd.f32 %v3098_v38, %v2922_v7  ;;  %v2917_v9 = vpop.permute.xlu1 %2916 }
 0x458   : > { %v2933_v62 = vpop.permute.xlu0 %2932  ;;  %v2923_v4 = vadd.f32 %v2917_v9, %v2816_v15  ;;  %v3736_v15 = vmul.f32 %v9004_v51, %v9035_v23  ;;  %v9055_v9 = vstv %s9006_s15  ;;  %s9313_s15 = sld [smem:[#allocation8 + $0x4b]] }
 0x459   : > { %v2941_v55 = vadd.f32 %v2933_v62, %v2822_v22  ;;  %3478 = vrot.lane.b32.xlu1 %v3472_v43, %s6935_s28  ;;  %v3755_v22 = vmul.f32 %v9029_v25, %v9008_v20  ;;  %v9061_v62 = vld [vmem:[#allocation3 + $0x30] sm:$0xff] }
 0x45a   : > { %3480 = vrot.lane.b32.xlu0 %v3473_v42, %s6935_s28  ;;  %v8995_v34 = vadd.f32 %v3099_v19, %v2923_v4  ;;  %v3115_v4 = vmul.f32 %v3112_v28, %v8862_v13  ;;  %v2845_v19 = vstv %s9014_s16  ;;  %v4018_v14 = vmul.f32 %v9055_v9, %v9061_v62  ;;  %s9335_s16 = sld [smem:[#allocation9 + $0x4b]] }
 0x45b   : > { %v8997_v1 = vadd.f32 %v3105_v27, %v2941_v55  ;;  %v2935_v40 = vpop.permute.xlu1 %2934  ;;  %v3121_v55 = vmul.f32 %v3120_v50, %v8854_v3  ;;  %v2839_v27 = vmul.f32 %v2837_v17, %v8789_v8  ;;  %v3122_v28 = vmul.f32 %v3120_v50, %v8860_v2 }
 0x45c   : > { %v2937_v16 = vpop.permute.xlu0 %2936  ;;  %v2942_v29 = vadd.f32 %v2935_v40, %v2823_v36  ;;  %v2840_v36 = vmul.f32 %v2837_v17, %v8791_v10 }
 0x45d   : > { %11364 = vst [vmem:[#allocation14_spill] sm:$0xff] %v8997_v1  ;;  %v2943_v57 = vadd.f32 %v2937_v16, %v2824_v12  ;;  %3482 = vrot.lane.b32.xlu1 %v3474_v26, %s6935_s28  ;;  %v3756_v26 = vmul.f32 %v9029_v25, %v9035_v23  ;;  %v11398_v1 = vmov 0 }
 0x45e   : > { %3498 = vrot.lane.b32.xlu0 %v3492_v63, %s6935_s28  ;;  %v9019_v59 = vadd.f32 %v3106_v37, %v2942_v29  ;;  %v9081_v29 = vstv %s9031_s17  ;;  %s9337_s17 = sld [smem:[#allocation8 + $0x1b]] }
 0x45f   : > { %v9021_v47 = vadd.f32 %v3107_v49, %v2943_v57  ;;  %v2953_v31 = vpop.permute.xlu1 %2952  ;;  %v9084_v57 = vstv %s9033_s19  ;;  %s6365_s19 = sld [smem:[#allocation9 + $0x38]] }
 0x460   : > { %11365 = vst [vmem:[#allocation15_spill] sm:$0xff] %v9019_v59  ;;  %v2955_v52 = vpop.permute.xlu0 %2954  ;;  %v2961_v45 = vadd.f32 %v2953_v31, %v2830_v53  ;;  %v3123_v53 = vmul.f32 %v3120_v50, %v8862_v13  ;;  %v2846_v31 = vmul.f32 %v2845_v19, %v8783_v41  ;;  %v9103_v50 = vstv %s9059_s21  ;;  %s6326_s21 = sld [smem:[#allocation8 + $0x25]] }
 0x461   : > { %11366 = vst [vmem:[#allocation16_spill] sm:$0xff] %v9021_v47  ;;  %v2962_v30 = vadd.f32 %v2955_v52, %v2831_v60  ;;  %3500 = vrot.lane.b32.xlu1 %v3493_v11, %s6935_s28  ;;  %v3128_v60 = vstv %s9042_s11  ;;  %v2847_v52 = vmul.f32 %v2845_v19, %v8789_v8  ;;  %s6367_s11 = sld [smem:[#allocation9 + $0x39]] }
 0x462   : > { %3741 = vrot.lane.b32.xlu0 %v3735_v54, %s6935_s28  ;;  %v9046_v7 = vadd.f32 %v3113_v56, %v2961_v45  ;;  %v3512_v56 = vmul.f32 %v9084_v57, %v8927_v24 }
 0x463   : > { %v9048_v39 = vadd.f32 %v3114_v5, %v2962_v30  ;;  %v2957_v38 = vpop.permute.xlu1 %2956  ;;  %v4038_v30 = vmul.f32 %v9081_v29, %v9061_v62  ;;  %v2853_v5 = vstv %s9057_s20  ;;  %s6324_s20 = sld [smem:[#allocation8 + $0x24]] }
 0x464   : > { %11367 = vst [vmem:[#allocation17_spill] sm:$0xff] %v9046_v7  ;;  %v2973_v58 = vpop.permute.xlu0 %2972  ;;  %v2963_v42 = vadd.f32 %v2957_v38, %v2832_v48  ;;  %v9109_v48 = vld [vmem:[#allocation3 + $0x29] sm:$0x7] }
 0x465   : > { %11368 = vst [vmem:[#allocation18_spill] sm:$0xff] %v9048_v39  ;;  %v2981_v43 = vadd.f32 %v2973_v58, %v2838_v33  ;;  %3761 = vrot.lane.b32.xlu1 %v3755_v22, %s6935_s28  ;;  %v3129_v58 = vmul.f32 %v3128_v60, %v8854_v3  ;;  %v3136_v22 = vstv %s9068_s23  ;;  %s6385_s23 = sld [smem:[#allocation9 + $0x42]] }
 0x466   : > { %3743 = vrot.lane.b32.xlu0 %v3736_v15, %s6935_s28  ;;  %v9072_v12 = vadd.f32 %v3115_v4, %v2963_v42  ;;  %v3130_v15 = vmul.f32 %v3128_v60, %v8860_v2  ;;  %v2848_v42 = vmul.f32 %v2845_v19, %v8791_v10 }
 0x467   : > { %v9074_v40 = vadd.f32 %v3121_v55, %v2981_v43  ;;  %v2975_v16 = vpop.permute.xlu1 %2974  ;;  %v2854_v43 = vmul.f32 %v2853_v5, %v8783_v41 }
 0x468   : > { %11369 = vst [vmem:[#allocation19_spill] sm:$0xff] %v9072_v12  ;;  %v2977_v63 = vpop.permute.xlu0 %2976  ;;  %v2982_v37 = vadd.f32 %v2975_v16, %v2839_v27  ;;  %v3552_v16 = vmul.f32 %v9103_v50, %v8927_v24 }
 0x469   : > { %11370 = vst [vmem:[#allocation20_spill] sm:$0xff] %v9074_v40  ;;  %v2983_v49 = vadd.f32 %v2977_v63, %v2840_v36  ;;  %3763 = vrot.lane.b32.xlu1 %v3756_v26, %s6935_s28  ;;  %v3737_v63 = vmul.f32 %v9004_v51, %v9109_v48  ;;  %v9132_v26 = vld [vmem:[#allocation3 + $0x38] sm:$0xff]  ;;  %v2855_v51 = vmul.f32 %v2853_v5, %v8789_v8 }
 0x46a   : > { %4024 = vrot.lane.b32.xlu0 %v4018_v14, %s6935_s28  ;;  %v9093_v54 = vadd.f32 %v3122_v28, %v2982_v37  ;;  %v3131_v37 = vmul.f32 %v3128_v60, %v8862_v13  ;;  %v2856_v28 = vmul.f32 %v2853_v5, %v8791_v10  ;;  %v3757_v60 = vmul.f32 %v9029_v25, %v9109_v48 }
 0x46b   : > { %v9095_v11 = vadd.f32 %v3123_v53, %v2983_v49  ;;  %v2993_v17 = vpop.permute.xlu1 %2992  ;;  %v3137_v49 = vmul.f32 %v3136_v22, %v8854_v3  ;;  %v3144_v25 = vstv %s9116_s26  ;;  %v9502_v12 = vstv %s6385_s23  ;;  %s6346_s26 = sld [smem:[#allocation8 + $0x2f]]  ;;  %s9729_s23 = sld [smem:[#allocation8 + $0x42]] }
 0x46c   : > { %11371 = vst [vmem:[#allocation21_spill] sm:$0xff] %v9093_v54  ;;  %v2995_v45 = vpop.permute.xlu0 %2994  ;;  %v3001_v33 = vadd.f32 %v2993_v17, %v2846_v31 }
 0x46d   : > { %11372 = vst [vmem:[#allocation22_spill] sm:$0xff] %v9095_v11  ;;  %v3002_v38 = vadd.f32 %v2995_v45, %v2847_v52  ;;  %4044 = vrot.lane.b32.xlu1 %v4038_v30, %s6935_s28  ;;  %v4019_v45 = vmul.f32 %v9055_v9, %v9132_v26  ;;  %v2861_v30 = vstv %s9105_s24  ;;  %s6387_s24 = sld [smem:[#allocation9 + $0x43]] }
 0x46e   : > { %3518 = vrot.lane.b32.xlu0 %v3512_v56, %s6935_s28  ;;  %v9120_v4 = vadd.f32 %v3129_v58, %v3001_v33  ;;  %v9152_v56 = vstv %s9107_s25  ;;  %v9156_v33 = vld [vmem:[#allocation3 + $0x31] sm:$0xff]  ;;  %v3138_v58 = vmul.f32 %v3136_v22, %v8860_v2  ;;  %s6344_s25 = sld [smem:[#allocation8 + $0x2e]] }
 0x46f   : > { %v9122_v55 = vadd.f32 %v3130_v15, %v3002_v38  ;;  %v2997_v27 = vpop.permute.xlu1 %2996  ;;  %v3139_v15 = vmul.f32 %v3136_v22, %v8862_v13  ;;  %v4301_v22 = vmul.f32 %v9152_v56, %v9156_v33 }
 0x470   : > { %11373 = vst [vmem:[#allocation23_spill] sm:$0xff] %v9120_v4  ;;  %v3013_v36 = vpop.permute.xlu0 %3012  ;;  %v3003_v19 = vadd.f32 %v2997_v27, %v2848_v42  ;;  %v2862_v42 = vmul.f32 %v2861_v30, %v8783_v41 }
 0x471   : > { %11374 = vst [vmem:[#allocation24_spill] sm:$0xff] %v9122_v55  ;;  %v3021_v14 = vadd.f32 %v3013_v36, %v2854_v43  ;;  %3558 = vrot.lane.b32.xlu1 %v3552_v16, %s6935_s28  ;;  %v2863_v43 = vmul.f32 %v2861_v30, %v8789_v8 }
 0x472   : > { %3745 = vrot.lane.b32.xlu0 %v3737_v63, %s6935_s28  ;;  %v9142_v53 = vadd.f32 %v3131_v37, %v3003_v19  ;;  %v4039_v19 = vmul.f32 %v9081_v29, %v9132_v26  ;;  %v9175_v37 = vstv %s9130_s29  ;;  %s6407_s29 = sld [smem:[#allocation9 + $0x4d]] }
 0x473   : > { %v9144_v31 = vadd.f32 %v3137_v49, %v3021_v14  ;;  %v3015_v52 = vpop.permute.xlu1 %3014  ;;  %v2869_v14 = vstv %s9128_s27  ;;  %s6405_s27 = sld [smem:[#allocation9 + $0x4c]] }
 0x474   : > { %11375 = vst [vmem:[#allocation25_spill] sm:$0xff] %v9142_v53  ;;  %v3017_v17 = vpop.permute.xlu0 %3016  ;;  %v3022_v5 = vadd.f32 %v3015_v52, %v2855_v51  ;;  %v3146_v52 = vmul.f32 %v3144_v25, %v8860_v2  ;;  %v9548_v59 = vstv %s6344_s25  ;;  %s9752_s25 = sld [smem:[#allocation8 + $0x43]] }
 0x475   : > { %11376 = vst [vmem:[#allocation26_spill] sm:$0xff] %v9144_v31  ;;  %v3023_v38 = vadd.f32 %v3017_v17, %v2856_v28  ;;  %3765 = vrot.lane.b32.xlu1 %v3757_v60, %s6935_s28  ;;  %v3145_v28 = vmul.f32 %v3144_v25, %v8854_v3  ;;  %v3152_v17 = vstv %s9138_s30  ;;  %v2864_v60 = vmul.f32 %v2861_v30, %v8791_v10  ;;  %s6309_s30 = sld [smem:[#allocation9 + $0x1c]] }
 0x476   : > { %4026 = vrot.lane.b32.xlu0 %v4019_v45, %s6935_s28  ;;  %v9165_v27 = vadd.f32 %v3138_v58, %v3022_v5  ;;  %v2870_v45 = vmul.f32 %v2869_v14, %v8783_v41 }
 0x477   : > { %v9167_v36 = vadd.f32 %v3139_v15, %v3023_v38  ;;  %v3033_v16 = vpop.permute.xlu1 %3032 }
 0x478   : > { %11377 = vst [vmem:[#allocation27_spill] sm:$0xff] %v9165_v27  ;;  %v3035_v63 = vpop.permute.xlu0 %3034  ;;  %v3041_v49 = vadd.f32 %v3033_v16, %v2862_v42  ;;  %v4321_v42 = vmul.f32 %v9175_v37, %v9156_v33  ;;  %v9199_v16 = vstv %s9154_s6  ;;  %s6311_s6 = sld [smem:[#allocation9 + $0x1d]]  ;;  %v9594_v39 = vstv %s6407_s29  ;;  %s9848_s29 = sld [smem:[#allocation9 + $0x31]] }
 0x479   : > { %11378 = vst [vmem:[#allocation28_spill] sm:$0xff] %v9167_v36  ;;  %v3042_v51 = vadd.f32 %v3035_v63, %v2863_v43  ;;  %4046 = vrot.lane.b32.xlu1 %v4039_v19, %s6935_s28  ;;  %v3513_v43 = vmul.f32 %v9084_v57, %v8942_v32  ;;  %v3147_v19 = vmul.f32 %v3144_v25, %v8862_v13 }
 0x47a   : > { %4307 = vrot.lane.b32.xlu0 %v4301_v22, %s6935_s28  ;;  %v9190_v5 = vadd.f32 %v3145_v28, %v3041_v49  ;;  %v3153_v22 = vmul.f32 %v3152_v17, %v8854_v3  ;;  %v2871_v49 = vmul.f32 %v2869_v14, %v8789_v8  ;;  %v3553_v25 = vmul.f32 %v9103_v50, %v8942_v32 }
 0x47b   : > { %v9192_v38 = vadd.f32 %v3146_v52, %v3042_v51  ;;  %v3037_v58 = vpop.permute.xlu1 %3036  ;;  %v2872_v51 = vmul.f32 %v2869_v14, %v8791_v10 }
 0x47c   : > { %11379 = vst [vmem:[#allocation29_spill] sm:$0xff] %v9190_v5  ;;  %v3053_v15 = vpop.permute.xlu0 %3052  ;;  %v3043_v63 = vadd.f32 %v3037_v58, %v2864_v60  ;;  %v2877_v58 = vstv %s9177_s7  ;;  %s6292_s7 = sld [smem:[#allocation8 + $0x14]] }
 0x47d   : > { %11380 = vst [vmem:[#allocation30_spill] sm:$0xff] %v9192_v38  ;;  %v3061_v30 = vadd.f32 %v3053_v15, %v2870_v45  ;;  %4327 = vrot.lane.b32.xlu1 %v4321_v42, %s6935_s28  ;;  %v3795_v45 = vmul.f32 %v9199_v16, %v9008_v20  ;;  %v9217_v15 = vstv %s9179_s8  ;;  %v9219_v42 = vld [vmem:[#allocation3 + $0x40] sm:$0x7]  ;;  %v2879_v36 = vmul.f32 %v2877_v58, %v8789_v8  ;;  %s6364_s8 = sld [smem:[#allocation8 + $0x38]] }
 0x47e   : > { %3520 = vrot.lane.b32.xlu0 %v3513_v43, %s6935_s28  ;;  %v9207_v28 = vadd.f32 %v3147_v19, %v3043_v63  ;;  %v3154_v63 = vmul.f32 %v3152_v17, %v8860_v2  ;;  %v3160_v19 = vstv %s9186_s9  ;;  %v3837_v47 = vmul.f32 %v9217_v15, %v9109_v48  ;;  %s6293_s9 = sld [smem:[#allocation9 + $0x14]] }
 0x47f   : > { %v9209_v52 = vadd.f32 %v3153_v22, %v3061_v30  ;;  %v3055_v0 = vpop.permute.xlu1 %3054  ;;  %v3155_v30 = vmul.f32 %v3152_v17, %v8862_v13  ;;  %v2878_v22 = vmul.f32 %v2877_v58, %v8783_v41  ;;  %v4020_v17 = vmul.f32 %v9055_v9, %v9219_v42 }
 0x480   : > { %11381 = vst [vmem:[#allocation31_spill] sm:$0xff] %v9207_v28  ;;  %v3057_v60 = vpop.permute.xlu0 %3056  ;;  %v3062_v43 = vadd.f32 %v3055_v0, %v2871_v49  ;;  %v3161_v41 = vmul.f32 %v3160_v19, %v8854_v3  ;;  %v3162_v8 = vmul.f32 %v3160_v19, %v8860_v2  ;;  %v9255_v2 = vld [vmem:[#allocation3 + $0x48] sm:$0xff]  ;;  %v11394_v28 = vmov 0.0  }
 0x481   : > { %11382 = vst [vmem:[#allocation32_spill] sm:$0xff] %v9209_v52  ;;  %v3063_v14 = vadd.f32 %v3057_v60, %v2872_v51  ;;  %3560 = vrot.lane.b32.xlu1 %v3553_v25, %s6935_s28  ;;  %v3835_v51 = vmul.f32 %v9217_v15, %v9008_v20  ;;  %v9238_v60 = vld [vmem:[#allocation3 + $0x39] sm:$0xff]  ;;  %6568 = vmatprep.mubr.msk.f32.mxu0 %vm6939_vm6, %v11394_v28  ;;  %v9608_v4 = vstv %s6311_s6  ;;  %s9930_s6 = sld [smem:[#allocation8 + $0x4d]] }
 0x482   : > { %3801 = vrot.lane.b32.xlu0 %v3795_v45, %s6935_s28  ;;  %v9230_v27 = vadd.f32 %v3154_v63, %v3062_v43  ;;  %v2880_v43 = vmul.f32 %v2877_v58, %v8791_v10  ;;  %v4302_v3 = vmul.f32 %v9152_v56, %v9238_v60  ;;  %v3163_v10 = vmul.f32 %v3160_v19, %v8862_v13 }
 0x483   : > { %v9232_v52 = vadd.f32 %v3155_v30, %v3063_v14  ;;  %v3073_v0 = vpop.permute.xlu1 %3072  ;;  %6553 = vmatprep.mubr.msk.f32.mxu1 %vm6939_vm6, %v11394_v28 }
 0x484   : > { %11383 = vst [vmem:[#allocation33_spill] sm:$0xff] %v9230_v27  ;;  %v3075_v49 = vpop.permute.xlu0 %3074  ;;  %v3081_v25 = vadd.f32 %v3073_v0, %v2878_v22  ;;  %v9258_v0 = vstv %s9221_s10  ;;  %s6366_s10 = sld [smem:[#allocation8 + $0x39]] }
 0x485   : > { %11384 = vst [vmem:[#allocation34_spill] sm:$0xff] %v9232_v52  ;;  %v3082_v45 = vadd.f32 %v3075_v49, %v2879_v36  ;;  %3841 = vrot.lane.b32.xlu1 %v3835_v51, %s6935_s28  ;;  %v4040_v36 = vmul.f32 %v9081_v29, %v9219_v42  ;;  %v4322_v29 = vmul.f32 %v9175_v37, %v9238_v60 }
 0x486   : > { %4028 = vrot.lane.b32.xlu0 %v4020_v17, %s6935_s28  ;;  %v9245_v14 = vadd.f32 %v3161_v41, %v3081_v25  ;;  %v4584_v17 = vmul.f32 %v9258_v0, %v9255_v2  ;;  %v9273_v25 = vstv %s6383_s12  ;;  %v3514_v41 = vmul.f32 %v9084_v57, %v8944_v44  ;;  %s6312_s12 = sld [smem:[#allocation8 + $0x1e]] }
 0x487   : > { %v9247_v63 = vadd.f32 %v3162_v8, %v3082_v45  ;;  %v3077_v9 = vpop.permute.xlu1 %3076  ;;  %v4604_v45 = vmul.f32 %v9273_v25, %v9255_v2  ;;  %v11309_v57 = vmov 0.0|0.0  }
 0x488   : > { %11385 = vst [vmem:[#allocation35_spill] sm:$0xff] %v9245_v14  ;;  %v9249_v30 = vpop.permute.xlu0 %3175  ;;  %v3083_v22 = vadd.f32 %v3077_v9, %v2880_v43  ;;  %v3554_v9 = vmul.f32 %v9103_v50, %v8944_v44  ;;  %6700 = vmatprep.subr.bf16.mxu0 %v11309_v57  ;;  %6697 = vmatprep.subr.bf16.mxu1 %v11309_v57  ;;  %v9395_v14 = vstv %s9337_s17  ;;  %s6352_s17 = sld [smem:[#allocation8 + $0x32]] }
 0x489   : > { %11386 = vst [vmem:[#allocation36_spill] sm:$0xff] %v9247_v63  ;;  %4048 = vrot.lane.b32.xlu1 %v4040_v36, %s6935_s28  ;;  %v3796_v36 = vmul.f32 %v9199_v16, %v9035_v23  ;;  %v11311_v63 = vmov 1.0|1.0   ;;  %v3532_v5 = vmul.f32 %v9395_v14, %v8927_v24 }
 0x48a   : > { %4309 = vrot.lane.b32.xlu0 %v4302_v3, %s6935_s28  ;;  %v9263_v58 = vadd.f32 %v3163_v10, %v3083_v22  ;;  %v9295_v3 = vstv %s6345_s13  ;;  %v2771_v22 = vlaneseq  ;;  %s6313_s13 = sld [smem:[#allocation9 + $0x1e]] }
 0x48b   : > { %v9265_v49 = vpop.permute.xlu1 %3177 }
 0x48c   : > { %11387 = vst [vmem:[#allocation37_spill] sm:$0xff] %v9263_v58  ;;  %v9267_v51 = vpop.permute.xlu0 %3179  ;;  %v2772_v10 = vshrl.u32 %v2771_v22, 7 }
 0x48d   : > { %4329 = vrot.lane.b32.xlu1 %v4322_v29, %s6935_s28  ;;  %v2776_v29 = vand.u32 127, %v2771_v22 }
 0x48e   : > { %4590 = vrot.lane.b32.xlu0 %v4584_v17, %s6935_s28  ;;  %v2773_v52 = vadd.s32 8, %v2772_v10  ;;  %v2777_v22 = vmul.u32 2, %v2772_v10  ;;  %v2774_v57 = vadd.s32 16, %v2772_v10 }
 0x48f   : > { %v9277_v13 = vpop.permute.xlu1 %3195 }
 0x490   : > { %v9279_v19 = vpop.permute.xlu0 %3197  ;;  %v2778_v27 = vmul.u32 2, %v2773_v52  ;;  %vm9317_vm5 = vcmp.eq.s32.totalorder %v2776_v29, %v2777_v22  ;;  %v2789_v58 = vadd.s32 1, %v2777_v22 }
 0x491   : > { %4610 = vrot.lane.b32.xlu1 %v4604_v45, %s6935_s28  ;;  %v3836_v45 = vmul.f32 %v9217_v15, %v9035_v23 }
 0x492   : > { %3522 = vrot.lane.b32.xlu0 %v3514_v41, %s6935_s28  ;;  %v4078_v41 = vmul.f32 %v9295_v3, %v9061_v62  ;;  %vm2781_vm7 = vcmp.eq.s32.totalorder %v2776_v29, %v2778_v27  ;;  %v2790_v22 = vadd.s32 1, %v2778_v27  ;;  %vm2792_vm9 = vcmp.eq.s32.totalorder %v2776_v29, %v2789_v58 }
 0x493   : > { %v9287_v8 = vpop.permute.xlu1 %3199  ;;  %vm9343_vm8 = vmpackc.low %vm2781_vm7, %vm9317_vm5  ;;  %v11403_v58 = vmov 0 }
 0x494   : > { %v9289_v43 = vpop.permute.xlu0 %3215  ;;  %v11399_v1 = vsel %vm9343_vm8, 4294967295, %v11398_v1  ;;  %6702 = vmatpush3.bf16.msk.msra.mxu0 %vm9343_vm8, %v11311_v63  ;;  %vm2793_vm11 = vcmp.eq.s32.totalorder %v2776_v29, %v2790_v22 }
 0x495   : > { %11388 = vst [vmem:[#allocation38_spill] sm:$0xff] %v9289_v43  ;;  %3562 = vrot.lane.b32.xlu1 %v3554_v9, %s6935_s28  ;;  %v9309_v9 = vld [vmem:[#allocation3 + $0x41] sm:$0x7]  ;;  %11400 = vst [vmem:[#allocation45_spill] sm:$0xff] %v11399_v1  ;;  %6566 = vmatprep.subr.mxu0 %v11394_v28  ;;  %v9516_v1 = vstv %s6387_s24  ;;  %s9739_s24 = sld [smem:[#allocation8 + $0x46]] }
 0x496   : > { %3803 = vrot.lane.b32.xlu0 %v3796_v36, %s6935_s28  ;;  %11391 = vst [vmem:[#allocation41_spill] sm:$0xff] %v9309_v9  ;;  %v9311_v36 = vstv %s6347_s14  ;;  %v4303_v52 = vmul.f32 %v9152_v56, %v9309_v9  ;;  %vm9359_vm12 = vmpackc.low %vm2793_vm11, %vm2792_vm9  ;;  %s6332_s14 = sld [smem:[#allocation8 + $0x28]] }
 0x497   : > { %v9301_v17 = vpop.permute.xlu1 %3217  ;;  %v4118_v10 = vmul.f32 %v9311_v36, %v9061_v62  ;;  %v11404_v58 = vsel %vm9359_vm12, 4294967295, %v11403_v58  ;;  %6699 = vmatpush3.bf16.msk.msra.mxu1 %vm9359_vm12, %v11311_v63  ;;  %v11410_v63 = vmov 0.0|0.0  }
 0x498   : > { %11389 = vst [vmem:[#allocation39_spill] sm:$0xff] %v9301_v17  ;;  %v9303_v50 = vpop.permute.xlu0 %3219  ;;  %11405 = vst [vmem:[#allocation48_spill] sm:$0xff] %v11404_v58  ;;  %6551 = vmatprep.subr.mxu1 %v11394_v28 }
 0x499   : > { %11390 = vst [vmem:[#allocation40_spill] sm:$0xff] %v9303_v50  ;;  %3843 = vrot.lane.b32.xlu1 %v3836_v45, %s6935_s28  ;;  %v2779_v45 = vmul.u32 2, %v2774_v57  ;;  %v4323_v57 = vmul.f32 %v9175_v37, %v9309_v9  ;;  %v3797_v50 = vmul.f32 %v9199_v16, %v9109_v48  ;;  %v9432_v16 = vstv %s6367_s11  ;;  %s6353_s11 = sld [smem:[#allocation9 + $0x32]] }
 0x49a   : > { %4084 = vrot.lane.b32.xlu0 %v4078_v41, %s6935_s28  ;;  %v9333_v41 = vld [vmem:[#allocation3 + $0x50] sm:$0xff] }
 0x49b   : > { %v9325_v40 = vpop.permute.xlu1 %3235  ;;  %11397 = vst [vmem:[#allocation44_spill] sm:$0xff] %v9333_v41  ;;  %vm2782_vm10 = vcmp.eq.s32.totalorder %v2776_v29, %v2779_v45  ;;  %v2791_v56 = vadd.s32 1, %v2779_v45  ;;  %v9369_v45 = vstv %s9313_s15  ;;  %v4645_v55 = vmul.f32 %v9502_v12, %v9333_v41  ;;  %s6333_s15 = sld [smem:[#allocation9 + $0x28]] }
 0x49c   : > { %11395 = vst [vmem:[#allocation42_spill] sm:$0xff] %v9325_v40  ;;  %v9327_v43 = vpop.permute.xlu0 %3237  ;;  %v9364_v37 = vsel %vm2782_vm10, 1.0, %v11394_v28  ;;  %v9616_v40 = vld [vmem:[#allocation3 + $0x18] sm:$0xff] }
 0x49d   : > { %11396 = vst [vmem:[#allocation43_spill] sm:$0xff] %v9327_v43  ;;  %4124 = vrot.lane.b32.xlu1 %v4118_v10, %s6935_s28  ;;  %v4585_v10 = vmul.f32 %v9258_v0, %v9333_v41  ;;  %11406 = vst [vmem:[#allocation49_spill] sm:$0xff] %v9364_v37  ;;  %vm2794_vm14 = vcmp.eq.s32.totalorder %v2776_v29, %v2791_v56  ;;  %6567 = vmatpush3.msk.msra.mxu0 %vm5075_vm13, %v9364_v37  ;;  %v9582_v43 = vstv %s6405_s27  ;;  %s9831_s27 = sld [smem:[#allocation9 + $0x30]] }
 0x49e   : > { %4311 = vrot.lane.b32.xlu0 %v4303_v52, %s6935_s28  ;;  %v9366_v52 = vld [vmem:[#allocation3 + $0x49] sm:$0xff]  ;;  %v9377_v22 = vsel %vm2794_vm14, 1.0, %v11394_v28  ;;  %6709 = vmatprep.subr.bf16.mxu0 %v11410_v63  ;;  %v4644_v37 = vmul.f32 %v9502_v12, %v9255_v2  ;;  %11436 = vst [vmem:[#allocation78_spill] sm:$0xff] %v9616_v40  ;;  %v3632_v7 = vmul.f32 %v9616_v40, %v9608_v4 }
 0x49f   : > { %v9352_v27 = vpop.permute.xlu1 %3239  ;;  %11407 = vst [vmem:[#allocation50_spill] sm:$0xff] %v9377_v22  ;;  %6552 = vmatpush3.msk.msra.mxu1 %vm5075_vm13, %v9377_v22 }
 0x4a0   : > { %11401 = vst [vmem:[#allocation46_spill] sm:$0xff] %v9352_v27  ;;  %v9354_v31 = vpop.permute.xlu0 %3255  ;;  %6703 = vmatprep.subr.bf16.mxu1 %v11410_v63 }
 0x4a1   : > { %11402 = vst [vmem:[#allocation47_spill] sm:$0xff] %v9354_v31  ;;  %4331 = vrot.lane.b32.xlu1 %v4323_v57, %s6935_s28  ;;  %v4605_v31 = vmul.f32 %v9273_v25, %v9333_v41  ;;  %v4867_v57 = vmul.f32 %v9369_v45, %v9366_v52 }
 0x4a2   : > { %4592 = vrot.lane.b32.xlu0 %v4585_v10, %s6935_s28  ;;  %v9392_v10 = vstv %s9335_s16  ;;  %s6329_s16 = sld [smem:[#allocation9 + $0x26]] }
 0x4a3   : > { %v9382_v29 = vpop.permute.xlu1 %3257  ;;  %v4887_v11 = vmul.f32 %v9392_v10, %v9366_v52 }
 0x4a4   : > { %11408 = vst [vmem:[#allocation51_spill] sm:$0xff] %v9382_v29  ;;  %v9384_v56 = vpop.permute.xlu0 %3259  ;;  %v4684_v29 = vmul.f32 %v9516_v1, %v9255_v2 }
 0x4a5   : > { %11409 = vst [vmem:[#allocation52_spill] sm:$0xff] %v9384_v56  ;;  %4612 = vrot.lane.b32.xlu1 %v4605_v31, %s6935_s28 }
 0x4a6   : > { %4873 = vrot.lane.b32.xlu0 %v4867_v57, %s6935_s28 }
 0x4a7   : > { %v9402_v38 = vpop.permute.xlu1 %3275 }
 0x4a8   : > { %11411 = vst [vmem:[#allocation53_spill] sm:$0xff] %v9402_v38  ;;  %v9404_v56 = vpop.permute.xlu0 %3277 }
 0x4a9   : > { %11412 = vst [vmem:[#allocation54_spill] sm:$0xff] %v9404_v56  ;;  %4893 = vrot.lane.b32.xlu1 %v4887_v11, %s6935_s28  ;;  %v4079_v11 = vmul.f32 %v9295_v3, %v9132_v26 }
 0x4aa   : > { %3538 = vrot.lane.b32.xlu0 %v3532_v5, %s6935_s28  ;;  %v4119_v5 = vmul.f32 %v9311_v36, %v9132_v26 }
 0x4ab   : > { %v9412_v31 = vpop.permute.xlu1 %3279 }
 0x4ac   : > { %11413 = vst [vmem:[#allocation55_spill] sm:$0xff] %v9412_v31  ;;  %v9414_v57 = vpop.permute.xlu0 %3295  ;;  %v9456_v31 = vld [vmem:[#allocation3 + $0x51] sm:$0xff] }
 0x4ad   : > { %11414 = vst [vmem:[#allocation56_spill] sm:$0xff] %v9414_v57  ;;  %3805 = vrot.lane.b32.xlu1 %v3797_v50, %s6935_s28  ;;  %v9430_v57 = vstv %s6365_s19  ;;  %11422 = vst [vmem:[#allocation64_spill] sm:$0xff] %v9456_v31  ;;  %s6331_s19 = sld [smem:[#allocation9 + $0x27]] }
 0x4ae   : > { %3845 = vrot.lane.b32.xlu0 %v3837_v47, %s6935_s28  ;;  %v4361_v50 = vmul.f32 %v9430_v57, %v9156_v33 }
 0x4af   : > { %v9422_v53 = vpop.permute.xlu1 %3297 }
 0x4b0   : > { %11415 = vst [vmem:[#allocation57_spill] sm:$0xff] %v9422_v53  ;;  %v9424_v27 = vpop.permute.xlu0 %3299  ;;  %v9444_v53 = vld [vmem:[#allocation3 + $0x58] sm:$0x7] }
 0x4b1   : > { %11416 = vst [vmem:[#allocation58_spill] sm:$0xff] %v9424_v27  ;;  %4086 = vrot.lane.b32.xlu1 %v4079_v11, %s6935_s28  ;;  %v4401_v27 = vmul.f32 %v9432_v16, %v9156_v33  ;;  %11419 = vst [vmem:[#allocation61_spill] sm:$0xff] %v9444_v53 }
 0x4b2   : > { %4126 = vrot.lane.b32.xlu0 %v4119_v5, %s6935_s28 }
 0x4b3   : > { %v9436_v15 = vpop.permute.xlu1 %3315 }
 0x4b4   : > { %11417 = vst [vmem:[#allocation59_spill] sm:$0xff] %v9436_v15  ;;  %v9438_v47 = vpop.permute.xlu0 %3317  ;;  %v4606_v15 = vmul.f32 %v9273_v25, %v9444_v53 }
 0x4b5   : > { %11418 = vst [vmem:[#allocation60_spill] sm:$0xff] %v9438_v47  ;;  %4367 = vrot.lane.b32.xlu1 %v4361_v50, %s6935_s28  ;;  %v4586_v47 = vmul.f32 %v9258_v0, %v9444_v53  ;;  %v4888_v0 = vmul.f32 %v9392_v10, %v9456_v31 }
 0x4b6   : > { %4407 = vrot.lane.b32.xlu0 %v4401_v27, %s6935_s28 }
 0x4b7   : > { %v9448_v11 = vpop.permute.xlu1 %3319 }
 0x4b8   : > { %11420 = vst [vmem:[#allocation62_spill] sm:$0xff] %v9448_v11  ;;  %v9450_v5 = vpop.permute.xlu0 %3335  ;;  %v9468_v11 = vstv %s6324_s20  ;;  %s6372_s20 = sld [smem:[#allocation8 + $0x3c]] }
 0x4b9   : > { %11421 = vst [vmem:[#allocation63_spill] sm:$0xff] %v9450_v5  ;;  %4594 = vrot.lane.b32.xlu1 %v4586_v47, %s6935_s28  ;;  %v4868_v5 = vmul.f32 %v9369_v45, %v9456_v31 }
 0x4ba   : > { %4614 = vrot.lane.b32.xlu0 %v4606_v15, %s6935_s28  ;;  %v3533_v15 = vmul.f32 %v9395_v14, %v8942_v32  ;;  %v4080_v32 = vmul.f32 %v9295_v3, %v9219_v42 }
 0x4bb   : > { %v9460_v50 = vpop.permute.xlu1 %3337 }
 0x4bc   : > { %11423 = vst [vmem:[#allocation65_spill] sm:$0xff] %v9460_v50  ;;  %v9462_v27 = vpop.permute.xlu0 %3339  ;;  %v9480_v50 = vstv %s6326_s21  ;;  %s9717_s21 = sld [smem:[#allocation9 + $0x3c]] }
 0x4bd   : > { %11424 = vst [vmem:[#allocation66_spill] sm:$0xff] %v9462_v27  ;;  %4875 = vrot.lane.b32.xlu1 %v4868_v5, %s6935_s28  ;;  %v3775_v27 = vmul.f32 %v9468_v11, %v9008_v20 }
 0x4be   : > { %4895 = vrot.lane.b32.xlu0 %v4888_v0, %s6935_s28 }
 0x4bf   : > { %v9472_v25 = vpop.permute.xlu1 %3355 }
 0x4c0   : > { %11425 = vst [vmem:[#allocation67_spill] sm:$0xff] %v9472_v25  ;;  %v9474_v47 = vpop.permute.xlu0 %3357 }
 0x4c1   : > { %11426 = vst [vmem:[#allocation68_spill] sm:$0xff] %v9474_v47  ;;  %3540 = vrot.lane.b32.xlu1 %v3533_v15, %s6935_s28  ;;  %v3815_v47 = vmul.f32 %v9480_v50, %v9008_v20 }
 0x4c2   : > { %3781 = vrot.lane.b32.xlu0 %v3775_v27, %s6935_s28  ;;  %v4120_v27 = vmul.f32 %v9311_v36, %v9219_v42  ;;  %v9514_v36 = vld [vmem:[#allocation3 + $0x59] sm:$0x7] }
 0x4c3   : > { %v9484_v5 = vpop.permute.xlu1 %3359  ;;  %v4869_v54 = vmul.f32 %v9369_v45, %v9514_v36 }
 0x4c4   : > { %11427 = vst [vmem:[#allocation69_spill] sm:$0xff] %v9484_v5  ;;  %v9486_v0 = vpop.permute.xlu0 %3458  ;;  %v4362_v5 = vmul.f32 %v9430_v57, %v9238_v60 }
 0x4c5   : > { %3821 = vrot.lane.b32.xlu1 %v3815_v47, %s6935_s28 }
 0x4c6   : > { %4088 = vrot.lane.b32.xlu0 %v4080_v32, %s6935_s28  ;;  %v4402_v32 = vmul.f32 %v9432_v16, %v9238_v60 }
 0x4c7   : > { %v9494_v25 = vpop.permute.xlu1 %3460 }
 0x4c8   : > { %v9496_v15 = vpop.permute.xlu0 %3462 }
 0x4c9   : > { %4128 = vrot.lane.b32.xlu1 %v4120_v27, %s6935_s28 }
 0x4ca   : > { %4369 = vrot.lane.b32.xlu0 %v4362_v5, %s6935_s28 }
 0x4cb   : > { %v9506_v3 = vpop.permute.xlu1 %3478 }
 0x4cc   : > { %v9508_v47 = vpop.permute.xlu0 %3480 }
 0x4cd   : > { %4409 = vrot.lane.b32.xlu1 %v4402_v32, %s6935_s28 }
 0x4ce   : > { %4650 = vrot.lane.b32.xlu0 %v4644_v37, %s6935_s28  ;;  %v4889_v37 = vmul.f32 %v9392_v10, %v9514_v36 }
 0x4cf   : > { %v9520_v27 = vpop.permute.xlu1 %3482 }
 0x4d0   : > { %11428 = vst [vmem:[#allocation70_spill] sm:$0xff] %v9520_v27  ;;  %v9522_v5 = vpop.permute.xlu0 %3498  ;;  %v9636_v27 = vstv %s6364_s8  ;;  %s9961_s8 = sld [smem:[#allocation8 + $0x1d]] }
 0x4d1   : > { %11429 = vst [vmem:[#allocation71_spill] sm:$0xff] %v9522_v5  ;;  %4690 = vrot.lane.b32.xlu1 %v4684_v29, %s6935_s28  ;;  %v3494_v5 = vmul.f32 %v8981_v18, %v8944_v44 }
 0x4d2   : > { %4877 = vrot.lane.b32.xlu0 %v4869_v54, %s6935_s28  ;;  %v3534_v54 = vmul.f32 %v9395_v14, %v8944_v44  ;;  %v9560_v44 = vstv %s6346_s26  ;;  %s9763_s26 = sld [smem:[#allocation9 + $0x46]] }
 0x4d3   : > { %v9530_v17 = vpop.permute.xlu1 %3500 }
 0x4d4   : > { %11430 = vst [vmem:[#allocation72_spill] sm:$0xff] %v9530_v17  ;;  %v9532_v32 = vpop.permute.xlu0 %3741  ;;  %v3776_v17 = vmul.f32 %v9468_v11, %v9035_v23 }
 0x4d5   : > { %4897 = vrot.lane.b32.xlu1 %v4889_v37, %s6935_s28  ;;  %v4058_v37 = vmul.f32 %v9548_v59, %v9061_v62 }
 0x4d6   : > { %3502 = vrot.lane.b32.xlu0 %v3494_v5, %s6935_s28  ;;  %v3816_v5 = vmul.f32 %v9480_v50, %v9035_v23  ;;  %v4363_v23 = vmul.f32 %v9430_v57, %v9309_v9 }
 0x4d7   : > { %v9540_v45 = vpop.permute.xlu1 %3761 }
 0x4d8   : > { %v9542_v29 = vpop.permute.xlu0 %3743 }
 0x4d9   : > { %3542 = vrot.lane.b32.xlu1 %v3534_v54, %s6935_s28  ;;  %v4098_v54 = vmul.f32 %v9560_v44, %v9061_v62 }
 0x4da   : > { %3783 = vrot.lane.b32.xlu0 %v3776_v17, %s6935_s28 }
 0x4db   : > { %v9552_v18 = vpop.permute.xlu1 %3763 }
 0x4dc   : > { %v9554_v10 = vpop.permute.xlu0 %4024 }
 0x4dd   : > { %3823 = vrot.lane.b32.xlu1 %v3816_v5, %s6935_s28 }
 0x4de   : > { %4064 = vrot.lane.b32.xlu0 %v4058_v37, %s6935_s28  ;;  %v4403_v37 = vmul.f32 %v9432_v16, %v9309_v9  ;;  %v4927_v16 = vmul.f32 %v9582_v43, %v9366_v52 }
 0x4df   : > { %v9564_v14 = vpop.permute.xlu1 %4044 }
 0x4e0   : > { %v9566_v17 = vpop.permute.xlu0 %3518 }
 0x4e1   : > { %11431 = vst [vmem:[#allocation73_spill] sm:$0xff] %v9566_v17  ;;  %4104 = vrot.lane.b32.xlu1 %v4098_v54, %s6935_s28  ;;  %v4967_v17 = vmul.f32 %v9594_v39, %v9366_v52 }
 0x4e2   : > { %4371 = vrot.lane.b32.xlu0 %v4363_v23, %s6935_s28  ;;  %v4685_v23 = vmul.f32 %v9516_v1, %v9333_v41 }
 0x4e3   : > { %v9574_v56 = vpop.permute.xlu1 %3558 }
 0x4e4   : > { %11432 = vst [vmem:[#allocation74_spill] sm:$0xff] %v9574_v56  ;;  %v9576_v5 = vpop.permute.xlu0 %3745  ;;  %v9596_v56 = vstv %s6309_s30  ;;  %s9904_s30 = sld [smem:[#allocation8 + $0x4c]] }
 0x4e5   : > { %11433 = vst [vmem:[#allocation75_spill] sm:$0xff] %v9576_v5  ;;  %4411 = vrot.lane.b32.xlu1 %v4403_v37, %s6935_s28  ;;  %v3592_v38 = vmul.f32 %v9596_v56, %v8927_v24  ;;  %v3777_v24 = vmul.f32 %v9468_v11, %v9109_v48  ;;  %v4059_v5 = vmul.f32 %v9548_v59, %v9132_v26 }
 0x4e6   : > { %4652 = vrot.lane.b32.xlu0 %v4645_v55, %s6935_s28  ;;  %v3184_v11 = vadd.f32 %v9249_v30, %v8936_v46  ;;  %v4099_v46 = vmul.f32 %v9560_v44, %v9132_v26  ;;  %v4341_v30 = vmul.f32 %v9636_v27, %v9156_v33 }
 0x4e7   : > { %v9586_v57 = vpop.permute.xlu1 %3765 }
 0x4e8   : > { %11434 = vst [vmem:[#allocation76_spill] sm:$0xff] %v9586_v57  ;;  %v9588_v54 = vpop.permute.xlu0 %4026 }
 0x4e9   : > { %4692 = vrot.lane.b32.xlu1 %v4685_v23, %s6935_s28 }
 0x4ea   : > { %4933 = vrot.lane.b32.xlu0 %v4927_v16, %s6935_s28 }
 0x4eb   : > { %v9600_v55 = vpop.permute.xlu1 %4046 }
 0x4ec   : > { %v9602_v37 = vpop.permute.xlu0 %4307 }
 0x4ed   : > { %4973 = vrot.lane.b32.xlu1 %v4967_v17, %s6935_s28 }
 0x4ee   : > { %3598 = vrot.lane.b32.xlu0 %v3592_v38, %s6935_s28  ;;  %v9624_v38 = vstv %s6292_s7  ;;  %s9932_s7 = sld [smem:[#allocation8 + $0x1c]] }
 0x4ef   : > { %v9612_v23 = vpop.permute.xlu1 %4327 }
 0x4f0   : > { %v9614_v16 = vpop.permute.xlu0 %3520 }
 0x4f1   : > { %11435 = vst [vmem:[#allocation77_spill] sm:$0xff] %v9614_v16  ;;  %3638 = vrot.lane.b32.xlu1 %v3632_v7, %s6935_s28  ;;  %v3817_v16 = vmul.f32 %v9480_v50, %v9109_v48  ;;  %v3372_v7 = vmul.f32 %v9616_v40, %v9624_v38 }
 0x4f2   : > { %3785 = vrot.lane.b32.xlu0 %v3777_v24, %s6935_s28  ;;  %v9642_v24 = vstv %s6293_s9  ;;  %s9967_s9 = sld [smem:[#allocation9 + $0x15]] }
 0x4f3   : > { %v9626_v17 = vpop.permute.xlu1 %3560 }
 0x4f4   : > { %11437 = vst [vmem:[#allocation79_spill] sm:$0xff] %v9626_v17  ;;  %v9628_v57 = vpop.permute.xlu0 %3801  ;;  %v9654_v17 = vstv %s6366_s10  ;;  %s9989_s10 = sld [smem:[#allocation9 + $0x16]] }
 0x4f5   : > { %11438 = vst [vmem:[#allocation80_spill] sm:$0xff] %v9628_v57  ;;  %3825 = vrot.lane.b32.xlu1 %v3817_v16, %s6935_s28  ;;  %v3204_v16 = vadd.f32 %v9277_v13, %v8974_v61  ;;  %v9656_v57 = vstv %s6312_s12  ;;  %v4381_v61 = vmul.f32 %v9654_v17, %v9156_v33  ;;  %v4646_v13 = vmul.f32 %v9502_v12, %v9444_v53  ;;  %s9999_s12 = sld [smem:[#allocation9 + $0x3a]] }
 0x4f6   : > { %4066 = vrot.lane.b32.xlu0 %v4059_v5, %s6935_s28  ;;  %v3375_v5 = vadd.f32 %v3372_v7, %v3184_v11  ;;  %v3655_v7 = vmul.f32 %v9656_v57, %v9008_v20 }
 0x4f7   : > { %v9644_v48 = vpop.permute.xlu1 %3841 }
 0x4f8   : > { %11439 = vst [vmem:[#allocation81_spill] sm:$0xff] %v9644_v48  ;;  %v9646_v50 = vpop.permute.xlu0 %4028  ;;  %v3467_v48 = vadd.f32 %v9486_v0, %v3375_v5  ;;  %v9673_v0 = vstv %s6313_s13  ;;  %v9678_v5 = vstv %s6332_s14  ;;  %s10010_s13 = sld [smem:[#allocation9 + $0x1f]]  ;;  %s10026_s14 = sld [smem:[#allocation9 + $0x3b]] }
 0x4f9   : > { %11440 = vst [vmem:[#allocation82_spill] sm:$0xff] %v9646_v50  ;;  %4106 = vrot.lane.b32.xlu1 %v4099_v46, %s6935_s28  ;;  %v3380_v50 = vmul.f32 %v9616_v40, %v9642_v24 }
 0x4fa   : > { %4347 = vrot.lane.b32.xlu0 %v4341_v30, %s6935_s28  ;;  %v3658_v30 = vadd.f32 %v3655_v7, %v3467_v48  ;;  %v3938_v48 = vmul.f32 %v9678_v5, %v9061_v62 }
 0x4fb   : > { %v9663_v9 = vpop.permute.xlu1 %4048  ;;  %v3383_v11 = vadd.f32 %v3380_v50, %v3204_v16  ;;  %v4686_v50 = vmul.f32 %v9516_v1, %v9444_v53  ;;  %v4928_v16 = vmul.f32 %v9582_v43, %v9456_v31 }
 0x4fc   : > { %11441 = vst [vmem:[#allocation83_spill] sm:$0xff] %v9663_v9  ;;  %v9665_v41 = vpop.permute.xlu0 %4309  ;;  %v3750_v40 = vadd.f32 %v9532_v32, %v3658_v30  ;;  %v9703_v32 = vld [vmem:[#allocation3 + $0x20] sm:$0xff] }
 0x4fd   : > { %4387 = vrot.lane.b32.xlu1 %v4381_v61, %s6935_s28  ;;  %v3487_v46 = vadd.f32 %v9506_v3, %v3383_v11  ;;  %v3663_v61 = vmul.f32 %v9673_v0, %v9008_v20  ;;  %v4968_v20 = vmul.f32 %v9594_v39, %v9456_v31  ;;  %11443 = vst [vmem:[#allocation85_spill] sm:$0xff] %v9703_v32 }
 0x4fe   : > { %4654 = vrot.lane.b32.xlu0 %v4646_v13, %s6935_s28  ;;  %v9695_v13 = vstv %s6333_s15  ;;  %v3593_v7 = vmul.f32 %v9703_v32, %v9596_v56  ;;  %v3941_v30 = vadd.f32 %v3938_v48, %v3750_v40  ;;  %v3633_v40 = vmul.f32 %v9703_v32, %v9608_v4  ;;  %s10033_s15 = sld [smem:[#allocation9 + $0x20]] }
 0x4ff   : > { %v9680_v9 = vpop.permute.xlu1 %4329  ;;  %v3666_v3 = vadd.f32 %v3663_v61, %v3487_v46  ;;  %v9733_v48 = vstv %s6331_s19  ;;  %s10095_s19 = sld [smem:[#allocation9 + $0x33]] }
 0x500   : > { %v9682_v12 = vpop.permute.xlu0 %4590  ;;  %v4033_v61 = vadd.f32 %v9554_v10, %v3941_v30 }
 0x501   : > { %4694 = vrot.lane.b32.xlu1 %v4686_v50, %s6935_s28  ;;  %v3770_v46 = vadd.f32 %v9540_v45, %v3666_v3  ;;  %v9708_v50 = vstv %s6329_s16  ;;  %v9725_v45 = vld [vmem:[#allocation3 + $0x19] sm:$0xff]  ;;  %s10044_s16 = sld [smem:[#allocation9 + $0x29]] }
 0x502   : > { %4935 = vrot.lane.b32.xlu0 %v4928_v16, %s6935_s28  ;;  %v9710_v16 = vstv %s6352_s17  ;;  %11446 = vst [vmem:[#allocation88_spill] sm:$0xff] %v9725_v45  ;;  %v3875_v3 = vmul.f32 %v9725_v45, %v9708_v50  ;;  %s10073_s17 = sld [smem:[#allocation9 + $0x2a]] }
 0x503   : > { %v9697_v1 = vpop.permute.xlu1 %4610 }
 0x504   : > { %v9699_v11 = vpop.permute.xlu0 %3522 }
 0x505   : > { %11442 = vst [vmem:[#allocation84_spill] sm:$0xff] %v9699_v11  ;;  %4975 = vrot.lane.b32.xlu1 %v4968_v20, %s6935_s28  ;;  %v3946_v11 = vmul.f32 %v9695_v13, %v9061_v62  ;;  %v4221_v62 = vmul.f32 %v9710_v16, %v9156_v33  ;;  %v9735_v20 = vstv %s6353_s11  ;;  %s10115_s11 = sld [smem:[#allocation8 + $0x26]] }
 0x506   : > { %3600 = vrot.lane.b32.xlu0 %v3593_v7, %s6935_s28 }
 0x507   : > { %v9719_v53 = vpop.permute.xlu1 %3562  ;;  %v3949_v10 = vadd.f32 %v3946_v11, %v3770_v46  ;;  %v4224_v30 = vadd.f32 %v4221_v62, %v4033_v61  ;;  %v3915_v46 = vmul.f32 %v9725_v45, %v9733_v48  ;;  %v4100_v62 = vmul.f32 %v9560_v44, %v9219_v42 }
 0x508   : > { %11444 = vst [vmem:[#allocation86_spill] sm:$0xff] %v9719_v53  ;;  %v9721_v31 = vpop.permute.xlu0 %3803  ;;  %v9742_v53 = vstv %s6372_s20  ;;  %s10117_s20 = sld [smem:[#allocation9 + $0x34]] }
 0x509   : > { %11445 = vst [vmem:[#allocation87_spill] sm:$0xff] %v9721_v31  ;;  %3640 = vrot.lane.b32.xlu1 %v3633_v40, %s6935_s28  ;;  %v4053_v7 = vadd.f32 %v9564_v14, %v3949_v10  ;;  %v4060_v40 = vmul.f32 %v9548_v59, %v9219_v42  ;;  %v3205_v14 = vadd.f32 %v9279_v19, %v8976_v21  ;;  %v9772_v19 = vstv %s9717_s21  ;;  %s10127_s21 = sld [smem:[#allocation9 + $0x3d]] }
 0x50a   : > { %3881 = vrot.lane.b32.xlu0 %v3875_v3, %s6935_s28  ;;  %v3185_v3 = vadd.f32 %v9265_v49, %v8953_v35  ;;  %v4316_v61 = vadd.f32 %v9602_v37, %v4224_v30  ;;  %v4229_v10 = vmul.f32 %v9735_v20, %v9156_v33  ;;  %v3373_v59 = vmul.f32 %v9703_v32, %v9624_v38 }
 0x50b   : > { %v9744_v31 = vpop.permute.xlu1 %3843  ;;  %v3381_v35 = vmul.f32 %v9703_v32, %v9642_v24  ;;  %v4504_v21 = vmul.f32 %v9742_v53, %v9255_v2  ;;  %v4342_v30 = vmul.f32 %v9636_v27, %v9238_v60 }
 0x50c   : > { %11447 = vst [vmem:[#allocation89_spill] sm:$0xff] %v9744_v31  ;;  %v9746_v11 = vpop.permute.xlu0 %4084  ;;  %v4232_v49 = vadd.f32 %v4229_v10, %v4053_v7 }
 0x50d   : > { %11448 = vst [vmem:[#allocation90_spill] sm:$0xff] %v9746_v11  ;;  %3921 = vrot.lane.b32.xlu1 %v3915_v46, %s6935_s28  ;;  %v9783_v46 = vstv %s9729_s23  ;;  %v3384_v7 = vadd.f32 %v3381_v35, %v3205_v14  ;;  %v4507_v31 = vadd.f32 %v4504_v21, %v4316_v61  ;;  %v4382_v61 = vmul.f32 %v9654_v17, %v9238_v60  ;;  %s10138_s23 = sld [smem:[#allocation8 + $0x27]] }
 0x50e   : > { %4068 = vrot.lane.b32.xlu0 %v4060_v40, %s6935_s28  ;;  %v3376_v40 = vadd.f32 %v3373_v59, %v3185_v3  ;;  %v4336_v10 = vadd.f32 %v9612_v23, %v4232_v49  ;;  %v4512_v3 = vmul.f32 %v9772_v19, %v9255_v2  ;;  %v4624_v59 = vmul.f32 %v9783_v46, %v9255_v2 }
 0x50f   : > { %v9774_v33 = vpop.permute.xlu1 %4124  ;;  %v3488_v44 = vadd.f32 %v9508_v47, %v3384_v7  ;;  %v4599_v11 = vadd.f32 %v9682_v12, %v4507_v31  ;;  %v9805_v35 = vstv %s9752_s25  ;;  %v9818_v21 = vstv %s9763_s26  ;;  %s10151_s25 = sld [smem:[#allocation8 + $0x16]] }
 0x510   : > { %11449 = vst [vmem:[#allocation91_spill] sm:$0xff] %v9774_v33  ;;  %v9776_v37 = vpop.permute.xlu0 %4311  ;;  %v9789_v33 = vstv %s9739_s24  ;;  %v3468_v32 = vadd.f32 %v9494_v25, %v3376_v40  ;;  %v9807_v25 = vld [vmem:[#allocation3 + $0x21] sm:$0xff]  ;;  %v4515_v12 = vadd.f32 %v4512_v3, %v4336_v10  ;;  %v4664_v10 = vmul.f32 %v9805_v35, %v9255_v2  ;;  %s10145_s24 = sld [smem:[#allocation8 + $0x15]]  ;;  %s10153_s26 = sld [smem:[#allocation9 + $0x3e]] }
 0x511   : > { %11450 = vst [vmem:[#allocation92_spill] sm:$0xff] %v9776_v37  ;;  %4108 = vrot.lane.b32.xlu1 %v4100_v62, %s6935_s28  ;;  %v3656_v31 = vmul.f32 %v9807_v25, %v9656_v57  ;;  %v3664_v47 = vmul.f32 %v9807_v25, %v9673_v0  ;;  %v4787_v49 = vmul.f32 %v9789_v33, %v9366_v52 }
 0x512   : > { %4349 = vrot.lane.b32.xlu0 %v4342_v30, %s6935_s28  ;;  %v4619_v40 = vadd.f32 %v9697_v1, %v4515_v12  ;;  %v4929_v3 = vmul.f32 %v9582_v43, %v9514_v36  ;;  %v3939_v2 = vmul.f32 %v9678_v5, %v9132_v26  ;;  %v3947_v43 = vmul.f32 %v9695_v13, %v9132_v26 }
 0x513   : > { %v9796_v14 = vpop.permute.xlu1 %4331  ;;  %v3659_v62 = vadd.f32 %v3656_v31, %v3468_v32  ;;  %v3667_v30 = vadd.f32 %v3664_v47, %v3488_v44  ;;  %v4790_v7 = vadd.f32 %v4787_v49, %v4599_v11  ;;  %v4795_v32 = vmul.f32 %v9818_v21, %v9366_v52  ;;  %v9844_v44 = vld [vmem:[#allocation3 + $0x28] sm:$0x7] }
 0x514   : > { %11451 = vst [vmem:[#allocation93_spill] sm:$0xff] %v9796_v14  ;;  %v9798_v23 = vpop.permute.xlu0 %4592  ;;  %v4969_v11 = vmul.f32 %v9594_v39, %v9514_v36  ;;  %v11453_v26 = vmov 1.0|1.0  }
 0x515   : > { %4389 = vrot.lane.b32.xlu1 %v4382_v61, %s6935_s28  ;;  %v3751_v61 = vadd.f32 %v9542_v29, %v3659_v62  ;;  %v4798_v29 = vadd.f32 %v4795_v32, %v4619_v40  ;;  %v3634_v62 = vmul.f32 %v9844_v44, %v9608_v4  ;;  %v4230_v4 = vmul.f32 %v9735_v20, %v9238_v60 }
 0x516   : > { %4630 = vrot.lane.b32.xlu0 %v4624_v59, %s6935_s28  ;;  %v3771_v59 = vadd.f32 %v9552_v18, %v3667_v30  ;;  %v3876_v30 = vmul.f32 %v9807_v25, %v9708_v50  ;;  %v9881_v40 = vstv %s9831_s27  ;;  %v9902_v32 = vstv %s9848_s29  ;;  %s10173_s27 = sld [smem:[#allocation8 + $0x1f]] }
 0x517   : > { %v9821_v45 = vpop.permute.xlu1 %4612  ;;  %s10177_s29 = sld [smem:[#allocation9 + $0x47]] }
 0x518   : > { %v4874_v14 = vpop.permute.xlu0 %4873  ;;  %v3950_v31 = vadd.f32 %v3947_v43, %v3771_v59 }
 0x519   : > { %v4882_v37 = vadd.f32 %v4874_v14, %v4790_v7  ;;  %4670 = vrot.lane.b32.xlu1 %v4664_v10, %s6935_s28  ;;  %v3594_v14 = vmul.f32 %v9844_v44, %v9596_v56 }
 0x51a   : > { %4937 = vrot.lane.b32.xlu0 %v4929_v3, %s6935_s28  ;;  %v4054_v56 = vadd.f32 %v9600_v55, %v3950_v31  ;;  %v4222_v55 = vmul.f32 %v9710_v16, %v9238_v60  ;;  %v3916_v3 = vmul.f32 %v9807_v25, %v9733_v48  ;;  %v11458_v31 = vld [vmem:[#allocation41_spill] sm:$0xff] }
 0x51b   : > { %6569 = vmatmul.mubr.msk.f32.vlgmr.msra.gmra.mrb[0].mxu0 %vm5065_vm15, %v4882_v37  ;;  %v4894_v18 = vpop.permute.xlu1 %4893  ;;  %v3942_v37 = vadd.f32 %v3939_v2, %v3751_v61  ;;  %v9897_v61 = vld [vmem:[#allocation3 + $0x30] sm:$0xff] }
 0x51c   : > { %v9840_v1 = vpop.permute.xlu0 %3538  ;;  %6571 = vmatprep.mubr.msk.f32.mxu0 %vm6939_vm6, %v11394_v28  ;;  %6711 = vmatpush3.bf16.msk.msra.mxu0 %vm9359_vm12, %v11453_v26  ;;  %v4902_v47 = vadd.f32 %v4894_v18, %v4798_v29  ;;  %v4233_v7 = vadd.f32 %v4230_v4, %v4054_v56  ;;  %11456 = vst [vmem:[#allocation97_spill] sm:$0xff] %v9897_v61 }
 0x51d   : > { %11452 = vst [vmem:[#allocation94_spill] sm:$0xff] %v9840_v1  ;;  %6611 = vmatprep.subr.mxu0 %v11394_v28  ;;  %4977 = vrot.lane.b32.xlu1 %v4969_v11, %s6935_s28  ;;  %v4034_v39 = vadd.f32 %v9588_v54, %v3942_v37  ;;  %v3186_v54 = vadd.f32 %v9267_v51, %v8955_v6 }
 0x51e   : > { %3602 = vrot.lane.b32.xlu0 %v3594_v14, %s6935_s28  ;;  %6554 = vmatmul.mubr.msk.f32.vlgmr.msra.gmra.mrb[0].mxu1 %vm5065_vm15, %v4902_v47  ;;  %v3374_v6 = vmul.f32 %v9844_v44, %v9624_v38  ;;  %v4158_v59 = vmul.f32 %v9897_v61, %v9881_v40  ;;  %v3206_v38 = vadd.f32 %v9287_v8, %v8995_v34  ;;  %v11457_v14 = vld [vmem:[#allocation44_spill] sm:$0xff] }
 0x51f   : > { %v9861_v12 = vpop.permute.xlu1 %3805  ;;  %6556 = vmatprep.mubr.msk.f32.mxu1 %vm6939_vm6, %v11394_v28  ;;  %6705 = vmatpush3.bf16.msk.msra.mxu1 %vm9359_vm12, %v11453_v26  ;;  %v4225_v51 = vadd.f32 %v4222_v55, %v4034_v39  ;;  %v4337_v29 = vadd.f32 %v9680_v9, %v4233_v7  ;;  %v3382_v11 = vmul.f32 %v9844_v44, %v9642_v24  ;;  %v9934_v24 = vld [vmem:[#allocation3 + $0x29] sm:$0x7] }
 0x520   : > { %11454 = vst [vmem:[#allocation95_spill] sm:$0xff] %v9861_v12  ;;  %v9863_v49 = vpop.permute.xlu0 %3845  ;;  %6581 = vmatprep.subr.mxu1 %v11394_v28  ;;  %6612 = vmatpush3.msk.msra.mxu0 %vm5075_vm13, %v9377_v22  ;;  %v3377_v2 = vadd.f32 %v3374_v6, %v3186_v54  ;;  %v4505_v37 = vmul.f32 %v9742_v53, %v11457_v14 }
 0x521   : > { %11455 = vst [vmem:[#allocation96_spill] sm:$0xff] %v9863_v49  ;;  %3642 = vrot.lane.b32.xlu1 %v3634_v62, %s6935_s28  ;;  %6712 = vmatprep.subr.bf16.mxu0 %v11410_v63  ;;  %v4317_v43 = vadd.f32 %v9665_v41, %v4225_v51  ;;  %v4513_v34 = vmul.f32 %v9772_v19, %v11457_v14 }
 0x522   : > { %3883 = vrot.lane.b32.xlu0 %v3876_v30, %s6935_s28  ;;  %v3469_v18 = vadd.f32 %v9496_v15, %v3377_v2  ;;  %v4198_v41 = vmul.f32 %v9897_v61, %v9902_v32  ;;  %v4343_v47 = vmul.f32 %v9636_v27, %v11458_v31  ;;  %v3385_v15 = vadd.f32 %v3382_v11, %v3206_v38  ;;  %v11459_v30 = vld [vmem:[#allocation70_spill] sm:$0xff]  ;;  %v11461_v2 = vld [vmem:[#allocation64_spill] sm:$0xff] }
 0x523   : > { %v9891_v10 = vpop.permute.xlu1 %4086  ;;  %6582 = vmatpush3.msk.msra.mxu1 %vm5075_vm13, %v9377_v22  ;;  %v3657_v39 = vmul.f32 %v9934_v24, %v9656_v57  ;;  %v4508_v56 = vadd.f32 %v4505_v37, %v4317_v43  ;;  %v4516_v62 = vadd.f32 %v4513_v34, %v4337_v29  ;;  %v4383_v57 = vmul.f32 %v9654_v17, %v11458_v31  ;;  %v11482_v22 = vld [vmem:[#allocation80_spill] sm:$0xff] }
 0x524   : > { %v9893_v60 = vpop.permute.xlu0 %4126  ;;  %6706 = vmatprep.subr.bf16.mxu1 %v11410_v63  ;;  %v3489_v54 = vadd.f32 %v11459_v30, %v3385_v15  ;;  %v4625_v7 = vmul.f32 %v9783_v46, %v11457_v14  ;;  %v4796_v43 = vmul.f32 %v9818_v21, %v11461_v2  ;;  %v3940_v29 = vmul.f32 %v9678_v5, %v9219_v42  ;;  %v11463_v30 = vld [vmem:[#allocation82_spill] sm:$0xff] }
 0x525   : > { %3923 = vrot.lane.b32.xlu1 %v3916_v3, %s6935_s28  ;;  %v3660_v27 = vadd.f32 %v3657_v39, %v3469_v18  ;;  %v4600_v55 = vadd.f32 %v9798_v23, %v4508_v56  ;;  %v4620_v4 = vadd.f32 %v9821_v45, %v4516_v62  ;;  %v9952_v3 = vstv %s9904_s30  ;;  %v11462_v39 = vld [vmem:[#allocation76_spill] sm:$0xff]  ;;  %s10191_s30 = sld [smem:[#allocation9 + $0x44]] }
 0x526   : > { %4164 = vrot.lane.b32.xlu0 %v4158_v59, %s6935_s28  ;;  %v11460_v59 = vld [vmem:[#allocation75_spill] sm:$0xff]  ;;  %v3665_v23 = vmul.f32 %v9934_v24, %v9673_v0  ;;  %v4788_v45 = vmul.f32 %v9789_v33, %v11461_v2  ;;  %v4665_v34 = vmul.f32 %v9805_v35, %v11457_v14  ;;  %v9977_v15 = vstv %s9932_s7  ;;  %v9983_v14 = vld [vmem:[#allocation3 + $0x40] sm:$0x7]  ;;  %s10205_s7 = sld [smem:[#allocation9 + $0x45]] }
 0x527   : > { %v9922_v8 = vpop.permute.xlu1 %4367  ;;  %v3752_v38 = vadd.f32 %v11460_v59, %v3660_v27  ;;  %v4799_v11 = vadd.f32 %v4796_v43, %v4620_v4  ;;  %v3948_v27 = vmul.f32 %v9983_v14, %v9695_v13 }
 0x528   : > { %v9924_v9 = vpop.permute.xlu0 %4407  ;;  %v3668_v17 = vadd.f32 %v3665_v23, %v3489_v54  ;;  %v4791_v18 = vadd.f32 %v4788_v45, %v4600_v55  ;;  %v10008_v23 = vstv %s9961_s8  ;;  %s10238_s8 = sld [smem:[#allocation8 + $0x20]] }
 0x529   : > { %4204 = vrot.lane.b32.xlu1 %v4198_v41, %s6935_s28  ;;  %v4907_v41 = vmul.f32 %v9952_v3, %v9366_v52  ;;  %v3943_v62 = vadd.f32 %v3940_v29, %v3752_v38  ;;  %v4223_v38 = vmul.f32 %v9710_v16, %v11458_v31 }
 0x52a   : > { %4351 = vrot.lane.b32.xlu0 %v4343_v47, %s6935_s28  ;;  %v9974_v47 = vstv %s9930_s6  ;;  %v3772_v56 = vadd.f32 %v11462_v39, %v3668_v17  ;;  %v10016_v17 = vstv %s9967_s9  ;;  %s10203_s6 = sld [smem:[#allocation9 + $0x48]]  ;;  %s10253_s9 = sld [smem:[#allocation8 + $0x29]] }
 0x52b   : > { %v9943_v6 = vpop.permute.xlu1 %4594  ;;  %v4035_v54 = vadd.f32 %v11463_v30, %v3943_v62  ;;  %v10042_v30 = vstv %s9989_s10  ;;  %s10276_s10 = sld [smem:[#allocation8 + $0x2a]] }
 0x52c   : > { %v9945_v51 = vpop.permute.xlu0 %4614  ;;  %v3951_v13 = vadd.f32 %v3948_v27, %v3772_v56  ;;  %v4231_v56 = vmul.f32 %v9735_v20, %v11458_v31  ;;  %v3917_v31 = vmul.f32 %v9934_v24, %v9733_v48  ;;  %v10052_v27 = vld [vmem:[#allocation3 + $0x38] sm:$0xff] }
 0x52d   : > { %4391 = vrot.lane.b32.xlu1 %v4383_v57, %s6935_s28  ;;  %v4947_v57 = vmul.f32 %v9974_v47, %v9366_v52  ;;  %v11466_v52 = vld [vmem:[#allocation83_spill] sm:$0xff]  ;;  %v4226_v43 = vadd.f32 %v4223_v38, %v4035_v54  ;;  %v11478_v48 = vld [vmem:[#allocation73_spill] sm:$0xff] }
 0x52e   : > { %4632 = vrot.lane.b32.xlu0 %v4625_v7, %s6935_s28  ;;  %v11465_v7 = vld [vmem:[#allocation78_spill] sm:$0xff]  ;;  %v4055_v45 = vadd.f32 %v11466_v52, %v3951_v13  ;;  %v11475_v13 = vld [vmem:[#allocation23_spill] sm:$0xff] }
 0x52f   : > { %v4876_v0 = vpop.permute.xlu1 %4875  ;;  %v3572_v59 = vmul.f32 %v11465_v7, %v9977_v15  ;;  %v3612_v16 = vmul.f32 %v11465_v7, %v10008_v23 }
 0x530   : > { %v4896_v37 = vpop.permute.xlu0 %4895  ;;  %v4883_v42 = vadd.f32 %v4876_v0, %v4791_v18  ;;  %v11469_v0 = vld [vmem:[#allocation17_spill] sm:$0xff]  ;;  %v4234_v62 = vadd.f32 %v4231_v56, %v4055_v45 }
 0x531   : > { %v4903_v5 = vadd.f32 %v4896_v37, %v4799_v11  ;;  %4672 = vrot.lane.b32.xlu1 %v4665_v34, %s6935_s28  ;;  %v3877_v11 = vmul.f32 %v9934_v24, %v9708_v50  ;;  %v11470_v37 = vld [vmem:[#allocation42_spill] sm:$0xff]  ;;  %v3396_v50 = vmul.f32 %v11465_v7, %v10016_v17  ;;  %v11477_v45 = vld [vmem:[#allocation93_spill] sm:$0xff] }
 0x532   : > { %4913 = vrot.lane.b32.xlu0 %v4907_v41, %s6935_s28  ;;  %6572 = vmatmul.mubr.msk.f32.gmra.mrb[2].mxu0 %vm5065_vm15, %v4883_v42  ;;  %v3244_v34 = vadd.f32 %v11470_v37, %v11469_v0  ;;  %v11471_v41 = vld [vmem:[#allocation92_spill] sm:$0xff]  ;;  %v11472_v42 = vld [vmem:[#allocation61_spill] sm:$0xff]  ;;  %v3412_v37 = vmul.f32 %v11465_v7, %v10042_v30 }
 0x533   : > { %6557 = vmatmul.mubr.msk.f32.gmra.mrb[2].mxu1 %vm5065_vm15, %v4903_v5  ;;  %v9991_v55 = vpop.permute.xlu1 %3540  ;;  %6574 = vmatprep.mubr.msk.f32.mxu0 %vm6939_vm6, %v11394_v28  ;;  %v4318_v39 = vadd.f32 %v11471_v41, %v4226_v43  ;;  %v4506_v5 = vmul.f32 %v9742_v53, %v11472_v42  ;;  %v11476_v53 = vld [vmem:[#allocation53_spill] sm:$0xff]  ;;  %v4338_v43 = vadd.f32 %v11477_v45, %v4234_v62 }
 0x534   : > { %v9993_v4 = vpop.permute.xlu0 %3781  ;;  %6559 = vmatprep.mubr.msk.f32.mxu1 %vm6939_vm6, %v11394_v28  ;;  %v3284_v38 = vadd.f32 %v11476_v53, %v11475_v13  ;;  %v3399_v52 = vadd.f32 %v3396_v50, %v3244_v34  ;;  %v4514_v34 = vmul.f32 %v9772_v19, %v11472_v42  ;;  %v4199_v50 = vmul.f32 %v10052_v27, %v9902_v32  ;;  %v10081_v62 = vld [vmem:[#allocation3 + $0x31] sm:$0xff] }
 0x535   : > { %11464 = vst [vmem:[#allocation44_spill] sm:$0xff] %v9993_v4  ;;  %4953 = vrot.lane.b32.xlu1 %v4947_v57, %s6935_s28  ;;  %v4159_v57 = vmul.f32 %v10052_v27, %v9881_v40  ;;  %11479 = vst [vmem:[#allocation76_spill] sm:$0xff] %v10081_v62  ;;  %v11480_v19 = vld [vmem:[#allocation88_spill] sm:$0xff]  ;;  %v4789_v13 = vmul.f32 %v9789_v33, %v9514_v36  ;;  %v10093_v53 = vstv %s10033_s15  ;;  %s10315_s15 = sld [smem:[#allocation8 + $0x31]] }
 0x536   : > { %3578 = vrot.lane.b32.xlu0 %v3572_v59, %s6935_s28  ;;  %v10057_v59 = vstv %s9999_s12  ;;  %v3527_v0 = vadd.f32 %v11478_v48, %v3399_v52  ;;  %v11481_v52 = vld [vmem:[#allocation74_spill] sm:$0xff]  ;;  %s10283_s12 = sld [smem:[#allocation9 + $0x17]] }
 0x537   : > { %v10018_v29 = vpop.permute.xlu1 %3821  ;;  %11474 = vst [vmem:[#allocation64_spill] sm:$0xff] %v10057_v59  ;;  %v4441_v7 = vmul.f32 %v10081_v62, %v10057_v59 }
 0x538   : > { %11467 = vst [vmem:[#allocation41_spill] sm:$0xff] %v10018_v29  ;;  %v10020_v18 = vpop.permute.xlu0 %4088  ;;  %v11498_v29 = vld [vmem:[#allocation54_spill] sm:$0xff] }
 0x539   : > { %11468 = vst [vmem:[#allocation70_spill] sm:$0xff] %v10020_v18  ;;  %3618 = vrot.lane.b32.xlu1 %v3612_v16, %s6935_s28  ;;  %v4509_v16 = vadd.f32 %v4506_v5, %v4318_v39  ;;  %v10086_v5 = vstv %s10026_s14  ;;  %v11499_v18 = vld [vmem:[#allocation15_spill] sm:$0xff]  ;;  %s10306_s14 = sld [smem:[#allocation8 + $0x30]] }
 0x53a   : > { %3885 = vrot.lane.b32.xlu0 %v3877_v11, %s6935_s28  ;;  %v10063_v11 = vstv %s10010_s13  ;;  %s10299_s13 = sld [smem:[#allocation9 + $0x18]] }
 0x53b   : > { %v10046_v54 = vpop.permute.xlu1 %4128  ;;  %v4601_v41 = vadd.f32 %v9943_v6, %v4509_v16  ;;  %v3415_v6 = vadd.f32 %v3412_v37, %v3284_v38  ;;  %v10102_v37 = vstv %s10044_s16  ;;  %s10347_s16 = sld [smem:[#allocation9 + $0x21]] }
 0x53c   : > { %11473 = vst [vmem:[#allocation75_spill] sm:$0xff] %v10046_v54  ;;  %v10048_v20 = vpop.permute.xlu0 %4369 }
 0x53d   : > { %3925 = vrot.lane.b32.xlu1 %v3917_v31, %s6935_s28  ;;  %v3679_v31 = vmul.f32 %v11480_v19, %v10063_v11  ;;  %v3567_v45 = vadd.f32 %v11481_v52, %v3415_v6  ;;  %v4792_v48 = vadd.f32 %v4789_v13, %v4601_v41  ;;  %v4908_v13 = vmul.f32 %v9952_v3, %v11461_v2  ;;  %v11484_v52 = vld [vmem:[#allocation81_spill] sm:$0xff] }
 0x53e   : > { %4166 = vrot.lane.b32.xlu0 %v4159_v57, %s6935_s28  ;;  %v4517_v57 = vadd.f32 %v4514_v34, %v4338_v43  ;;  %v4481_v34 = vmul.f32 %v10081_v62, %v10086_v5 }
 0x53f   : > { %v10075_v39 = vpop.permute.xlu1 %4409  ;;  %v3682_v16 = vadd.f32 %v3679_v31, %v3527_v0  ;;  %v3695_v0 = vmul.f32 %v11480_v19, %v10093_v53  ;;  %v10125_v31 = vstv %s10073_s17  ;;  %s10395_s17 = sld [smem:[#allocation9 + $0x22]] }
 0x540   : > { %v10077_v56 = vpop.permute.xlu0 %4650  ;;  %v4621_v38 = vadd.f32 %v9945_v51, %v4517_v57  ;;  %v4797_v51 = vmul.f32 %v9818_v21, %v9514_v36  ;;  %v4666_v57 = vmul.f32 %v9805_v35, %v11472_v42  ;;  %v11485_v35 = vld [vmem:[#allocation90_spill] sm:$0xff] }
 0x541   : > { %4206 = vrot.lane.b32.xlu1 %v4199_v50, %s6935_s28  ;;  %v4626_v50 = vmul.f32 %v9783_v46, %v11472_v42  ;;  %v3698_v41 = vadd.f32 %v3695_v0, %v3567_v45  ;;  %v11487_v0 = vld [vmem:[#allocation85_spill] sm:$0xff] }
 0x542   : > { %4447 = vrot.lane.b32.xlu0 %v4441_v7, %s6935_s28  ;;  %v3810_v7 = vadd.f32 %v11482_v22, %v3682_v16  ;;  %v3962_v22 = vmul.f32 %v9897_v61, %v10102_v37  ;;  %v4800_v46 = vadd.f32 %v4797_v51, %v4621_v38 }
 0x543   : > { %v10104_v43 = vpop.permute.xlu1 %4690  ;;  %v3850_v45 = vadd.f32 %v11484_v52, %v3698_v41 }
 0x544   : > { %v4878_v33 = vpop.permute.xlu0 %4877  ;;  %v3965_v16 = vadd.f32 %v3962_v22, %v3810_v7  ;;  %v4948_v7 = vmul.f32 %v9974_v47, %v11461_v2  ;;  %v10168_v22 = vstv %s10115_s11  ;;  %v11488_v2 = vld [vmem:[#allocation91_spill] sm:$0xff]  ;;  %s10467_s11 = sld [smem:[#allocation9 + $0x4f]] }
 0x545   : > { %v4884_v6 = vadd.f32 %v4878_v33, %v4792_v48  ;;  %4487 = vrot.lane.b32.xlu1 %v4481_v34, %s6935_s28  ;;  %v10141_v48 = vstv %s10095_s19  ;;  %v3978_v33 = vmul.f32 %v9897_v61, %v10125_v31  ;;  %s10434_s19 = sld [smem:[#allocation9 + $0x4e]] }
 0x546   : > { %4634 = vrot.lane.b32.xlu0 %v4626_v50, %s6935_s28  ;;  %v4093_v42 = vadd.f32 %v11485_v35, %v3965_v16  ;;  %v4245_v41 = vmul.f32 %v10081_v62, %v10141_v48  ;;  %v3613_v16 = vmul.f32 %v11487_v0, %v10008_v23  ;;  %v11490_v35 = vld [vmem:[#allocation18_spill] sm:$0xff] }
 0x547   : > { %6575 = vmatmul.mubr.msk.f32.gmra.mrb[4].mxu0 %vm5065_vm15, %v4884_v6  ;;  %v4898_v36 = vpop.permute.xlu1 %4897  ;;  %v3573_v6 = vmul.f32 %v11487_v0, %v9977_v15  ;;  %v3981_v51 = vadd.f32 %v3978_v33, %v3850_v45  ;;  %v11491_v33 = vld [vmem:[#allocation43_spill] sm:$0xff] }
 0x548   : > { %v10129_v21 = vpop.permute.xlu0 %3502  ;;  %6613 = vmatprep.mubr.msk.f32.mxu0 %vm6939_vm6, %v11394_v28  ;;  %v4904_v38 = vadd.f32 %v4898_v36, %v4800_v46  ;;  %v10171_v46 = vstv %s10117_s20  ;;  %s10533_s20 = sld [smem:[#allocation8 + $0x3a]] }
 0x549   : > { %11483 = vst [vmem:[#allocation82_spill] sm:$0xff] %v10129_v21  ;;  %4674 = vrot.lane.b32.xlu1 %v4666_v57, %s6935_s28  ;;  %v4133_v36 = vadd.f32 %v11488_v2, %v3981_v51  ;;  %v4248_v57 = vadd.f32 %v4245_v41, %v4093_v42  ;;  %v10199_v51 = vstv %s10138_s23  ;;  %v10208_v41 = vstv %s10145_s24  ;;  %s10621_s23 = sld [smem:[#allocation8 + $0x33]]  ;;  %s10623_s24 = sld [smem:[#allocation8 + $0x34]] }
 0x54a   : > { %4915 = vrot.lane.b32.xlu0 %v4908_v13, %s6935_s28  ;;  %6560 = vmatmul.mubr.msk.f32.gmra.mrb[4].mxu1 %vm5065_vm15, %v4904_v38  ;;  %v10181_v13 = vstv %s10127_s21  ;;  %v3855_v38 = vmul.f32 %v11480_v19, %v10168_v22  ;;  %v3397_v2 = vmul.f32 %v11487_v0, %v10016_v17  ;;  %v10236_v21 = vstv %s10173_s27  ;;  %s10568_s21 = sld [smem:[#allocation8 + $0x3b]]  ;;  %s10678_s27 = sld [smem:[#allocation8 + $0x3d]] }
 0x54b   : > { %v10155_v34 = vpop.permute.xlu1 %3542  ;;  %6583 = vmatprep.mubr.msk.f32.mxu1 %vm6939_vm6, %v11394_v28  ;;  %v4376_v42 = vadd.f32 %v9922_v8, %v4248_v57  ;;  %v10212_v57 = vld [vmem:[#allocation3 + $0x48] sm:$0xff]  ;;  %11501 = vst [vmem:[#allocation53_spill] sm:$0xff] %v10236_v21 }
 0x54c   : > { %11486 = vst [vmem:[#allocation78_spill] sm:$0xff] %v10155_v34  ;;  %v10157_v50 = vpop.permute.xlu0 %3783  ;;  %11492 = vst [vmem:[#allocation17_spill] sm:$0xff] %v10212_v57  ;;  %v11500_v34 = vld [vmem:[#allocation39_spill] sm:$0xff] }
 0x54d   : > { %4955 = vrot.lane.b32.xlu1 %v4948_v7, %s6935_s28  ;;  %v3245_v7 = vadd.f32 %v11491_v33, %v11490_v35  ;;  %v4528_v35 = vmul.f32 %v10212_v57, %v10181_v13  ;;  %v3225_v49 = vadd.f32 %v11500_v34, %v11499_v18  ;;  %v3389_v34 = vmul.f32 %v11487_v0, %v10208_v41 }
 0x54e   : > { %3580 = vrot.lane.b32.xlu0 %v3573_v6, %s6935_s28  ;;  %v4261_v6 = vmul.f32 %v10081_v62, %v10171_v46 }
 0x54f   : > { %v10183_v52 = vpop.permute.xlu1 %3823  ;;  %v3400_v1 = vadd.f32 %v3397_v2, %v3245_v7  ;;  %v4531_v54 = vadd.f32 %v4528_v35, %v4376_v42  ;;  %v10261_v2 = vld [vmem:[#allocation3 + $0x39] sm:$0xff]  ;;  %v3680_v35 = vmul.f32 %v9807_v25, %v10063_v11 }
 0x550   : > { %v10185_v45 = vpop.permute.xlu0 %4064  ;;  %v4264_v8 = vadd.f32 %v4261_v6, %v4133_v36  ;;  %v4160_v36 = vmul.f32 %v9983_v14, %v9881_v40  ;;  %v11497_v6 = vld [vmem:[#allocation24_spill] sm:$0xff]  ;;  %v10243_v40 = vstv %s10177_s29  ;;  %11506 = vst [vmem:[#allocation74_spill] sm:$0xff] %v10261_v2  ;;  %s10682_s29 = sld [smem:[#allocation9 + $0x2c]] }
 0x551   : > { %11489 = vst [vmem:[#allocation83_spill] sm:$0xff] %v10185_v45  ;;  %3620 = vrot.lane.b32.xlu1 %v3613_v16, %s6935_s28  ;;  %v10217_v16 = vstv %s10151_s25  ;;  %v3895_v45 = vmul.f32 %v11480_v19, %v10199_v51  ;;  %v3285_v4 = vadd.f32 %v11498_v29, %v11497_v6  ;;  %11502 = vst [vmem:[#allocation93_spill] sm:$0xff] %v10243_v40  ;;  %v11503_v19 = vld [vmem:[#allocation77_spill] sm:$0xff]  ;;  %v10270_v6 = vld [vmem:[#allocation3 + $0x49] sm:$0xff]  ;;  %s10649_s25 = sld [smem:[#allocation9 + $0x2b]] }
 0x552   : > { %3861 = vrot.lane.b32.xlu0 %v3855_v38, %s6935_s28  ;;  %11493 = vst [vmem:[#allocation42_spill] sm:$0xff] %v10217_v16  ;;  %v10220_v38 = vstv %s10153_s26  ;;  %v4416_v62 = vadd.f32 %v9924_v9, %v4264_v8  ;;  %v3528_v29 = vadd.f32 %v11503_v19, %v3400_v1  ;;  %v3413_v9 = vmul.f32 %v11487_v0, %v10042_v30  ;;  %s10651_s26 = sld [smem:[#allocation8 + $0x44]] }
 0x553   : > { %11494 = vst [vmem:[#allocation92_spill] sm:$0xff] %v10220_v38  ;;  %v10222_v33 = vpop.permute.xlu1 %4104  ;;  %v4659_v7 = vadd.f32 %v10077_v56, %v4531_v54  ;;  %v4544_v18 = vmul.f32 %v10212_v57, %v10220_v38  ;;  %v4200_v1 = vmul.f32 %v9983_v14, %v9902_v32  ;;  %v4442_v54 = vmul.f32 %v10261_v2, %v10057_v59  ;;  %v11510_v32 = vld [vmem:[#allocation51_spill] sm:$0xff] }
 0x554   : > { %11495 = vst [vmem:[#allocation61_spill] sm:$0xff] %v10222_v33  ;;  %v10224_v58 = vpop.permute.xlu0 %4371  ;;  %v10266_v56 = vstv %s10191_s30  ;;  %v3416_v8 = vadd.f32 %v3413_v9, %v3285_v4  ;;  %11508 = vst [vmem:[#allocation81_spill] sm:$0xff] %v10270_v6  ;;  %v4811_v19 = vmul.f32 %v10270_v6, %v10243_v40  ;;  %v11509_v33 = vld [vmem:[#allocation21_spill] sm:$0xff]  ;;  %v10281_v4 = vstv %s10203_s6  ;;  %v11512_v9 = vld [vmem:[#allocation79_spill] sm:$0xff]  ;;  %s10697_s30 = sld [smem:[#allocation8 + $0x45]]  ;;  %s10721_s6 = sld [smem:[#allocation8 + $0x3e]] }
 0x555   : > { %11496 = vst [vmem:[#allocation23_spill] sm:$0xff] %v10224_v58  ;;  %3901 = vrot.lane.b32.xlu1 %v3895_v45, %s6935_s28  ;;  %11507 = vst [vmem:[#allocation80_spill] sm:$0xff] %v10266_v56  ;;  %v3392_v58 = vadd.f32 %v3389_v34, %v3225_v49  ;;  %v3683_v12 = vadd.f32 %v3680_v35, %v3528_v29  ;;  %v11513_v49 = vld [vmem:[#allocation72_spill] sm:$0xff]  ;;  %v4482_v59 = vmul.f32 %v10261_v2, %v10086_v5  ;;  %v11514_v29 = vld [vmem:[#allocation87_spill] sm:$0xff] }
 0x556   : > { %4168 = vrot.lane.b32.xlu0 %v4160_v36, %s6935_s28  ;;  %v4547_v36 = vadd.f32 %v4544_v18, %v4416_v62  ;;  %11511 = vst [vmem:[#allocation90_spill] sm:$0xff] %v10281_v4  ;;  %v10286_v62 = vstv %s10205_s7  ;;  %v3568_v18 = vadd.f32 %v11512_v9, %v3416_v8  ;;  %v10309_v35 = vstv %s10238_s8  ;;  %s10745_s7 = sld [smem:[#allocation8 + $0x47]]  ;;  %s6396_s8 = sld [smem:[#allocation8 + $0x48]] }
 0x557   : > { %v10255_v45 = vpop.permute.xlu1 %4411  ;;  %v3508_v34 = vadd.f32 %v11513_v49, %v3392_v58  ;;  %v3811_v8 = vadd.f32 %v11514_v29, %v3683_v12  ;;  %v3405_v58 = vmul.f32 %v11487_v0, %v10217_v16 }
 0x558   : > { %11504 = vst [vmem:[#allocation73_spill] sm:$0xff] %v10255_v45  ;;  %v10257_v42 = vpop.permute.xlu0 %4652  ;;  %v3265_v45 = vadd.f32 %v11510_v32, %v11509_v33  ;;  %v4699_v40 = vadd.f32 %v10104_v43, %v4547_v36  ;;  %v4814_v33 = vadd.f32 %v4811_v19, %v4659_v7  ;;  %v4827_v7 = vmul.f32 %v10270_v6, %v10281_v4 }
 0x559   : > { %11505 = vst [vmem:[#allocation88_spill] sm:$0xff] %v10257_v42  ;;  %4208 = vrot.lane.b32.xlu1 %v4200_v1, %s6935_s28  ;;  %v3696_v1 = vmul.f32 %v9807_v25, %v10093_v53  ;;  %v4724_v42 = vmul.f32 %v10212_v57, %v10266_v56  ;;  %v3672_v36 = vmul.f32 %v9807_v25, %v10236_v21 }
 0x55a   : > { %4449 = vrot.lane.b32.xlu0 %v4442_v54, %s6935_s28  ;;  %v3963_v19 = vmul.f32 %v10052_v27, %v10102_v37  ;;  %v3408_v9 = vadd.f32 %v3405_v58, %v3265_v45  ;;  %v11517_v45 = vld [vmem:[#allocation89_spill] sm:$0xff] }
 0x55b   : > { %v10293_v32 = vpop.permute.xlu1 %4692  ;;  %v3699_v12 = vadd.f32 %v3696_v1, %v3568_v18  ;;  %v3675_v49 = vadd.f32 %v3672_v36, %v3508_v34  ;;  %v10343_v36 = vstv %s10283_s12  ;;  %s6300_s12 = sld [smem:[#allocation8 + $0x18]] }
 0x55c   : > { %v4934_v54 = vpop.permute.xlu0 %4933  ;;  %v3966_v1 = vadd.f32 %v3963_v19, %v3811_v8  ;;  %v3548_v58 = vadd.f32 %v9991_v55, %v3408_v9  ;;  %v3979_v8 = vmul.f32 %v10052_v27, %v10125_v31  ;;  %v4246_v19 = vmul.f32 %v10261_v2, %v10141_v48 }
 0x55d   : > { %v4942_v43 = vadd.f32 %v4934_v54, %v4814_v33  ;;  %4489 = vrot.lane.b32.xlu1 %v4482_v59, %s6935_s28  ;;  %v4830_v33 = vadd.f32 %v4827_v7, %v4699_v40  ;;  %v10321_v54 = vstv %s10253_s9  ;;  %v4764_v59 = vmul.f32 %v10212_v57, %v10286_v62  ;;  %v11521_v40 = vld [vmem:[#allocation46_spill] sm:$0xff]  ;;  %s6298_s9 = sld [smem:[#allocation8 + $0x17]] }
 0x55e   : > { %4730 = vrot.lane.b32.xlu0 %v4724_v42, %s6935_s28  ;;  %v10327_v42 = vld [vmem:[#allocation3 + $0x59] sm:$0x7]  ;;  %v3851_v34 = vadd.f32 %v11517_v45, %v3699_v12  ;;  %v10340_v7 = vstv %s10276_s10  ;;  %v3791_v55 = vadd.f32 %v10157_v50, %v3675_v49  ;;  %v3688_v12 = vmul.f32 %v9807_v25, %v10309_v35  ;;  %s6408_s10 = sld [smem:[#allocation8 + $0x4e]] }
 0x55f   : > { %6584 = vmatmul.mubr.msk.f32.vlgmr.msra.gmra.mrb[6].mxu1 %vm5065_vm15, %v4942_v43  ;;  %v4974_v29 = vpop.permute.xlu1 %4973  ;;  %11515 = vst [vmem:[#allocation85_spill] sm:$0xff] %v10327_v42  ;;  %v4909_v18 = vmul.f32 %v10327_v42, %v9952_v3  ;;  %v4094_v3 = vadd.f32 %v9891_v10, %v3966_v1  ;;  %v10359_v9 = vstv %s10299_s13  ;;  %v4949_v10 = vmul.f32 %v10327_v42, %v9974_v47  ;;  %v11518_v1 = vld [vmem:[#allocation49_spill] sm:$0xff]  ;;  %s6410_s13 = sld [smem:[#allocation8 + $0x4f]] }
 0x560   : > { %v10323_v6 = vpop.permute.xlu0 %3598  ;;  %6586 = vmatprep.mubr.msk.f32.mxu1 %vm6939_vm6, %v11394_v28  ;;  %6708 = vmatpush3.bf16.msk.msra.mxu1 %vm9343_vm8, %v11453_v26  ;;  %v4982_v43 = vadd.f32 %v4974_v29, %v4830_v33  ;;  %v3574_v50 = vmul.f32 %v9844_v44, %v9977_v15  ;;  %v3982_v49 = vadd.f32 %v3979_v8, %v3851_v34  ;;  %v10377_v45 = vstv %s10306_s14  ;;  %s6318_s14 = sld [smem:[#allocation8 + $0x21]] }
 0x561   : > { %6596 = vmatprep.subr.mxu1 %v11394_v28  ;;  %4770 = vrot.lane.b32.xlu1 %v4764_v59, %s6935_s28  ;;  %v3691_v59 = vadd.f32 %v3688_v12, %v3548_v58  ;;  %v3398_v47 = vmul.f32 %v9844_v44, %v10016_v17  ;;  %v3414_v15 = vmul.f32 %v9844_v44, %v10042_v30  ;;  %v10393_v58 = vstv %s10315_s15  ;;  %v11520_v30 = vld [vmem:[#allocation19_spill] sm:$0xff]  ;;  %s6320_s15 = sld [smem:[#allocation8 + $0x22]] }
 0x562   : > { %4917 = vrot.lane.b32.xlu0 %v4909_v18, %s6935_s28  ;;  %6614 = vmatmul.mubr.msk.f32.vlgmr.msra.gmra.mrb[6].mxu0 %vm5065_vm15, %v4982_v43  ;;  %v3955_v18 = vmul.f32 %v10052_v27, %v10321_v54  ;;  %v10388_v34 = vmul.f32 %v9934_v24, %v10063_v11  ;;  %11519 = vst [vmem:[#allocation91_spill] sm:$0xff] %v10393_v58 }
 0x563   : > { %v10361_v33 = vpop.permute.xlu1 %3638  ;;  %6616 = vmatprep.mubr.msk.f32.mxu0 %vm6939_vm6, %v11394_v28  ;;  %6714 = vmatpush3.bf16.msk.msra.mxu0 %vm9343_vm8, %v11453_v26  ;;  %v4134_v43 = vadd.f32 %v9893_v60, %v3982_v49  ;;  %v4249_v8 = vadd.f32 %v4246_v19, %v4094_v3  ;;  %v3831_v17 = vadd.f32 %v10183_v52, %v3691_v59  ;;  %v10441_v59 = vld [vmem:[#allocation3 + $0x50] sm:$0xff] }
 0x564   : > { %v10363_v29 = vpop.permute.xlu0 %3785  ;;  %6597 = vmatpush3.msk.msra.mxu1 %vm5075_vm13, %v11518_v1  ;;  %6626 = vmatprep.subr.mxu0 %v11394_v28  ;;  %v3958_v12 = vadd.f32 %v3955_v18, %v3791_v55  ;;  %v3246_v11 = vadd.f32 %v11521_v40, %v11520_v30  ;;  %v3614_v60 = vmul.f32 %v9844_v44, %v10008_v23 }
 0x565   : > { %4957 = vrot.lane.b32.xlu1 %v4949_v10, %s6935_s28  ;;  %6715 = vmatprep.subr.bf16.mxu1 %v11410_v63  ;;  %v10404_v10 = vmul.f32 %v9934_v24, %v10093_v53  ;;  %v3856_v52 = vmul.f32 %v9807_v25, %v10168_v22  ;;  %v4377_v3 = vadd.f32 %v10048_v20, %v4249_v8  ;;  %v11523_v8 = vld [vmem:[#allocation25_spill] sm:$0xff] }
 0x566   : > { %3582 = vrot.lane.b32.xlu0 %v3574_v50, %s6935_s28  ;;  %v4262_v40 = vmul.f32 %v10261_v2, %v10171_v46  ;;  %v3971_v55 = vmul.f32 %v10052_v27, %v10340_v7  ;;  %v10424_v23 = vmul.f32 %v9983_v14, %v10102_v37  ;;  %v10428_v19 = vmul.f32 %v9983_v14, %v10125_v31  ;;  %v11536_v2 = vld [vmem:[#allocation29_spill] sm:$0xff] }
 0x567   : > { %v10406_v50 = vpop.permute.xlu1 %3825  ;;  %6627 = vmatpush3.msk.msra.mxu0 %vm5075_vm13, %v11518_v1  ;;  %v3390_v20 = vmul.f32 %v9844_v44, %v10208_v41  ;;  %v3406_v37 = vmul.f32 %v9844_v44, %v10217_v16  ;;  %v4529_v31 = vmul.f32 %v10441_v59, %v10181_v13  ;;  %v4138_v44 = vmul.f32 %v9897_v61, %v10377_v45 }
 0x568   : > { %v4067_v26 = vpop.permute.xlu0 %4066  ;;  %6721 = vmatprep.subr.bf16.mxu0 %v11410_v63  ;;  %v4265_v49 = vadd.f32 %v4262_v40, %v4134_v43  ;;  %v3974_v18 = vadd.f32 %v3971_v55, %v3831_v17  ;;  %v3896_v43 = vmul.f32 %v9807_v25, %v10199_v51  ;;  %v4545_v17 = vmul.f32 %v10441_v59, %v10220_v38 }
 0x569   : > { %v10417_v53 = vadd.f32 %v4067_v26, %v3958_v12  ;;  %3622 = vrot.lane.b32.xlu1 %v3614_v60, %s6935_s28  ;;  %v10437_v26 = vstv %s10347_s16  ;;  %v11524_v12 = vld [vmem:[#allocation55_spill] sm:$0xff]  ;;  %v3401_v60 = vadd.f32 %v3398_v47, %v3246_v11  ;;  %v10459_v11 = vld [vmem:[#allocation3 + $0x18] sm:$0xff]  ;;  %s6361_s16 = sld [smem:[#allocation9 + $0x36]] }
 0x56a   : > { %3863 = vrot.lane.b32.xlu0 %v3856_v52, %s6935_s28  ;;  %v3286_v30 = vadd.f32 %v11524_v12, %v11523_v8  ;;  %v4417_v40 = vadd.f32 %v10075_v39, %v4265_v49  ;;  %v11527_v8 = vld [vmem:[#allocation84_spill] sm:$0xff]  ;;  %v3428_v12 = vmul.f32 %v10459_v11, %v10343_v36  ;;  %v3444_v25 = vmul.f32 %v10459_v11, %v10359_v9 }
 0x56b   : > { %11522 = vst [vmem:[#allocation18_spill] sm:$0xff] %v10417_v53  ;;  %v4107_v52 = vpop.permute.xlu1 %4106  ;;  %v4532_v53 = vadd.f32 %v4529_v31, %v4377_v3  ;;  %v3529_v47 = vadd.f32 %v11527_v8, %v3401_v60  ;;  %v10470_v39 = vstv %s10395_s17  ;;  %v11528_v3 = vld [vmem:[#allocation16_spill] sm:$0xff]  ;;  %v4178_v8 = vmul.f32 %v9897_v61, %v10393_v58  ;;  %v11544_v58 = vld [vmem:[#allocation67_spill] sm:$0xff]  ;;  %s6379_s17 = sld [smem:[#allocation9 + $0x3f]] }
 0x56c   : > { %v10447_v1 = vpop.permute.xlu0 %4347  ;;  %v10456_v55 = vadd.f32 %v4107_v52, %v3974_v18  ;;  %v11529_v49 = vld [vmem:[#allocation40_spill] sm:$0xff]  ;;  %v3673_v52 = vmul.f32 %v9934_v24, %v10236_v21  ;;  %v4725_v61 = vmul.f32 %v10441_v59, %v10266_v56  ;;  %v11538_v21 = vld [vmem:[#allocation22_spill] sm:$0xff] }
 0x56d   : > { %11525 = vst [vmem:[#allocation43_spill] sm:$0xff] %v10447_v1  ;;  %3903 = vrot.lane.b32.xlu1 %v3896_v43, %s6935_s28  ;;  %v3226_v31 = vadd.f32 %v11529_v49, %v11528_v3  ;;  %v11530_v18 = vld [vmem:[#allocation88_spill] sm:$0xff] }
 0x56e   : > { %11526 = vst [vmem:[#allocation24_spill] sm:$0xff] %v10456_v55  ;;  %4144 = vrot.lane.b32.xlu0 %v4138_v44, %s6935_s28  ;;  %v4660_v60 = vadd.f32 %v11530_v18, %v4532_v53  ;;  %v3417_v55 = vadd.f32 %v3414_v15, %v3286_v30  ;;  %v10483_v44 = vld [vmem:[#allocation3 + $0x41] sm:$0x7]  ;;  %v11533_v1 = vld [vmem:[#allocation64_spill] sm:$0xff]  ;;  %v11535_v53 = vld [vmem:[#allocation93_spill] sm:$0xff] }
 0x56f   : > { %v10479_v63 = vpop.permute.xlu1 %4387  ;;  %v4443_v57 = vmul.f32 %v10483_v44, %v11533_v1  ;;  %v10487_v3 = vld [vmem:[#allocation3 + $0x51] sm:$0xff]  ;;  %v4483_v18 = vmul.f32 %v10483_v44, %v10086_v5  ;;  %v11537_v15 = vld [vmem:[#allocation59_spill] sm:$0xff]  ;;  %v10506_v5 = vstv %s10434_s19  ;;  %s6381_s19 = sld [smem:[#allocation9 + $0x40]] }
 0x570   : > { %11531 = vst [vmem:[#allocation54_spill] sm:$0xff] %v10479_v63  ;;  %v10481_v43 = vpop.permute.xlu0 %4654  ;;  %11534 = vst [vmem:[#allocation39_spill] sm:$0xff] %v10487_v3  ;;  %v4812_v49 = vmul.f32 %v10487_v3, %v11535_v53  ;;  %v3324_v30 = vadd.f32 %v11537_v15, %v11536_v2  ;;  %v4548_v63 = vadd.f32 %v4545_v17, %v4417_v40  ;;  %v11539_v1 = vld [vmem:[#allocation52_spill] sm:$0xff]  ;;  %v11541_v2 = vld [vmem:[#allocation30_spill] sm:$0xff] }
 0x571   : > { %11532 = vst [vmem:[#allocation15_spill] sm:$0xff] %v10481_v43  ;;  %v4828_v42 = vmul.f32 %v10487_v3, %v10281_v4  ;;  %v3266_v38 = vadd.f32 %v11539_v1, %v11538_v21  ;;  %v11540_v43 = vld [vmem:[#allocation86_spill] sm:$0xff]  ;;  %v3684_v53 = vadd.f32 %v10388_v34, %v3529_v47  ;;  %4184 = vrot.lane.b32.xlu1 %v4178_v8, %s6935_s28  ;;  %v11542_v40 = vld [vmem:[#allocation60_spill] sm:$0xff]  ;;  %v11543_v3 = vld [vmem:[#allocation35_spill] sm:$0xff] }
 0x572   : > { %v3569_v16 = vadd.f32 %v11540_v43, %v3417_v55  ;;  %4451 = vrot.lane.b32.xlu0 %v4443_v57, %s6935_s28  ;;  %v3325_v17 = vadd.f32 %v11542_v40, %v11541_v2  ;;  %v3393_v15 = vadd.f32 %v3390_v20, %v3226_v31  ;;  %v4700_v56 = vadd.f32 %v10293_v32, %v4548_v63  ;;  %v11545_v1 = vld [vmem:[#allocation95_spill] sm:$0xff]  ;;  %v11546_v43 = vld [vmem:[#allocation82_spill] sm:$0xff]  ;;  %v11547_v32 = vld [vmem:[#allocation81_spill] sm:$0xff] }
 0x573   : > { %v4815_v4 = vadd.f32 %v4812_v49, %v4660_v60  ;;  %v3364_v21 = vadd.f32 %v11544_v58, %v11543_v3  ;;  %v3812_v55 = vadd.f32 %v11545_v1, %v3684_v53  ;;  %v10514_v34 = vpop.permute.xlu1 %4694  ;;  %v3429_v57 = vmul.f32 %v11487_v0, %v10343_v36  ;;  %v10526_v53 = vld [vmem:[#allocation3 + $0x20] sm:$0xff] }
 0x574   : > { %v4936_v47 = vpop.permute.xlu0 %4935  ;;  %v4765_v8 = vmul.f32 %v10441_v59, %v10286_v62  ;;  %v3509_v20 = vadd.f32 %v11546_v43, %v3393_v15  ;;  %v3431_v31 = vadd.f32 %v3428_v12, %v3324_v30  ;;  %v5007_v60 = vmul.f32 %v11547_v32, %v10506_v5  ;;  %v11549_v12 = vld [vmem:[#allocation68_spill] sm:$0xff]  ;;  %v10541_v1 = vld [vmem:[#allocation3 + $0x19] sm:$0xff] }
 0x575   : > { %v4943_v63 = vadd.f32 %v4936_v47, %v4815_v4  ;;  %v3700_v58 = vadd.f32 %v10404_v10, %v3569_v16  ;;  %v3409_v3 = vadd.f32 %v3406_v37, %v3266_v38  ;;  %4491 = vrot.lane.b32.xlu1 %v4483_v18, %s6935_s28  ;;  %v3445_v0 = vmul.f32 %v10526_v53, %v10359_v9  ;;  %v11548_v4 = vld [vmem:[#allocation36_spill] sm:$0xff] }
 0x576   : > { %4732 = vrot.lane.b32.xlu0 %v4725_v61, %s6935_s28  ;;  %v10531_v49 = vstv %s10467_s11  ;;  %v3365_v30 = vadd.f32 %v11549_v12, %v11548_v4  ;;  %v3607_v2 = vadd.f32 %v10323_v6, %v3431_v31  ;;  %v4831_v16 = vadd.f32 %v4828_v42, %v4700_v56  ;;  %v11550_v10 = vld [vmem:[#allocation96_spill] sm:$0xff]  ;;  %v11551_v6 = vld [vmem:[#allocation78_spill] sm:$0xff]  ;;  %s6399_s11 = sld [smem:[#allocation9 + $0x49]] }
 0x577   : > { %6587 = vmatmul.mubr.msk.f32.gmra.mrb[8].mxu1 %vm5065_vm15, %v4943_v63  ;;  %v3432_v38 = vadd.f32 %v3429_v57, %v3325_v17  ;;  %v3852_v61 = vadd.f32 %v11550_v10, %v3700_v58  ;;  %v3967_v37 = vadd.f32 %v10424_v23, %v3812_v55  ;;  %v3447_v18 = vadd.f32 %v3444_v25, %v3364_v21  ;;  %v4976_v40 = vpop.permute.xlu1 %4975  ;;  %v11552_v17 = vld [vmem:[#allocation70_spill] sm:$0xff] }
 0x578   : > { %v3601_v15 = vpop.permute.xlu0 %3600  ;;  %v3711_v47 = vmul.f32 %v10541_v1, %v10437_v26  ;;  %6589 = vmatprep.mubr.msk.f32.mxu1 %vm6939_vm6, %v11394_v28  ;;  %v3549_v43 = vadd.f32 %v11551_v6, %v3409_v3  ;;  %v3676_v31 = vadd.f32 %v3673_v52, %v3509_v20  ;;  %v4983_v56 = vadd.f32 %v4976_v40, %v4831_v16 }
 0x579   : > { %v10548_v42 = vadd.f32 %v3601_v15, %v3432_v38  ;;  %v4095_v57 = vadd.f32 %v11552_v17, %v3967_v37  ;;  %v4247_v23 = vmul.f32 %v10483_v44, %v10141_v48  ;;  %v3689_v25 = vmul.f32 %v9934_v24, %v10309_v35  ;;  %4772 = vrot.lane.b32.xlu1 %v4765_v8, %s6935_s28  ;;  %v11554_v37 = vld [vmem:[#allocation14_spill] sm:$0xff] }
 0x57a   : > { %5013 = vrot.lane.b32.xlu0 %v5007_v60, %s6935_s28  ;;  %v3647_v21 = vadd.f32 %v10361_v33, %v3447_v18  ;;  %v3792_v55 = vadd.f32 %v10363_v29, %v3676_v31  ;;  %6617 = vmatmul.mubr.msk.f32.gmra.mrb[8].mxu0 %vm5065_vm15, %v4983_v56  ;;  %v3448_v52 = vadd.f32 %v3445_v0, %v3365_v30  ;;  %v11553_v30 = vld [vmem:[#allocation75_spill] sm:$0xff] }
 0x57b   : > { %v3714_v20 = vadd.f32 %v3711_v47, %v3607_v2  ;;  %v3641_v63 = vpop.permute.xlu1 %3640  ;;  %v5047_v48 = vmul.f32 %v11547_v32, %v10531_v49  ;;  %v3857_v3 = vmul.f32 %v9934_v24, %v10168_v22  ;;  %v3727_v8 = vmul.f32 %v10541_v1, %v10470_v39  ;;  %6619 = vmatprep.mubr.msk.f32.mxu0 %vm6939_vm6, %v11394_v28 }
 0x57c   : > { %v3882_v58 = vpop.permute.xlu0 %3881  ;;  %v3956_v33 = vmul.f32 %v9983_v14, %v10321_v54  ;;  %v3983_v29 = vadd.f32 %v10428_v19, %v3852_v61  ;;  %v3692_v60 = vadd.f32 %v3689_v25, %v3549_v43  ;;  %v10573_v0 = vadd.f32 %v3641_v63, %v3448_v52  ;;  %v11555_v19 = vld [vmem:[#allocation38_spill] sm:$0xff]  ;;  %v11556_v43 = vld [vmem:[#allocation23_spill] sm:$0xff] }
 0x57d   : > { %v10575_v4 = vadd.f32 %v3882_v58, %v3714_v20  ;;  %v4250_v12 = vadd.f32 %v4247_v23, %v4095_v57  ;;  %5053 = vrot.lane.b32.xlu1 %v5047_v48, %s6935_s28  ;;  %v10580_v22 = vstv %s10533_s20  ;;  %v3730_v38 = vadd.f32 %v3727_v8, %v3647_v21  ;;  %v11557_v52 = vld [vmem:[#allocation91_spill] sm:$0xff]  ;;  %v11559_v48 = vld [vmem:[#allocation20_spill] sm:$0xff]  ;;  %s6401_s20 = sld [smem:[#allocation9 + $0x4a]] }
 0x57e   : > { %3865 = vrot.lane.b32.xlu0 %v3857_v3, %s6935_s28  ;;  %v4135_v2 = vadd.f32 %v11553_v30, %v3983_v29  ;;  %v3832_v16 = vadd.f32 %v10406_v50, %v3692_v60  ;;  %v3959_v10 = vadd.f32 %v3956_v33, %v3792_v55  ;;  %v3224_v61 = vadd.f32 %v11555_v19, %v11554_v37  ;;  %v11560_v3 = vld [vmem:[#allocation47_spill] sm:$0xff]  ;;  %v11561_v33 = vld [vmem:[#allocation73_spill] sm:$0xff]  ;;  %v11563_v30 = vld [vmem:[#allocation42_spill] sm:$0xff] }
 0x57f   : > { %v4263_v18 = vmul.f32 %v10483_v44, %v10171_v46  ;;  %v3922_v40 = vpop.permute.xlu1 %3921  ;;  %v3897_v47 = vmul.f32 %v9934_v24, %v10199_v51  ;;  %v4139_v6 = vmul.f32 %v10052_v27, %v10377_v45  ;;  %v4378_v31 = vadd.f32 %v11556_v43, %v4250_v12  ;;  %v10603_v51 = vld [vmem:[#allocation3 + $0x58] sm:$0x7] }
 0x580   : > { %v4069_v15 = vpop.permute.xlu0 %4068  ;;  %v10593_v50 = vadd.f32 %v3922_v40, %v3730_v38  ;;  %v3972_v17 = vmul.f32 %v9983_v14, %v10340_v7  ;;  %v3388_v46 = vmul.f32 %v10459_v11, %v10208_v41  ;;  %v4530_v57 = vmul.f32 %v10603_v51, %v10181_v13  ;;  %v11558_v41 = vld [vmem:[#allocation76_spill] sm:$0xff] }
 0x581   : > { %v10595_v56 = vadd.f32 %v4069_v15, %v3959_v10  ;;  %3905 = vrot.lane.b32.xlu1 %v3897_v47, %s6935_s28  ;;  %v4266_v24 = vadd.f32 %v4263_v18, %v4135_v2  ;;  %v4179_v20 = vmul.f32 %v10052_v27, %v11557_v52  ;;  %v4421_v63 = vmul.f32 %v11558_v41, %v10580_v22  ;;  %v11562_v27 = vld [vmem:[#allocation71_spill] sm:$0xff]  ;;  %v11565_v10 = vld [vmem:[#allocation92_spill] sm:$0xff] }
 0x582   : > { %4146 = vrot.lane.b32.xlu0 %v4139_v6, %s6935_s28  ;;  %v3975_v23 = vadd.f32 %v3972_v17, %v3832_v16  ;;  %v3391_v25 = vadd.f32 %v3388_v46, %v3224_v61  ;;  %v10614_v58 = vstv %s10568_s21  ;;  %v3264_v8 = vadd.f32 %v11560_v3, %v11559_v48  ;;  %v11564_v16 = vld [vmem:[#allocation15_spill] sm:$0xff]  ;;  %v11566_v40 = vld [vmem:[#allocation80_spill] sm:$0xff]  ;;  %v11567_v6 = vld [vmem:[#allocation53_spill] sm:$0xff]  ;;  %s6754_s21 = smul.u32 120, %s11607_s22 }
 0x583   : > { %v4109_v21 = vpop.permute.xlu1 %4108  ;;  %v4418_v29 = vadd.f32 %v11561_v33, %v4266_v24  ;;  %v4533_v60 = vadd.f32 %v4530_v57, %v4378_v31  ;;  %v3404_v2 = vmul.f32 %v10459_v11, %v11563_v30  ;;  %v4546_v37 = vmul.f32 %v10603_v51, %v11565_v10  ;;  %v11568_v17 = vld [vmem:[#allocation93_spill] sm:$0xff]  ;;  %v11570_v57 = vld [vmem:[#allocation31_spill] sm:$0xff] }
 0x584   : > { %v10607_v55 = vpop.permute.xlu0 %4349  ;;  %v10619_v13 = vadd.f32 %v4109_v21, %v3975_v23  ;;  %v3507_v12 = vadd.f32 %v11562_v27, %v3391_v25  ;;  %v4461_v18 = vmul.f32 %v11558_v41, %v10614_v58  ;;  %v4726_v15 = vmul.f32 %v10603_v51, %v11566_v40  ;;  %v11569_v46 = vld [vmem:[#allocation85_spill] sm:$0xff]  ;;  %v11571_v23 = vld [vmem:[#allocation62_spill] sm:$0xff]  ;;  %v11573_v27 = vld [vmem:[#allocation39_spill] sm:$0xff] }
 0x585   : > { %4186 = vrot.lane.b32.xlu1 %v4179_v20, %s6935_s28  ;;  %v4661_v38 = vadd.f32 %v11564_v16, %v4533_v60  ;;  %v3407_v47 = vadd.f32 %v3404_v2, %v3264_v8  ;;  %v3671_v43 = vmul.f32 %v10541_v1, %v11567_v6  ;;  %v4549_v31 = vadd.f32 %v4546_v37, %v4418_v29  ;;  %v11572_v21 = vld [vmem:[#allocation94_spill] sm:$0xff]  ;;  %v11574_v2 = vld [vmem:[#allocation44_spill] sm:$0xff] }
 0x586   : > { %4427 = vrot.lane.b32.xlu0 %v4421_v63, %s6935_s28  ;;  %v4813_v24 = vmul.f32 %v11569_v46, %v11568_v17  ;;  %v3326_v25 = vadd.f32 %v11571_v23, %v11570_v57  ;;  %v3687_v8 = vmul.f32 %v10541_v1, %v10309_v35  ;;  %v4766_v60 = vmul.f32 %v10603_v51, %v10286_v62  ;;  %v11575_v37 = vld [vmem:[#allocation90_spill] sm:$0xff] }
 0x587   : > { %v10633_v19 = vpop.permute.xlu1 %4389  ;;  %v3547_v20 = vadd.f32 %v11572_v21, %v3407_v47  ;;  %v3674_v63 = vadd.f32 %v3671_v43, %v3507_v12  ;;  %v4701_v48 = vadd.f32 %v10514_v34, %v4549_v31  ;;  %v5008_v30 = vmul.f32 %v11573_v27, %v10506_v5  ;;  %v10666_v34 = vld [vmem:[#allocation3 + $0x28] sm:$0x7]  ;;  %v11578_v47 = vld [vmem:[#allocation69_spill] sm:$0xff] }
 0x588   : > { %v10635_v61 = vpop.permute.xlu0 %4630  ;;  %v4816_v3 = vadd.f32 %v4813_v24, %v4661_v38  ;;  %v4829_v12 = vmul.f32 %v11569_v46, %v11575_v37  ;;  %v3430_v35 = vmul.f32 %v10666_v34, %v10343_v36  ;;  %v11576_v38 = vld [vmem:[#allocation97_spill] sm:$0xff]  ;;  %v10673_v40 = vstv %s10621_s23  ;;  %v10693_v21 = vld [vmem:[#allocation3 + $0x21] sm:$0xff] }
 0x589   : > { %4467 = vrot.lane.b32.xlu1 %v4461_v18, %s6935_s28  ;;  %v3790_v16 = vadd.f32 %v11574_v2, %v3674_v63  ;;  %v3954_v18 = vmul.f32 %v11576_v38, %v10321_v54  ;;  %v10676_v62 = vstv %s10623_s24  ;;  %v3690_v43 = vadd.f32 %v3687_v8, %v3547_v20  ;;  %s11058_s24 = scalar_lea.vmem %s11306_s5, %s6754_s21 }
 0x58a   : > { %4734 = vrot.lane.b32.xlu0 %v4726_v15, %s6935_s28  ;;  %v11577_v15 = vld [vmem:[#allocation37_spill] sm:$0xff]  ;;  %v4832_v36 = vadd.f32 %v4829_v12, %v4701_v48  ;;  %v3433_v54 = vadd.f32 %v3430_v35, %v3326_v25  ;;  %v5048_v24 = vmul.f32 %v11573_v27, %v10531_v49  ;;  %v4140_v57 = vmul.f32 %v9983_v14, %v10377_v45 }
 0x58b   : > { %v10657_v33 = vpop.permute.xlu1 %4670  ;;  %v3366_v6 = vadd.f32 %v11578_v47, %v11577_v15  ;;  %v3446_v23 = vmul.f32 %v10666_v34, %v10359_v9  ;;  %v3712_v20 = vmul.f32 %v10693_v21, %v10437_v26  ;;  %v11579_v25 = vld [vmem:[#allocation41_spill] sm:$0xff]  ;;  %v3957_v48 = vadd.f32 %v3954_v18, %v3790_v16  ;;  %v11581_v18 = vld [vmem:[#allocation74_spill] sm:$0xff] }
 0x58c   : > { %v4938_v29 = vpop.permute.xlu0 %4937  ;;  %v3830_v63 = vadd.f32 %v11579_v25, %v3690_v43  ;;  %v10707_v9 = vstv %s10649_s25  ;;  %v10710_v45 = vstv %s10651_s26  ;;  %v4237_v37 = vmul.f32 %v11558_v41, %v10673_v40  ;;  %s6338_s25 = sld [smem:[#allocation8 + $0x2b]]  ;;  %s6340_s26 = sld [smem:[#allocation8 + $0x2c]] }
 0x58d   : > { %v4944_v10 = vadd.f32 %v4938_v29, %v4816_v3  ;;  %4774 = vrot.lane.b32.xlu1 %v4766_v60, %s6935_s28  ;;  %v11580_v29 = vld [vmem:[#allocation83_spill] sm:$0xff]  ;;  %v3449_v16 = vadd.f32 %v3446_v23, %v3366_v6  ;;  %v4180_v38 = vmul.f32 %v9983_v14, %v11557_v52  ;;  %v3728_v15 = vmul.f32 %v10693_v21, %v10470_v39  ;;  %v11582_v52 = vld [vmem:[#allocation61_spill] sm:$0xff] }
 0x58e   : > { %5015 = vrot.lane.b32.xlu0 %v5008_v30, %s6935_s28  ;;  %v4073_v60 = vadd.f32 %v11580_v29, %v3957_v48  ;;  %v10713_v30 = vld [vmem:[#allocation3 + $0x30] sm:$0xff]  ;;  %v10743_v14 = vstv %s10682_s29  ;;  %v4462_v25 = vmul.f32 %v11581_v18, %v10614_v58  ;;  %v11584_v29 = vld [vmem:[#allocation43_spill] sm:$0xff]  ;;  %s11105_s29 = sld [smem:[#allocation8 + $0x36]] }
 0x58f   : > { %6590 = vmatmul.mubr.msk.f32.gmra.mrb[10].mxu1 %vm5065_vm15, %v4944_v10  ;;  %v4978_v31 = vpop.permute.xlu1 %4977  ;;  %v3970_v2 = vmul.f32 %v10713_v30, %v10340_v7  ;;  %v3715_v10 = vadd.f32 %v3712_v20, %v10548_v42  ;;  %v4422_v7 = vmul.f32 %v11581_v18, %v10580_v22  ;;  %v3994_v43 = vmul.f32 %v10713_v30, %v10707_v9 }
 0x590   : > { %v3603_v17 = vpop.permute.xlu0 %3602  ;;  %6598 = vmatprep.mubr.msk.f32.mxu1 %vm6939_vm6, %v11394_v28  ;;  %v4984_v3 = vadd.f32 %v4978_v31, %v4832_v36  ;;  %v10738_v36 = vstv %s10678_s27  ;;  %v4240_v31 = vadd.f32 %v4237_v37, %v4073_v60  ;;  %v10772_v37 = vstv %s10721_s6  ;;  %s11103_s27 = sld [smem:[#allocation8 + $0x35]]  ;;  %s11178_s6 = sld [smem:[#allocation8 + $0x40]] }
 0x591   : > { %v10702_v8 = vadd.f32 %v3603_v17, %v3433_v54  ;;  %5055 = vrot.lane.b32.xlu1 %v5048_v24, %s6935_s28  ;;  %v3973_v42 = vadd.f32 %v3970_v2, %v3830_v63  ;;  %v3731_v17 = vadd.f32 %v3728_v15, %v10573_v0  ;;  %v3997_v24 = vadd.f32 %v3994_v43, %v10575_v4  ;;  %v11583_v63 = vld [vmem:[#allocation17_spill] sm:$0xff]  ;;  %v11585_v15 = vld [vmem:[#allocation54_spill] sm:$0xff] }
 0x592   : > { %4148 = vrot.lane.b32.xlu0 %v4140_v57, %s6935_s28  ;;  %6620 = vmatmul.mubr.msk.f32.gmra.mrb[10].mxu0 %vm5065_vm15, %v4984_v3  ;;  %v4253_v57 = vmul.f32 %v11558_v41, %v10676_v62  ;;  %v4704_v48 = vmul.f32 %v11583_v63, %v10710_v45  ;;  %v10757_v3 = vstv %s10697_s30  ;;  %v4356_v60 = vadd.f32 %v11584_v29, %v4240_v31  ;;  %s11114_s30 = sld [smem:[#allocation8 + $0x3f]] }
 0x593   : > { %v3643_v12 = vpop.permute.xlu1 %3642  ;;  %6628 = vmatprep.mubr.msk.f32.mxu0 %vm6939_vm6, %v11394_v28  ;;  %v4113_v54 = vadd.f32 %v11582_v52, %v3973_v42  ;;  %v4010_v4 = vmul.f32 %v10713_v30, %v10743_v14  ;;  %v4536_v31 = vmul.f32 %v11583_v63, %v10772_v37 }
 0x594   : > { %v3884_v35 = vpop.permute.xlu0 %3883  ;;  %v10731_v47 = vadd.f32 %v3643_v12, %v3449_v16  ;;  %v4520_v16 = vmul.f32 %v11583_v63, %v10738_v36 }
 0x595   : > { %v10733_v6 = vadd.f32 %v3884_v35, %v3715_v10  ;;  %4188 = vrot.lane.b32.xlu1 %v4180_v38, %s6935_s28  ;;  %v4256_v41 = vadd.f32 %v4253_v57, %v4113_v54  ;;  %v4013_v10 = vadd.f32 %v4010_v4, %v10593_v50  ;;  %v4744_v38 = vmul.f32 %v11583_v63, %v10757_v3  ;;  %v11586_v63 = vld [vmem:[#allocation26_spill] sm:$0xff] }
 0x596   : > { %4429 = vrot.lane.b32.xlu0 %v4422_v7, %s6935_s28  ;;  %v5009_v7 = vmul.f32 %v11569_v46, %v10506_v5  ;;  %v4523_v43 = vadd.f32 %v4520_v16, %v4356_v60  ;;  %v10786_v50 = vstv %s10745_s7  ;;  %v4423_v57 = vmul.f32 %v10483_v44, %v10580_v22  ;;  %s11190_s7 = sld [smem:[#allocation8 + $0x49]] }
 0x597   : > { %v3924_v23 = vpop.permute.xlu1 %3923  ;;  %v4396_v42 = vadd.f32 %v11585_v15, %v4256_v41  ;;  %v4463_v41 = vmul.f32 %v10483_v44, %v10614_v58  ;;  %v4705_v16 = vmul.f32 %v10441_v59, %v10710_v45  ;;  %v11588_v15 = vld [vmem:[#allocation32_spill] sm:$0xff]  ;;  %v11589_v58 = vld [vmem:[#allocation63_spill] sm:$0xff] }
 0x598   : > { %v4165_v20 = vpop.permute.xlu0 %4164  ;;  %v10760_v2 = vadd.f32 %v3924_v23, %v3731_v17  ;;  %v4639_v54 = vadd.f32 %v10635_v61, %v4523_v43  ;;  %v10803_v61 = vstv %s6396_s8  ;;  %s11200_s8 = sld [smem:[#allocation8 + $0x4a]] }
 0x599   : > { %v10762_v0 = vadd.f32 %v4165_v20, %v3997_v24  ;;  %4469 = vrot.lane.b32.xlu1 %v4462_v25, %s6935_s28  ;;  %v5049_v24 = vmul.f32 %v11569_v46, %v10531_v49  ;;  %v4539_v23 = vadd.f32 %v4536_v31, %v4396_v42  ;;  %v4803_v20 = vmul.f32 %v11547_v32, %v10786_v50 }
 0x59a   : > { %4710 = vrot.lane.b32.xlu0 %v4704_v48, %s6935_s28  ;;  %v10805_v25 = vstv %s6298_s9  ;;  %v11587_v48 = vld [vmem:[#allocation56_spill] sm:$0xff]  ;;  %v3344_v42 = vadd.f32 %v11589_v58, %v11588_v15 }
 0x59b   : > { %v4205_v12 = vpop.permute.xlu1 %4204  ;;  %v3304_v29 = vadd.f32 %v11587_v48, %v11586_v63  ;;  %v4679_v49 = vadd.f32 %v10657_v33, %v4539_v23  ;;  %v4806_v60 = vadd.f32 %v4803_v20, %v4639_v54  ;;  %v10824_v33 = vstv %s6300_s12 }
 0x59c   : > { %v10774_v35 = vpop.permute.xlu0 %4351  ;;  %v10781_v52 = vadd.f32 %v4205_v12, %v4013_v10  ;;  %v4819_v12 = vmul.f32 %v11547_v32, %v10803_v61  ;;  %v10833_v20 = vstv %s6410_s13  ;;  %v11590_v63 = vmov 1.0|1.0  }
 0x59d   : > { %4750 = vrot.lane.b32.xlu1 %v4744_v38, %s6935_s28  ;;  %v3420_v38 = vmul.f32 %v10459_v11, %v10805_v25  ;;  %v5027_v15 = vmul.f32 %v11547_v32, %v10833_v20 }
 0x59e   : > { %5017 = vrot.lane.b32.xlu0 %v5009_v7, %s6935_s28  ;;  %v10820_v7 = vstv %s6408_s10  ;;  %v4822_v43 = vadd.f32 %v4819_v12, %v4679_v49 }
 0x59f   : > { %v10791_v17 = vpop.permute.xlu1 %4391  ;;  %v3423_v54 = vadd.f32 %v3420_v38, %v3304_v29  ;;  %v4987_v23 = vmul.f32 %v11547_v32, %v10820_v7  ;;  %v3436_v29 = vmul.f32 %v10459_v11, %v10824_v33 }
 0x5a0   : > { %v10793_v5 = vpop.permute.xlu0 %4632 }
 0x5a1   : > { %5057 = vrot.lane.b32.xlu1 %v5049_v24, %s6935_s28 }
 0x5a2   : > { %4431 = vrot.lane.b32.xlu0 %v4423_v57, %s6935_s28  ;;  %v4745_v57 = vmul.f32 %v10441_v59, %v10757_v3 }
 0x5a3   : > { %v10810_v22 = vpop.permute.xlu1 %4672 }
 0x5a4   : > { %v4914_v4 = vpop.permute.xlu0 %4913 }
 0x5a5   : > { %v4922_v10 = vadd.f32 %v4914_v4, %v4806_v60  ;;  %4471 = vrot.lane.b32.xlu1 %v4463_v41, %s6935_s28  ;;  %v10844_v4 = vld [vmem:[#allocation3 + $0x29] sm:$0x7] }
 0x5a6   : > { %4712 = vrot.lane.b32.xlu0 %v4705_v16, %s6935_s28  ;;  %v3713_v41 = vmul.f32 %v10844_v4, %v10437_v26  ;;  %v4238_v16 = vmul.f32 %v11581_v18, %v10673_v40  ;;  %v4706_v26 = vmul.f32 %v10603_v51, %v10710_v45  ;;  %v3729_v58 = vmul.f32 %v10844_v4, %v10470_v39  ;;  %v11594_v45 = vld [vmem:[#allocation18_spill] sm:$0xff] }
 0x5a7   : > { %6599 = vmatmul.mubr.msk.f32.vlgmr.msra.gmra.mrb[6].mxu1 %vm5065_vm15, %v4922_v10  ;;  %v4954_v31 = vpop.permute.xlu1 %4953  ;;  %v3439_v10 = vadd.f32 %v3436_v29, %v3344_v42  ;;  %v11593_v39 = vmov 0.0|0.0   ;;  %v4746_v29 = vmul.f32 %v10603_v51, %v10757_v3 }
 0x5a8   : > { %v3579_v24 = vpop.permute.xlu0 %3578  ;;  %6601 = vmatprep.mubr.msk.f32.mxu1 %vm6939_vm6, %v11394_v28  ;;  %6717 = vmatpush3.bf16.msk.msra.mxu1 %vm9359_vm12, %v11590_v63  ;;  %v4962_v60 = vadd.f32 %v4954_v31, %v4822_v43  ;;  %v3716_v12 = vadd.f32 %v3713_v41, %v10702_v8  ;;  %v11592_v43 = vld [vmem:[#allocation50_spill] sm:$0xff]  ;;  %v4241_v31 = vadd.f32 %v4238_v16, %v11594_v45 }
 0x5a9   : > { %v10840_v49 = vadd.f32 %v3579_v24, %v3423_v54  ;;  %6641 = vmatprep.subr.mxu1 %v11394_v28  ;;  %4752 = vrot.lane.b32.xlu1 %v4745_v57, %s6935_s28  ;;  %v10869_v54 = vld [vmem:[#allocation3 + $0x38] sm:$0xff]  ;;  %v3732_v24 = vadd.f32 %v3729_v58, %v10731_v47  ;;  %v4988_v41 = vmul.f32 %v11573_v27, %v10820_v7 }
 0x5aa   : > { %4993 = vrot.lane.b32.xlu0 %v4987_v23, %s6935_s28  ;;  %6629 = vmatmul.mubr.msk.f32.vlgmr.msra.gmra.mrb[6].mxu0 %vm5065_vm15, %v4962_v60  ;;  %v3995_v32 = vmul.f32 %v10869_v54, %v10707_v9  ;;  %v4254_v23 = vmul.f32 %v11581_v18, %v10676_v62  ;;  %v11595_v18 = vld [vmem:[#allocation24_spill] sm:$0xff] }
 0x5ab   : > { %v3619_v11 = vpop.permute.xlu1 %3618  ;;  %6631 = vmatprep.mubr.msk.f32.mxu0 %vm6939_vm6, %v11394_v28  ;;  %6723 = vmatpush3.bf16.msk.msra.mxu0 %vm9359_vm12, %v11590_v63 }
 0x5ac   : > { %v3886_v38 = vpop.permute.xlu0 %3885  ;;  %6642 = vmatpush3.msk.msra.mxu1 %vm5075_vm13, %v11592_v43  ;;  %v10865_v42 = vadd.f32 %v3619_v11, %v3439_v10  ;;  %v3998_v57 = vadd.f32 %v3995_v32, %v10733_v6  ;;  %6671 = vmatprep.subr.mxu0 %v11394_v28  ;;  %v4357_v10 = vadd.f32 %v10607_v55, %v4241_v31 }
 0x5ad   : > { %v10867_v8 = vadd.f32 %v3886_v38, %v3716_v12  ;;  %6718 = vmatprep.subr.bf16.mxu1 %v11593_v39  ;;  %5033 = vrot.lane.b32.xlu1 %v5027_v15, %s6935_s28  ;;  %v4011_v6 = vmul.f32 %v10869_v54, %v10743_v14  ;;  %v4257_v3 = vadd.f32 %v4254_v23, %v11595_v18  ;;  %v11597_v23 = vld [vmem:[#allocation57_spill] sm:$0xff]  ;;  %v10933_v18 = vstv %s6318_s14 }
 0x5ae   : > { %4714 = vrot.lane.b32.xlu0 %v4706_v26, %s6935_s28  ;;  %v4521_v12 = vmul.f32 %v10441_v59, %v10738_v36  ;;  %v5028_v15 = vmul.f32 %v11573_v27, %v10833_v20  ;;  %v4989_v26 = vmul.f32 %v11569_v46, %v10820_v7  ;;  %v5029_v7 = vmul.f32 %v11569_v46, %v10833_v20 }
 0x5af   : > { %v3926_v60 = vpop.permute.xlu1 %3925  ;;  %6672 = vmatpush3.msk.msra.mxu0 %vm5075_vm13, %v11592_v43  ;;  %v4014_v55 = vadd.f32 %v4011_v6, %v10760_v2  ;;  %v4397_v58 = vadd.f32 %v10633_v19, %v4257_v3  ;;  %v4820_v6 = vmul.f32 %v11573_v27, %v10803_v61  ;;  %v3421_v20 = vmul.f32 %v10526_v53, %v10805_v25  ;;  %v11598_v3 = vld [vmem:[#allocation33_spill] sm:$0xff] }
 0x5b0   : > { %v4167_v48 = vpop.permute.xlu0 %4166  ;;  %v10890_v16 = vadd.f32 %v3926_v60, %v3732_v24  ;;  %6724 = vmatprep.subr.bf16.mxu0 %v11593_v39  ;;  %v4524_v43 = vadd.f32 %v4521_v12, %v4357_v10  ;;  %v4537_v39 = vmul.f32 %v10441_v59, %v10772_v37  ;;  %v4804_v24 = vmul.f32 %v11573_v27, %v10786_v50  ;;  %v11599_v12 = vld [vmem:[#allocation65_spill] sm:$0xff] }
 0x5b1   : > { %v10892_v47 = vadd.f32 %v4167_v48, %v3998_v57  ;;  %4754 = vrot.lane.b32.xlu1 %v4746_v29, %s6935_s28  ;;  %v11596_v57 = vld [vmem:[#allocation27_spill] sm:$0xff] }
 0x5b2   : > { %4995 = vrot.lane.b32.xlu0 %v4988_v41, %s6935_s28  ;;  %v4640_v2 = vadd.f32 %v10793_v5, %v4524_v43  ;;  %v4540_v19 = vadd.f32 %v4537_v39, %v4397_v58  ;;  %v3305_v60 = vadd.f32 %v11597_v23, %v11596_v57  ;;  %v3703_v39 = vmul.f32 %v10541_v1, %v10933_v18 }
 0x5b3   : > { %v4207_v11 = vpop.permute.xlu1 %4206 }
 0x5b4   : > { %v10905_v38 = vpop.permute.xlu0 %4447  ;;  %v10912_v32 = vadd.f32 %v4207_v11, %v4014_v55  ;;  %v4680_v5 = vadd.f32 %v10810_v22, %v4540_v19  ;;  %v4807_v48 = vadd.f32 %v4804_v24, %v4640_v2  ;;  %v3345_v55 = vadd.f32 %v11599_v12, %v11598_v3 }
 0x5b5   : > { %5035 = vrot.lane.b32.xlu1 %v5028_v15, %s6935_s28  ;;  %v3424_v15 = vadd.f32 %v3421_v20, %v3305_v60  ;;  %v3437_v2 = vmul.f32 %v10526_v53, %v10824_v33  ;;  %v3706_v24 = vadd.f32 %v3703_v39, %v10840_v49  ;;  %v4239_v60 = vmul.f32 %v10483_v44, %v10673_v40 }
 0x5b6   : > { %4997 = vrot.lane.b32.xlu0 %v4989_v26, %s6935_s28  ;;  %v4823_v11 = vadd.f32 %v4820_v6, %v4680_v5  ;;  %v4255_v3 = vmul.f32 %v10483_v44, %v10676_v62 }
 0x5b7   : > { %v10919_v45 = vpop.permute.xlu1 %4487  ;;  %v3440_v19 = vadd.f32 %v3437_v2, %v3345_v55  ;;  %v4522_v55 = vmul.f32 %v10603_v51, %v10738_v36 }
 0x5b8   : > { %v4635_v31 = vpop.permute.xlu0 %4634  ;;  %v4258_v12 = vadd.f32 %v4255_v3, %v10619_v13  ;;  %v4805_v13 = vmul.f32 %v11569_v46, %v10786_v50 }
 0x5b9   : > { %5037 = vrot.lane.b32.xlu1 %v5029_v7, %s6935_s28  ;;  %v10946_v7 = vstv %s6320_s15  ;;  %s6359_s28 = sld [smem:[#allocation9 + $0x35]] }
 0x5bb   : > { %v4675_v29 = vpop.permute.xlu1 %4674 }
 0x5bc   : > { %v4916_v41 = vpop.permute.xlu0 %4915 }
 0x5bd   : > { %v4923_v10 = vadd.f32 %v4916_v41, %v4807_v48  ;;  %v3719_v48 = vmul.f32 %v10541_v1, %v10946_v7  ;;  %v4242_v41 = vadd.f32 %v4239_v60, %v10595_v56  ;;  %v11003_v60 = vstv %s6361_s16 }
 0x5bf   : > { %6602 = vmatmul.mubr.msk.f32.gmra.mrb[8].mxu1 %vm5065_vm15, %v4923_v10  ;;  %v4956_v22 = vpop.permute.xlu1 %4955  ;;  %v3722_v10 = vadd.f32 %v3719_v48, %v10865_v42  ;;  %v4358_v20 = vadd.f32 %v10774_v35, %v4242_v41  ;;  %v4398_v42 = vadd.f32 %v10791_v17, %v4258_v12  ;;  %v4538_v35 = vmul.f32 %v10603_v51, %v10772_v37 }
 0x5c0   : > { %v3581_v26 = vpop.permute.xlu0 %3580  ;;  %6604 = vmatprep.mubr.msk.f32.mxu1 %vm6939_vm6, %v11394_v28  ;;  %v4963_v58 = vadd.f32 %v4956_v22, %v4823_v11  ;;  %v4821_v17 = vmul.f32 %v11569_v46, %v10803_v61  ;;  %v10999_v61 = vld [vmem:[#allocation3 + $0x31] sm:$0xff]  ;;  %v11006_v41 = vstv %s6379_s17 }
 0x5c1   : > { %v10940_v43 = vadd.f32 %v3581_v26, %v3424_v15  ;;  %v4525_v11 = vadd.f32 %v4522_v55, %v4358_v20  ;;  %v4541_v26 = vadd.f32 %v4538_v35, %v4398_v42  ;;  %v4293_v3 = vmul.f32 %v10999_v61, %v11003_v60  ;;  %v11016_v55 = vld [vmem:[#allocation3 + $0x48] sm:$0xff] }
 0x5c2   : > { %6632 = vmatmul.mubr.msk.f32.gmra.mrb[8].mxu0 %vm5065_vm15, %v4963_v58  ;;  %v4560_v42 = vmul.f32 %v11016_v55, %v11006_v41 }
 0x5c3   : > { %v3621_v57 = vpop.permute.xlu1 %3620  ;;  %6634 = vmatprep.mubr.msk.f32.mxu0 %vm6939_vm6, %v11394_v28  ;;  %v4641_v15 = vadd.f32 %v4635_v31, %v4525_v11  ;;  %v4681_v36 = vadd.f32 %v4675_v29, %v4541_v26  ;;  %v10990_v29 = vstv %s6359_s28  ;;  %v4296_v12 = vadd.f32 %v4293_v3, %v10781_v52 }
 0x5c4   : > { %v3862_v23 = vpop.permute.xlu0 %3861  ;;  %v10954_v5 = vadd.f32 %v3621_v57, %v3440_v19  ;;  %v11027_v26 = vstv %s6399_s11 }
 0x5c5   : > { %v10956_v53 = vadd.f32 %v3862_v23, %v3706_v24  ;;  %v4808_v58 = vadd.f32 %v4805_v13, %v4641_v15  ;;  %v4824_v37 = vadd.f32 %v4821_v17, %v4681_v36  ;;  %v4277_v23 = vmul.f32 %v10999_v61, %v10990_v29 }
 0x5c6   : > { %v4496_v35 = vadd.f32 %v10919_v45, %v4296_v12 }
 0x5c7   : > { %v3902_v49 = vpop.permute.xlu1 %3901  ;;  %v4280_v48 = vadd.f32 %v4277_v23, %v10762_v0  ;;  %v11020_v0 = vstv %s6381_s19 }
 0x5c8   : > { %v10962_v6 = vpop.permute.xlu0 %4168  ;;  %v10967_v40 = vadd.f32 %v3902_v49, %v3722_v10  ;;  %v4576_v52 = vmul.f32 %v11016_v55, %v11020_v0 }
 0x5c9   : > { %v4456_v20 = vadd.f32 %v10905_v38, %v4280_v48 }
 0x5cb   : > { %v10972_v1 = vpop.permute.xlu1 %4208  ;;  %v4563_v38 = vadd.f32 %v4560_v42, %v4456_v20 }
 0x5cc   : > { %v10974_v56 = vpop.permute.xlu0 %4449 }
 0x5cf   : > { %v10979_v22 = vpop.permute.xlu1 %4489 }
 0x5d0   : > { %v4731_v62 = vpop.permute.xlu0 %4730 }
 0x5d1   : > { %v4739_v13 = vadd.f32 %v4731_v62, %v4563_v38  ;;  %v11050_v38 = vld [vmem:[#allocation3 + $0x39] sm:$0xff] }
 0x5d3   : > { %v4771_v2 = vpop.permute.xlu1 %4770 }
 0x5d4   : > { %v4918_v39 = vpop.permute.xlu0 %4917 }
 0x5d5   : > { %v4924_v19 = vadd.f32 %v4918_v39, %v4808_v58  ;;  %v4579_v39 = vadd.f32 %v4576_v52, %v4496_v35 }
 0x5d7   : > { %6605 = vmatmul.mubr.msk.f32.gmra.mrb[10].mxu1 %vm5065_vm15, %v4924_v19  ;;  %v4958_v31 = vpop.permute.xlu1 %4957  ;;  %v11033_v19 = vld [vmem:[#allocation3 + $0x49] sm:$0xff]  ;;  %v4779_v45 = vadd.f32 %v4771_v2, %v4579_v39 }
 0x5d8   : > { %v10986_v24 = vpop.permute.xlu0 %3582  ;;  %6643 = vmatprep.mubr.msk.f32.mxu1 %vm6939_vm6, %v11394_v28  ;;  %v4964_v50 = vadd.f32 %v4958_v31, %v4824_v37  ;;  %v4843_v17 = vmul.f32 %v11033_v19, %v11027_v26  ;;  %v11037_v37 = vstv %s6401_s20 }
 0x5d9   : > { %v4859_v62 = vmul.f32 %v11033_v19, %v11037_v37 }
 0x5da   : > { %6635 = vmatmul.mubr.msk.f32.gmra.mrb[10].mxu0 %vm5065_vm15, %v4964_v50  ;;  %v4846_v31 = vadd.f32 %v4843_v17, %v4739_v13  ;;  %v4278_v13 = vmul.f32 %v11050_v38, %v10990_v29 }
 0x5db   : > { %v10993_v57 = vpop.permute.xlu1 %3622  ;;  %6673 = vmatprep.mubr.msk.f32.mxu0 %vm6939_vm6, %v11394_v28  ;;  %v4862_v12 = vadd.f32 %v4859_v62, %v4779_v45 }
 0x5dc   : > { %v10995_v46 = vpop.permute.xlu0 %3863  ;;  %v4281_v17 = vadd.f32 %v4278_v13, %v10892_v47  ;;  %v4294_v47 = vmul.f32 %v11050_v38, %v11003_v60  ;;  %v11089_v13 = vld [vmem:[#allocation3 + $0x40] sm:$0x7] }
 0x5de   : > { %v4457_v62 = vadd.f32 %v10974_v56, %v4281_v17 }
 0x5df   : > { %v11008_v10 = vpop.permute.xlu1 %3903 }
 0x5e0   : > { %v11010_v49 = vpop.permute.xlu0 %4144 }
 0x5e3   : > { %v11022_v11 = vpop.permute.xlu1 %4184 }
 0x5e4   : > { %v11024_v15 = vpop.permute.xlu0 %4451 }
 0x5e7   : > { %v11031_v36 = vpop.permute.xlu1 %4491 }
 0x5e8   : > { %v4733_v58 = vpop.permute.xlu0 %4732 }
 0x5eb   : > { %v4773_v50 = vpop.permute.xlu1 %4772 }
 0x5ec   : > { %v5014_v23 = vpop.permute.xlu0 %5013 }
 0x5ed   : > { %v5022_v48 = vadd.f32 %v5014_v23, %v4846_v31 }
 0x5ee   : > { %v5237_v20 = vpop.f32.mrb[0].mxu0 }
 0x5ef   : > { %v6570_v3 = vpop.f32.mrb[1].mxu0  ;;  %6644 = vmatmul.mubr.msk.f32.vlgmr.msra.gmra.mrb[12].mxu1 %vm5065_vm15, %v5022_v48  ;;  %v5054_v42 = vpop.permute.xlu1 %5053 }
 0x5f0   : > { %v11043_v35 = vpop.permute.xlu0 %3865  ;;  %6646 = vmatprep.mubr.msk.f32.mxu1 %vm6939_vm6, %v11394_v28  ;;  %6720 = vmatpush3.bf16.msk.msra.mxu1 %vm9343_vm8, %v11590_v63  ;;  %v5062_v52 = vadd.f32 %v5054_v42, %v4862_v12  ;;  %v4297_v3 = vadd.f32 %v4294_v47, %v10912_v32  ;;  %v4561_v12 = vmul.f32 %v10441_v59, %v11006_v41 }
 0x5f1   : > { %6656 = vmatprep.subr.mxu1 %v11394_v28  ;;  %v5145_v39 = vpop.f32.mrb[0].mxu1  ;;  %v4577_v32 = vmul.f32 %v10441_v59, %v11020_v0 }
 0x5f2   : > { %v5238_v45 = vadd.f32 %v5237_v20, %v5145_v39  ;;  %v6555_v31 = vpop.f32.mrb[1].mxu1  ;;  %6674 = vmatmul.mubr.msk.f32.vlgmr.msra.gmra.mrb[12].mxu0 %vm5065_vm15, %v5062_v52  ;;  %v11601_v20 = vld [vmem:[#allocation49_spill] sm:$0xff]  ;;  %v4497_v56 = vadd.f32 %v10979_v22, %v4297_v3  ;;  %v4564_v2 = vadd.f32 %v4561_v12, %v4457_v62  ;;  %v3996_v52 = vmul.f32 %v11089_v13, %v10707_v9 }
 0x5f3   : > { %v11062_v23 = vpop.permute.xlu1 %3905  ;;  %6676 = vmatprep.mubr.msk.f32.mxu0 %vm6939_vm6, %v11394_v28  ;;  %6726 = vmatpush3.bf16.msk.msra.mxu0 %vm9343_vm8, %v11590_v63  ;;  %v4844_v22 = vmul.f32 %v11573_v27, %v11027_v26  ;;  %v4012_v9 = vmul.f32 %v11089_v13, %v10743_v14  ;;  %v4279_v12 = vmul.f32 %v10483_v44, %v10990_v29 }
 0x5f4   : > { %v11064_v48 = vpop.permute.xlu0 %4146  ;;  %5252 = vst.msk [vmem:[%s11058_s24] sm:$0xff] %vm5251_vm0, %v5238_v45  ;;  %6657 = vmatpush3.msk.msra.mxu1 %vm5075_vm13, %v11601_v20  ;;  %6686 = vmatprep.subr.mxu0 %v11394_v28  ;;  %v4740_v39 = vadd.f32 %v4733_v58, %v4564_v2  ;;  %v3999_v31 = vadd.f32 %v3996_v52, %v10867_v8  ;;  %v11602_v52 = vld [vmem:[#allocation28_spill] sm:$0xff] }
 0x5f5   : > { %v4580_v47 = vadd.f32 %v4577_v32, %v4497_v56  ;;  %v4015_v8 = vadd.f32 %v4012_v9, %v10890_v16 }
 0x5f6   : > { %v4175_v62 = vadd.f32 %v10962_v6, %v3999_v31  ;;  %v4860_v6 = vmul.f32 %v11573_v27, %v11037_v37  ;;  %v11120_v31 = vstv %s6338_s25 }
 0x5f7   : > { %v11082_v42 = vpop.permute.xlu1 %4186  ;;  %6687 = vmatpush3.msk.msra.mxu0 %vm5075_vm13, %v11601_v20  ;;  %v4780_v58 = vadd.f32 %v4773_v50, %v4580_v47  ;;  %v4847_v20 = vadd.f32 %v4844_v22, %v4740_v39  ;;  %v4215_v14 = vadd.f32 %v10972_v1, %v4015_v8  ;;  %v11603_v39 = vld [vmem:[#allocation58_spill] sm:$0xff]  ;;  %v4295_v1 = vmul.f32 %v10483_v44, %v11003_v60 }
 0x5f8   : > { %v11084_v63 = vpop.permute.xlu0 %4427  ;;  %v4282_v50 = vadd.f32 %v4279_v12, %v4175_v62  ;;  %v3306_v32 = vadd.f32 %v11603_v39, %v11602_v52  ;;  %v3422_v22 = vmul.f32 %v10666_v34, %v10805_v25  ;;  %v11131_v62 = vstv %s6340_s26  ;;  %v11604_v60 = vld [vmem:[#allocation34_spill] sm:$0xff] }
 0x5f9   : > { %v4863_v2 = vadd.f32 %v4860_v6, %v4780_v58 }
 0x5fa   : > { %v4458_v27 = vadd.f32 %v11024_v15, %v4282_v50  ;;  %v4562_v15 = vmul.f32 %v10603_v51, %v11006_v41  ;;  %v3425_v6 = vadd.f32 %v3422_v22, %v3306_v32  ;;  %v11141_v50 = vstv %s11103_s27 }
 0x5fb   : > { %v11095_v17 = vpop.permute.xlu1 %4467  ;;  %v3704_v41 = vmul.f32 %v10693_v21, %v10933_v18  ;;  %v4002_v22 = vmul.f32 %v10713_v30, %v11131_v62 }
 0x5fc   : > { %v4735_v45 = vpop.permute.xlu0 %4734  ;;  %v3589_v32 = vadd.f32 %v10986_v24, %v3425_v6  ;;  %v3720_v24 = vmul.f32 %v10693_v21, %v10946_v7 }
 0x5ff   : > { %v11107_v59 = vpop.permute.xlu1 %4774 }
 0x600   : > { %v5016_v3 = vpop.permute.xlu0 %5015 }
 0x601   : > { %v5023_v56 = vadd.f32 %v5016_v3, %v4847_v20  ;;  %v3986_v20 = vmul.f32 %v10713_v30, %v11120_v31  ;;  %v4298_v3 = vadd.f32 %v4295_v1, %v4215_v14  ;;  %v4565_v1 = vadd.f32 %v4562_v15, %v4458_v27 }
 0x602   : > { %v4269_v30 = vmul.f32 %v10999_v61, %v11141_v50  ;;  %v3987_v15 = vmul.f32 %v10869_v54, %v11120_v31 }
 0x603   : > { %6647 = vmatmul.mubr.msk.f32.gmra.mrb[14].mxu1 %vm5065_vm15, %v5023_v56  ;;  %v5056_v16 = vpop.permute.xlu1 %5055  ;;  %v11605_v56 = vld [vmem:[#allocation66_spill] sm:$0xff]  ;;  %v3989_v39 = vadd.f32 %v3986_v20, %v10956_v53  ;;  %v4741_v53 = vadd.f32 %v4735_v45, %v4565_v1  ;;  %v3723_v45 = vadd.f32 %v3720_v24, %v10954_v5 }
 0x604   : > { %v11122_v47 = vpop.permute.xlu0 %4148  ;;  %6649 = vmatprep.mubr.msk.f32.mxu1 %vm6939_vm6, %v11394_v28  ;;  %v5063_v29 = vadd.f32 %v5056_v16, %v4863_v2  ;;  %v3346_v25 = vadd.f32 %v11605_v56, %v11604_v60  ;;  %v11144_v2 = vstv %s11105_s29  ;;  %v4498_v16 = vadd.f32 %v11031_v36, %v4298_v3 }
 0x605   : > { %v5242_v58 = vpop.f32.mrb[2].mxu0  ;;  %v4578_v36 = vmul.f32 %v10603_v51, %v11020_v0  ;;  %v11182_v0 = vld [vmem:[#allocation3 + $0x59] sm:$0x7]  ;;  %v3911_v60 = vadd.f32 %v11008_v10, %v3723_v45  ;;  %v4285_v5 = vmul.f32 %v10999_v61, %v11144_v2 }
 0x606   : > { %v5150_v9 = vpop.f32.mrb[2].mxu1  ;;  %v6573_v44 = vpop.f32.mrb[3].mxu0  ;;  %6677 = vmatmul.mubr.msk.f32.gmra.mrb[14].mxu0 %vm5065_vm15, %v5063_v29  ;;  %v3438_v29 = vmul.f32 %v10666_v34, %v10824_v33  ;;  %v3705_v34 = vmul.f32 %v10844_v4, %v10933_v18  ;;  %v4845_v21 = vmul.f32 %v11182_v0, %v11027_v26  ;;  %v4861_v10 = vmul.f32 %v11182_v0, %v11037_v37 }
 0x607   : > { %v5243_v8 = vadd.f32 %v5242_v58, %v5150_v9  ;;  %v6558_v12 = vpop.f32.mrb[3].mxu1  ;;  %v11146_v52 = vpop.permute.xlu1 %4188  ;;  %6679 = vmatprep.mubr.msk.f32.mxu0 %vm6939_vm6, %v11394_v28  ;;  %v11164_v9 = vstv %s11114_s30  ;;  %v3707_v58 = vadd.f32 %v3704_v41, %v10940_v43  ;;  %v4581_v51 = vadd.f32 %v4578_v36, %v4498_v16 }
 0x608   : > { %v11148_v14 = vpop.permute.xlu0 %4429  ;;  %v4153_v12 = vadd.f32 %v11010_v49, %v3989_v39  ;;  %v3441_v27 = vadd.f32 %v3438_v29, %v3346_v25  ;;  %v4005_v49 = vadd.f32 %v4002_v22, %v10967_v40  ;;  %v3708_v3 = vadd.f32 %v3705_v34, %v3589_v32 }
 0x609   : > { %5253 = vst.msk [vmem:[%s11058_s24 + $0x8] sm:$0xff] %vm5251_vm0, %v5243_v8  ;;  %v3871_v43 = vadd.f32 %v10995_v46, %v3707_v58  ;;  %v4781_v40 = vadd.f32 %v11107_v59, %v4581_v51  ;;  %v4848_v44 = vadd.f32 %v4845_v21, %v4741_v53  ;;  %v4270_v37 = vmul.f32 %v11050_v38, %v11141_v50  ;;  %v6846_v21 = vld [vmem:[#allocation3 + $0x50] sm:$0xff] }
 0x60a   : > { %v3629_v18 = vadd.f32 %v10993_v57, %v3441_v27  ;;  %v4193_v46 = vadd.f32 %v11022_v11, %v4005_v49  ;;  %v4272_v8 = vadd.f32 %v4269_v30, %v4153_v12  ;;  %v3872_v26 = vadd.f32 %v11043_v35, %v3708_v3 }
 0x60b   : > { %v11176_v33 = vpop.permute.xlu1 %4469  ;;  %v3721_v57 = vmul.f32 %v10844_v4, %v10946_v7  ;;  %v3990_v11 = vadd.f32 %v3987_v15, %v3871_v43  ;;  %v4003_v35 = vmul.f32 %v10869_v54, %v11131_v62  ;;  %v3988_v4 = vmul.f32 %v11089_v13, %v11120_v31 }
 0x60c   : > { %v4711_v20 = vpop.permute.xlu0 %4710  ;;  %v4436_v6 = vadd.f32 %v11084_v63, %v4272_v8  ;;  %v4552_v7 = vmul.f32 %v11016_v55, %v11164_v9  ;;  %v4288_v39 = vadd.f32 %v4285_v5, %v4193_v46  ;;  %v4864_v63 = vadd.f32 %v4861_v10, %v4781_v40 }
 0x60d   : > { %v3724_v61 = vadd.f32 %v3721_v57, %v3629_v18  ;;  %v4154_v41 = vadd.f32 %v11064_v48, %v3990_v11  ;;  %v4006_v16 = vadd.f32 %v4003_v35, %v3911_v60  ;;  %v3991_v1 = vadd.f32 %v3988_v4, %v3872_v26  ;;  %v6848_v4 = vld [vmem:[#allocation3 + $0x51] sm:$0xff] }
 0x60e   : > { %v11216_v54 = vstv %s11178_s6  ;;  %v4476_v48 = vadd.f32 %v11095_v17, %v4288_v39  ;;  %v4555_v22 = vadd.f32 %v4552_v7, %v4436_v6  ;;  %v4004_v53 = vmul.f32 %v11089_v13, %v11131_v62  ;;  %v6845_v17 = vld [vmem:[#allocation3 + $0x41] sm:$0x7] }
 0x60f   : > { %v4751_v56 = vpop.permute.xlu1 %4750  ;;  %v3912_v29 = vadd.f32 %v11062_v23, %v3724_v61  ;;  %v4194_v12 = vadd.f32 %v11082_v42, %v4006_v16  ;;  %v11226_v36 = vstv %s11190_s7  ;;  %v4155_v27 = vadd.f32 %v11122_v47, %v3991_v1 }
 0x610   : > { %v5018_v25 = vpop.permute.xlu0 %5017  ;;  %v4273_v24 = vadd.f32 %v4270_v37, %v4154_v41  ;;  %v4719_v34 = vadd.f32 %v4711_v20, %v4555_v22  ;;  %v4568_v30 = vmul.f32 %v11016_v55, %v11216_v54  ;;  %v4286_v23 = vmul.f32 %v11050_v38, %v11144_v2 }
 0x611   : > { %v5024_v59 = vadd.f32 %v5018_v25, %v4848_v44  ;;  %v4271_v42 = vmul.f32 %v6845_v17, %v11141_v50  ;;  %v11236_v13 = vstv %s11200_s8  ;;  %v4007_v47 = vadd.f32 %v4004_v53, %v3912_v29 }
 0x612   : > { %v4437_v62 = vadd.f32 %v11148_v14, %v4273_v24  ;;  %v4571_v20 = vadd.f32 %v4568_v30, %v4476_v48  ;;  %v4835_v55 = vmul.f32 %v11033_v19, %v11226_v36  ;;  %v4289_v51 = vadd.f32 %v4286_v23, %v4194_v12 }
 0x613   : > { %6650 = vmatmul.mubr.msk.f32.gmra.mrb[16].mxu1 %vm5065_vm15, %v5024_v59  ;;  %v5058_v32 = vpop.permute.xlu1 %5057  ;;  %v4553_v38 = vmul.f32 %v6846_v21, %v11164_v9  ;;  %v4195_v50 = vadd.f32 %v11146_v52, %v4007_v47  ;;  %v4274_v3 = vadd.f32 %v4271_v42, %v4155_v27  ;;  %v4287_v8 = vmul.f32 %v6845_v17, %v11144_v2  ;;  %v6847_v52 = vld [vmem:[#allocation3 + $0x58] sm:$0x7] }
 0x614   : > { %v4432_v31 = vpop.permute.xlu0 %4431  ;;  %6658 = vmatprep.mubr.msk.f32.mxu1 %vm6939_vm6, %v11394_v28  ;;  %v5064_v58 = vadd.f32 %v5058_v32, %v4864_v63  ;;  %v4759_v45 = vadd.f32 %v4751_v56, %v4571_v20  ;;  %v4838_v46 = vadd.f32 %v4835_v55, %v4719_v34  ;;  %v4851_v14 = vmul.f32 %v11033_v19, %v11236_v13 }
 0x615   : > { %v4477_v60 = vadd.f32 %v11176_v33, %v4289_v51  ;;  %v4438_v26 = vadd.f32 %v4432_v31, %v4274_v3  ;;  %v4556_v57 = vadd.f32 %v4553_v38, %v4437_v62  ;;  %v4569_v25 = vmul.f32 %v6846_v21, %v11216_v54 }
 0x616   : > { %6680 = vmatmul.mubr.msk.f32.gmra.mrb[16].mxu0 %vm5065_vm15, %v5064_v58  ;;  %v4554_v56 = vmul.f32 %v6847_v52, %v11164_v9  ;;  %v4290_v6 = vadd.f32 %v4287_v8, %v4195_v50  ;;  %v4854_v19 = vadd.f32 %v4851_v14, %v4759_v45  ;;  %v4836_v7 = vmul.f32 %v6848_v4, %v11226_v36 }
 0x617   : > { %v4472_v43 = vpop.permute.xlu1 %4471  ;;  %6688 = vmatprep.mubr.msk.f32.mxu0 %vm6939_vm6, %v11394_v28  ;;  %v4572_v41 = vadd.f32 %v4569_v25, %v4477_v60  ;;  %v4570_v1 = vmul.f32 %v6847_v52, %v11216_v54  ;;  %v4852_v22 = vmul.f32 %v6848_v4, %v11236_v13  ;;  %v4837_v58 = vmul.f32 %v11182_v0, %v11226_v36 }
 0x618   : > { %v4713_v49 = vpop.permute.xlu0 %4712  ;;  %v4478_v61 = vadd.f32 %v4472_v43, %v4290_v6  ;;  %v4557_v39 = vadd.f32 %v4554_v56, %v4438_v26  ;;  %v4853_v23 = vmul.f32 %v11182_v0, %v11236_v13 }
 0x619   : > { %v4720_v2 = vadd.f32 %v4713_v49, %v4556_v57 }
 0x61a   : > { %v5247_v18 = vpop.f32.mrb[4].mxu0  ;;  %v4573_v29 = vadd.f32 %v4570_v1, %v4478_v61 }
 0x61b   : > { %v6576_v15 = vpop.f32.mrb[5].mxu0  ;;  %v4753_v40 = vpop.permute.xlu1 %4752  ;;  %v4839_v37 = vadd.f32 %v4836_v7, %v4720_v2 }
 0x61c   : > { %v4994_v44 = vpop.permute.xlu0 %4993  ;;  %v4760_v63 = vadd.f32 %v4753_v40, %v4572_v41 }
 0x61d   : > { %v5002_v5 = vadd.f32 %v4994_v44, %v4838_v46  ;;  %v5155_v11 = vpop.f32.mrb[4].mxu1 }
 0x61e   : > { %v5248_v59 = vadd.f32 %v5247_v18, %v5155_v11  ;;  %v6561_v10 = vpop.f32.mrb[5].mxu1  ;;  %v4855_v53 = vadd.f32 %v4852_v22, %v4760_v63 }
 0x61f   : > { %6659 = vmatmul.mubr.msk.f32.vlgmr.msra.gmra.mrb[12].mxu1 %vm5065_vm15, %v5002_v5  ;;  %v5034_v35 = vpop.permute.xlu1 %5033 }
 0x620   : > { %v4715_v33 = vpop.permute.xlu0 %4714  ;;  %6661 = vmatprep.mubr.msk.f32.mxu1 %vm6939_vm6, %v11394_v28  ;;  %5255 = vst.msk [vmem:[%s11058_s24 + $0x10] sm:$0x7] %vm5254_vm1, %v5248_v59  ;;  %v5042_v9 = vadd.f32 %v5034_v35, %v4854_v19 }
 0x621   : > { %v4721_v16 = vadd.f32 %v4715_v33, %v4557_v39 }
 0x622   : > { %6689 = vmatmul.mubr.msk.f32.vlgmr.msra.gmra.mrb[12].mxu0 %vm5065_vm15, %v5042_v9 }
 0x623   : > { %v4755_v32 = vpop.permute.xlu1 %4754  ;;  %6691 = vmatprep.mubr.msk.f32.mxu0 %vm6939_vm6, %v11394_v28  ;;  %v4840_v27 = vadd.f32 %v4837_v58, %v4721_v16 }
 0x624   : > { %v4996_v31 = vpop.permute.xlu0 %4995  ;;  %v4761_v12 = vadd.f32 %v4755_v32, %v4573_v29 }
 0x625   : > { %v5003_v48 = vadd.f32 %v4996_v31, %v4839_v37 }
 0x626   : > { %v4856_v36 = vadd.f32 %v4853_v23, %v4761_v12 }
 0x627   : > { %6662 = vmatmul.mubr.msk.f32.gmra.mrb[14].mxu1 %vm5065_vm15, %v5003_v48  ;;  %v5036_v54 = vpop.permute.xlu1 %5035 }
 0x628   : > { %v4998_v24 = vpop.permute.xlu0 %4997  ;;  %6664 = vmatprep.mubr.msk.f32.mxu1 %vm6939_vm6, %v11394_v28  ;;  %v5043_v34 = vadd.f32 %v5036_v54, %v4855_v53 }
 0x629   : > { %v5004_v30 = vadd.f32 %v4998_v24, %v4840_v27 }
 0x62a   : > { %6692 = vmatmul.mubr.msk.f32.gmra.mrb[14].mxu0 %vm5065_vm15, %v5043_v34 }
 0x62b   : > { %6665 = vmatmul.mubr.msk.f32.gmra.mrb[16].mxu1 %vm5065_vm15, %v5004_v30  ;;  %v5038_v17 = vpop.permute.xlu1 %5037  ;;  %6694 = vmatprep.mubr.msk.f32.mxu0 %vm6939_vm6, %v11394_v28 }
 0x62c   : > { %v5044_v42 = vadd.f32 %v5038_v17, %v4856_v36 }
 0x62e   : > { %6695 = vmatmul.mubr.msk.f32.gmra.mrb[16].mxu0 %vm5065_vm15, %v5044_v42 }
 0x67a   : > { %v5420_v43 = vpop.f32.mrb[6].mxu1 }
 0x67b   : > { %6436 = vst.msk [vmem:[%s11058_s24 + $0x18] sm:$0xff] %vm5251_vm0, %v5420_v43  ;;  %v6600_v49 = vpop.f32.mrb[7].mxu1 }
 0x67d   : > { %v5602_v0 = vpop.f32.mrb[6].mxu0 }
 0x67e   : > { %6451 = vst.msk [vmem:[%s11058_s24 + $0x30] sm:$0xff] %vm5251_vm0, %v5602_v0  ;;  %v6630_v13 = vpop.f32.mrb[7].mxu0 }
 0x692   : > { %v5425_v47 = vpop.f32.mrb[8].mxu1 }
 0x693   : > { %6437 = vst.msk [vmem:[%s11058_s24 + $0x20] sm:$0xff] %vm5251_vm0, %v5425_v47  ;;  %v6603_v62 = vpop.f32.mrb[9].mxu1 }
 0x695   : > { %v5607_v28 = vpop.f32.mrb[8].mxu0 }
 0x696   : > { %6452 = vst.msk [vmem:[%s11058_s24 + $0x38] sm:$0xff] %vm5251_vm0, %v5607_v28  ;;  %v6633_v20 = vpop.f32.mrb[9].mxu0 }
 0x6aa   : > { %v5430_v55 = vpop.f32.mrb[10].mxu1 }
 0x6ab   : > { %6438 = vst.msk [vmem:[%s11058_s24 + $0x28] sm:$0x7] %vm5254_vm1, %v5430_v55  ;;  %v6606_v51 = vpop.f32.mrb[11].mxu1 }
 0x6ad   : > { %v5612_v21 = vpop.f32.mrb[10].mxu0 }
 0x6ae   : > { %6453 = vst.msk [vmem:[%s11058_s24 + $0x40] sm:$0x7] %vm5254_vm1, %v5612_v21  ;;  %v6636_v38 = vpop.f32.mrb[11].mxu0 }
 0x6f2   : > { %v5784_v18 = vpop.f32.mrb[12].mxu1 }
 0x6f3   : > { %6466 = vst.msk [vmem:[%s11058_s24 + $0x48] sm:$0xff] %vm5251_vm0, %v5784_v18  ;;  %v6660_v50 = vpop.f32.mrb[13].mxu1 }
 0x6f5   : > { %v5966_v45 = vpop.f32.mrb[12].mxu0 }
 0x6f6   : > { %6481 = vst.msk [vmem:[%s11058_s24 + $0x60] sm:$0xff] %vm5251_vm0, %v5966_v45  ;;  %v6690_v3 = vpop.f32.mrb[13].mxu0 }
 0x6fa   : > { %v5789_v15 = vpop.f32.mrb[14].mxu1 }
 0x6fb   : > { %6467 = vst.msk [vmem:[%s11058_s24 + $0x50] sm:$0xff] %vm5251_vm0, %v5789_v15  ;;  %v6663_v46 = vpop.f32.mrb[15].mxu1 }
 0x6fd   : > { %v5971_v40 = vpop.f32.mrb[14].mxu0 }
 0x6fe   : > { %v5794_v8 = vpop.f32.mrb[16].mxu1  ;;  %6482 = vst.msk [vmem:[%s11058_s24 + $0x68] sm:$0xff] %vm5251_vm0, %v5971_v40  ;;  %v6693_v14 = vpop.f32.mrb[15].mxu0 }
 0x6ff   : > { %6468 = vst.msk [vmem:[%s11058_s24 + $0x58] sm:$0x7] %vm5254_vm1, %v5794_v8  ;;  %v6666_v44 = vpop.f32.mrb[17].mxu1 }
 0x701   : > { %v5976_v60 = vpop.f32.mrb[16].mxu0 }
 0x702   : > { %6483 = vst.msk [vmem:[%s11058_s24 + $0x70] sm:$0x7] %vm5254_vm1, %v5976_v60  ;;  %v6696_v26 = vpop.f32.mrb[17].mxu0 }
 0x703 PF: > { %s18_s18 = sadd.s32 1, %s6927_s18  }
 0x704   : > { %p15_p2 = scmp.ge.s32.totalorder %s18_s18, 4  }
 0x706   :  { %17 = sbr.rel (!%p15_p2) target bundleno = 3 (0x3), region = 100 }
 0x70d   :  { %6005 = vsyncpa [#allocation5], 1 }
 0x70e   :  { %6007 = vsyncpa [#allocation5 + $0x1], 1 }
 0x70f   :  { %6008 = vsyncpa [#allocation7], 1 }
 0x710   :  { %6009 = vsyncpa [#allocation10], 1 }

</bundles_post_ra>
